<compile_context>
chip_gen: v7x
topology: tpu7x:2x2x1
jax: 0.10.0
libtpu: 0.0.40
codegen_flags: <defaults>
</compile_context>

<pallas_src>
import functools

import jax
import jax.numpy as jnp
import numpy as np
from jax.experimental import pallas as pl
from jax.experimental.pallas import tpu as pltpu

CIN = 768
COUT = 256
N_BRANCH = 4
K_TOTAL = N_BRANCH * CIN          # 3072 — fused contraction dimension
BN_EPS = 1e-5


def _agg_kernel(x_ref, w_ref, b_ref, o_ref):
    """One spatial tile: out = relu(x) @ w + bias.

    x_ref : (tm, 3072)  bf16  branch-concatenated pre-ReLU activations
    w_ref : (3072, 256) bf16  BN-scale-folded 1x1-conv weights (grid-resident)
    b_ref : (1, 256)    f32   pre-summed folded-BN biases      (grid-resident)
    o_ref : (tm, 256)         output tile (lane-dense, 256 wide)
    """
    x = jnp.maximum(x_ref[...], 0)                        # ReLU (VPU, bf16)
    acc = jnp.dot(x, w_ref[...],                          # one long-K MXU matmul
                  preferred_element_type=jnp.float32)
    o_ref[...] = (acc + b_ref[...]).astype(o_ref.dtype)   # bias add + store


@functools.partial(jax.jit,
                   static_argnames=("tm", "out_dtype", "single_buffer_resident"))
def global_aggregation_cell(x_cat, w_cat, bias_total, *, tm=512,
                            out_dtype=jnp.bfloat16,
                            single_buffer_resident=True):
    """x_cat:      (M, 4*768) bf16 — the four pre-ReLU branch inputs concatenated
                   along channels (a free reshape when the producer emits
                   (M, 4, 768); no wrapper-side cast/pad copies are made here).
       w_cat:      (4*768, 256) bf16 — per-branch (CIN, COUT) 1x1-conv weights
                   with the inference-BN scale folded in, stacked along K.
       bias_total: (1, 256) f32 — sum over branches of the folded BN biases.

    Returns (M, 256) out_dtype = sum_b BN_b(Conv1x1_b(relu(s_b))).
    """
    M, K = x_cat.shape
    cout = w_cat.shape[-1]
    tm = min(tm, M)

    resident = (dict(pipeline_mode=pl.Buffered(1)) if single_buffer_resident
                else {})

    return pl.pallas_call(
        _agg_kernel,
        out_shape=jax.ShapeDtypeStruct((M, cout), out_dtype),
        grid_spec=pltpu.PrefetchScalarGridSpec(
            num_scalar_prefetch=0,
            # Ragged last tile (M % tm != 0) is masked by Pallas — no jnp.pad.
            grid=(pl.cdiv(M, tm),),
            in_specs=[
                pl.BlockSpec((tm, K), lambda i: (i, 0)),
                pl.BlockSpec((K, cout), lambda i: (0, 0), **resident),
                pl.BlockSpec((1, cout), lambda i: (0, 0), **resident),
            ],
            out_specs=pl.BlockSpec((tm, cout), lambda i: (i, 0)),
        ),
        compiler_params=pltpu.CompilerParams(
            dimension_semantics=("parallel",)),
    )(x_cat, w_cat, bias_total)


def make_params(key):
    """Deterministic preprocess{0..3} params: conv weight + folded BN scale/bias."""
    w_mats, scales, biases = [], [], []
    for i in range(N_BRANCH):
        k_w, k_g, k_b, k_m, k_v = jax.random.split(jax.random.fold_in(key, i), 5)
        # PyTorch Conv2d weight is (COUT, CIN, 1, 1); matmul form is (CIN, COUT).
        w = jax.random.normal(k_w, (COUT, CIN), jnp.float32) * 0.02
        gamma = 1.0 + 0.1 * jax.random.normal(k_g, (COUT,), jnp.float32)
        beta = 0.1 * jax.random.normal(k_b, (COUT,), jnp.float32)
        run_mean = 0.1 * jax.random.normal(k_m, (COUT,), jnp.float32)
        run_var = jax.nn.softplus(jax.random.normal(k_v, (COUT,), jnp.float32)) + 0.5
        scale = gamma / jnp.sqrt(run_var + BN_EPS)
        bias = beta - run_mean * scale
        w_mats.append(w.T)          # (CIN, COUT)
        scales.append(scale)
        biases.append(bias)
    return jnp.stack(w_mats), jnp.stack(scales), jnp.stack(biases)


def fold_params(w_stack, scale_stack, bias_stack):
    """Fold inference BN into the weights; return kernel-ready operands."""
    w_folded = (w_stack * scale_stack[:, None, :]).astype(jnp.bfloat16)
    w_cat = w_folded.reshape(K_TOTAL, COUT)                       # (3072, 256)
    bias_total = jnp.sum(bias_stack, axis=0, keepdims=True)       # (1, 256) f32
    return w_cat, bias_total


def reference_f32(x_branches, w_stack, scale_stack, bias_stack):
    """Module semantics in full f32 (per-branch BN scale/bias), flattened NHWC."""
    acc = jnp.zeros((x_branches.shape[1], w_stack.shape[-1]), jnp.float32)
    for b in range(N_BRANCH):
        y = jnp.maximum(x_branches[b], 0.0) @ w_stack[b]
        acc = acc + y * scale_stack[b][None, :] + bias_stack[b][None, :]
    return acc


def reference_quantized(x_cat_bf16, w_cat_bf16, bias_total):
    """Same fold + bf16 quantization as the kernel, f32 math (tight check)."""
    x = jnp.maximum(x_cat_bf16.astype(jnp.float32), 0.0)
    return x @ w_cat_bf16.astype(jnp.float32) + bias_total


if __name__ == "__main__":
    key = jax.random.PRNGKey(0)
    k_params, k_x = jax.random.split(key)

    # Small demo shapes; channel widths are fixed by the module (4 x 768 -> 256).
    N, H, W = 2, 32, 32
    M = N * H * W                                        # 2048 spatial positions

    # The four branch inputs, in the module's NCHW layout (what PyTorch passes).
    s_nchw = [jax.random.normal(jax.random.fold_in(k_x, i), (N, CIN, H, W),
                                jnp.float32) for i in range(N_BRANCH)]

    # --- producer-side, one-time layout/dtype prep (outside the kernel path) ---
    # A real pipeline's upstream cells would emit this (M, 4*768) bf16 slab
    # directly; the kernel wrapper itself makes no extra cast/pad copies.
    x_branches = jnp.stack([jnp.transpose(s, (0, 2, 3, 1)).reshape(M, CIN)
                            for s in s_nchw])            # (4, M, 768) f32 (refs)
    x_cat = jnp.transpose(x_branches, (1, 0, 2)).reshape(M, K_TOTAL)
    x_cat = x_cat.astype(jnp.bfloat16)                   # (M, 3072) bf16

    w_stack, scale_stack, bias_stack = make_params(k_params)
    w_cat, bias_total = fold_params(w_stack, scale_stack, bias_stack)

    # tm=256 on M=2048 -> 8 grid steps: both v7x TensorCores get >=4 pipelined
    # steps; ~4.5 MiB VMEM, well under every generation's scoped limit.
    run = functools.partial(global_aggregation_cell, x_cat, w_cat, bias_total,
                            tm=256)
    try:
        out_flat = jax.block_until_ready(run(single_buffer_resident=True))
    except Exception:
        # Single-buffering the resident weight/bias blocks is a pure
        # VMEM-headroom optimization; fall back to default double buffering if
        # this JAX/Mosaic build rejects pipeline_mode=pl.Buffered(1).
        out_flat = jax.block_until_ready(run(single_buffer_resident=False))

    # NHWC -> NCHW view of the module output torch.cat(states[4:5], dim=1).
    out_nchw = out_flat.reshape(N, H, W, COUT).transpose(0, 3, 1, 2)
    assert out_nchw.shape == (N, COUT, H, W)

    out_f32 = np.asarray(out_flat, dtype=np.float32)

    # Tight check vs a reference using the same bf16 quantization / folding.
    ref_tight = np.asarray(
        reference_quantized(x_cat, w_cat, bias_total).astype(jnp.bfloat16),
        dtype=np.float32)
    np.testing.assert_allclose(out_f32, ref_tight, rtol=2e-2, atol=2e-2)

    # Loose check vs the full-f32 module semantics (bf16 quantization of the
    # big streams is the only approximation).
    ref_f32 = np.asarray(
        reference_f32(x_branches, w_stack, scale_stack, bias_stack))
    np.testing.assert_allclose(out_f32, ref_f32, rtol=5e-2, atol=5e-2)

    # TODO(synk): drop_path (training-only stochastic depth) has no eval-mode
    # effect and is intentionally not implemented.
    print("KERNEL_OK")
</pallas_src>

<mosaic_0001>
module attributes {stable_mosaic.version = 11 : i64} {
  func.func @_agg_kernel(%arg0: i32, %arg1: memref<256x3072xbf16, #tpu.memory_space<vmem>>, %arg2: memref<3072x256xbf16, #tpu.memory_space<vmem>>, %arg3: memref<1x256xf32, #tpu.memory_space<vmem>>, %arg4: memref<256x256xbf16, #tpu.memory_space<vmem>>) attributes {dimension_semantics = [#tpu.dimension_semantics<parallel>], iteration_bounds = array<i64: 8>, scalar_prefetch = 0 : i64, scratch_operands = 0 : i64, tpu.core_type = #tpu.core_type<tc>, window_params = [{transform_indices = @transform_0, window_bounds = array<i64: 256, 3072>}, {pipeline_mode = #tpu.pipeline_mode<synchronous>, transform_indices = @transform_1, window_bounds = array<i64: 3072, 256>}, {pipeline_mode = #tpu.pipeline_mode<synchronous>, transform_indices = @transform_2, window_bounds = array<i64: 1, 256>}, {transform_indices = @transform_3, window_bounds = array<i64: 256, 256>}]} {
    %c0 = arith.constant 0 : index
    %c0_0 = arith.constant 0 : index
    %0 = vector.load %arg1[%c0, %c0_0] : memref<256x3072xbf16, #tpu.memory_space<vmem>>, vector<256x3072xbf16>
    %cst = arith.constant 0.000000e+00 : bf16
    %1 = vector.broadcast %cst : bf16 to vector<256x3072xbf16>
    %2 = arith.maximumf %0, %1 : vector<256x3072xbf16>
    %c0_1 = arith.constant 0 : index
    %c0_2 = arith.constant 0 : index
    %3 = vector.load %arg2[%c0_1, %c0_2] : memref<3072x256xbf16, #tpu.memory_space<vmem>>, vector<3072x256xbf16>
    %cst_3 = arith.constant dense<0.000000e+00> : vector<256x256xf32>
    %4 = tpu.matmul %2, %3, %cst_3 {dimension_numbers = #tpu.dot_dimension_numbers<[1], [0], [0], [1], [0, 0, 1, 1], [], []>} : vector<256x3072xbf16>, vector<3072x256xbf16>, vector<256x256xf32> -> vector<256x256xf32>
    %c0_4 = arith.constant 0 : index
    %c0_5 = arith.constant 0 : index
    %5 = vector.load %arg3[%c0_4, %c0_5] : memref<1x256xf32, #tpu.memory_space<vmem>>, vector<1x256xf32>
    %6 = vector.broadcast %5 : vector<1x256xf32> to vector<256x256xf32>
    %7 = arith.addf %4, %6 : vector<256x256xf32>
    %8 = arith.truncf %7 : vector<256x256xf32> to vector<256x256xbf16>
    %c0_6 = arith.constant 0 : index
    %c0_7 = arith.constant 0 : index
    %9 = vector.load %arg4[%c0_6, %c0_7] : memref<256x256xbf16, #tpu.memory_space<vmem>>, vector<256x256xbf16>
    tpu.vector_store %arg4[%c0_6, %c0_7], %8 {strides = array<i32>} : memref<256x256xbf16, #tpu.memory_space<vmem>>, vector<256x256xbf16>,
    return
  }
  func.func @transform_0(%arg0: i32) -> (i32, i32) {
    %c0_i32 = arith.constant 0 : i32
    %c0_i32_0 = arith.constant 0 : i32
    return %arg0, %c0_i32 : i32, i32
  }
  func.func @transform_1(%arg0: i32) -> (i32, i32) {
    %c0_i32 = arith.constant 0 : i32
    %c0_i32_0 = arith.constant 0 : i32
    %c0_i32_1 = arith.constant 0 : i32
    return %c0_i32, %c0_i32_0 : i32, i32
  }
  func.func @transform_2(%arg0: i32) -> (i32, i32) {
    %c0_i32 = arith.constant 0 : i32
    %c0_i32_0 = arith.constant 0 : i32
    %c0_i32_1 = arith.constant 0 : i32
    return %c0_i32, %c0_i32_0 : i32, i32
  }
  func.func @transform_3(%arg0: i32) -> (i32, i32) {
    %c0_i32 = arith.constant 0 : i32
    %c0_i32_0 = arith.constant 0 : i32
    return %arg0, %c0_i32 : i32, i32
  }
}

module attributes {stable_mosaic.version = 11 : i64} {
  func.func @_agg_kernel(%arg0: i32, %arg1: memref<256x3072xbf16, #tpu.memory_space<vmem>>, %arg2: memref<3072x256xbf16, #tpu.memory_space<vmem>>, %arg3: memref<1x256xf32, #tpu.memory_space<vmem>>, %arg4: memref<256x256xbf16, #tpu.memory_space<vmem>>) attributes {dimension_semantics = [#tpu.dimension_semantics<parallel>], iteration_bounds = array<i64: 8>, scalar_prefetch = 0 : i64, scratch_operands = 0 : i64, tpu.core_type = #tpu.core_type<tc>, window_params = [{transform_indices = @transform_0, window_bounds = array<i64: 256, 3072>}, {pipeline_mode = #tpu.pipeline_mode<synchronous>, transform_indices = @transform_1, window_bounds = array<i64: 3072, 256>}, {pipeline_mode = #tpu.pipeline_mode<synchronous>, transform_indices = @transform_2, window_bounds = array<i64: 1, 256>}, {transform_indices = @transform_3, window_bounds = array<i64: 256, 256>}]} {
    %c0 = arith.constant 0 : index
    %c0_0 = arith.constant 0 : index
    %0 = vector.load %arg1[%c0, %c0_0] : memref<256x3072xbf16, #tpu.memory_space<vmem>>, vector<256x3072xbf16>
    %cst = arith.constant 0.000000e+00 : bf16
    %1 = vector.broadcast %cst : bf16 to vector<256x3072xbf16>
    %2 = arith.maximumf %0, %1 : vector<256x3072xbf16>
    %c0_1 = arith.constant 0 : index
    %c0_2 = arith.constant 0 : index
    %3 = vector.load %arg2[%c0_1, %c0_2] : memref<3072x256xbf16, #tpu.memory_space<vmem>>, vector<3072x256xbf16>
    %cst_3 = arith.constant dense<0.000000e+00> : vector<256x256xf32>
    %4 = tpu.matmul %2, %3, %cst_3 {dimension_numbers = #tpu.dot_dimension_numbers<[1], [0], [0], [1], [0, 0, 1, 1], [], []>} : vector<256x3072xbf16>, vector<3072x256xbf16>, vector<256x256xf32> -> vector<256x256xf32>
    %c0_4 = arith.constant 0 : index
    %c0_5 = arith.constant 0 : index
    %5 = vector.load %arg3[%c0_4, %c0_5] : memref<1x256xf32, #tpu.memory_space<vmem>>, vector<1x256xf32>
    %6 = vector.broadcast %5 : vector<1x256xf32> to vector<256x256xf32>
    %7 = arith.addf %4, %6 : vector<256x256xf32>
    %8 = arith.truncf %7 : vector<256x256xf32> to vector<256x256xbf16>
    %c0_6 = arith.constant 0 : index
    %c0_7 = arith.constant 0 : index
    %9 = vector.load %arg4[%c0_6, %c0_7] : memref<256x256xbf16, #tpu.memory_space<vmem>>, vector<256x256xbf16>
    tpu.vector_store %arg4[%c0_6, %c0_7], %8 {strides = array<i32>} : memref<256x256xbf16, #tpu.memory_space<vmem>>, vector<256x256xbf16>,
    return
  }
  func.func @transform_0(%arg0: i32) -> (i32, i32) {
    %c0_i32 = arith.constant 0 : i32
    %c0_i32_0 = arith.constant 0 : i32
    return %arg0, %c0_i32 : i32, i32
  }
  func.func @transform_1(%arg0: i32) -> (i32, i32) {
    %c0_i32 = arith.constant 0 : i32
    %c0_i32_0 = arith.constant 0 : i32
    %c0_i32_1 = arith.constant 0 : i32
    return %c0_i32, %c0_i32_0 : i32, i32
  }
  func.func @transform_2(%arg0: i32) -> (i32, i32) {
    %c0_i32 = arith.constant 0 : i32
    %c0_i32_0 = arith.constant 0 : i32
    %c0_i32_1 = arith.constant 0 : i32
    return %c0_i32, %c0_i32_0 : i32, i32
  }
  func.func @transform_3(%arg0: i32) -> (i32, i32) {
    %c0_i32 = arith.constant 0 : i32
    %c0_i32_0 = arith.constant 0 : i32
    return %arg0, %c0_i32 : i32, i32
  }
}

</mosaic_0001>

<bundles_post_ra>
// kernel: global_aggregation_cell.1
= control target key start
LH: loop header
LB: loop body
LE: loop exit
PB: predicated region body
PF: predicated region fallthrough
CT: control target
= control target key end

     0   :  { %8 = vsyncpa [#allocation3], 0  ;;  %s11448_s0 = inlined_call_operand.hbm [shape: bf16[2048,3072], index: 0, kind: input, shape index: {}]   ;;  %s11449_s1 = inlined_call_operand.hbm [shape: bf16[3072,256], index: 1, kind: input, shape index: {}]   ;;  %s11450_s2 = inlined_call_operand.hbm [shape: f32[1,256], index: 2, kind: input, shape index: {}]   ;;  %s11451_s3 = inlined_call_operand.hbm [shape: bf16[2048,256], index: 3, kind: output, shape index: {}]  }
   0x1   :  { %10 = vsyncpa [#allocation3 + $0x1], 0 }
   0x2   :  { %11 = vsyncpa [#allocation6], 0 }
   0x3   :  { %12 = vsyncpa [#allocation4], 0 }
   0x4   :  { %14 = vsyncpa [#allocation4 + $0x1], 0  ;;  %s10333_s12 = smov 0   ;;  %s10335_s13 = smov 0  }
   0x5   :  { %s10337_s14 = smov 0   ;;  %s10339_s15 = smov 0  }
   0x6 LB: > { %s10354_s16 = sadd.s32 4294967295, %s10300_s15   ;;  %s7871_s17 = sadd.s32 4294967294, %s10300_s15   ;;  %s10300_s15 = sphi %s10339_s15, %s11470_s15   ;;  %s10296_s14 = sphi %s10337_s14, %s11469_s14   ;;  %s10292_s13 = sphi %s10335_s13, %s11468_s13   ;;  %s10288_s12 = sphi %s10333_s12, %s11467_s12  }
   0x7   : > { %p40_p0 = scmp.ne.s32.totalorder %s10292_s13, %s10288_s12  ;;  %p11452_p1 = scmp.eq.s32.totalorder %s10354_s16, 0 }
   0x8   : > { %p112_p3 = scmp.eq.s32.totalorder %s7871_s17, 7  ;;  %p7872_p5 = scmp.ge.s32.totalorder %s10300_s15, 1 }
   0x9   : > { %p10363_p4 = por %p11452_p1, %p40_p0  ;;  %p119_p7 = scmp.lt.s32.totalorder %s10300_s15, 9 }
   0xa   : > { %p10368_p6 = por %p112_p3, %p40_p0  ;;  %s10302_s21 = smov [#allocation5]  }
   0xb   : > { %s11455_s18 = scalar_select %p10363_p4, 1, 0 }
   0xc   : > { %s11456_s19 = scalar_select %p10368_p6, 1, 0 }
   0xd   : > { %p10373_p8 = pnand %p7872_p5, %p119_p7  ;;  %s131_s22 = sshll.u32 %s10302_s21, 4  ;;  %s132_s22 = int_to_ptr.vmem [resolvable:$true] %s131_s22 }
   0xe   : > { %s10303_s24 = smov [#allocation7]   ;;  %s10144_s28 = scalar_lea.hbm %s11449_s1, 49152 }
   0xf   : > { %s11457_s20 = scalar_select %p10373_p8, 1, 0 }
  0x10   : > { %p9506_p9 = pneg %p10373_p8  ;;  %s145_s25 = sshll.u32 %s10303_s24, 4  ;;  %s10385_s25 = int_to_ptr.vmem [resolvable:$true] %s145_s25 }
  0x11   : > { %p10145_p11 = scmp.ne.s32.totalorder %s11449_s1, %s10144_s28  ;;  %p10151_p3 = scmp.lt.u32.totalorder %s10144_s28, %s11449_s1 }
  0x12   : > { %p10381_p10 = pnand %p9506_p9, %p11452_p1 }
  0x14   : > { %p10146_p12 = pneg %p10381_p10 }
  0x16   : > { %p10147_p13 = pnand %p10146_p12, %p10145_p11 }
  0x18   : > { %p10148_p0 = pneg %p10147_p13 }
  0x1a   : > { %p10153_p5 = pnand %p10151_p3, %p10148_p0 }
  0x1c   : > { %10156 = shalt.err (!%p10153_p5)
}
  0x1d   : > { %s10157_s6 = scalar_lea.vmem %s132_s22, 49152  ;;  %p10165_p2 = scmp.lt.s32.totalorder %s132_s22, %s132_s22 }
  0x1e   : > { %p10158_p7 = scmp.ne.s32.totalorder %s132_s22, %s10157_s6  ;;  %p10166_p6 = scmp.lt.s32.totalorder %s10157_s6, %s10157_s6 }
  0x20   : > { %p10160_p9 = pnand %p10158_p7, %p10146_p12  ;;  %p10167_p4 = por %p10166_p6, %p10165_p2 }
  0x22   : > { %p10161_p1 = pneg %p10160_p9 }
  0x24   : > { %p10168_p8 = pnand %p10167_p4, %p10161_p1 }
  0x26   : > { %10171 = shalt.err (!%p10168_p8)
}
  0x27   : > { %s10304_s7 = smov 128   ;;  %s10305_s8 = smov 8  }
  0x28   : > { %9509 = dma.hbm_to_vmem [thread:$0]  (!%p10381_p10), %s11449_s1, 49152, %s132_s22, [#allocation6], %s10304_s7, %s10304_s7, %s10305_s8  }
  0x29   : > { %s10172_s21 = scalar_lea.hbm %s11450_s2, 32 }
  0x2a   : > { %p10173_p11 = scmp.ne.s32.totalorder %s11450_s2, %s10172_s21  ;;  %p10179_p4 = scmp.lt.u32.totalorder %s10172_s21, %s11450_s2 }
  0x2c   : > { %p10175_p1 = pnand %p10173_p11, %p10146_p12 }
  0x2e   : > { %p10176_p2 = pneg %p10175_p1 }
  0x30   : > { %p10181_p6 = pnand %p10179_p4, %p10176_p2 }
  0x32   : > { %10184 = shalt.err (!%p10181_p6)
}
  0x33   : > { %s10185_s22 = scalar_lea.vmem %s10385_s25, 32  ;;  %p10193_p3 = scmp.lt.s32.totalorder %s10385_s25, %s10385_s25 }
  0x34   : > { %p10186_p8 = scmp.ne.s32.totalorder %s10385_s25, %s10185_s22  ;;  %p10194_p5 = scmp.lt.s32.totalorder %s10185_s22, %s10185_s22 }
  0x36   : > { %p10188_p13 = pnand %p10186_p8, %p10146_p12  ;;  %p10195_p7 = por %p10194_p5, %p10193_p3 }
  0x38   : > { %p10189_p0 = pneg %p10188_p13 }
  0x3a   : > { %p10196_p9 = pnand %p10195_p7, %p10189_p0 }
  0x3c   : > { %10199 = shalt.err (!%p10196_p9)
}
  0x3d   : > { %9512 = dma.hbm_to_vmem [thread:$0]  (!%p10381_p10), %s11450_s2, 32, %s10385_s25, [#allocation6]  }
  0x3e   : > { %s10435_s4 = sadd.s32 1, %s10300_s15   ;;  %s27_s23 = sadd.s32 1, %s10296_s14 }
  0x3f   : > { %s24_s5 = ssub.s32 %s10300_s15, %s10435_s4  ;;  %p34_p12 = scmp.ne.s32.totalorder %s10296_s14, %s10292_s13 }
  0x40   : > { %p25_p11 = scmp.eq.s32.totalorder %s24_s5, 0  ;;  %p35_p1 = scmp.eq.s32.totalorder %s10300_s15, 0 }
  0x41   : > { %p11459_p2 = scmp.eq.s32.totalorder %s10354_s16, 7  ;;  %p9523_p6 = scmp.lt.s32.totalorder %s10300_s15, 8 }
  0x42   : > { %s10451_s7 = scalar_select %p25_p11, %s10296_s14, %s27_s23  }
  0x43   : > { %p10445_p4 = por %p11459_p2, %p34_p12  ;;  %p36_p8 = por %p35_p1, %p34_p12 }
  0x44   : > { %s156_s8 = sand.u32 1, %s10296_s14   ;;  %s9492_s25 = smul.u32 49152, %s10300_s15 }
  0x45   : > { %s9491_s9 = smul.u32 3072, %s156_s8  ;;  %p10455_p10 = pnand %p9523_p6, %p36_p8 }
  0x46   : > { %s10462_s21 = scalar_lea.hbm %s11448_s0, %s9492_s25  ;;  %s10466_s27 = scalar_lea.sflag [#allocation3], %s156_s8 }
  0x47   : > { %s160_s24 = scalar_lea.vmem [#allocation2], %s9491_s9  ;;  %s10200_s28 = scalar_lea.hbm %s10462_s21, 49152 }
  0x48   : > { %s168_s26 = sshll.u32 %s160_s24, 4  ;;  %p10201_p13 = scmp.ne.s32.totalorder %s10462_s21, %s10200_s28  ;;  %s10464_s26 = int_to_ptr.vmem [resolvable:$true] %s168_s26 }
  0x49   : > { %p10202_p0 = pneg %p10455_p10  ;;  %s10205_s30 = scalar_lea.hbm %s11448_s0, 393216 }
  0x4a   : > { %p10206_p7 = scmp.lt.u32.totalorder %s10462_s21, %s11448_s0  ;;  %p10207_p9 = scmp.lt.u32.totalorder %s10205_s30, %s10200_s28 }
  0x4b   : > { %p10203_p3 = pnand %p10202_p0, %p10201_p13  ;;  %p10209_p11 = scmp.lt.u32.totalorder %s10200_s28, %s10462_s21 }
  0x4c   : > { %p10208_p12 = por %p10207_p9, %p10206_p7 }
  0x4d   : > { %p10204_p5 = pneg %p10203_p3 }
  0x4e   : > { %p10210_p1 = por %p10209_p11, %p10208_p12 }
  0x50   : > { %p10211_p2 = pnand %p10210_p1, %p10204_p5 }
  0x52   : > { %10214 = shalt.err (!%p10211_p2)
}
  0x53   : > { %s10215_s8 = scalar_lea.vmem %s10464_s26, 49152  ;;  %s10306_s9 = smov [#allocation2]  }
  0x54   : > { %p10216_p6 = scmp.ne.s32.totalorder %s10464_s26, %s10215_s8  ;;  %s10220_s25 = sshll.u32 %s10306_s9, 4  ;;  %s10221_s25 = int_to_ptr.vmem [resolvable:$false] %s10220_s25 }
  0x55   : > { %s10222_s11 = scalar_lea.vmem %s10221_s25, 98304  ;;  %p10223_p3 = scmp.lt.s32.totalorder %s10464_s26, %s10221_s25 }
  0x56   : > { %p10218_p8 = pnand %p10216_p6, %p10202_p0  ;;  %p10224_p7 = scmp.lt.s32.totalorder %s10222_s11, %s10215_s8 }
  0x58   : > { %p10219_p13 = pneg %p10218_p8  ;;  %p10225_p9 = por %p10224_p7, %p10223_p3 }
  0x5a   : > { %p10226_p12 = pnand %p10225_p9, %p10219_p13 }
  0x5c   : > { %10229 = shalt.err (!%p10226_p12)
}
  0x5d   : > { %s10307_s17 = smov 1536   ;;  %s10308_s24 = smov 96  }
  0x5e   : > { %9516 = dma.hbm_to_vmem [thread:$0]  (!%p10455_p10), %s10462_s21, 49152, %s10464_s26, %s10466_s27, %s10307_s17, %s10307_s17, %s10308_s24  }
  0x5f   : > { %p11462_p0 = scmp.ne.s32.totalorder %s11457_s20, 0 }
  0x60   : > { %s10497_s28 = sand.u32 (!%p11462_p0), 1, %s10292_s13   ;;  %p11463_p5 = scmp.ne.s32.totalorder (!%p11462_p0), %s11455_s18, 0 }
  0x61   : > { %180 = sbr.rel (%p11462_p0) target bundleno = 1169 (0x491), region = 32  ;;  %s183_s29 = scalar_lea.sflag (!%p11462_p0), [#allocation3], %s10497_s28 }
  0x62   : > { %s9493_s22 = smul.u32 (!%p11462_p0), 3072, %s10497_s28 }
  0x64   : > { %s10501_s30 = scalar_lea.vmem (!%p11462_p0), [#allocation2], %s9493_s22 }
  0x68   : > { %10275 = dma.done.wait (%p11463_p5), %s183_s29, 49152  }
  0x69   : > { %10277 = vsyncadd (%p11463_p5), %s183_s29, 4294918144  ;;  %p11464_p10 = scmp.eq.s32.totalorder %s10354_s16, 0 }
  0x6b   : > { %10279 = dma.done.wait (%p11464_p10), [#allocation6], 49184   ;;  %p11465_p11 = pmov %p11464_p10 }
  0x6c   : > { %v9568_v0 = vld [vmem:[#allocation5 + $0x4] ss:$8 sps:$4 sm:$0xff]   ;;  %v9572_v2 = vld [vmem:[#allocation5] ss:$8 sps:$4 sm:$0xff]   ;;  %v9574_v4 = vld [vmem:[#allocation5 + $0x14] ss:$8 sps:$4 sm:$0xff]  }
  0x6d   : > { %10281 = vsyncadd (%p11465_p11), [#allocation6], 4294918112  ;;  %v9570_v1 = vld [vmem:[#allocation5 + $0x604] ss:$8 sps:$4 sm:$0xff]   ;;  %5224 = vmatprep.subr.bf16.mxu1 %v9568_v0  ;;  %v9573_v3 = vld [vmem:[#allocation5 + $0x600] ss:$8 sps:$4 sm:$0xff]  }
  0x6e   : > { %6382 = vmatprep.subr.bf16.mxu0 %v9570_v1  ;;  %5225 = vmatpush1.bf16.msra.mxu1 %v9572_v2  ;;  %v9576_v5 = vld [vmem:[#allocation5 + $0x614] ss:$8 sps:$4 sm:$0xff]   ;;  %v9578_v6 = vld [vmem:[#allocation5 + $0x10] ss:$8 sps:$4 sm:$0xff]   ;;  %v9580_v8 = vld [vmem:[#allocation5 + $0x24] ss:$8 sps:$4 sm:$0xff]  }
  0x6f   : > { %6383 = vmatpush1.bf16.msra.mxu0 %v9573_v3  ;;  %5226 = vmatprep.subr.bf16.mxu1 %v9574_v4  ;;  %v9579_v7 = vld [vmem:[#allocation5 + $0x610] ss:$8 sps:$4 sm:$0xff]   ;;  %v9582_v9 = vld [vmem:[#allocation5 + $0x624] ss:$8 sps:$4 sm:$0xff]   ;;  %v9584_v10 = vld [vmem:[#allocation5 + $0x20] ss:$8 sps:$4 sm:$0xff]  }
  0x70   : > { %6384 = vmatprep.subr.bf16.mxu0 %v9576_v5  ;;  %v9585_v11 = vld [vmem:[#allocation5 + $0x620] ss:$8 sps:$4 sm:$0xff]   ;;  %v9586_v12 = vld [vmem:[#allocation5 + $0x34] ss:$8 sps:$4 sm:$0xff]   ;;  %v9590_v14 = vld [vmem:[#allocation5 + $0x30] ss:$8 sps:$4 sm:$0xff]  }
  0x71   : > { %v9588_v13 = vld [vmem:[#allocation5 + $0x634] ss:$8 sps:$4 sm:$0xff]   ;;  %v9591_v15 = vld [vmem:[#allocation5 + $0x630] ss:$8 sps:$4 sm:$0xff]   ;;  %v9592_v16 = vld [vmem:[#allocation5 + $0x44] ss:$8 sps:$4 sm:$0xff]  }
  0x72   : > { %5227 = vmatpush1.bf16.msra.mxu1 %v9578_v6  ;;  %v9594_v17 = vld [vmem:[#allocation5 + $0x644] ss:$8 sps:$4 sm:$0xff]   ;;  %v9596_v18 = vld [vmem:[#allocation5 + $0x40] ss:$8 sps:$4 sm:$0xff]   ;;  %v9598_v20 = vld [vmem:[#allocation5 + $0x54] ss:$8 sps:$4 sm:$0xff]  }
  0x73   : > { %6385 = vmatpush1.bf16.msra.mxu0 %v9579_v7  ;;  %5228 = vmatprep.subr.bf16.mxu1 %v9580_v8  ;;  %v9597_v19 = vld [vmem:[#allocation5 + $0x640] ss:$8 sps:$4 sm:$0xff]   ;;  %v9600_v21 = vld [vmem:[#allocation5 + $0x654] ss:$8 sps:$4 sm:$0xff]   ;;  %v9602_v22 = vld [vmem:[#allocation5 + $0x50] ss:$8 sps:$4 sm:$0xff]  }
  0x74   : > { %6386 = vmatprep.subr.bf16.mxu0 %v9582_v9  ;;  %v9603_v23 = vld [vmem:[#allocation5 + $0x650] ss:$8 sps:$4 sm:$0xff]   ;;  %v9604_v24 = vld [vmem:[#allocation5 + $0x64] ss:$8 sps:$4 sm:$0xff]   ;;  %v9608_v26 = vld [vmem:[#allocation5 + $0x60] ss:$8 sps:$4 sm:$0xff]  }
  0x75   : > { %v9606_v25 = vld [vmem:[#allocation5 + $0x664] ss:$8 sps:$4 sm:$0xff]   ;;  %v9609_v27 = vld [vmem:[#allocation5 + $0x660] ss:$8 sps:$4 sm:$0xff]   ;;  %v9610_v28 = vld [vmem:[#allocation5 + $0x74] ss:$8 sps:$4 sm:$0xff]  }
  0x76   : > { %5229 = vmatpush1.bf16.msra.mxu1 %v9584_v10  ;;  %v9612_v29 = vld [vmem:[#allocation5 + $0x674] ss:$8 sps:$4 sm:$0xff]   ;;  %v9614_v30 = vld [vmem:[#allocation5 + $0x70] ss:$8 sps:$4 sm:$0xff]   ;;  %v9616_v32 = vld [vmem:[#allocation5 + $0x84] ss:$8 sps:$4 sm:$0xff]  }
  0x77   : > { %6387 = vmatpush1.bf16.msra.mxu0 %v9585_v11  ;;  %5230 = vmatprep.subr.bf16.mxu1 %v9586_v12  ;;  %v9615_v31 = vld [vmem:[#allocation5 + $0x670] ss:$8 sps:$4 sm:$0xff]   ;;  %v9618_v33 = vld [vmem:[#allocation5 + $0x684] ss:$8 sps:$4 sm:$0xff]   ;;  %v9620_v34 = vld [vmem:[#allocation5 + $0x80] ss:$8 sps:$4 sm:$0xff]  }
  0x78   : > { %6388 = vmatprep.subr.bf16.mxu0 %v9588_v13  ;;  %v9621_v35 = vld [vmem:[#allocation5 + $0x680] ss:$8 sps:$4 sm:$0xff]   ;;  %v9622_v36 = vld [vmem:[#allocation5 + $0x94] ss:$8 sps:$4 sm:$0xff]   ;;  %v9626_v38 = vld [vmem:[#allocation5 + $0x90] ss:$8 sps:$4 sm:$0xff]  }
  0x79   : > { %v9624_v37 = vld [vmem:[#allocation5 + $0x694] ss:$8 sps:$4 sm:$0xff]   ;;  %v9627_v39 = vld [vmem:[#allocation5 + $0x690] ss:$8 sps:$4 sm:$0xff]   ;;  %v9628_v40 = vld [vmem:[#allocation5 + $0xa4] ss:$8 sps:$4 sm:$0xff]  }
  0x7a   : > { %5231 = vmatpush1.bf16.msra.mxu1 %v9590_v14  ;;  %v9630_v41 = vld [vmem:[#allocation5 + $0x6a4] ss:$8 sps:$4 sm:$0xff]   ;;  %v9632_v42 = vld [vmem:[#allocation5 + $0xa0] ss:$8 sps:$4 sm:$0xff]   ;;  %v9634_v44 = vld [vmem:[#allocation5 + $0xb4] ss:$8 sps:$4 sm:$0xff]  }
  0x7b   : > { %6389 = vmatpush1.bf16.msra.mxu0 %v9591_v15  ;;  %5232 = vmatprep.subr.bf16.mxu1 %v9592_v16  ;;  %v9633_v43 = vld [vmem:[#allocation5 + $0x6a0] ss:$8 sps:$4 sm:$0xff]   ;;  %v9636_v45 = vld [vmem:[#allocation5 + $0x6b4] ss:$8 sps:$4 sm:$0xff]   ;;  %v9638_v46 = vld [vmem:[#allocation5 + $0xb0] ss:$8 sps:$4 sm:$0xff]  }
  0x7c   : > { %6390 = vmatprep.subr.bf16.mxu0 %v9594_v17  ;;  %v9639_v47 = vld [vmem:[#allocation5 + $0x6b0] ss:$8 sps:$4 sm:$0xff]   ;;  %v220_v48 = vld [vmem:[%s10501_s30] sm:$0xff]  ;;  %v10309_v50 = vmov 0   ;;  %v9646_v63 = vld [vmem:[#allocation5 + $0xd4] ss:$8 sps:$4 sm:$0xff]  }
  0x7d   : > { %v232_v49 = vld [vmem:[%s10501_s30 + $0x60] sm:$0xff]  ;;  %v10514_v51 = vmax.bf16 %v10309_v50, %v220_v48  ;;  %v226_v52 = vld [vmem:[%s10501_s30 + $0x30] sm:$0xff]  ;;  %s7882_s18 = sshll.u32 %s10497_s28, 8  ;;  %s8722_s10 = sshll.u32 %s10354_s16, 12 }
  0x7e   : > { %5233 = vmatpush1.bf16.msra.mxu1 %v9596_v18  ;;  %v238_v53 = vld [vmem:[%s10501_s30 + $0x90] sm:$0xff]  ;;  %v9640_v54 = vld [vmem:[#allocation5 + $0xc4] ss:$8 sps:$4 sm:$0xff]   ;;  %v10519_v55 = vmax.bf16 %v10309_v50, %v232_v49  ;;  %v10522_v56 = vmax.bf16 %v10309_v50, %v226_v52  ;;  %v9644_v61 = vld [vmem:[#allocation5 + $0xc0] ss:$8 sps:$4 sm:$0xff]   ;;  %s11304_s20 = scalar_lea.vmem [#allocation8], %s7882_s18  ;;  %s11401_s23 = scalar_lea.hbm %s11451_s3, %s8722_s10 }
  0x7f   : > { %6391 = vmatpush1.bf16.msra.mxu0 %v9597_v19  ;;  %5234 = vmatprep.subr.bf16.mxu1 %v9598_v20  ;;  %v10525_v57 = vmax.bf16 %v10309_v50, %v238_v53  ;;  %v9642_v58 = vld [vmem:[#allocation5 + $0x6c4] ss:$8 sps:$4 sm:$0xff]   ;;  %v9645_v62 = vld [vmem:[#allocation5 + $0x6c0] ss:$8 sps:$4 sm:$0xff]   ;;  %v9648_v0 = vld [vmem:[#allocation5 + $0x6d4] ss:$8 sps:$4 sm:$0xff]  }
  0x80   : > { %6392 = vmatprep.subr.bf16.mxu0 %v9600_v21  ;;  %v7884_v59 = vcombine.high %v10514_v51, %v10519_v55  ;;  %v9650_v1 = vld [vmem:[#allocation5 + $0xd0] ss:$8 sps:$4 sm:$0xff]   ;;  %v9652_v3 = vld [vmem:[#allocation5 + $0xe4] ss:$8 sps:$4 sm:$0xff]   ;;  %v9656_v5 = vld [vmem:[#allocation5 + $0xe0] ss:$8 sps:$4 sm:$0xff]  }
  0x81   : > { %v7896_v60 = vcombine.high %v10522_v56, %v10525_v57  ;;  %v9651_v2 = vld [vmem:[#allocation5 + $0x6d0] ss:$8 sps:$4 sm:$0xff]   ;;  %v9654_v4 = vld [vmem:[#allocation5 + $0x6e4] ss:$8 sps:$4 sm:$0xff]   ;;  %v9657_v6 = vld [vmem:[#allocation5 + $0x6e0] ss:$8 sps:$4 sm:$0xff]  }
  0x82   : > { %5235 = vmatpush1.bf16.msra.mxu1 %v9602_v22  ;;  %5256 = vmatprep.mubr.bf16.mxu1 %v7884_v59  ;;  %v9658_v7 = vld [vmem:[#allocation5 + $0xf4] ss:$8 sps:$4 sm:$0xff]   ;;  %v244_v9 = vld [vmem:[%s10501_s30 + $0xc0] sm:$0xff]  ;;  %v9662_v13 = vld [vmem:[#allocation5 + $0xf0] ss:$8 sps:$4 sm:$0xff]   ;;  %v7883_v22 = vcombine.low %v10514_v51, %v10519_v55  ;;  %s7779_s21 = sshll.u32 %s11304_s20, 4  ;;  %s11403_s21 = int_to_ptr.vmem [resolvable:$true] %s7779_s21 }
  0x83   : > { %6393 = vmatpush1.bf16.msra.mxu0 %v9603_v23  ;;  %5236 = vmatprep.subr.bf16.mxu1 %v9604_v24  ;;  %v9660_v8 = vld [vmem:[#allocation5 + $0x6f4] ss:$8 sps:$4 sm:$0xff]   ;;  %v256_v10 = vld [vmem:[%s10501_s30 + $0x120] sm:$0xff]  ;;  %v9663_v14 = vld [vmem:[#allocation5 + $0x6f0] ss:$8 sps:$4 sm:$0xff]   ;;  %v628_v16 = vmax.bf16 %v10309_v50, %v244_v9  ;;  %v7895_v23 = vcombine.low %v10522_v56, %v10525_v57  ;;  %s7765_s5 = scalar_lea.sflag [#allocation4], %s10497_s28 }
  0x84   : > { %6394 = vmatprep.subr.bf16.mxu0 %v9606_v25  ;;  %6414 = vmatprep.mubr.bf16.mxu0 %v7896_v60  ;;  %v250_v11 = vld [vmem:[%s10501_s30 + $0xf0] sm:$0xff]  ;;  %v9666_v15 = vld [vmem:[#allocation5 + $0x104] ss:$8 sps:$4 sm:$0xff]   ;;  %v640_v18 = vmax.bf16 %v10309_v50, %v256_v10  ;;  %v9664_v21 = vld [vmem:[#allocation5 + $0x100] ss:$8 sps:$4 sm:$0xff]   ;;  %s10230_s8 = scalar_lea.vmem %s11403_s21, 4096 }
  0x85   : > { %v262_v12 = vld [vmem:[%s10501_s30 + $0x150] sm:$0xff]  ;;  %v9669_v17 = vld [vmem:[#allocation5 + $0x704] ss:$8 sps:$4 sm:$0xff]   ;;  %v634_v19 = vmax.bf16 %v10309_v50, %v250_v11  ;;  %v9667_v24 = vld [vmem:[#allocation5 + $0x700] ss:$8 sps:$4 sm:$0xff]   ;;  %p10231_p1 = scmp.ne.s32.totalorder %s11403_s21, %s10230_s8  ;;  %s10310_s16 = smov [#allocation8]  }
  0x86   : > { %5237 = vmatpush1.bf16.msra.mxu1 %v9608_v26  ;;  %v646_v20 = vmax.bf16 %v10309_v50, %v262_v12  ;;  %v268_v25 = vld [vmem:[%s10501_s30 + $0x180] sm:$0xff]  ;;  %v298_v49 = vld [vmem:[%s10501_s30 + $0x270] sm:$0xff]  ;;  %s10234_s9 = sshll.u32 %s10310_s16, 4  ;;  %s10235_s9 = int_to_ptr.vmem [resolvable:$false] %s10234_s9 }
  0x87   : > { %6395 = vmatpush1.bf16.msra.mxu0 %v9609_v27  ;;  %5238 = vmatprep.subr.bf16.mxu1 %v9610_v28  ;;  %v280_v26 = vld [vmem:[%s10501_s30 + $0x1e0] sm:$0xff]  ;;  %v274_v27 = vld [vmem:[%s10501_s30 + $0x1b0] sm:$0xff]  ;;  %v7908_v28 = vcombine.high %v628_v16, %v640_v18  ;;  %v682_v56 = vmax.bf16 %v10309_v50, %v298_v49  ;;  %p10232_p2 = pnand %p10231_p1, %p10445_p4  ;;  %s10236_s25 = scalar_lea.vmem %s10235_s9, 8192 }
  0x88   : > { %6396 = vmatprep.subr.bf16.mxu0 %v9612_v29  ;;  %v7920_v29 = vcombine.high %v634_v19, %v646_v20  ;;  %v310_v51 = vld [vmem:[%s10501_s30 + $0x2d0] sm:$0xff]  ;;  %v316_v60 = vld [vmem:[%s10501_s30 + $0x300] sm:$0xff]  ;;  %p10237_p8 = scmp.lt.s32.totalorder %s11403_s21, %s10235_s9  ;;  %p10238_p13 = scmp.lt.s32.totalorder %s10236_s25, %s10230_s8 }
  0x89   : > { %v9684_v52 = vld [vmem:[#allocation5 + $0x134] ss:$8 sps:$4 sm:$0xff]   ;;  %v694_v57 = vmax.bf16 %v10309_v50, %v310_v51  ;;  %v9685_v59 = vld [vmem:[#allocation5 + $0x730] ss:$8 sps:$4 sm:$0xff]   ;;  %v700_v10 = vmax.bf16 %v10309_v50, %v316_v60  ;;  %p10233_p6 = pneg %p10232_p2 }
  0x8a   : > { %5239 = vmatpush1.bf16.msra.mxu1 %v9614_v30  ;;  %v286_v30 = vld [vmem:[%s10501_s30 + $0x210] sm:$0xff]  ;;  %p10239_p3 = por %p10238_p13, %p10237_p8 }
  0x8b   : > { %6397 = vmatpush1.bf16.msra.mxu0 %v9615_v31  ;;  %5240 = vmatprep.subr.bf16.mxu1 %v9616_v32  ;;  %v9672_v31 = vld [vmem:[#allocation5 + $0x114] ss:$8 sps:$4 sm:$0xff]  }
  0x8c   : > { %6398 = vmatprep.subr.bf16.mxu0 %v9618_v33  ;;  %v9675_v32 = vld [vmem:[#allocation5 + $0x714] ss:$8 sps:$4 sm:$0xff]   ;;  %v9670_v33 = vld [vmem:[#allocation5 + $0x110] ss:$8 sps:$4 sm:$0xff]   ;;  %p10240_p7 = pnand %p10239_p3, %p10233_p6 }
  0x8d   : > { %v9687_v53 = vld [vmem:[#allocation5 + $0x734] ss:$8 sps:$4 sm:$0xff]  }
  0x8e   : > { %5241 = vmatpush1.bf16.msra.mxu1 %v9620_v34  ;;  %v9673_v34 = vld [vmem:[#allocation5 + $0x710] ss:$8 sps:$4 sm:$0xff]   ;;  %v9699_v9 = vld [vmem:[#allocation5 + $0x754] ss:$8 sps:$4 sm:$0xff]  }
  0x8f   : > { %6399 = vmatpush1.bf16.msra.mxu0 %v9621_v35  ;;  %5242 = vmatprep.subr.bf16.mxu1 %v9622_v36  ;;  %v652_v35 = vmax.bf16 %v10309_v50, %v268_v25  ;;  %v664_v36 = vmax.bf16 %v10309_v50, %v280_v26  ;;  %v9700_v26 = vld [vmem:[#allocation5 + $0x160] ss:$8 sps:$4 sm:$0xff]   ;;  %v9723_v49 = vld [vmem:[#allocation5 + $0x794] ss:$8 sps:$4 sm:$0xff]  }
  0x90   : > { %6400 = vmatprep.subr.bf16.mxu0 %v9624_v37  ;;  %v658_v37 = vmax.bf16 %v10309_v50, %v274_v27  ;;  %v9703_v27 = vld [vmem:[#allocation5 + $0x760] ss:$8 sps:$4 sm:$0xff]  }
  0x92   : > { %5243 = vmatpush1.bf16.msra.mxu1 %v9626_v38  ;;  %v670_v38 = vmax.bf16 %v10309_v50, %v286_v30 }
  0x93   : > { %6401 = vmatpush1.bf16.msra.mxu0 %v9627_v39  ;;  %5244 = vmatprep.subr.bf16.mxu1 %v9628_v40  ;;  %v9678_v39 = vld [vmem:[#allocation5 + $0x124] ss:$8 sps:$4 sm:$0xff]  }
  0x94   : > { %6402 = vmatprep.subr.bf16.mxu0 %v9630_v41  ;;  %v9681_v40 = vld [vmem:[#allocation5 + $0x724] ss:$8 sps:$4 sm:$0xff]   ;;  %v7907_v41 = vcombine.low %v628_v16, %v640_v18  ;;  %v7944_v48 = vcombine.high %v658_v37, %v670_v38 }
  0x95   : > { %v340_v16 = vld [vmem:[%s10501_s30 + $0x3c0] sm:$0xff] }
  0x96   : > { %5245 = vmatpush1.bf16.msra.mxu1 %v9632_v42  ;;  %v7919_v42 = vcombine.low %v634_v19, %v646_v20  ;;  %v9705_v18 = vld [vmem:[#allocation5 + $0x764] ss:$8 sps:$4 sm:$0xff]   ;;  %v7967_v20 = vcombine.low %v682_v56, %v694_v57  ;;  %v724_v30 = vmax.bf16 %v10309_v50, %v340_v16 }
  0x97   : > { %6403 = vmatpush1.bf16.msra.mxu0 %v9633_v43  ;;  %5246 = vmatprep.subr.bf16.mxu1 %v9634_v44  ;;  %v9676_v43 = vld [vmem:[#allocation5 + $0x120] ss:$8 sps:$4 sm:$0xff]  }
  0x98   : > { %6404 = vmatprep.subr.bf16.mxu0 %v9636_v45  ;;  %v9679_v44 = vld [vmem:[#allocation5 + $0x720] ss:$8 sps:$4 sm:$0xff]  }
  0x99   : > { %v292_v45 = vld [vmem:[%s10501_s30 + $0x240] sm:$0xff] }
  0x9a   : > { %5247 = vmatpush1.bf16.msra.mxu1 %v9638_v46  ;;  %v304_v46 = vld [vmem:[%s10501_s30 + $0x2a0] sm:$0xff] }
  0x9b   : > { %6405 = vmatpush1.bf16.msra.mxu0 %v9639_v47  ;;  %5248 = vmatprep.subr.bf16.mxu1 %v9640_v54  ;;  %v7932_v47 = vcombine.high %v652_v35, %v664_v36  ;;  %v676_v54 = vmax.bf16 %v10309_v50, %v292_v45  ;;  %v688_v55 = vmax.bf16 %v10309_v50, %v304_v46  ;;  %v9712_v46 = vld [vmem:[#allocation5 + $0x180] ss:$8 sps:$4 sm:$0xff]  }
  0x9c   : > { %6406 = vmatprep.subr.bf16.mxu0 %v9642_v58  ;;  %v9682_v58 = vld [vmem:[#allocation5 + $0x130] ss:$8 sps:$4 sm:$0xff]  }
  0x9d   : > { %v7955_v19 = vcombine.low %v676_v54, %v688_v55 }
  0x9e   : > { %5249 = vmatpush1.bf16.msra.mxu1 %v9644_v61  ;;  %v9690_v61 = vld [vmem:[#allocation5 + $0x144] ss:$8 sps:$4 sm:$0xff]  }
  0x9f   : > { %6407 = vmatpush1.bf16.msra.mxu0 %v9645_v62  ;;  %5250 = vmatprep.subr.bf16.mxu1 %v9646_v63  ;;  %v9693_v62 = vld [vmem:[#allocation5 + $0x744] ss:$8 sps:$4 sm:$0xff]   ;;  %v7931_v63 = vcombine.low %v652_v35, %v664_v36  ;;  %v9709_v35 = vld [vmem:[#allocation5 + $0x770] ss:$8 sps:$4 sm:$0xff]  }
  0xa0   : > { %6408 = vmatprep.subr.bf16.mxu0 %v9648_v0  ;;  %v7943_v0 = vcombine.low %v658_v37, %v670_v38  ;;  %v364_v36 = vld [vmem:[%s10501_s30 + $0x480] sm:$0xff] }
  0xa1   : > { %v9714_v37 = vld [vmem:[#allocation5 + $0x184] ss:$8 sps:$4 sm:$0xff]   ;;  %v748_v51 = vmax.bf16 %v10309_v50, %v364_v36 }
  0xa2   : > { %5251 = vmatpush1.bf16.msra.mxu1 %v9650_v1  ;;  %v328_v1 = vld [vmem:[%s10501_s30 + $0x360] sm:$0xff] }
  0xa3   : > { %6409 = vmatpush1.bf16.msra.mxu0 %v9651_v2  ;;  %5252 = vmatprep.subr.bf16.mxu1 %v9652_v3  ;;  %v322_v2 = vld [vmem:[%s10501_s30 + $0x330] sm:$0xff]  ;;  %v712_v11 = vmax.bf16 %v10309_v50, %v328_v1  ;;  %v9717_v38 = vld [vmem:[#allocation5 + $0x784] ss:$8 sps:$4 sm:$0xff]  }
  0xa4   : > { %6410 = vmatprep.subr.bf16.mxu0 %v9654_v4  ;;  %v334_v3 = vld [vmem:[%s10501_s30 + $0x390] sm:$0xff]  ;;  %v7956_v4 = vcombine.high %v676_v54, %v688_v55  ;;  %v706_v12 = vmax.bf16 %v10309_v50, %v322_v2 }
  0xa5   : > { %v9718_v55 = vld [vmem:[#allocation5 + $0x190] ss:$8 sps:$4 sm:$0xff]  }
  0xa6   : > { %5253 = vmatpush1.bf16.msra.mxu1 %v9656_v5  ;;  %v7968_v5 = vcombine.high %v682_v56, %v694_v57  ;;  %v9721_v56 = vld [vmem:[#allocation5 + $0x790] ss:$8 sps:$4 sm:$0xff]   ;;  %v388_v57 = vld [vmem:[%s10501_s30 + $0x540] sm:$0xff] }
  0xa7   : > { %6411 = vmatpush1.bf16.msra.mxu0 %v9657_v6  ;;  %5254 = vmatprep.subr.bf16.mxu1 %v9658_v7  ;;  %v9688_v6 = vld [vmem:[#allocation5 + $0x140] ss:$8 sps:$4 sm:$0xff]  }
  0xa8   : > { %6412 = vmatprep.subr.bf16.mxu0 %v9660_v8  ;;  %v9691_v7 = vld [vmem:[#allocation5 + $0x740] ss:$8 sps:$4 sm:$0xff]   ;;  %v9696_v8 = vld [vmem:[#allocation5 + $0x154] ss:$8 sps:$4 sm:$0xff]  }
  0xaa   : > { %5255 = vmatpush1.bf16.msra.mxu1 %v9662_v13  ;;  %v718_v13 = vmax.bf16 %v10309_v50, %v334_v3  ;;  %v9724_v3 = vld [vmem:[#allocation5 + $0x1a0] ss:$8 sps:$4 sm:$0xff]  }
  0xab   : > { %6413 = vmatpush1.bf16.msra.mxu0 %v9663_v14  ;;  %5417 = vmatprep.subr.bf16.mxu1 %v9666_v15  ;;  %v9694_v14 = vld [vmem:[#allocation5 + $0x150] ss:$8 sps:$4 sm:$0xff]  }
  0xac   : > { %6575 = vmatprep.subr.bf16.mxu0 %v9669_v17  ;;  %v9697_v15 = vld [vmem:[#allocation5 + $0x750] ss:$8 sps:$4 sm:$0xff]   ;;  %v9702_v17 = vld [vmem:[#allocation5 + $0x164] ss:$8 sps:$4 sm:$0xff]   ;;  %v7992_v25 = vcombine.high %v706_v12, %v718_v13 }
  0xad   : > { %5257 = vmatmul.mubr.bf16.vlgmr.msra.gmra.mrb[0].mxu1 %v7883_v22  ;;  %v346_v22 = vld [vmem:[%s10501_s30 + $0x3f0] sm:$0xff] }
  0xae   : > { %6415 = vmatmul.mubr.bf16.vlgmr.msra.gmra.mrb[0].mxu0 %v7895_v23  ;;  %5418 = vmatpush1.bf16.msra.mxu1 %v9664_v21  ;;  %v352_v21 = vld [vmem:[%s10501_s30 + $0x420] sm:$0xff]  ;;  %v358_v23 = vld [vmem:[%s10501_s30 + $0x450] sm:$0xff] }
  0xaf   : > { %6576 = vmatpush1.bf16.msra.mxu0 %v9667_v24  ;;  %5266 = vmatprep.mubr.bf16.mxu1 %v7908_v28  ;;  %v7980_v24 = vcombine.high %v700_v10, %v712_v11  ;;  %v9708_v28 = vld [vmem:[#allocation5 + $0x174] ss:$8 sps:$4 sm:$0xff]  }
  0xb0   : > { %6424 = vmatprep.mubr.bf16.mxu0 %v7920_v29  ;;  %5419 = vmatprep.subr.bf16.mxu1 %v9672_v31  ;;  %v9711_v29 = vld [vmem:[#allocation5 + $0x774] ss:$8 sps:$4 sm:$0xff]   ;;  %v736_v31 = vmax.bf16 %v10309_v50, %v352_v21 }
  0xb1   : > { %6577 = vmatprep.subr.bf16.mxu0 %v9675_v32  ;;  %v730_v32 = vmax.bf16 %v10309_v50, %v346_v22 }
  0xb2   : > { %5420 = vmatpush1.bf16.msra.mxu1 %v9670_v33  ;;  %v742_v33 = vmax.bf16 %v10309_v50, %v358_v23  ;;  %v8003_v60 = vcombine.low %v724_v30, %v736_v31  ;;  %v9736_v23 = vld [vmem:[#allocation5 + $0x1c0] ss:$8 sps:$4 sm:$0xff]  }
  0xb3   : > { %6578 = vmatpush1.bf16.msra.mxu0 %v9673_v34  ;;  %5421 = vmatprep.subr.bf16.mxu1 %v9678_v39  ;;  %v9706_v34 = vld [vmem:[#allocation5 + $0x170] ss:$8 sps:$4 sm:$0xff]   ;;  %v7979_v39 = vcombine.low %v700_v10, %v712_v11 }
  0xb4   : > { %6579 = vmatprep.subr.bf16.mxu0 %v9681_v40  ;;  %v7991_v40 = vcombine.low %v706_v12, %v718_v13  ;;  %v8016_v45 = vcombine.high %v730_v32, %v742_v33  ;;  %v9730_v11 = vld [vmem:[#allocation5 + $0x1b0] ss:$8 sps:$4 sm:$0xff]   ;;  %v412_v13 = vld [vmem:[%s10501_s30 + $0x600] sm:$0xff] }
  0xb5   : > { %5267 = vmatmul.mubr.bf16.gmra.mrb[4].mxu1 %v7907_v41  ;;  %v376_v41 = vld [vmem:[%s10501_s30 + $0x4e0] sm:$0xff]  ;;  %v9733_v12 = vld [vmem:[#allocation5 + $0x7b0] ss:$8 sps:$4 sm:$0xff]  }
  0xb6   : > { %6425 = vmatmul.mubr.bf16.gmra.mrb[4].mxu0 %v7919_v42  ;;  %5276 = vmatprep.mubr.bf16.mxu1 %v7932_v47  ;;  %v370_v42 = vld [vmem:[%s10501_s30 + $0x4b0] sm:$0xff]  ;;  %v9715_v47 = vld [vmem:[#allocation5 + $0x780] ss:$8 sps:$4 sm:$0xff]  }
  0xb7   : > { %6434 = vmatprep.mubr.bf16.mxu0 %v7944_v48  ;;  %5422 = vmatpush1.bf16.msra.mxu1 %v9676_v43  ;;  %v382_v43 = vld [vmem:[%s10501_s30 + $0x510] sm:$0xff] }
  0xb8   : > { %6580 = vmatpush1.bf16.msra.mxu0 %v9679_v44  ;;  %5423 = vmatprep.subr.bf16.mxu1 %v9684_v52  ;;  %v8004_v44 = vcombine.high %v724_v30, %v736_v31  ;;  %v9720_v48 = vld [vmem:[#allocation5 + $0x194] ss:$8 sps:$4 sm:$0xff]   ;;  %v760_v52 = vmax.bf16 %v10309_v50, %v376_v41  ;;  %v766_v54 = vmax.bf16 %v10309_v50, %v382_v43  ;;  %v9742_v31 = vld [vmem:[#allocation5 + $0x1d0] ss:$8 sps:$4 sm:$0xff]   ;;  %v9748_v43 = vld [vmem:[#allocation5 + $0x1e0] ss:$8 sps:$4 sm:$0xff]  }
  0xb9   : > { %6581 = vmatprep.subr.bf16.mxu0 %v9687_v53  ;;  %v754_v53 = vmax.bf16 %v10309_v50, %v370_v42 }
  0xba   : > { %v8028_v1 = vcombine.high %v748_v51, %v760_v52  ;;  %v8027_v16 = vcombine.low %v748_v51, %v760_v52  ;;  %v9754_v52 = vld [vmem:[#allocation5 + $0x1f0] ss:$8 sps:$4 sm:$0xff]  }
  0xbb   : > { %5424 = vmatpush1.bf16.msra.mxu1 %v9682_v58  ;;  %v9726_v58 = vld [vmem:[#allocation5 + $0x1a4] ss:$8 sps:$4 sm:$0xff]   ;;  %v8040_v2 = vcombine.high %v754_v53, %v766_v54 }
  0xbc   : > { %6582 = vmatpush1.bf16.msra.mxu0 %v9685_v59  ;;  %5425 = vmatprep.subr.bf16.mxu1 %v9690_v61  ;;  %v9729_v59 = vld [vmem:[#allocation5 + $0x7a4] ss:$8 sps:$4 sm:$0xff]   ;;  %v8015_v61 = vcombine.low %v730_v32, %v742_v33  ;;  %v9745_v32 = vld [vmem:[#allocation5 + $0x7d0] ss:$8 sps:$4 sm:$0xff]  }
  0xbd   : > { %6583 = vmatprep.subr.bf16.mxu0 %v9693_v62  ;;  %5277 = vmatmul.mubr.bf16.gmra.mrb[8].mxu1 %v7931_v63  ;;  %v400_v62 = vld [vmem:[%s10501_s30 + $0x5a0] sm:$0xff]  ;;  %v394_v63 = vld [vmem:[%s10501_s30 + $0x570] sm:$0xff] }
  0xbe   : > { %6435 = vmatmul.mubr.bf16.gmra.mrb[8].mxu0 %v7943_v0  ;;  %5286 = vmatprep.mubr.bf16.mxu1 %v7956_v4  ;;  %v406_v0 = vld [vmem:[%s10501_s30 + $0x5d0] sm:$0xff]  ;;  %v9727_v4 = vld [vmem:[#allocation5 + $0x7a0] ss:$8 sps:$4 sm:$0xff]  }
  0xbf   : > { %6444 = vmatprep.mubr.bf16.mxu0 %v7968_v5  ;;  %5426 = vmatpush1.bf16.msra.mxu1 %v9688_v6  ;;  %v9732_v5 = vld [vmem:[#allocation5 + $0x1b4] ss:$8 sps:$4 sm:$0xff]   ;;  %v790_v10 = vmax.bf16 %v10309_v50, %v406_v0  ;;  %v436_v33 = vld [vmem:[%s10501_s30 + $0x6c0] sm:$0xff] }
  0xc0   : > { %6584 = vmatpush1.bf16.msra.mxu0 %v9691_v7  ;;  %5427 = vmatprep.subr.bf16.mxu1 %v9696_v8  ;;  %v9735_v6 = vld [vmem:[#allocation5 + $0x7b4] ss:$8 sps:$4 sm:$0xff]   ;;  %v772_v7 = vmax.bf16 %v10309_v50, %v388_v57  ;;  %v784_v8 = vmax.bf16 %v10309_v50, %v400_v62 }
  0xc1   : > { %6585 = vmatprep.subr.bf16.mxu0 %v9699_v9  ;;  %v778_v9 = vmax.bf16 %v10309_v50, %v394_v63  ;;  %v466_v62 = vld [vmem:[%s10501_s30 + $0x7b0] sm:$0xff] }
  0xc2   : > { %v8052_v21 = vcombine.high %v772_v7, %v784_v8  ;;  %v8051_v36 = vcombine.low %v772_v7, %v784_v8  ;;  %v478_v63 = vld [vmem:[%s10501_s30 + $0x810] sm:$0xff]  ;;  %v496_v7 = vld [vmem:[%s10501_s30 + $0x8a0] sm:$0xff] }
  0xc3   : > { %5428 = vmatpush1.bf16.msra.mxu1 %v9694_v14  ;;  %v9738_v14 = vld [vmem:[#allocation5 + $0x1c4] ss:$8 sps:$4 sm:$0xff]   ;;  %v8064_v22 = vcombine.high %v778_v9, %v790_v10 }
  0xc4   : > { %6586 = vmatpush1.bf16.msra.mxu0 %v9697_v15  ;;  %5429 = vmatprep.subr.bf16.mxu1 %v9702_v17  ;;  %v9741_v15 = vld [vmem:[#allocation5 + $0x7c4] ss:$8 sps:$4 sm:$0xff]   ;;  %v8039_v17 = vcombine.low %v754_v53, %v766_v54  ;;  %v9757_v53 = vld [vmem:[#allocation5 + $0x7f0] ss:$8 sps:$4 sm:$0xff]  }
  0xc5   : > { %6587 = vmatprep.subr.bf16.mxu0 %v9705_v18  ;;  %5287 = vmatmul.mubr.bf16.gmra.mrb[12].mxu1 %v7955_v19  ;;  %v424_v18 = vld [vmem:[%s10501_s30 + $0x660] sm:$0xff]  ;;  %v418_v19 = vld [vmem:[%s10501_s30 + $0x630] sm:$0xff] }
  0xc6   : > { %6445 = vmatmul.mubr.bf16.gmra.mrb[12].mxu0 %v7967_v20  ;;  %5296 = vmatprep.mubr.bf16.mxu1 %v7980_v24  ;;  %v430_v20 = vld [vmem:[%s10501_s30 + $0x690] sm:$0xff]  ;;  %v9739_v24 = vld [vmem:[#allocation5 + $0x7c0] ss:$8 sps:$4 sm:$0xff]   ;;  %v9762_v54 = vld [vmem:[#allocation5 + $0x204] ss:$8 sps:$4 sm:$0xff]  }
  0xc7   : > { %6454 = vmatprep.mubr.bf16.mxu0 %v7992_v25  ;;  %5430 = vmatpush1.bf16.msra.mxu1 %v9700_v26  ;;  %v9744_v25 = vld [vmem:[#allocation5 + $0x1d4] ss:$8 sps:$4 sm:$0xff]   ;;  %v814_v30 = vmax.bf16 %v10309_v50, %v430_v20 }
  0xc8   : > { %6588 = vmatpush1.bf16.msra.mxu0 %v9703_v27  ;;  %5431 = vmatprep.subr.bf16.mxu1 %v9708_v28  ;;  %v9747_v26 = vld [vmem:[#allocation5 + $0x7d4] ss:$8 sps:$4 sm:$0xff]   ;;  %v796_v27 = vmax.bf16 %v10309_v50, %v412_v13  ;;  %v808_v28 = vmax.bf16 %v10309_v50, %v424_v18  ;;  %v880_v13 = vmax.bf16 %v10309_v50, %v496_v7  ;;  %v508_v18 = vld [vmem:[%s10501_s30 + $0x900] sm:$0xff] }
  0xc9   : > { %6589 = vmatprep.subr.bf16.mxu0 %v9711_v29  ;;  %v802_v29 = vmax.bf16 %v10309_v50, %v418_v19  ;;  %v520_v19 = vld [vmem:[%s10501_s30 + $0x960] sm:$0xff] }
  0xca   : > { %v8076_v41 = vcombine.high %v796_v27, %v808_v28 }
  0xcb   : > { %5432 = vmatpush1.bf16.msra.mxu1 %v9706_v34  ;;  %v9750_v34 = vld [vmem:[#allocation5 + $0x1e4] ss:$8 sps:$4 sm:$0xff]   ;;  %v8088_v42 = vcombine.high %v802_v29, %v814_v30  ;;  %v8087_v57 = vcombine.low %v802_v29, %v814_v30 }
  0xcc   : > { %6590 = vmatpush1.bf16.msra.mxu0 %v9709_v35  ;;  %5433 = vmatprep.subr.bf16.mxu1 %v9714_v37  ;;  %v9753_v35 = vld [vmem:[#allocation5 + $0x7e4] ss:$8 sps:$4 sm:$0xff]   ;;  %v8063_v37 = vcombine.low %v778_v9, %v790_v10  ;;  %v490_v10 = vld [vmem:[%s10501_s30 + $0x870] sm:$0xff] }
  0xcd   : > { %6591 = vmatprep.subr.bf16.mxu0 %v9717_v38  ;;  %5297 = vmatmul.mubr.bf16.gmra.mrb[16].mxu1 %v7979_v39  ;;  %v448_v38 = vld [vmem:[%s10501_s30 + $0x720] sm:$0xff]  ;;  %v442_v39 = vld [vmem:[%s10501_s30 + $0x6f0] sm:$0xff] }
  0xce   : > { %6455 = vmatmul.mubr.bf16.gmra.mrb[16].mxu0 %v7991_v40  ;;  %5306 = vmatprep.mubr.bf16.mxu1 %v8004_v44  ;;  %v454_v40 = vld [vmem:[%s10501_s30 + $0x750] sm:$0xff]  ;;  %v9751_v44 = vld [vmem:[#allocation5 + $0x7e0] ss:$8 sps:$4 sm:$0xff]  }
  0xcf   : > { %6464 = vmatprep.mubr.bf16.mxu0 %v8016_v45  ;;  %5434 = vmatpush1.bf16.msra.mxu1 %v9712_v46  ;;  %v9756_v45 = vld [vmem:[#allocation5 + $0x1f4] ss:$8 sps:$4 sm:$0xff]   ;;  %v838_v51 = vmax.bf16 %v10309_v50, %v454_v40  ;;  %v556_v40 = vld [vmem:[%s10501_s30 + $0xa80] sm:$0xff] }
  0xd0   : > { %6592 = vmatpush1.bf16.msra.mxu0 %v9715_v47  ;;  %5435 = vmatprep.subr.bf16.mxu1 %v9720_v48  ;;  %v9759_v46 = vld [vmem:[#allocation5 + $0x7f4] ss:$8 sps:$4 sm:$0xff]   ;;  %v820_v47 = vmax.bf16 %v10309_v50, %v436_v33  ;;  %v832_v48 = vmax.bf16 %v10309_v50, %v448_v38 }
  0xd1   : > { %6593 = vmatprep.subr.bf16.mxu0 %v9723_v49  ;;  %v826_v49 = vmax.bf16 %v10309_v50, %v442_v39  ;;  %v550_v33 = vld [vmem:[%s10501_s30 + $0xa50] sm:$0xff] }
  0xd2   : > { %v934_v39 = vmax.bf16 %v10309_v50, %v550_v33  ;;  %v9768_v33 = vld [vmem:[#allocation5 + $0x214] ss:$8 sps:$4 sm:$0xff]  }
  0xd3   : > { %5436 = vmatpush1.bf16.msra.mxu1 %v9718_v55  ;;  %v9765_v55 = vld [vmem:[#allocation5 + $0x804] ss:$8 sps:$4 sm:$0xff]  }
  0xd4   : > { %6594 = vmatpush1.bf16.msra.mxu0 %v9721_v56  ;;  %5437 = vmatprep.subr.bf16.mxu1 %v9726_v58  ;;  %v8075_v56 = vcombine.low %v796_v27, %v808_v28  ;;  %v460_v58 = vld [vmem:[%s10501_s30 + $0x780] sm:$0xff] }
  0xd5   : > { %6595 = vmatprep.subr.bf16.mxu0 %v9729_v59  ;;  %5307 = vmatmul.mubr.bf16.gmra.mrb[20].mxu1 %v8003_v60  ;;  %v472_v59 = vld [vmem:[%s10501_s30 + $0x7e0] sm:$0xff]  ;;  %v8100_v60 = vcombine.high %v820_v47, %v832_v48  ;;  %v844_v0 = vmax.bf16 %v10309_v50, %v460_v58  ;;  %v598_v58 = vld [vmem:[%s10501_s30 + $0xbd0] sm:$0xff] }
  0xd6   : > { %6465 = vmatmul.mubr.bf16.gmra.mrb[20].mxu0 %v8015_v61  ;;  %5316 = vmatprep.mubr.bf16.mxu1 %v8028_v1  ;;  %v8112_v61 = vcombine.high %v826_v49, %v838_v51  ;;  %v856_v1 = vmax.bf16 %v10309_v50, %v472_v59  ;;  %v532_v28 = vld [vmem:[%s10501_s30 + $0x9c0] sm:$0xff] }
  0xd7   : > { %6474 = vmatprep.mubr.bf16.mxu0 %v8040_v2  ;;  %5438 = vmatpush1.bf16.msra.mxu1 %v9724_v3  ;;  %v850_v2 = vmax.bf16 %v10309_v50, %v466_v62  ;;  %v862_v3 = vmax.bf16 %v10309_v50, %v478_v63 }
  0xd8   : > { %6596 = vmatpush1.bf16.msra.mxu0 %v9727_v4  ;;  %5439 = vmatprep.subr.bf16.mxu1 %v9732_v5  ;;  %v8099_v4 = vcombine.low %v820_v47, %v832_v48  ;;  %v8111_v5 = vcombine.low %v826_v49, %v838_v51  ;;  %v8124_v8 = vcombine.high %v844_v0, %v856_v1 }
  0xd9   : > { %6597 = vmatprep.subr.bf16.mxu0 %v9735_v6  ;;  %v484_v6 = vld [vmem:[%s10501_s30 + $0x840] sm:$0xff]  ;;  %v8136_v9 = vcombine.high %v850_v2, %v862_v3  ;;  %v940_v48 = vmax.bf16 %v10309_v50, %v556_v40 }
  0xdb   : > { %5440 = vmatpush1.bf16.msra.mxu1 %v9730_v11  ;;  %v502_v11 = vld [vmem:[%s10501_s30 + $0x8d0] sm:$0xff] }
  0xdc   : > { %6598 = vmatpush1.bf16.msra.mxu0 %v9733_v12  ;;  %5441 = vmatprep.subr.bf16.mxu1 %v9738_v14  ;;  %v868_v12 = vmax.bf16 %v10309_v50, %v484_v6  ;;  %v874_v14 = vmax.bf16 %v10309_v50, %v490_v10  ;;  %v239_v6 = vld [vmem:[%s10501_s30 + $0x98] sm:$0xff] }
  0xdd   : > { %6599 = vmatprep.subr.bf16.mxu0 %v9741_v15  ;;  %5317 = vmatmul.mubr.bf16.gmra.mrb[24].mxu1 %v8027_v16  ;;  %v886_v15 = vmax.bf16 %v10309_v50, %v502_v11  ;;  %v8123_v16 = vcombine.low %v844_v0, %v856_v1  ;;  %v982_v0 = vmax.bf16 %v10309_v50, %v598_v58  ;;  %v221_v1 = vld [vmem:[%s10501_s30 + $0x8] sm:$0xff] }
  0xde   : > { %6475 = vmatmul.mubr.bf16.gmra.mrb[24].mxu0 %v8039_v17  ;;  %5326 = vmatprep.mubr.bf16.mxu1 %v8052_v21  ;;  %v8135_v17 = vcombine.low %v850_v2, %v862_v3  ;;  %v8148_v20 = vcombine.high %v868_v12, %v880_v13  ;;  %v8147_v29 = vcombine.low %v868_v12, %v880_v13 }
  0xdf   : > { %6484 = vmatprep.mubr.bf16.mxu0 %v8064_v22  ;;  %5442 = vmatpush1.bf16.msra.mxu1 %v9736_v23  ;;  %v8160_v21 = vcombine.high %v874_v14, %v886_v15  ;;  %v514_v22 = vld [vmem:[%s10501_s30 + $0x930] sm:$0xff]  ;;  %v8159_v30 = vcombine.low %v874_v14, %v886_v15  ;;  %v623_v12 = vmax.bf16 %v10309_v50, %v239_v6  ;;  %v323_v6 = vld [vmem:[%s10501_s30 + $0x338] sm:$0xff] }
  0xe0   : > { %6600 = vmatpush1.bf16.msra.mxu0 %v9739_v24  ;;  %5443 = vmatprep.subr.bf16.mxu1 %v9744_v25  ;;  %v526_v23 = vld [vmem:[%s10501_s30 + $0x990] sm:$0xff]  ;;  %v892_v24 = vmax.bf16 %v10309_v50, %v508_v18  ;;  %v904_v25 = vmax.bf16 %v10309_v50, %v520_v19  ;;  %v257_v18 = vld [vmem:[%s10501_s30 + $0x128] sm:$0xff]  ;;  %v251_v19 = vld [vmem:[%s10501_s30 + $0xf8] sm:$0xff] }
  0xe1   : > { %6601 = vmatprep.subr.bf16.mxu0 %v9747_v26  ;;  %v898_v26 = vmax.bf16 %v10309_v50, %v514_v22  ;;  %v910_v27 = vmax.bf16 %v10309_v50, %v526_v23  ;;  %v641_v22 = vmax.bf16 %v10309_v50, %v257_v18  ;;  %v635_v23 = vmax.bf16 %v10309_v50, %v251_v19  ;;  %v9790_v18 = vld [vmem:[#allocation5 + $0x250] ss:$8 sps:$4 sm:$0xff]  }
  0xe2   : > { %v9793_v19 = vld [vmem:[#allocation5 + $0x850] ss:$8 sps:$4 sm:$0xff]  }
  0xe3   : > { %5444 = vmatpush1.bf16.msra.mxu1 %v9742_v31  ;;  %v544_v31 = vld [vmem:[%s10501_s30 + $0xa20] sm:$0xff] }
  0xe4   : > { %6602 = vmatpush1.bf16.msra.mxu0 %v9745_v32  ;;  %5445 = vmatprep.subr.bf16.mxu1 %v9750_v34  ;;  %v538_v32 = vld [vmem:[%s10501_s30 + $0x9f0] sm:$0xff]  ;;  %v8172_v34 = vcombine.high %v892_v24, %v904_v25 }
  0xe5   : > { %6603 = vmatprep.subr.bf16.mxu0 %v9753_v35  ;;  %5327 = vmatmul.mubr.bf16.gmra.mrb[28].mxu1 %v8051_v36  ;;  %v8184_v35 = vcombine.high %v898_v26, %v910_v27  ;;  %v916_v36 = vmax.bf16 %v10309_v50, %v532_v28  ;;  %v922_v38 = vmax.bf16 %v10309_v50, %v538_v32  ;;  %v287_v32 = vld [vmem:[%s10501_s30 + $0x218] sm:$0xff] }
  0xe6   : > { %6485 = vmatmul.mubr.bf16.gmra.mrb[28].mxu0 %v8063_v37  ;;  %5336 = vmatprep.mubr.bf16.mxu1 %v8076_v41  ;;  %v928_v37 = vmax.bf16 %v10309_v50, %v544_v31  ;;  %v8171_v41 = vcombine.low %v892_v24, %v904_v25  ;;  %v9760_v25 = vld [vmem:[#allocation5 + $0x200] ss:$8 sps:$4 sm:$0xff]   ;;  %v275_v31 = vld [vmem:[%s10501_s30 + $0x1b8] sm:$0xff] }
  0xe7   : > { %6494 = vmatprep.mubr.bf16.mxu0 %v8088_v42  ;;  %5446 = vmatpush1.bf16.msra.mxu1 %v9748_v43  ;;  %v8183_v42 = vcombine.low %v898_v26, %v910_v27  ;;  %v568_v43 = vld [vmem:[%s10501_s30 + $0xae0] sm:$0xff]  ;;  %v8208_v47 = vcombine.high %v922_v38, %v934_v39  ;;  %v269_v27 = vld [vmem:[%s10501_s30 + $0x188] sm:$0xff] }
  0xe8   : > { %6604 = vmatpush1.bf16.msra.mxu0 %v9751_v44  ;;  %5447 = vmatprep.subr.bf16.mxu1 %v9756_v45  ;;  %v562_v44 = vld [vmem:[%s10501_s30 + $0xab0] sm:$0xff]  ;;  %v952_v49 = vmax.bf16 %v10309_v50, %v568_v43  ;;  %v9763_v26 = vld [vmem:[#allocation5 + $0x800] ss:$8 sps:$4 sm:$0xff]   ;;  %v9774_v43 = vld [vmem:[#allocation5 + $0x224] ss:$8 sps:$4 sm:$0xff]  }
  0xe9   : > { %6605 = vmatprep.subr.bf16.mxu0 %v9759_v46  ;;  %v574_v45 = vld [vmem:[%s10501_s30 + $0xb10] sm:$0xff]  ;;  %v8196_v46 = vcombine.high %v916_v36, %v928_v37  ;;  %v946_v51 = vmax.bf16 %v10309_v50, %v562_v44  ;;  %v9777_v44 = vld [vmem:[#allocation5 + $0x824] ss:$8 sps:$4 sm:$0xff]  }
  0xea   : > { %v8220_v59 = vcombine.high %v940_v48, %v952_v49  ;;  %v8219_v2 = vcombine.low %v940_v48, %v952_v49  ;;  %v9772_v48 = vld [vmem:[#allocation5 + $0x220] ss:$8 sps:$4 sm:$0xff]  }
  0xeb   : > { %5448 = vmatpush1.bf16.msra.mxu1 %v9754_v52  ;;  %v958_v52 = vmax.bf16 %v10309_v50, %v574_v45  ;;  %v293_v45 = vld [vmem:[%s10501_s30 + $0x248] sm:$0xff] }
  0xec   : > { %6606 = vmatpush1.bf16.msra.mxu0 %v9757_v53  ;;  %5610 = vmatprep.subr.bf16.mxu1 %v9762_v54  ;;  %v580_v53 = vld [vmem:[%s10501_s30 + $0xb40] sm:$0xff]  ;;  %v8195_v54 = vcombine.low %v916_v36, %v928_v37  ;;  %v653_v37 = vmax.bf16 %v10309_v50, %v269_v27  ;;  %v677_v58 = vmax.bf16 %v10309_v50, %v293_v45  ;;  %v359_v27 = vld [vmem:[%s10501_s30 + $0x458] sm:$0xff]  ;;  %v377_v45 = vld [vmem:[%s10501_s30 + $0x4e8] sm:$0xff] }
  0xed   : > { %6768 = vmatprep.subr.bf16.mxu0 %v9765_v55  ;;  %5337 = vmatmul.mubr.bf16.gmra.mrb[32].mxu1 %v8075_v56  ;;  %v8207_v55 = vcombine.low %v922_v38, %v934_v39  ;;  %v592_v56 = vld [vmem:[%s10501_s30 + $0xba0] sm:$0xff]  ;;  %v8231_v3 = vcombine.low %v946_v51, %v958_v52  ;;  %v9766_v38 = vld [vmem:[#allocation5 + $0x210] ss:$8 sps:$4 sm:$0xff]  }
  0xee   : > { %6495 = vmatmul.mubr.bf16.gmra.mrb[32].mxu0 %v8087_v57  ;;  %5346 = vmatprep.mubr.bf16.mxu1 %v8100_v60  ;;  %v586_v57 = vld [vmem:[%s10501_s30 + $0xb70] sm:$0xff]  ;;  %v8232_v60 = vcombine.high %v946_v51, %v958_v52  ;;  %v976_v62 = vmax.bf16 %v10309_v50, %v592_v56  ;;  %v9775_v49 = vld [vmem:[#allocation5 + $0x820] ss:$8 sps:$4 sm:$0xff]   ;;  %v299_v52 = vld [vmem:[%s10501_s30 + $0x278] sm:$0xff] }
  0xef   : > { %6504 = vmatprep.mubr.bf16.mxu0 %v8112_v61  ;;  %v964_v61 = vmax.bf16 %v10309_v50, %v580_v53  ;;  %v970_v63 = vmax.bf16 %v10309_v50, %v586_v57  ;;  %v9769_v39 = vld [vmem:[#allocation5 + $0x810] ss:$8 sps:$4 sm:$0xff]   ;;  %v305_v51 = vld [vmem:[%s10501_s30 + $0x2a8] sm:$0xff]  ;;  %v9780_v56 = vld [vmem:[#allocation5 + $0x234] ss:$8 sps:$4 sm:$0xff]  }
  0xf0   : > { %v311_v53 = vld [vmem:[%s10501_s30 + $0x2d8] sm:$0xff] }
  0xf1   : > { %v8244_v7 = vcombine.high %v964_v61, %v976_v62  ;;  %v8243_v13 = vcombine.low %v964_v61, %v976_v62  ;;  %v8255_v14 = vcombine.low %v970_v63, %v982_v0  ;;  %v9783_v57 = vld [vmem:[#allocation5 + $0x834] ss:$8 sps:$4 sm:$0xff]   ;;  %v695_v61 = vmax.bf16 %v10309_v50, %v311_v53  ;;  %v9778_v62 = vld [vmem:[#allocation5 + $0x230] ss:$8 sps:$4 sm:$0xff]  }
  0xf2   : > { %v9816_v53 = vld [vmem:[#allocation5 + $0x294] ss:$8 sps:$4 sm:$0xff]  }
  0xf5   : > { %5347 = vmatmul.mubr.bf16.gmra.mrb[36].mxu1 %v8099_v4  ;;  %v233_v4 = vld [vmem:[%s10501_s30 + $0x68] sm:$0xff] }
  0xf6   : > { %6505 = vmatmul.mubr.bf16.gmra.mrb[36].mxu0 %v8111_v5  ;;  %5356 = vmatprep.mubr.bf16.mxu1 %v8124_v8  ;;  %v227_v5 = vld [vmem:[%s10501_s30 + $0x38] sm:$0xff]  ;;  %v8256_v8 = vcombine.high %v970_v63, %v982_v0  ;;  %v617_v10 = vmax.bf16 %v10309_v50, %v233_v4  ;;  %v9786_v0 = vld [vmem:[#allocation5 + $0x244] ss:$8 sps:$4 sm:$0xff]  }
  0xf7   : > { %6514 = vmatprep.mubr.bf16.mxu0 %v8136_v9  ;;  %v605_v9 = vmax.bf16 %v10309_v50, %v221_v1  ;;  %v611_v11 = vmax.bf16 %v10309_v50, %v227_v5  ;;  %v9781_v63 = vld [vmem:[#allocation5 + $0x830] ss:$8 sps:$4 sm:$0xff]   ;;  %v9789_v1 = vld [vmem:[#allocation5 + $0x844] ss:$8 sps:$4 sm:$0xff]  }
  0xf8   : > { %v329_v5 = vld [vmem:[%s10501_s30 + $0x368] sm:$0xff] }
  0xf9   : > { %v7886_v15 = vcombine.high %v605_v9, %v617_v10  ;;  %v7885_v28 = vcombine.low %v605_v9, %v617_v10  ;;  %v9787_v9 = vld [vmem:[#allocation5 + $0x840] ss:$8 sps:$4 sm:$0xff]  }
  0xfd   : > { %5357 = vmatmul.mubr.bf16.gmra.mrb[40].mxu1 %v8123_v16  ;;  %v7898_v16 = vcombine.high %v611_v11, %v623_v12 }
  0xfe   : > { %6515 = vmatmul.mubr.bf16.gmra.mrb[40].mxu0 %v8135_v17  ;;  %5366 = vmatprep.mubr.bf16.mxu1 %v8148_v20  ;;  %v245_v17 = vld [vmem:[%s10501_s30 + $0xc8] sm:$0xff]  ;;  %v263_v20 = vld [vmem:[%s10501_s30 + $0x158] sm:$0xff] }
  0xff   : > { %6524 = vmatprep.mubr.bf16.mxu0 %v8160_v21  ;;  %v629_v21 = vmax.bf16 %v10309_v50, %v245_v17  ;;  %v647_v24 = vmax.bf16 %v10309_v50, %v263_v20  ;;  %v9798_v20 = vld [vmem:[#allocation5 + $0x264] ss:$8 sps:$4 sm:$0xff]  }
 0x101   : > { %v7922_v36 = vcombine.high %v635_v23, %v647_v24 }
 0x105   : > { %5367 = vmatmul.mubr.bf16.gmra.mrb[44].mxu1 %v8147_v29  ;;  %v7897_v29 = vcombine.low %v611_v11, %v623_v12  ;;  %v9792_v12 = vld [vmem:[#allocation5 + $0x254] ss:$8 sps:$4 sm:$0xff]  }
 0x106   : > { %6525 = vmatmul.mubr.bf16.gmra.mrb[44].mxu0 %v8159_v30  ;;  %5376 = vmatprep.mubr.bf16.mxu1 %v8172_v34  ;;  %v281_v30 = vld [vmem:[%s10501_s30 + $0x1e8] sm:$0xff]  ;;  %v9771_v34 = vld [vmem:[#allocation5 + $0x814] ss:$8 sps:$4 sm:$0xff]  }
 0x107   : > { %6534 = vmatprep.mubr.bf16.mxu0 %v8184_v35  ;;  %v7910_v35 = vcombine.high %v629_v21, %v641_v22  ;;  %v665_v40 = vmax.bf16 %v10309_v50, %v281_v30 }
 0x10d   : > { %5377 = vmatmul.mubr.bf16.gmra.mrb[48].mxu1 %v8171_v41  ;;  %v659_v41 = vmax.bf16 %v10309_v50, %v275_v31 }
 0x10e   : > { %6535 = vmatmul.mubr.bf16.gmra.mrb[48].mxu0 %v8183_v42  ;;  %5386 = vmatprep.mubr.bf16.mxu1 %v8196_v46  ;;  %v671_v42 = vmax.bf16 %v10309_v50, %v287_v32  ;;  %v7909_v46 = vcombine.low %v629_v21, %v641_v22  ;;  %v9801_v21 = vld [vmem:[#allocation5 + $0x864] ss:$8 sps:$4 sm:$0xff]   ;;  %v9804_v32 = vld [vmem:[#allocation5 + $0x274] ss:$8 sps:$4 sm:$0xff]  }
 0x10f   : > { %6544 = vmatprep.mubr.bf16.mxu0 %v8208_v47  ;;  %v7921_v47 = vcombine.low %v635_v23, %v647_v24  ;;  %v341_v22 = vld [vmem:[%s10501_s30 + $0x3c8] sm:$0xff] }
 0x110   : > { %v7945_v4 = vcombine.low %v659_v41, %v671_v42 }
 0x115   : > { %5387 = vmatmul.mubr.bf16.gmra.mrb[52].mxu1 %v8195_v54  ;;  %v7934_v54 = vcombine.high %v653_v37, %v665_v40 }
 0x116   : > { %6545 = vmatmul.mubr.bf16.gmra.mrb[52].mxu0 %v8207_v55  ;;  %5396 = vmatprep.mubr.bf16.mxu1 %v8220_v59  ;;  %v7946_v55 = vcombine.high %v659_v41, %v671_v42  ;;  %v689_v59 = vmax.bf16 %v10309_v50, %v305_v51  ;;  %v9813_v41 = vld [vmem:[#allocation5 + $0x884] ss:$8 sps:$4 sm:$0xff]  }
 0x117   : > { %6554 = vmatprep.mubr.bf16.mxu0 %v8232_v60  ;;  %v683_v60 = vmax.bf16 %v10309_v50, %v299_v52  ;;  %v365_v42 = vld [vmem:[%s10501_s30 + $0x488] sm:$0xff] }
 0x118   : > { %v7958_v10 = vcombine.high %v677_v58, %v689_v59  ;;  %v7957_v23 = vcombine.low %v677_v58, %v689_v59  ;;  %v9814_v59 = vld [vmem:[#allocation5 + $0x290] ss:$8 sps:$4 sm:$0xff]  }
 0x119   : > { %v7970_v11 = vcombine.high %v683_v60, %v695_v61  ;;  %v7969_v24 = vcombine.low %v683_v60, %v695_v61  ;;  %v9817_v60 = vld [vmem:[#allocation5 + $0x890] ss:$8 sps:$4 sm:$0xff]   ;;  %v9822_v61 = vld [vmem:[#allocation5 + $0x2a4] ss:$8 sps:$4 sm:$0xff]  }
 0x11d   : > { %5397 = vmatmul.mubr.bf16.gmra.mrb[56].mxu1 %v8219_v2  ;;  %v317_v2 = vld [vmem:[%s10501_s30 + $0x308] sm:$0xff] }
 0x11e   : > { %6555 = vmatmul.mubr.bf16.gmra.mrb[56].mxu0 %v8231_v3  ;;  %5406 = vmatprep.mubr.bf16.mxu1 %v8244_v7  ;;  %v7933_v3 = vcombine.low %v653_v37, %v665_v40  ;;  %v335_v7 = vld [vmem:[%s10501_s30 + $0x398] sm:$0xff]  ;;  %v743_v37 = vmax.bf16 %v10309_v50, %v359_v27  ;;  %v9810_v40 = vld [vmem:[#allocation5 + $0x284] ss:$8 sps:$4 sm:$0xff]  }
 0x11f   : > { %6564 = vmatprep.mubr.bf16.mxu0 %v8256_v8  ;;  %v9784_v8 = vld [vmem:[#allocation5 + $0x240] ss:$8 sps:$4 sm:$0xff]   ;;  %v719_v17 = vmax.bf16 %v10309_v50, %v335_v7 }
 0x125   : > { %5407 = vmatmul.mubr.bf16.gmra.mrb[60].mxu1 %v8243_v13  ;;  %v9795_v13 = vld [vmem:[#allocation5 + $0x854] ss:$8 sps:$4 sm:$0xff]  }
 0x126   : > { %6565 = vmatmul.mubr.bf16.gmra.mrb[60].mxu0 %v8255_v14  ;;  %5449 = vmatprep.mubr.bf16.mxu1 %v7886_v15  ;;  %v701_v14 = vmax.bf16 %v10309_v50, %v317_v2  ;;  %v713_v15 = vmax.bf16 %v10309_v50, %v329_v5  ;;  %v401_v2 = vld [vmem:[%s10501_s30 + $0x5a8] sm:$0xff] }
 0x127   : > { %6607 = vmatprep.mubr.bf16.mxu0 %v7898_v16  ;;  %v707_v16 = vmax.bf16 %v10309_v50, %v323_v6  ;;  %v9820_v5 = vld [vmem:[#allocation5 + $0x2a0] ss:$8 sps:$4 sm:$0xff]  }
 0x128   : > { %v7982_v30 = vcombine.high %v701_v14, %v713_v15  ;;  %v9823_v6 = vld [vmem:[#allocation5 + $0x8a0] ss:$8 sps:$4 sm:$0xff]  }
 0x129   : > { %v7994_v31 = vcombine.high %v707_v16, %v719_v17 }
 0x12d   : > { %5450 = vmatmul.mubr.bf16.vlgmr.msra.gmra.mrb[0].mxu1 %v7885_v28  ;;  %v9796_v28 = vld [vmem:[#allocation5 + $0x260] ss:$8 sps:$4 sm:$0xff]  }
 0x12e   : > { %6608 = vmatmul.mubr.bf16.vlgmr.msra.gmra.mrb[0].mxu0 %v7897_v29  ;;  %5611 = vmatpush1.bf16.msra.mxu1 %v9760_v25  ;;  %v353_v25 = vld [vmem:[%s10501_s30 + $0x428] sm:$0xff] }
 0x12f   : > { %6769 = vmatpush1.bf16.msra.mxu0 %v9763_v26  ;;  %5459 = vmatprep.mubr.bf16.mxu1 %v7910_v35  ;;  %v347_v26 = vld [vmem:[%s10501_s30 + $0x3f8] sm:$0xff]  ;;  %v9799_v29 = vld [vmem:[#allocation5 + $0x860] ss:$8 sps:$4 sm:$0xff]   ;;  %v737_v35 = vmax.bf16 %v10309_v50, %v353_v25 }
 0x130   : > { %6617 = vmatprep.mubr.bf16.mxu0 %v7922_v36  ;;  %5612 = vmatprep.subr.bf16.mxu1 %v9768_v33  ;;  %v9807_v33 = vld [vmem:[#allocation5 + $0x874] ss:$8 sps:$4 sm:$0xff]   ;;  %v731_v36 = vmax.bf16 %v10309_v50, %v347_v26  ;;  %v9832_v25 = vld [vmem:[#allocation5 + $0x2c0] ss:$8 sps:$4 sm:$0xff]  }
 0x131   : > { %6770 = vmatprep.subr.bf16.mxu0 %v9771_v34  ;;  %v725_v34 = vmax.bf16 %v10309_v50, %v341_v22  ;;  %v425_v22 = vld [vmem:[%s10501_s30 + $0x668] sm:$0xff] }
 0x132   : > { %5613 = vmatpush1.bf16.msra.mxu1 %v9766_v38  ;;  %v9802_v38 = vld [vmem:[#allocation5 + $0x270] ss:$8 sps:$4 sm:$0xff]   ;;  %v8018_v52 = vcombine.high %v731_v36, %v743_v37  ;;  %v9835_v26 = vld [vmem:[#allocation5 + $0x8c0] ss:$8 sps:$4 sm:$0xff]  }
 0x133   : > { %6771 = vmatpush1.bf16.msra.mxu0 %v9769_v39  ;;  %5614 = vmatprep.subr.bf16.mxu1 %v9774_v43  ;;  %v9805_v39 = vld [vmem:[#allocation5 + $0x870] ss:$8 sps:$4 sm:$0xff]   ;;  %v7981_v43 = vcombine.low %v701_v14, %v713_v15  ;;  %v8006_v51 = vcombine.high %v725_v34, %v737_v35 }
 0x134   : > { %6772 = vmatprep.subr.bf16.mxu0 %v9777_v44  ;;  %v7993_v44 = vcombine.low %v707_v16, %v719_v17  ;;  %v9826_v15 = vld [vmem:[#allocation5 + $0x2b0] ss:$8 sps:$4 sm:$0xff]   ;;  %v9834_v17 = vld [vmem:[#allocation5 + $0x2c4] ss:$8 sps:$4 sm:$0xff]  }
 0x135   : > { %5460 = vmatmul.mubr.bf16.gmra.mrb[4].mxu1 %v7909_v46  ;;  %v371_v46 = vld [vmem:[%s10501_s30 + $0x4b8] sm:$0xff] }
 0x136   : > { %6618 = vmatmul.mubr.bf16.gmra.mrb[4].mxu0 %v7921_v47  ;;  %5469 = vmatprep.mubr.bf16.mxu1 %v7934_v54  ;;  %v383_v47 = vld [vmem:[%s10501_s30 + $0x518] sm:$0xff] }
 0x137   : > { %6627 = vmatprep.mubr.bf16.mxu0 %v7946_v55  ;;  %5615 = vmatpush1.bf16.msra.mxu1 %v9772_v48  ;;  %v9808_v48 = vld [vmem:[#allocation5 + $0x280] ss:$8 sps:$4 sm:$0xff]   ;;  %v9819_v54 = vld [vmem:[#allocation5 + $0x894] ss:$8 sps:$4 sm:$0xff]   ;;  %v749_v55 = vmax.bf16 %v10309_v50, %v365_v42  ;;  %v767_v58 = vmax.bf16 %v10309_v50, %v383_v47  ;;  %v9829_v16 = vld [vmem:[#allocation5 + $0x8b0] ss:$8 sps:$4 sm:$0xff]  }
 0x138   : > { %6773 = vmatpush1.bf16.msra.mxu0 %v9775_v49  ;;  %5616 = vmatprep.subr.bf16.mxu1 %v9780_v56  ;;  %v9811_v49 = vld [vmem:[#allocation5 + $0x880] ss:$8 sps:$4 sm:$0xff]   ;;  %v761_v56 = vmax.bf16 %v10309_v50, %v377_v45 }
 0x139   : > { %6774 = vmatprep.subr.bf16.mxu0 %v9783_v57  ;;  %v755_v57 = vmax.bf16 %v10309_v50, %v371_v46  ;;  %v449_v42 = vld [vmem:[%s10501_s30 + $0x728] sm:$0xff] }
 0x13a   : > { %v8030_v7 = vcombine.high %v749_v55, %v761_v56  ;;  %v9844_v45 = vld [vmem:[#allocation5 + $0x2e0] ss:$8 sps:$4 sm:$0xff]  }
 0x13b   : > { %5617 = vmatpush1.bf16.msra.mxu1 %v9778_v62  ;;  %v9825_v62 = vld [vmem:[#allocation5 + $0x8a4] ss:$8 sps:$4 sm:$0xff]   ;;  %v9847_v46 = vld [vmem:[#allocation5 + $0x8e0] ss:$8 sps:$4 sm:$0xff]  }
 0x13c   : > { %6775 = vmatpush1.bf16.msra.mxu0 %v9781_v63  ;;  %5618 = vmatprep.subr.bf16.mxu1 %v9786_v0  ;;  %v389_v63 = vld [vmem:[%s10501_s30 + $0x548] sm:$0xff]  ;;  %v8005_v0 = vcombine.low %v725_v34, %v737_v35  ;;  %v9838_v35 = vld [vmem:[#allocation5 + $0x2d0] ss:$8 sps:$4 sm:$0xff]  }
 0x13d   : > { %6776 = vmatprep.subr.bf16.mxu0 %v9789_v1  ;;  %5470 = vmatmul.mubr.bf16.gmra.mrb[8].mxu1 %v7933_v3  ;;  %v8017_v1 = vcombine.low %v731_v36, %v743_v37  ;;  %v395_v3 = vld [vmem:[%s10501_s30 + $0x578] sm:$0xff]  ;;  %v9846_v37 = vld [vmem:[#allocation5 + $0x2e4] ss:$8 sps:$4 sm:$0xff]  }
 0x13e   : > { %6628 = vmatmul.mubr.bf16.gmra.mrb[8].mxu0 %v7945_v4  ;;  %5479 = vmatprep.mubr.bf16.mxu1 %v7958_v10  ;;  %v407_v4 = vld [vmem:[%s10501_s30 + $0x5d8] sm:$0xff] }
 0x13f   : > { %6637 = vmatprep.mubr.bf16.mxu0 %v7970_v11  ;;  %5619 = vmatpush1.bf16.msra.mxu1 %v9784_v8  ;;  %v8042_v8 = vcombine.high %v755_v57, %v767_v58  ;;  %v9831_v10 = vld [vmem:[#allocation5 + $0x8b4] ss:$8 sps:$4 sm:$0xff]   ;;  %v773_v11 = vmax.bf16 %v10309_v50, %v389_v63  ;;  %v791_v14 = vmax.bf16 %v10309_v50, %v407_v4  ;;  %v9841_v36 = vld [vmem:[#allocation5 + $0x8d0] ss:$8 sps:$4 sm:$0xff]   ;;  %v473_v63 = vld [vmem:[%s10501_s30 + $0x7e8] sm:$0xff] }
 0x140   : > { %6777 = vmatpush1.bf16.msra.mxu0 %v9787_v9  ;;  %5620 = vmatprep.subr.bf16.mxu1 %v9792_v12  ;;  %v9828_v9 = vld [vmem:[#allocation5 + $0x2b4] ss:$8 sps:$4 sm:$0xff]   ;;  %v785_v12 = vmax.bf16 %v10309_v50, %v401_v2 }
 0x141   : > { %6778 = vmatprep.subr.bf16.mxu0 %v9795_v13  ;;  %v779_v13 = vmax.bf16 %v10309_v50, %v395_v3  ;;  %v467_v2 = vld [vmem:[%s10501_s30 + $0x7b8] sm:$0xff] }
 0x142   : > { %v8054_v27 = vcombine.high %v773_v11, %v785_v12  ;;  %v479_v3 = vld [vmem:[%s10501_s30 + $0x818] sm:$0xff] }
 0x143   : > { %5621 = vmatpush1.bf16.msra.mxu1 %v9790_v18  ;;  %v9837_v18 = vld [vmem:[#allocation5 + $0x8c4] ss:$8 sps:$4 sm:$0xff]  }
 0x144   : > { %6779 = vmatpush1.bf16.msra.mxu0 %v9793_v19  ;;  %5622 = vmatprep.subr.bf16.mxu1 %v9798_v20  ;;  %v413_v19 = vld [vmem:[%s10501_s30 + $0x608] sm:$0xff]  ;;  %v8029_v20 = vcombine.low %v749_v55, %v761_v56  ;;  %v9850_v56 = vld [vmem:[#allocation5 + $0x2f0] ss:$8 sps:$4 sm:$0xff]  }
 0x145   : > { %6780 = vmatprep.subr.bf16.mxu0 %v9801_v21  ;;  %5480 = vmatmul.mubr.bf16.gmra.mrb[12].mxu1 %v7957_v23  ;;  %v8041_v21 = vcombine.low %v755_v57, %v767_v58  ;;  %v419_v23 = vld [vmem:[%s10501_s30 + $0x638] sm:$0xff]  ;;  %v9858_v58 = vld [vmem:[#allocation5 + $0x304] ss:$8 sps:$4 sm:$0xff]  }
 0x146   : > { %6638 = vmatmul.mubr.bf16.gmra.mrb[12].mxu0 %v7969_v24  ;;  %5489 = vmatprep.mubr.bf16.mxu1 %v7982_v30  ;;  %v431_v24 = vld [vmem:[%s10501_s30 + $0x698] sm:$0xff] }
 0x147   : > { %6647 = vmatprep.mubr.bf16.mxu0 %v7994_v31  ;;  %5623 = vmatpush1.bf16.msra.mxu1 %v9796_v28  ;;  %v8066_v28 = vcombine.high %v779_v13, %v791_v14  ;;  %v9843_v30 = vld [vmem:[#allocation5 + $0x8d4] ss:$8 sps:$4 sm:$0xff]   ;;  %v797_v31 = vmax.bf16 %v10309_v50, %v413_v19  ;;  %v815_v34 = vmax.bf16 %v10309_v50, %v431_v24  ;;  %v9853_v57 = vld [vmem:[#allocation5 + $0x8f0] ss:$8 sps:$4 sm:$0xff]   ;;  %v509_v24 = vld [vmem:[%s10501_s30 + $0x908] sm:$0xff] }
 0x148   : > { %6781 = vmatpush1.bf16.msra.mxu0 %v9799_v29  ;;  %5624 = vmatprep.subr.bf16.mxu1 %v9804_v32  ;;  %v9840_v29 = vld [vmem:[#allocation5 + $0x2d4] ss:$8 sps:$4 sm:$0xff]   ;;  %v809_v32 = vmax.bf16 %v10309_v50, %v425_v22 }
 0x149   : > { %6782 = vmatprep.subr.bf16.mxu0 %v9807_v33  ;;  %v803_v33 = vmax.bf16 %v10309_v50, %v419_v23 }
 0x14a   : > { %v8078_v47 = vcombine.high %v797_v31, %v809_v32 }
 0x14b   : > { %5625 = vmatpush1.bf16.msra.mxu1 %v9802_v38  ;;  %v9849_v38 = vld [vmem:[#allocation5 + $0x8e4] ss:$8 sps:$4 sm:$0xff]  }
 0x14c   : > { %6783 = vmatpush1.bf16.msra.mxu0 %v9805_v39  ;;  %5626 = vmatprep.subr.bf16.mxu1 %v9810_v40  ;;  %v437_v39 = vld [vmem:[%s10501_s30 + $0x6c8] sm:$0xff]  ;;  %v8053_v40 = vcombine.low %v773_v11, %v785_v12 }
 0x14d   : > { %6784 = vmatprep.subr.bf16.mxu0 %v9813_v41  ;;  %5490 = vmatmul.mubr.bf16.gmra.mrb[16].mxu1 %v7981_v43  ;;  %v8065_v41 = vcombine.low %v779_v13, %v791_v14  ;;  %v443_v43 = vld [vmem:[%s10501_s30 + $0x6f8] sm:$0xff]  ;;  %v485_v12 = vld [vmem:[%s10501_s30 + $0x848] sm:$0xff] }
 0x14e   : > { %6648 = vmatmul.mubr.bf16.gmra.mrb[16].mxu0 %v7993_v44  ;;  %5499 = vmatprep.mubr.bf16.mxu1 %v8006_v51  ;;  %v455_v44 = vld [vmem:[%s10501_s30 + $0x758] sm:$0xff]  ;;  %v497_v13 = vld [vmem:[%s10501_s30 + $0x8a8] sm:$0xff] }
 0x14f   : > { %6657 = vmatprep.mubr.bf16.mxu0 %v8018_v52  ;;  %5627 = vmatpush1.bf16.msra.mxu1 %v9808_v48  ;;  %v8090_v48 = vcombine.high %v803_v33, %v815_v34  ;;  %v9855_v51 = vld [vmem:[#allocation5 + $0x8f4] ss:$8 sps:$4 sm:$0xff]   ;;  %v821_v52 = vmax.bf16 %v10309_v50, %v437_v39  ;;  %v839_v55 = vmax.bf16 %v10309_v50, %v455_v44 }
 0x150   : > { %6785 = vmatpush1.bf16.msra.mxu0 %v9811_v49  ;;  %5628 = vmatprep.subr.bf16.mxu1 %v9816_v53  ;;  %v9852_v49 = vld [vmem:[#allocation5 + $0x2f4] ss:$8 sps:$4 sm:$0xff]   ;;  %v833_v53 = vmax.bf16 %v10309_v50, %v449_v42 }
 0x151   : > { %6786 = vmatprep.subr.bf16.mxu0 %v9819_v54  ;;  %v827_v54 = vmax.bf16 %v10309_v50, %v443_v43  ;;  %v491_v14 = vld [vmem:[%s10501_s30 + $0x878] sm:$0xff] }
 0x152   : > { %v551_v39 = vld [vmem:[%s10501_s30 + $0xa58] sm:$0xff] }
 0x153   : > { %5629 = vmatpush1.bf16.msra.mxu1 %v9814_v59  ;;  %v9861_v59 = vld [vmem:[#allocation5 + $0x904] ss:$8 sps:$4 sm:$0xff]   ;;  %v935_v43 = vmax.bf16 %v10309_v50, %v551_v39  ;;  %v9864_v39 = vld [vmem:[#allocation5 + $0x314] ss:$8 sps:$4 sm:$0xff]  }
 0x154   : > { %6787 = vmatpush1.bf16.msra.mxu0 %v9817_v60  ;;  %5630 = vmatprep.subr.bf16.mxu1 %v9822_v61  ;;  %v461_v60 = vld [vmem:[%s10501_s30 + $0x788] sm:$0xff]  ;;  %v8077_v61 = vcombine.low %v797_v31, %v809_v32 }
 0x155   : > { %6788 = vmatprep.subr.bf16.mxu0 %v9825_v62  ;;  %5500 = vmatmul.mubr.bf16.gmra.mrb[20].mxu1 %v8005_v0  ;;  %v8089_v62 = vcombine.low %v803_v33, %v815_v34  ;;  %v8102_v0 = vcombine.high %v821_v52, %v833_v53  ;;  %v845_v4 = vmax.bf16 %v10309_v50, %v461_v60 }
 0x156   : > { %6658 = vmatmul.mubr.bf16.gmra.mrb[20].mxu0 %v8017_v1  ;;  %5509 = vmatprep.mubr.bf16.mxu1 %v8030_v7  ;;  %v8114_v1 = vcombine.high %v827_v54, %v839_v55  ;;  %v863_v7 = vmax.bf16 %v10309_v50, %v479_v3 }
 0x157   : > { %6667 = vmatprep.mubr.bf16.mxu0 %v8042_v8  ;;  %5631 = vmatpush1.bf16.msra.mxu1 %v9820_v5  ;;  %v857_v5 = vmax.bf16 %v10309_v50, %v473_v63  ;;  %v8101_v8 = vcombine.low %v821_v52, %v833_v53  ;;  %v575_v52 = vld [vmem:[%s10501_s30 + $0xb18] sm:$0xff] }
 0x158   : > { %6789 = vmatpush1.bf16.msra.mxu0 %v9823_v6  ;;  %5632 = vmatprep.subr.bf16.mxu1 %v9828_v9  ;;  %v851_v6 = vmax.bf16 %v10309_v50, %v467_v2  ;;  %v8113_v9 = vcombine.low %v827_v54, %v839_v55  ;;  %v587_v63 = vld [vmem:[%s10501_s30 + $0xb78] sm:$0xff] }
 0x159   : > { %6790 = vmatprep.subr.bf16.mxu0 %v9831_v10  ;;  %v8126_v10 = vcombine.high %v845_v4, %v857_v5  ;;  %v971_v3 = vmax.bf16 %v10309_v50, %v587_v63 }
 0x15a   : > { %v8138_v11 = vcombine.high %v851_v6, %v863_v7 }
 0x15b   : > { %5633 = vmatpush1.bf16.msra.mxu1 %v9826_v15  ;;  %v503_v15 = vld [vmem:[%s10501_s30 + $0x8d8] sm:$0xff] }
 0x15c   : > { %6791 = vmatpush1.bf16.msra.mxu0 %v9829_v16  ;;  %5634 = vmatprep.subr.bf16.mxu1 %v9834_v17  ;;  %v869_v16 = vmax.bf16 %v10309_v50, %v485_v12  ;;  %v881_v17 = vmax.bf16 %v10309_v50, %v497_v13  ;;  %v887_v19 = vmax.bf16 %v10309_v50, %v503_v15  ;;  %v240_v12 = vld [vmem:[%s10501_s30 + $0xa0] sm:$0xff] }
 0x15d   : > { %6792 = vmatprep.subr.bf16.mxu0 %v9837_v18  ;;  %5510 = vmatmul.mubr.bf16.gmra.mrb[24].mxu1 %v8029_v20  ;;  %v875_v18 = vmax.bf16 %v10309_v50, %v491_v14  ;;  %v8125_v20 = vcombine.low %v845_v4, %v857_v5 }
 0x15e   : > { %6668 = vmatmul.mubr.bf16.gmra.mrb[24].mxu0 %v8041_v21  ;;  %5519 = vmatprep.mubr.bf16.mxu1 %v8054_v27  ;;  %v8137_v21 = vcombine.low %v851_v6, %v863_v7  ;;  %v8150_v22 = vcombine.high %v869_v16, %v881_v17  ;;  %v527_v27 = vld [vmem:[%s10501_s30 + $0x998] sm:$0xff]  ;;  %v8149_v32 = vcombine.low %v869_v16, %v881_v17 }
 0x15f   : > { %6677 = vmatprep.mubr.bf16.mxu0 %v8066_v28  ;;  %5635 = vmatpush1.bf16.msra.mxu1 %v9832_v25  ;;  %v8162_v23 = vcombine.high %v875_v18, %v887_v19  ;;  %v521_v25 = vld [vmem:[%s10501_s30 + $0x968] sm:$0xff]  ;;  %v893_v28 = vmax.bf16 %v10309_v50, %v509_v24  ;;  %v911_v31 = vmax.bf16 %v10309_v50, %v527_v27  ;;  %v264_v24 = vld [vmem:[%s10501_s30 + $0x160] sm:$0xff] }
 0x160   : > { %6793 = vmatpush1.bf16.msra.mxu0 %v9835_v26  ;;  %5636 = vmatprep.subr.bf16.mxu1 %v9840_v29  ;;  %v515_v26 = vld [vmem:[%s10501_s30 + $0x938] sm:$0xff]  ;;  %v905_v29 = vmax.bf16 %v10309_v50, %v521_v25  ;;  %v8161_v33 = vcombine.low %v875_v18, %v887_v19  ;;  %v624_v16 = vmax.bf16 %v10309_v50, %v240_v12  ;;  %v324_v12 = vld [vmem:[%s10501_s30 + $0x340] sm:$0xff] }
 0x161   : > { %6794 = vmatprep.subr.bf16.mxu0 %v9843_v30  ;;  %v899_v30 = vmax.bf16 %v10309_v50, %v515_v26 }
 0x162   : > { %v8174_v34 = vcombine.high %v893_v28, %v905_v29  ;;  %v8173_v44 = vcombine.low %v893_v28, %v905_v29  ;;  %v648_v28 = vmax.bf16 %v10309_v50, %v264_v24  ;;  %v9894_v24 = vld [vmem:[#allocation5 + $0x364] ss:$8 sps:$4 sm:$0xff]  }
 0x163   : > { %5637 = vmatpush1.bf16.msra.mxu1 %v9838_v35  ;;  %v8186_v35 = vcombine.high %v899_v30, %v911_v31 }
 0x164   : > { %6795 = vmatpush1.bf16.msra.mxu0 %v9841_v36  ;;  %5638 = vmatprep.subr.bf16.mxu1 %v9846_v37  ;;  %v533_v36 = vld [vmem:[%s10501_s30 + $0x9c8] sm:$0xff] }
 0x165   : > { %6796 = vmatprep.subr.bf16.mxu0 %v9849_v38  ;;  %5520 = vmatmul.mubr.bf16.gmra.mrb[28].mxu1 %v8053_v40  ;;  %v545_v37 = vld [vmem:[%s10501_s30 + $0xa28] sm:$0xff]  ;;  %v539_v38 = vld [vmem:[%s10501_s30 + $0x9f8] sm:$0xff]  ;;  %v917_v40 = vmax.bf16 %v10309_v50, %v533_v36  ;;  %v282_v36 = vld [vmem:[%s10501_s30 + $0x1f0] sm:$0xff] }
 0x166   : > { %6678 = vmatmul.mubr.bf16.gmra.mrb[28].mxu0 %v8065_v41  ;;  %5529 = vmatprep.mubr.bf16.mxu1 %v8078_v47  ;;  %v929_v41 = vmax.bf16 %v10309_v50, %v545_v37  ;;  %v923_v42 = vmax.bf16 %v10309_v50, %v539_v38  ;;  %v276_v37 = vld [vmem:[%s10501_s30 + $0x1c0] sm:$0xff] }
 0x167   : > { %6687 = vmatprep.mubr.bf16.mxu0 %v8090_v48  ;;  %5639 = vmatpush1.bf16.msra.mxu1 %v9844_v45  ;;  %v8185_v45 = vcombine.low %v899_v30, %v911_v31  ;;  %v557_v48 = vld [vmem:[%s10501_s30 + $0xa88] sm:$0xff]  ;;  %v288_v38 = vld [vmem:[%s10501_s30 + $0x220] sm:$0xff] }
 0x168   : > { %6797 = vmatpush1.bf16.msra.mxu0 %v9847_v46  ;;  %5640 = vmatprep.subr.bf16.mxu1 %v9852_v49  ;;  %v8198_v46 = vcombine.high %v917_v40, %v929_v41  ;;  %v8210_v47 = vcombine.high %v923_v42, %v935_v43  ;;  %v569_v49 = vld [vmem:[%s10501_s30 + $0xae8] sm:$0xff]  ;;  %v941_v53 = vmax.bf16 %v10309_v50, %v557_v48 }
 0x169   : > { %6798 = vmatprep.subr.bf16.mxu0 %v9855_v51  ;;  %v563_v51 = vld [vmem:[%s10501_s30 + $0xab8] sm:$0xff]  ;;  %v953_v54 = vmax.bf16 %v10309_v50, %v569_v49  ;;  %v9856_v31 = vld [vmem:[#allocation5 + $0x300] ss:$8 sps:$4 sm:$0xff]   ;;  %v9873_v48 = vld [vmem:[#allocation5 + $0x924] ss:$8 sps:$4 sm:$0xff]  }
 0x16a   : > { %v947_v55 = vmax.bf16 %v10309_v50, %v563_v51 }
 0x16b   : > { %5641 = vmatpush1.bf16.msra.mxu1 %v9850_v56  ;;  %v959_v56 = vmax.bf16 %v10309_v50, %v575_v52  ;;  %v8221_v5 = vcombine.low %v941_v53, %v953_v54 }
 0x16c   : > { %6799 = vmatpush1.bf16.msra.mxu0 %v9853_v57  ;;  %5803 = vmatprep.subr.bf16.mxu1 %v9858_v58  ;;  %v8197_v57 = vcombine.low %v917_v40, %v929_v41  ;;  %v8209_v58 = vcombine.low %v923_v42, %v935_v43  ;;  %v9867_v40 = vld [vmem:[#allocation5 + $0x914] ss:$8 sps:$4 sm:$0xff]   ;;  %v9862_v42 = vld [vmem:[#allocation5 + $0x310] ss:$8 sps:$4 sm:$0xff]  }
 0x16d   : > { %6961 = vmatprep.subr.bf16.mxu0 %v9861_v59  ;;  %5530 = vmatmul.mubr.bf16.gmra.mrb[32].mxu1 %v8077_v61  ;;  %v8222_v59 = vcombine.high %v941_v53, %v953_v54  ;;  %v8234_v60 = vcombine.high %v947_v55, %v959_v56  ;;  %v581_v61 = vld [vmem:[%s10501_s30 + $0xb48] sm:$0xff]  ;;  %v8233_v6 = vcombine.low %v947_v55, %v959_v56  ;;  %v9865_v43 = vld [vmem:[#allocation5 + $0x910] ss:$8 sps:$4 sm:$0xff]  }
 0x16e   : > { %6688 = vmatmul.mubr.bf16.gmra.mrb[32].mxu0 %v8089_v62  ;;  %5539 = vmatprep.mubr.bf16.mxu1 %v8102_v0  ;;  %v593_v62 = vld [vmem:[%s10501_s30 + $0xba8] sm:$0xff]  ;;  %v599_v0 = vld [vmem:[%s10501_s30 + $0xbd8] sm:$0xff]  ;;  %v294_v56 = vld [vmem:[%s10501_s30 + $0x250] sm:$0xff] }
 0x16f   : > { %6697 = vmatprep.mubr.bf16.mxu0 %v8114_v1  ;;  %v965_v1 = vmax.bf16 %v10309_v50, %v581_v61  ;;  %v977_v2 = vmax.bf16 %v10309_v50, %v593_v62  ;;  %v983_v4 = vmax.bf16 %v10309_v50, %v599_v0  ;;  %v9868_v54 = vld [vmem:[#allocation5 + $0x320] ss:$8 sps:$4 sm:$0xff]   ;;  %v9879_v61 = vld [vmem:[#allocation5 + $0x934] ss:$8 sps:$4 sm:$0xff]   ;;  %v678_v62 = vmax.bf16 %v10309_v50, %v294_v56 }
 0x170   : > { %v9871_v55 = vld [vmem:[#allocation5 + $0x920] ss:$8 sps:$4 sm:$0xff]  }
 0x171   : > { %v8246_v7 = vcombine.high %v965_v1, %v977_v2  ;;  %v8245_v17 = vcombine.low %v965_v1, %v977_v2  ;;  %v8257_v18 = vcombine.low %v971_v3, %v983_v4  ;;  %v9874_v2 = vld [vmem:[#allocation5 + $0x330] ss:$8 sps:$4 sm:$0xff]   ;;  %v9907_v56 = vld [vmem:[#allocation5 + $0x980] ss:$8 sps:$4 sm:$0xff]  }
 0x175   : > { %5540 = vmatmul.mubr.bf16.gmra.mrb[36].mxu1 %v8101_v8  ;;  %v8258_v8 = vcombine.high %v971_v3, %v983_v4  ;;  %v9877_v3 = vld [vmem:[#allocation5 + $0x930] ss:$8 sps:$4 sm:$0xff]   ;;  %v9882_v4 = vld [vmem:[#allocation5 + $0x344] ss:$8 sps:$4 sm:$0xff]  }
 0x176   : > { %6698 = vmatmul.mubr.bf16.gmra.mrb[36].mxu0 %v8113_v9  ;;  %5549 = vmatprep.mubr.bf16.mxu1 %v8126_v10  ;;  %v222_v9 = vld [vmem:[%s10501_s30 + $0x10] sm:$0xff] }
 0x177   : > { %6707 = vmatprep.mubr.bf16.mxu0 %v8138_v11  ;;  %v234_v10 = vld [vmem:[%s10501_s30 + $0x70] sm:$0xff]  ;;  %v228_v11 = vld [vmem:[%s10501_s30 + $0x40] sm:$0xff]  ;;  %v606_v13 = vmax.bf16 %v10309_v50, %v222_v9 }
 0x178   : > { %v618_v14 = vmax.bf16 %v10309_v50, %v234_v10  ;;  %v612_v15 = vmax.bf16 %v10309_v50, %v228_v11  ;;  %v318_v10 = vld [vmem:[%s10501_s30 + $0x310] sm:$0xff] }
 0x179   : > { %v330_v11 = vld [vmem:[%s10501_s30 + $0x370] sm:$0xff] }
 0x17a   : > { %v7888_v19 = vcombine.high %v606_v13, %v618_v14  ;;  %v7887_v29 = vcombine.low %v606_v13, %v618_v14  ;;  %v7899_v30 = vcombine.low %v612_v15, %v624_v16  ;;  %v336_v13 = vld [vmem:[%s10501_s30 + $0x3a0] sm:$0xff] }
 0x17b   : > { %v9880_v14 = vld [vmem:[#allocation5 + $0x340] ss:$8 sps:$4 sm:$0xff]  }
 0x17d   : > { %5550 = vmatmul.mubr.bf16.gmra.mrb[40].mxu1 %v8125_v20  ;;  %v7900_v20 = vcombine.high %v612_v15, %v624_v16  ;;  %v9883_v15 = vld [vmem:[#allocation5 + $0x940] ss:$8 sps:$4 sm:$0xff]   ;;  %v9888_v16 = vld [vmem:[#allocation5 + $0x354] ss:$8 sps:$4 sm:$0xff]  }
 0x17e   : > { %6708 = vmatmul.mubr.bf16.gmra.mrb[40].mxu0 %v8137_v21  ;;  %5559 = vmatprep.mubr.bf16.mxu1 %v8150_v22  ;;  %v246_v21 = vld [vmem:[%s10501_s30 + $0xd0] sm:$0xff] }
 0x17f   : > { %6717 = vmatprep.mubr.bf16.mxu0 %v8162_v23  ;;  %v258_v22 = vld [vmem:[%s10501_s30 + $0x130] sm:$0xff]  ;;  %v252_v23 = vld [vmem:[%s10501_s30 + $0x100] sm:$0xff]  ;;  %v630_v25 = vmax.bf16 %v10309_v50, %v246_v21  ;;  %v720_v21 = vmax.bf16 %v10309_v50, %v336_v13 }
 0x180   : > { %v642_v26 = vmax.bf16 %v10309_v50, %v258_v22  ;;  %v636_v27 = vmax.bf16 %v10309_v50, %v252_v23  ;;  %v9886_v22 = vld [vmem:[#allocation5 + $0x350] ss:$8 sps:$4 sm:$0xff]   ;;  %v9924_v13 = vld [vmem:[#allocation5 + $0x3b4] ss:$8 sps:$4 sm:$0xff]  }
 0x181   : > { %v9889_v23 = vld [vmem:[#allocation5 + $0x950] ss:$8 sps:$4 sm:$0xff]  }
 0x182   : > { %v7911_v49 = vcombine.low %v630_v25, %v642_v26  ;;  %v7923_v51 = vcombine.low %v636_v27, %v648_v28 }
 0x185   : > { %5560 = vmatmul.mubr.bf16.gmra.mrb[44].mxu1 %v8149_v32  ;;  %v9859_v32 = vld [vmem:[#allocation5 + $0x900] ss:$8 sps:$4 sm:$0xff]  }
 0x186   : > { %6718 = vmatmul.mubr.bf16.gmra.mrb[44].mxu0 %v8161_v33  ;;  %5569 = vmatprep.mubr.bf16.mxu1 %v8174_v34  ;;  %v270_v33 = vld [vmem:[%s10501_s30 + $0x190] sm:$0xff]  ;;  %v7912_v34 = vcombine.high %v630_v25, %v642_v26  ;;  %v9897_v25 = vld [vmem:[#allocation5 + $0x964] ss:$8 sps:$4 sm:$0xff]  }
 0x187   : > { %6727 = vmatprep.mubr.bf16.mxu0 %v8186_v35  ;;  %v7924_v35 = vcombine.high %v636_v27, %v648_v28  ;;  %v654_v41 = vmax.bf16 %v10309_v50, %v270_v33  ;;  %v360_v33 = vld [vmem:[%s10501_s30 + $0x460] sm:$0xff] }
 0x18d   : > { %5570 = vmatmul.mubr.bf16.gmra.mrb[48].mxu1 %v8173_v44  ;;  %v666_v44 = vmax.bf16 %v10309_v50, %v282_v36  ;;  %v9900_v36 = vld [vmem:[#allocation5 + $0x374] ss:$8 sps:$4 sm:$0xff]  }
 0x18e   : > { %6728 = vmatmul.mubr.bf16.gmra.mrb[48].mxu0 %v8185_v45  ;;  %5579 = vmatprep.mubr.bf16.mxu1 %v8198_v46  ;;  %v660_v45 = vmax.bf16 %v10309_v50, %v276_v37  ;;  %v672_v46 = vmax.bf16 %v10309_v50, %v288_v38  ;;  %v9903_v37 = vld [vmem:[#allocation5 + $0x974] ss:$8 sps:$4 sm:$0xff]  }
 0x18f   : > { %6737 = vmatprep.mubr.bf16.mxu0 %v8210_v47  ;;  %v9870_v47 = vld [vmem:[#allocation5 + $0x324] ss:$8 sps:$4 sm:$0xff]   ;;  %v7936_v52 = vcombine.high %v654_v41, %v666_v44 }
 0x190   : > { %v7948_v53 = vcombine.high %v660_v45, %v672_v46 }
 0x195   : > { %5580 = vmatmul.mubr.bf16.gmra.mrb[52].mxu1 %v8197_v57  ;;  %v306_v57 = vld [vmem:[%s10501_s30 + $0x2b0] sm:$0xff] }
 0x196   : > { %6738 = vmatmul.mubr.bf16.gmra.mrb[52].mxu0 %v8209_v58  ;;  %5589 = vmatprep.mubr.bf16.mxu1 %v8222_v59  ;;  %v300_v58 = vld [vmem:[%s10501_s30 + $0x280] sm:$0xff]  ;;  %v690_v63 = vmax.bf16 %v10309_v50, %v306_v57  ;;  %v9912_v57 = vld [vmem:[#allocation5 + $0x394] ss:$8 sps:$4 sm:$0xff]  }
 0x197   : > { %6747 = vmatprep.mubr.bf16.mxu0 %v8234_v60  ;;  %v312_v59 = vld [vmem:[%s10501_s30 + $0x2e0] sm:$0xff]  ;;  %v9876_v60 = vld [vmem:[#allocation5 + $0x334] ss:$8 sps:$4 sm:$0xff]   ;;  %v684_v0 = vmax.bf16 %v10309_v50, %v300_v58 }
 0x198   : > { %v696_v1 = vmax.bf16 %v10309_v50, %v312_v59  ;;  %v7959_v26 = vcombine.low %v678_v62, %v690_v63  ;;  %v9915_v58 = vld [vmem:[#allocation5 + $0x994] ss:$8 sps:$4 sm:$0xff]  }
 0x19a   : > { %v7972_v9 = vcombine.high %v684_v0, %v696_v1  ;;  %v7971_v27 = vcombine.low %v684_v0, %v696_v1  ;;  %v9913_v0 = vld [vmem:[#allocation5 + $0x990] ss:$8 sps:$4 sm:$0xff]   ;;  %v9918_v1 = vld [vmem:[#allocation5 + $0x3a4] ss:$8 sps:$4 sm:$0xff]  }
 0x19d   : > { %5590 = vmatmul.mubr.bf16.gmra.mrb[56].mxu1 %v8221_v5  ;;  %v9885_v5 = vld [vmem:[#allocation5 + $0x944] ss:$8 sps:$4 sm:$0xff]  }
 0x19e   : > { %6748 = vmatmul.mubr.bf16.gmra.mrb[56].mxu0 %v8233_v6  ;;  %5599 = vmatprep.mubr.bf16.mxu1 %v8246_v7  ;;  %v7935_v6 = vcombine.low %v654_v41, %v666_v44  ;;  %v7947_v7 = vcombine.low %v660_v45, %v672_v46  ;;  %v744_v41 = vmax.bf16 %v10309_v50, %v360_v33  ;;  %v9906_v44 = vld [vmem:[#allocation5 + $0x384] ss:$8 sps:$4 sm:$0xff]   ;;  %v9936_v33 = vld [vmem:[#allocation5 + $0x3d4] ss:$8 sps:$4 sm:$0xff]  }
 0x19f   : > { %6757 = vmatprep.mubr.bf16.mxu0 %v8258_v8  ;;  %v7960_v8 = vcombine.high %v678_v62, %v690_v63  ;;  %v9909_v45 = vld [vmem:[#allocation5 + $0x984] ss:$8 sps:$4 sm:$0xff]   ;;  %v9910_v63 = vld [vmem:[#allocation5 + $0x390] ss:$8 sps:$4 sm:$0xff]  }
 0x1a5   : > { %5600 = vmatmul.mubr.bf16.gmra.mrb[60].mxu1 %v8245_v17  ;;  %v9891_v17 = vld [vmem:[#allocation5 + $0x954] ss:$8 sps:$4 sm:$0xff]  }
 0x1a6   : > { %6758 = vmatmul.mubr.bf16.gmra.mrb[60].mxu0 %v8257_v18  ;;  %5642 = vmatprep.mubr.bf16.mxu1 %v7888_v19  ;;  %v702_v18 = vmax.bf16 %v10309_v50, %v318_v10  ;;  %v714_v19 = vmax.bf16 %v10309_v50, %v330_v11  ;;  %v408_v10 = vld [vmem:[%s10501_s30 + $0x5e0] sm:$0xff] }
 0x1a7   : > { %6800 = vmatprep.mubr.bf16.mxu0 %v7900_v20  ;;  %v708_v20 = vmax.bf16 %v10309_v50, %v324_v12  ;;  %v9916_v11 = vld [vmem:[#allocation5 + $0x3a0] ss:$8 sps:$4 sm:$0xff]  }
 0x1a8   : > { %v7984_v28 = vcombine.high %v702_v18, %v714_v19  ;;  %v7983_v46 = vcombine.low %v702_v18, %v714_v19  ;;  %v9919_v12 = vld [vmem:[#allocation5 + $0x9a0] ss:$8 sps:$4 sm:$0xff]   ;;  %v792_v18 = vmax.bf16 %v10309_v50, %v408_v10  ;;  %v9922_v19 = vld [vmem:[#allocation5 + $0x3b0] ss:$8 sps:$4 sm:$0xff]  }
 0x1ad   : > { %5643 = vmatmul.mubr.bf16.vlgmr.msra.gmra.mrb[0].mxu1 %v7887_v29  ;;  %v7996_v29 = vcombine.high %v708_v20, %v720_v21 }
 0x1ae   : > { %6801 = vmatmul.mubr.bf16.vlgmr.msra.gmra.mrb[0].mxu0 %v7899_v30  ;;  %5804 = vmatpush1.bf16.msra.mxu1 %v9856_v31  ;;  %v342_v30 = vld [vmem:[%s10501_s30 + $0x3d0] sm:$0xff] }
 0x1af   : > { %6962 = vmatpush1.bf16.msra.mxu0 %v9859_v32  ;;  %5652 = vmatprep.mubr.bf16.mxu1 %v7912_v34  ;;  %v354_v31 = vld [vmem:[%s10501_s30 + $0x430] sm:$0xff]  ;;  %v348_v32 = vld [vmem:[%s10501_s30 + $0x400] sm:$0xff]  ;;  %v726_v38 = vmax.bf16 %v10309_v50, %v342_v30 }
 0x1b0   : > { %6810 = vmatprep.mubr.bf16.mxu0 %v7924_v35  ;;  %5805 = vmatprep.subr.bf16.mxu1 %v9864_v39  ;;  %v9892_v34 = vld [vmem:[#allocation5 + $0x360] ss:$8 sps:$4 sm:$0xff]   ;;  %v738_v39 = vmax.bf16 %v10309_v50, %v354_v31 }
 0x1b1   : > { %6963 = vmatprep.subr.bf16.mxu0 %v9867_v40  ;;  %v9895_v35 = vld [vmem:[#allocation5 + $0x960] ss:$8 sps:$4 sm:$0xff]   ;;  %v732_v40 = vmax.bf16 %v10309_v50, %v348_v32 }
 0x1b2   : > { %5806 = vmatpush1.bf16.msra.mxu1 %v9862_v42  ;;  %v9898_v42 = vld [vmem:[#allocation5 + $0x370] ss:$8 sps:$4 sm:$0xff]   ;;  %v432_v30 = vld [vmem:[%s10501_s30 + $0x6a0] sm:$0xff] }
 0x1b3   : > { %6964 = vmatpush1.bf16.msra.mxu0 %v9865_v43  ;;  %5807 = vmatprep.subr.bf16.mxu1 %v9870_v47  ;;  %v9901_v43 = vld [vmem:[#allocation5 + $0x970] ss:$8 sps:$4 sm:$0xff]   ;;  %v7995_v47 = vcombine.low %v708_v20, %v720_v21  ;;  %v9930_v21 = vld [vmem:[#allocation5 + $0x3c4] ss:$8 sps:$4 sm:$0xff]   ;;  %v9928_v31 = vld [vmem:[#allocation5 + $0x3c0] ss:$8 sps:$4 sm:$0xff]  }
 0x1b4   : > { %6965 = vmatprep.subr.bf16.mxu0 %v9873_v48  ;;  %v8008_v48 = vcombine.high %v726_v38, %v738_v39  ;;  %v9925_v20 = vld [vmem:[#allocation5 + $0x9b0] ss:$8 sps:$4 sm:$0xff]   ;;  %v9931_v32 = vld [vmem:[#allocation5 + $0x9c0] ss:$8 sps:$4 sm:$0xff]  }
 0x1b5   : > { %5653 = vmatmul.mubr.bf16.gmra.mrb[4].mxu1 %v7911_v49  ;;  %v8020_v49 = vcombine.high %v732_v40, %v744_v41 }
 0x1b6   : > { %6811 = vmatmul.mubr.bf16.gmra.mrb[4].mxu0 %v7923_v51  ;;  %5662 = vmatprep.mubr.bf16.mxu1 %v7936_v52  ;;  %v366_v51 = vld [vmem:[%s10501_s30 + $0x490] sm:$0xff] }
 0x1b7   : > { %6820 = vmatprep.mubr.bf16.mxu0 %v7948_v53  ;;  %5808 = vmatpush1.bf16.msra.mxu1 %v9868_v54  ;;  %v378_v52 = vld [vmem:[%s10501_s30 + $0x4f0] sm:$0xff]  ;;  %v372_v53 = vld [vmem:[%s10501_s30 + $0x4c0] sm:$0xff]  ;;  %v750_v59 = vmax.bf16 %v10309_v50, %v366_v51 }
 0x1b8   : > { %6966 = vmatpush1.bf16.msra.mxu0 %v9871_v55  ;;  %5809 = vmatprep.subr.bf16.mxu1 %v9876_v60  ;;  %v384_v54 = vld [vmem:[%s10501_s30 + $0x520] sm:$0xff]  ;;  %v762_v60 = vmax.bf16 %v10309_v50, %v378_v52 }
 0x1b9   : > { %6967 = vmatprep.subr.bf16.mxu0 %v9879_v61  ;;  %v9904_v55 = vld [vmem:[#allocation5 + $0x380] ss:$8 sps:$4 sm:$0xff]   ;;  %v756_v61 = vmax.bf16 %v10309_v50, %v372_v53  ;;  %v768_v62 = vmax.bf16 %v10309_v50, %v384_v54  ;;  %v9948_v54 = vld [vmem:[#allocation5 + $0x3f4] ss:$8 sps:$4 sm:$0xff]  }
 0x1ba   : > { %v456_v51 = vld [vmem:[%s10501_s30 + $0x760] sm:$0xff] }
 0x1bb   : > { %5810 = vmatpush1.bf16.msra.mxu1 %v9874_v2  ;;  %v9921_v2 = vld [vmem:[#allocation5 + $0x9a4] ss:$8 sps:$4 sm:$0xff]   ;;  %v9940_v52 = vld [vmem:[#allocation5 + $0x3e0] ss:$8 sps:$4 sm:$0xff]  }
 0x1bc   : > { %6968 = vmatpush1.bf16.msra.mxu0 %v9877_v3  ;;  %5811 = vmatprep.subr.bf16.mxu1 %v9882_v4  ;;  %v8007_v3 = vcombine.low %v726_v38, %v738_v39  ;;  %v8019_v4 = vcombine.low %v732_v40, %v744_v41  ;;  %v816_v38 = vmax.bf16 %v10309_v50, %v432_v30  ;;  %v9934_v39 = vld [vmem:[#allocation5 + $0x3d0] ss:$8 sps:$4 sm:$0xff]   ;;  %v9942_v41 = vld [vmem:[#allocation5 + $0x3e4] ss:$8 sps:$4 sm:$0xff]   ;;  %v9943_v53 = vld [vmem:[#allocation5 + $0x9e0] ss:$8 sps:$4 sm:$0xff]  }
 0x1bd   : > { %6969 = vmatprep.subr.bf16.mxu0 %v9885_v5  ;;  %5663 = vmatmul.mubr.bf16.gmra.mrb[8].mxu1 %v7935_v6  ;;  %v8032_v5 = vcombine.high %v750_v59, %v762_v60  ;;  %v8044_v6 = vcombine.high %v756_v61, %v768_v62  ;;  %v9937_v40 = vld [vmem:[#allocation5 + $0x9d0] ss:$8 sps:$4 sm:$0xff]   ;;  %v516_v30 = vld [vmem:[%s10501_s30 + $0x940] sm:$0xff] }
 0x1be   : > { %6821 = vmatmul.mubr.bf16.gmra.mrb[8].mxu0 %v7947_v7  ;;  %5672 = vmatprep.mubr.bf16.mxu1 %v7960_v8  ;;  %v390_v7 = vld [vmem:[%s10501_s30 + $0x550] sm:$0xff] }
 0x1bf   : > { %6830 = vmatprep.mubr.bf16.mxu0 %v7972_v9  ;;  %5812 = vmatpush1.bf16.msra.mxu1 %v9880_v14  ;;  %v402_v8 = vld [vmem:[%s10501_s30 + $0x5b0] sm:$0xff]  ;;  %v396_v9 = vld [vmem:[%s10501_s30 + $0x580] sm:$0xff] }
 0x1c0   : > { %6970 = vmatpush1.bf16.msra.mxu0 %v9883_v15  ;;  %5813 = vmatprep.subr.bf16.mxu1 %v9888_v16  ;;  %v9927_v14 = vld [vmem:[#allocation5 + $0x9b4] ss:$8 sps:$4 sm:$0xff]   ;;  %v774_v15 = vmax.bf16 %v10309_v50, %v390_v7  ;;  %v786_v16 = vmax.bf16 %v10309_v50, %v402_v8  ;;  %v480_v7 = vld [vmem:[%s10501_s30 + $0x820] sm:$0xff] }
 0x1c1   : > { %6971 = vmatprep.subr.bf16.mxu0 %v9891_v17  ;;  %v780_v17 = vmax.bf16 %v10309_v50, %v396_v9 }
 0x1c3   : > { %5814 = vmatpush1.bf16.msra.mxu1 %v9886_v22  ;;  %v9933_v22 = vld [vmem:[#allocation5 + $0x9c4] ss:$8 sps:$4 sm:$0xff]  }
 0x1c4   : > { %6972 = vmatpush1.bf16.msra.mxu0 %v9889_v23  ;;  %5815 = vmatprep.subr.bf16.mxu1 %v9894_v24  ;;  %v8031_v23 = vcombine.low %v750_v59, %v762_v60  ;;  %v8043_v24 = vcombine.low %v756_v61, %v768_v62  ;;  %v840_v59 = vmax.bf16 %v10309_v50, %v456_v51  ;;  %v9946_v60 = vld [vmem:[#allocation5 + $0x3f0] ss:$8 sps:$4 sm:$0xff]   ;;  %v9954_v62 = vld [vmem:[#allocation5 + $0x404] ss:$8 sps:$4 sm:$0xff]  }
 0x1c5   : > { %6973 = vmatprep.subr.bf16.mxu0 %v9897_v25  ;;  %5673 = vmatmul.mubr.bf16.gmra.mrb[12].mxu1 %v7959_v26  ;;  %v8056_v25 = vcombine.high %v774_v15, %v786_v16  ;;  %v8068_v26 = vcombine.high %v780_v17, %v792_v18  ;;  %v9949_v61 = vld [vmem:[#allocation5 + $0x9f0] ss:$8 sps:$4 sm:$0xff]  }
 0x1c6   : > { %6831 = vmatmul.mubr.bf16.gmra.mrb[12].mxu0 %v7971_v27  ;;  %5682 = vmatprep.mubr.bf16.mxu1 %v7984_v28  ;;  %v414_v27 = vld [vmem:[%s10501_s30 + $0x610] sm:$0xff] }
 0x1c7   : > { %6840 = vmatprep.mubr.bf16.mxu0 %v7996_v29  ;;  %5816 = vmatpush1.bf16.msra.mxu1 %v9892_v34  ;;  %v426_v28 = vld [vmem:[%s10501_s30 + $0x670] sm:$0xff]  ;;  %v420_v29 = vld [vmem:[%s10501_s30 + $0x640] sm:$0xff] }
 0x1c8   : > { %6974 = vmatpush1.bf16.msra.mxu0 %v9895_v35  ;;  %5817 = vmatprep.subr.bf16.mxu1 %v9900_v36  ;;  %v9939_v34 = vld [vmem:[#allocation5 + $0x9d4] ss:$8 sps:$4 sm:$0xff]   ;;  %v798_v35 = vmax.bf16 %v10309_v50, %v414_v27  ;;  %v810_v36 = vmax.bf16 %v10309_v50, %v426_v28 }
 0x1c9   : > { %6975 = vmatprep.subr.bf16.mxu0 %v9903_v37  ;;  %v804_v37 = vmax.bf16 %v10309_v50, %v420_v29  ;;  %v510_v28 = vld [vmem:[%s10501_s30 + $0x910] sm:$0xff] }
 0x1ca   : > { %v522_v29 = vld [vmem:[%s10501_s30 + $0x970] sm:$0xff] }
 0x1cb   : > { %5818 = vmatpush1.bf16.msra.mxu1 %v9898_v42  ;;  %v9945_v42 = vld [vmem:[#allocation5 + $0x9e4] ss:$8 sps:$4 sm:$0xff]  }
 0x1cc   : > { %6976 = vmatpush1.bf16.msra.mxu0 %v9901_v43  ;;  %5819 = vmatprep.subr.bf16.mxu1 %v9906_v44  ;;  %v8055_v43 = vcombine.low %v774_v15, %v786_v16  ;;  %v8067_v44 = vcombine.low %v780_v17, %v792_v18  ;;  %v486_v16 = vld [vmem:[%s10501_s30 + $0x850] sm:$0xff]  ;;  %v492_v18 = vld [vmem:[%s10501_s30 + $0x880] sm:$0xff] }
 0x1cd   : > { %6977 = vmatprep.subr.bf16.mxu0 %v9909_v45  ;;  %5683 = vmatmul.mubr.bf16.gmra.mrb[16].mxu1 %v7983_v46  ;;  %v8080_v45 = vcombine.high %v798_v35, %v810_v36  ;;  %v8092_v46 = vcombine.high %v804_v37, %v816_v38  ;;  %v498_v17 = vld [vmem:[%s10501_s30 + $0x8b0] sm:$0xff] }
 0x1ce   : > { %6841 = vmatmul.mubr.bf16.gmra.mrb[16].mxu0 %v7995_v47  ;;  %5692 = vmatprep.mubr.bf16.mxu1 %v8008_v48  ;;  %v438_v47 = vld [vmem:[%s10501_s30 + $0x6d0] sm:$0xff] }
 0x1cf   : > { %6850 = vmatprep.mubr.bf16.mxu0 %v8020_v49  ;;  %5820 = vmatpush1.bf16.msra.mxu1 %v9904_v55  ;;  %v450_v48 = vld [vmem:[%s10501_s30 + $0x730] sm:$0xff]  ;;  %v444_v49 = vld [vmem:[%s10501_s30 + $0x700] sm:$0xff] }
 0x1d0   : > { %6978 = vmatpush1.bf16.msra.mxu0 %v9907_v56  ;;  %5821 = vmatprep.subr.bf16.mxu1 %v9912_v57  ;;  %v9951_v55 = vld [vmem:[#allocation5 + $0x9f4] ss:$8 sps:$4 sm:$0xff]   ;;  %v822_v56 = vmax.bf16 %v10309_v50, %v438_v47  ;;  %v834_v57 = vmax.bf16 %v10309_v50, %v450_v48 }
 0x1d1   : > { %6979 = vmatprep.subr.bf16.mxu0 %v9915_v58  ;;  %v828_v58 = vmax.bf16 %v10309_v50, %v444_v49 }
 0x1d3   : > { %5822 = vmatpush1.bf16.msra.mxu1 %v9910_v63  ;;  %v9957_v63 = vld [vmem:[#allocation5 + $0xa04] ss:$8 sps:$4 sm:$0xff]  }
 0x1d4   : > { %6980 = vmatpush1.bf16.msra.mxu0 %v9913_v0  ;;  %5823 = vmatprep.subr.bf16.mxu1 %v9918_v1  ;;  %v8079_v0 = vcombine.low %v798_v35, %v810_v36  ;;  %v8091_v1 = vcombine.low %v804_v37, %v816_v38 }
 0x1d5   : > { %6981 = vmatprep.subr.bf16.mxu0 %v9921_v2  ;;  %5693 = vmatmul.mubr.bf16.gmra.mrb[20].mxu1 %v8007_v3  ;;  %v8104_v2 = vcombine.high %v822_v56, %v834_v57  ;;  %v8116_v3 = vcombine.high %v828_v58, %v840_v59 }
 0x1d6   : > { %6851 = vmatmul.mubr.bf16.gmra.mrb[20].mxu0 %v8019_v4  ;;  %5702 = vmatprep.mubr.bf16.mxu1 %v8032_v5  ;;  %v462_v4 = vld [vmem:[%s10501_s30 + $0x790] sm:$0xff] }
 0x1d7   : > { %6860 = vmatprep.mubr.bf16.mxu0 %v8044_v6  ;;  %5824 = vmatpush1.bf16.msra.mxu1 %v9916_v11  ;;  %v474_v5 = vld [vmem:[%s10501_s30 + $0x7f0] sm:$0xff]  ;;  %v468_v6 = vld [vmem:[%s10501_s30 + $0x7c0] sm:$0xff]  ;;  %v846_v8 = vmax.bf16 %v10309_v50, %v462_v4  ;;  %v864_v11 = vmax.bf16 %v10309_v50, %v480_v7 }
 0x1d8   : > { %6982 = vmatpush1.bf16.msra.mxu0 %v9919_v12  ;;  %5825 = vmatprep.subr.bf16.mxu1 %v9924_v13  ;;  %v858_v9 = vmax.bf16 %v10309_v50, %v474_v5  ;;  %v852_v10 = vmax.bf16 %v10309_v50, %v468_v6  ;;  %v8103_v12 = vcombine.low %v822_v56, %v834_v57  ;;  %v576_v56 = vld [vmem:[%s10501_s30 + $0xb20] sm:$0xff] }
 0x1d9   : > { %6983 = vmatprep.subr.bf16.mxu0 %v9927_v14  ;;  %v8115_v13 = vcombine.low %v828_v58, %v840_v59  ;;  %v600_v4 = vld [vmem:[%s10501_s30 + $0xbe0] sm:$0xff] }
 0x1da   : > { %v8128_v14 = vcombine.high %v846_v8, %v858_v9  ;;  %v8140_v15 = vcombine.high %v852_v10, %v864_v11 }
 0x1db   : > { %5826 = vmatpush1.bf16.msra.mxu1 %v9922_v19  ;;  %v504_v19 = vld [vmem:[%s10501_s30 + $0x8e0] sm:$0xff] }
 0x1dc   : > { %6984 = vmatpush1.bf16.msra.mxu0 %v9925_v20  ;;  %5827 = vmatprep.subr.bf16.mxu1 %v9930_v21  ;;  %v870_v20 = vmax.bf16 %v10309_v50, %v486_v16  ;;  %v882_v21 = vmax.bf16 %v10309_v50, %v498_v17  ;;  %v241_v16 = vld [vmem:[%s10501_s30 + $0xa8] sm:$0xff] }
 0x1dd   : > { %6985 = vmatprep.subr.bf16.mxu0 %v9933_v22  ;;  %5703 = vmatmul.mubr.bf16.gmra.mrb[24].mxu1 %v8031_v23  ;;  %v876_v22 = vmax.bf16 %v10309_v50, %v492_v18  ;;  %v888_v23 = vmax.bf16 %v10309_v50, %v504_v19 }
 0x1de   : > { %6861 = vmatmul.mubr.bf16.gmra.mrb[24].mxu0 %v8043_v24  ;;  %5712 = vmatprep.mubr.bf16.mxu1 %v8056_v25  ;;  %v8127_v24 = vcombine.low %v846_v8, %v858_v9  ;;  %v8139_v25 = vcombine.low %v852_v10, %v864_v11  ;;  %v8151_v36 = vcombine.low %v870_v20, %v882_v21 }
 0x1df   : > { %6870 = vmatprep.mubr.bf16.mxu0 %v8068_v26  ;;  %5828 = vmatpush1.bf16.msra.mxu1 %v9928_v31  ;;  %v8152_v26 = vcombine.high %v870_v20, %v882_v21  ;;  %v8164_v27 = vcombine.high %v876_v22, %v888_v23  ;;  %v528_v31 = vld [vmem:[%s10501_s30 + $0x9a0] sm:$0xff]  ;;  %v8163_v37 = vcombine.low %v876_v22, %v888_v23 }
 0x1e0   : > { %6986 = vmatpush1.bf16.msra.mxu0 %v9931_v32  ;;  %5829 = vmatprep.subr.bf16.mxu1 %v9936_v33  ;;  %v894_v32 = vmax.bf16 %v10309_v50, %v510_v28  ;;  %v906_v33 = vmax.bf16 %v10309_v50, %v522_v29  ;;  %v912_v35 = vmax.bf16 %v10309_v50, %v528_v31  ;;  %v265_v28 = vld [vmem:[%s10501_s30 + $0x168] sm:$0xff] }
 0x1e1   : > { %6987 = vmatprep.subr.bf16.mxu0 %v9939_v34  ;;  %v900_v34 = vmax.bf16 %v10309_v50, %v516_v30  ;;  %v984_v8 = vmax.bf16 %v10309_v50, %v600_v4  ;;  %v625_v20 = vmax.bf16 %v10309_v50, %v241_v16  ;;  %v325_v16 = vld [vmem:[%s10501_s30 + $0x348] sm:$0xff] }
 0x1e2   : > { %v8176_v38 = vcombine.high %v894_v32, %v906_v33  ;;  %v8175_v48 = vcombine.low %v894_v32, %v906_v33  ;;  %v649_v32 = vmax.bf16 %v10309_v50, %v265_v28  ;;  %v9990_v28 = vld [vmem:[#allocation5 + $0x464] ss:$8 sps:$4 sm:$0xff]  }
 0x1e3   : > { %5830 = vmatpush1.bf16.msra.mxu1 %v9934_v39  ;;  %v8188_v39 = vcombine.high %v900_v34, %v912_v35  ;;  %v8187_v49 = vcombine.low %v900_v34, %v912_v35  ;;  %v9952_v35 = vld [vmem:[#allocation5 + $0x400] ss:$8 sps:$4 sm:$0xff]  }
 0x1e4   : > { %6988 = vmatpush1.bf16.msra.mxu0 %v9937_v40  ;;  %5831 = vmatprep.subr.bf16.mxu1 %v9942_v41  ;;  %v534_v40 = vld [vmem:[%s10501_s30 + $0x9d0] sm:$0xff] }
 0x1e5   : > { %6989 = vmatprep.subr.bf16.mxu0 %v9945_v42  ;;  %5713 = vmatmul.mubr.bf16.gmra.mrb[28].mxu1 %v8055_v43  ;;  %v546_v41 = vld [vmem:[%s10501_s30 + $0xa30] sm:$0xff]  ;;  %v540_v42 = vld [vmem:[%s10501_s30 + $0xa00] sm:$0xff] }
 0x1e6   : > { %6871 = vmatmul.mubr.bf16.gmra.mrb[28].mxu0 %v8067_v44  ;;  %5722 = vmatprep.mubr.bf16.mxu1 %v8080_v45  ;;  %v552_v43 = vld [vmem:[%s10501_s30 + $0xa60] sm:$0xff]  ;;  %v918_v44 = vmax.bf16 %v10309_v50, %v534_v40  ;;  %v930_v45 = vmax.bf16 %v10309_v50, %v546_v41  ;;  %v283_v40 = vld [vmem:[%s10501_s30 + $0x1f8] sm:$0xff]  ;;  %v277_v41 = vld [vmem:[%s10501_s30 + $0x1c8] sm:$0xff] }
 0x1e7   : > { %6880 = vmatprep.mubr.bf16.mxu0 %v8092_v46  ;;  %5832 = vmatpush1.bf16.msra.mxu1 %v9940_v52  ;;  %v924_v46 = vmax.bf16 %v10309_v50, %v540_v42  ;;  %v936_v47 = vmax.bf16 %v10309_v50, %v552_v43  ;;  %v289_v42 = vld [vmem:[%s10501_s30 + $0x228] sm:$0xff]  ;;  %v9960_v43 = vld [vmem:[#allocation5 + $0x414] ss:$8 sps:$4 sm:$0xff]  }
 0x1e8   : > { %6990 = vmatpush1.bf16.msra.mxu0 %v9943_v53  ;;  %5833 = vmatprep.subr.bf16.mxu1 %v9948_v54  ;;  %v8200_v51 = vcombine.high %v918_v44, %v930_v45  ;;  %v558_v53 = vld [vmem:[%s10501_s30 + $0xa90] sm:$0xff] }
 0x1e9   : > { %6991 = vmatprep.subr.bf16.mxu0 %v9951_v55  ;;  %v8212_v52 = vcombine.high %v924_v46, %v936_v47  ;;  %v570_v54 = vld [vmem:[%s10501_s30 + $0xaf0] sm:$0xff]  ;;  %v564_v55 = vld [vmem:[%s10501_s30 + $0xac0] sm:$0xff]  ;;  %v942_v57 = vmax.bf16 %v10309_v50, %v558_v53 }
 0x1ea   : > { %v954_v58 = vmax.bf16 %v10309_v50, %v570_v54  ;;  %v948_v59 = vmax.bf16 %v10309_v50, %v564_v55  ;;  %v9969_v53 = vld [vmem:[#allocation5 + $0xa24] ss:$8 sps:$4 sm:$0xff]  }
 0x1eb   : > { %5834 = vmatpush1.bf16.msra.mxu1 %v9946_v60  ;;  %v960_v60 = vmax.bf16 %v10309_v50, %v576_v56 }
 0x1ec   : > { %6992 = vmatpush1.bf16.msra.mxu0 %v9949_v61  ;;  %5996 = vmatprep.subr.bf16.mxu1 %v9954_v62  ;;  %v8199_v61 = vcombine.low %v918_v44, %v930_v45  ;;  %v8211_v62 = vcombine.low %v924_v46, %v936_v47  ;;  %v8223_v9 = vcombine.low %v942_v57, %v954_v58  ;;  %v9963_v44 = vld [vmem:[#allocation5 + $0xa14] ss:$8 sps:$4 sm:$0xff]   ;;  %v9958_v46 = vld [vmem:[#allocation5 + $0x410] ss:$8 sps:$4 sm:$0xff]  }
 0x1ed   : > { %7154 = vmatprep.subr.bf16.mxu0 %v9957_v63  ;;  %5723 = vmatmul.mubr.bf16.gmra.mrb[32].mxu1 %v8079_v0  ;;  %v8224_v63 = vcombine.high %v942_v57, %v954_v58  ;;  %v8236_v0 = vcombine.high %v948_v59, %v960_v60  ;;  %v8235_v10 = vcombine.low %v948_v59, %v960_v60  ;;  %v9961_v47 = vld [vmem:[#allocation5 + $0xa10] ss:$8 sps:$4 sm:$0xff]   ;;  %v9964_v58 = vld [vmem:[#allocation5 + $0x420] ss:$8 sps:$4 sm:$0xff]  }
 0x1ee   : > { %6881 = vmatmul.mubr.bf16.gmra.mrb[32].mxu0 %v8091_v1  ;;  %5732 = vmatprep.mubr.bf16.mxu1 %v8104_v2  ;;  %v582_v1 = vld [vmem:[%s10501_s30 + $0xb50] sm:$0xff]  ;;  %v9967_v59 = vld [vmem:[#allocation5 + $0xa20] ss:$8 sps:$4 sm:$0xff]   ;;  %v295_v60 = vld [vmem:[%s10501_s30 + $0x258] sm:$0xff] }
 0x1ef   : > { %6890 = vmatprep.mubr.bf16.mxu0 %v8116_v3  ;;  %v594_v2 = vld [vmem:[%s10501_s30 + $0xbb0] sm:$0xff]  ;;  %v588_v3 = vld [vmem:[%s10501_s30 + $0xb80] sm:$0xff]  ;;  %v966_v5 = vmax.bf16 %v10309_v50, %v582_v1 }
 0x1f0   : > { %v978_v6 = vmax.bf16 %v10309_v50, %v594_v2  ;;  %v972_v7 = vmax.bf16 %v10309_v50, %v588_v3  ;;  %v9975_v1 = vld [vmem:[#allocation5 + $0xa34] ss:$8 sps:$4 sm:$0xff]   ;;  %v679_v2 = vmax.bf16 %v10309_v50, %v295_v60  ;;  %v10003_v60 = vld [vmem:[#allocation5 + $0xa80] ss:$8 sps:$4 sm:$0xff]  }
 0x1f2   : > { %v8248_v11 = vcombine.high %v966_v5, %v978_v6  ;;  %v8247_v21 = vcombine.low %v966_v5, %v978_v6  ;;  %v8259_v22 = vcombine.low %v972_v7, %v984_v8  ;;  %v9970_v6 = vld [vmem:[#allocation5 + $0x430] ss:$8 sps:$4 sm:$0xff]  }
 0x1f5   : > { %5733 = vmatmul.mubr.bf16.gmra.mrb[36].mxu1 %v8103_v12  ;;  %v8260_v12 = vcombine.high %v972_v7, %v984_v8  ;;  %v9973_v7 = vld [vmem:[#allocation5 + $0xa30] ss:$8 sps:$4 sm:$0xff]   ;;  %v9978_v8 = vld [vmem:[#allocation5 + $0x444] ss:$8 sps:$4 sm:$0xff]  }
 0x1f6   : > { %6891 = vmatmul.mubr.bf16.gmra.mrb[36].mxu0 %v8115_v13  ;;  %5742 = vmatprep.mubr.bf16.mxu1 %v8128_v14  ;;  %v223_v13 = vld [vmem:[%s10501_s30 + $0x18] sm:$0xff] }
 0x1f7   : > { %6900 = vmatprep.mubr.bf16.mxu0 %v8140_v15  ;;  %v235_v14 = vld [vmem:[%s10501_s30 + $0x78] sm:$0xff]  ;;  %v229_v15 = vld [vmem:[%s10501_s30 + $0x48] sm:$0xff]  ;;  %v607_v17 = vmax.bf16 %v10309_v50, %v223_v13 }
 0x1f8   : > { %v619_v18 = vmax.bf16 %v10309_v50, %v235_v14  ;;  %v613_v19 = vmax.bf16 %v10309_v50, %v229_v15  ;;  %v319_v14 = vld [vmem:[%s10501_s30 + $0x318] sm:$0xff] }
 0x1f9   : > { %v331_v15 = vld [vmem:[%s10501_s30 + $0x378] sm:$0xff] }
 0x1fa   : > { %v7890_v23 = vcombine.high %v607_v17, %v619_v18  ;;  %v7889_v33 = vcombine.low %v607_v17, %v619_v18  ;;  %v7901_v34 = vcombine.low %v613_v19, %v625_v20  ;;  %v337_v17 = vld [vmem:[%s10501_s30 + $0x3a8] sm:$0xff] }
 0x1fb   : > { %v9976_v18 = vld [vmem:[#allocation5 + $0x440] ss:$8 sps:$4 sm:$0xff]  }
 0x1fd   : > { %5743 = vmatmul.mubr.bf16.gmra.mrb[40].mxu1 %v8127_v24  ;;  %v7902_v24 = vcombine.high %v613_v19, %v625_v20  ;;  %v9979_v19 = vld [vmem:[#allocation5 + $0xa40] ss:$8 sps:$4 sm:$0xff]   ;;  %v9984_v20 = vld [vmem:[#allocation5 + $0x454] ss:$8 sps:$4 sm:$0xff]  }
 0x1fe   : > { %6901 = vmatmul.mubr.bf16.gmra.mrb[40].mxu0 %v8139_v25  ;;  %5752 = vmatprep.mubr.bf16.mxu1 %v8152_v26  ;;  %v247_v25 = vld [vmem:[%s10501_s30 + $0xd8] sm:$0xff] }
 0x1ff   : > { %6910 = vmatprep.mubr.bf16.mxu0 %v8164_v27  ;;  %v259_v26 = vld [vmem:[%s10501_s30 + $0x138] sm:$0xff]  ;;  %v253_v27 = vld [vmem:[%s10501_s30 + $0x108] sm:$0xff]  ;;  %v631_v29 = vmax.bf16 %v10309_v50, %v247_v25  ;;  %v721_v25 = vmax.bf16 %v10309_v50, %v337_v17 }
 0x200   : > { %v643_v30 = vmax.bf16 %v10309_v50, %v259_v26  ;;  %v637_v31 = vmax.bf16 %v10309_v50, %v253_v27  ;;  %v9982_v26 = vld [vmem:[#allocation5 + $0x450] ss:$8 sps:$4 sm:$0xff]   ;;  %v10020_v17 = vld [vmem:[#allocation5 + $0x4b4] ss:$8 sps:$4 sm:$0xff]  }
 0x201   : > { %v9985_v27 = vld [vmem:[#allocation5 + $0xa50] ss:$8 sps:$4 sm:$0xff]  }
 0x202   : > { %v7913_v54 = vcombine.low %v631_v29, %v643_v30  ;;  %v7925_v55 = vcombine.low %v637_v31, %v649_v32 }
 0x205   : > { %5753 = vmatmul.mubr.bf16.gmra.mrb[44].mxu1 %v8151_v36  ;;  %v9955_v36 = vld [vmem:[#allocation5 + $0xa00] ss:$8 sps:$4 sm:$0xff]  }
 0x206   : > { %6911 = vmatmul.mubr.bf16.gmra.mrb[44].mxu0 %v8163_v37  ;;  %5762 = vmatprep.mubr.bf16.mxu1 %v8176_v38  ;;  %v271_v37 = vld [vmem:[%s10501_s30 + $0x198] sm:$0xff]  ;;  %v7914_v38 = vcombine.high %v631_v29, %v643_v30  ;;  %v9993_v29 = vld [vmem:[#allocation5 + $0xa64] ss:$8 sps:$4 sm:$0xff]  }
 0x207   : > { %6920 = vmatprep.mubr.bf16.mxu0 %v8188_v39  ;;  %v7926_v39 = vcombine.high %v637_v31, %v649_v32  ;;  %v655_v45 = vmax.bf16 %v10309_v50, %v271_v37  ;;  %v361_v37 = vld [vmem:[%s10501_s30 + $0x468] sm:$0xff] }
 0x20d   : > { %5763 = vmatmul.mubr.bf16.gmra.mrb[48].mxu1 %v8175_v48  ;;  %v667_v48 = vmax.bf16 %v10309_v50, %v283_v40  ;;  %v9996_v40 = vld [vmem:[#allocation5 + $0x474] ss:$8 sps:$4 sm:$0xff]  }
 0x20e   : > { %6921 = vmatmul.mubr.bf16.gmra.mrb[48].mxu0 %v8187_v49  ;;  %5772 = vmatprep.mubr.bf16.mxu1 %v8200_v51  ;;  %v661_v49 = vmax.bf16 %v10309_v50, %v277_v41  ;;  %v673_v51 = vmax.bf16 %v10309_v50, %v289_v42  ;;  %v9999_v41 = vld [vmem:[#allocation5 + $0xa74] ss:$8 sps:$4 sm:$0xff]  }
 0x20f   : > { %6930 = vmatprep.mubr.bf16.mxu0 %v8212_v52  ;;  %v9966_v52 = vld [vmem:[#allocation5 + $0x424] ss:$8 sps:$4 sm:$0xff]   ;;  %v7938_v56 = vcombine.high %v655_v45, %v667_v48 }
 0x210   : > { %v7950_v57 = vcombine.high %v661_v49, %v673_v51 }
 0x215   : > { %5773 = vmatmul.mubr.bf16.gmra.mrb[52].mxu1 %v8199_v61  ;;  %v307_v61 = vld [vmem:[%s10501_s30 + $0x2b8] sm:$0xff] }
 0x216   : > { %6931 = vmatmul.mubr.bf16.gmra.mrb[52].mxu0 %v8211_v62  ;;  %5782 = vmatprep.mubr.bf16.mxu1 %v8224_v63  ;;  %v301_v62 = vld [vmem:[%s10501_s30 + $0x288] sm:$0xff]  ;;  %v691_v3 = vmax.bf16 %v10309_v50, %v307_v61  ;;  %v10008_v61 = vld [vmem:[#allocation5 + $0x494] ss:$8 sps:$4 sm:$0xff]  }
 0x217   : > { %6940 = vmatprep.mubr.bf16.mxu0 %v8236_v0  ;;  %v313_v63 = vld [vmem:[%s10501_s30 + $0x2e8] sm:$0xff]  ;;  %v9972_v0 = vld [vmem:[#allocation5 + $0x434] ss:$8 sps:$4 sm:$0xff]   ;;  %v685_v4 = vmax.bf16 %v10309_v50, %v301_v62 }
 0x218   : > { %v697_v5 = vmax.bf16 %v10309_v50, %v313_v63  ;;  %v7961_v30 = vcombine.low %v679_v2, %v691_v3  ;;  %v10011_v62 = vld [vmem:[#allocation5 + $0xa94] ss:$8 sps:$4 sm:$0xff]  }
 0x21a   : > { %v7974_v13 = vcombine.high %v685_v4, %v697_v5  ;;  %v7973_v31 = vcombine.low %v685_v4, %v697_v5  ;;  %v10009_v4 = vld [vmem:[#allocation5 + $0xa90] ss:$8 sps:$4 sm:$0xff]   ;;  %v10014_v5 = vld [vmem:[#allocation5 + $0x4a4] ss:$8 sps:$4 sm:$0xff]  }
 0x21d   : > { %5783 = vmatmul.mubr.bf16.gmra.mrb[56].mxu1 %v8223_v9  ;;  %v9981_v9 = vld [vmem:[#allocation5 + $0xa44] ss:$8 sps:$4 sm:$0xff]  }
 0x21e   : > { %6941 = vmatmul.mubr.bf16.gmra.mrb[56].mxu0 %v8235_v10  ;;  %5792 = vmatprep.mubr.bf16.mxu1 %v8248_v11  ;;  %v7937_v10 = vcombine.low %v655_v45, %v667_v48  ;;  %v7949_v11 = vcombine.low %v661_v49, %v673_v51  ;;  %v745_v45 = vmax.bf16 %v10309_v50, %v361_v37  ;;  %v10002_v48 = vld [vmem:[#allocation5 + $0x484] ss:$8 sps:$4 sm:$0xff]   ;;  %v10032_v37 = vld [vmem:[#allocation5 + $0x4d4] ss:$8 sps:$4 sm:$0xff]  }
 0x21f   : > { %6950 = vmatprep.mubr.bf16.mxu0 %v8260_v12  ;;  %v7962_v12 = vcombine.high %v679_v2, %v691_v3  ;;  %v10005_v49 = vld [vmem:[#allocation5 + $0xa84] ss:$8 sps:$4 sm:$0xff]   ;;  %v10006_v3 = vld [vmem:[#allocation5 + $0x490] ss:$8 sps:$4 sm:$0xff]  }
 0x225   : > { %5793 = vmatmul.mubr.bf16.gmra.mrb[60].mxu1 %v8247_v21  ;;  %v9987_v21 = vld [vmem:[#allocation5 + $0xa54] ss:$8 sps:$4 sm:$0xff]  }
 0x226   : > { %6951 = vmatmul.mubr.bf16.gmra.mrb[60].mxu0 %v8259_v22  ;;  %5835 = vmatprep.mubr.bf16.mxu1 %v7890_v23  ;;  %v703_v22 = vmax.bf16 %v10309_v50, %v319_v14  ;;  %v715_v23 = vmax.bf16 %v10309_v50, %v331_v15  ;;  %v409_v14 = vld [vmem:[%s10501_s30 + $0x5e8] sm:$0xff] }
 0x227   : > { %6993 = vmatprep.mubr.bf16.mxu0 %v7902_v24  ;;  %v709_v24 = vmax.bf16 %v10309_v50, %v325_v16  ;;  %v10012_v15 = vld [vmem:[#allocation5 + $0x4a0] ss:$8 sps:$4 sm:$0xff]  }
 0x228   : > { %v7986_v32 = vcombine.high %v703_v22, %v715_v23  ;;  %v7985_v51 = vcombine.low %v703_v22, %v715_v23  ;;  %v10015_v16 = vld [vmem:[#allocation5 + $0xaa0] ss:$8 sps:$4 sm:$0xff]   ;;  %v793_v22 = vmax.bf16 %v10309_v50, %v409_v14  ;;  %v10018_v23 = vld [vmem:[#allocation5 + $0x4b0] ss:$8 sps:$4 sm:$0xff]  }
 0x22d   : > { %5836 = vmatmul.mubr.bf16.vlgmr.msra.gmra.mrb[0].mxu1 %v7889_v33  ;;  %v7998_v33 = vcombine.high %v709_v24, %v721_v25 }
 0x22e   : > { %6994 = vmatmul.mubr.bf16.vlgmr.msra.gmra.mrb[0].mxu0 %v7901_v34  ;;  %5997 = vmatpush1.bf16.msra.mxu1 %v9952_v35  ;;  %v343_v34 = vld [vmem:[%s10501_s30 + $0x3d8] sm:$0xff] }
 0x22f   : > { %7155 = vmatpush1.bf16.msra.mxu0 %v9955_v36  ;;  %5845 = vmatprep.mubr.bf16.mxu1 %v7914_v38  ;;  %v355_v35 = vld [vmem:[%s10501_s30 + $0x438] sm:$0xff]  ;;  %v349_v36 = vld [vmem:[%s10501_s30 + $0x408] sm:$0xff]  ;;  %v727_v42 = vmax.bf16 %v10309_v50, %v343_v34 }
 0x230   : > { %7003 = vmatprep.mubr.bf16.mxu0 %v7926_v39  ;;  %5998 = vmatprep.subr.bf16.mxu1 %v9960_v43  ;;  %v9988_v38 = vld [vmem:[#allocation5 + $0x460] ss:$8 sps:$4 sm:$0xff]   ;;  %v739_v43 = vmax.bf16 %v10309_v50, %v355_v35 }
 0x231   : > { %7156 = vmatprep.subr.bf16.mxu0 %v9963_v44  ;;  %v9991_v39 = vld [vmem:[#allocation5 + $0xa60] ss:$8 sps:$4 sm:$0xff]   ;;  %v733_v44 = vmax.bf16 %v10309_v50, %v349_v36 }
 0x232   : > { %5999 = vmatpush1.bf16.msra.mxu1 %v9958_v46  ;;  %v9994_v46 = vld [vmem:[#allocation5 + $0x470] ss:$8 sps:$4 sm:$0xff]   ;;  %v433_v34 = vld [vmem:[%s10501_s30 + $0x6a8] sm:$0xff] }
 0x233   : > { %7157 = vmatpush1.bf16.msra.mxu0 %v9961_v47  ;;  %6000 = vmatprep.subr.bf16.mxu1 %v9966_v52  ;;  %v9997_v47 = vld [vmem:[#allocation5 + $0xa70] ss:$8 sps:$4 sm:$0xff]   ;;  %v7997_v52 = vcombine.low %v709_v24, %v721_v25  ;;  %v10026_v25 = vld [vmem:[#allocation5 + $0x4c4] ss:$8 sps:$4 sm:$0xff]   ;;  %v10024_v35 = vld [vmem:[#allocation5 + $0x4c0] ss:$8 sps:$4 sm:$0xff]  }
 0x234   : > { %7158 = vmatprep.subr.bf16.mxu0 %v9969_v53  ;;  %v8010_v53 = vcombine.high %v727_v42, %v739_v43  ;;  %v10021_v24 = vld [vmem:[#allocation5 + $0xab0] ss:$8 sps:$4 sm:$0xff]   ;;  %v10027_v36 = vld [vmem:[#allocation5 + $0xac0] ss:$8 sps:$4 sm:$0xff]  }
 0x235   : > { %5846 = vmatmul.mubr.bf16.gmra.mrb[4].mxu1 %v7913_v54  ;;  %v8022_v54 = vcombine.high %v733_v44, %v745_v45 }
 0x236   : > { %7004 = vmatmul.mubr.bf16.gmra.mrb[4].mxu0 %v7925_v55  ;;  %5855 = vmatprep.mubr.bf16.mxu1 %v7938_v56  ;;  %v367_v55 = vld [vmem:[%s10501_s30 + $0x498] sm:$0xff] }
 0x237   : > { %7013 = vmatprep.mubr.bf16.mxu0 %v7950_v57  ;;  %6001 = vmatpush1.bf16.msra.mxu1 %v9964_v58  ;;  %v379_v56 = vld [vmem:[%s10501_s30 + $0x4f8] sm:$0xff]  ;;  %v373_v57 = vld [vmem:[%s10501_s30 + $0x4c8] sm:$0xff]  ;;  %v751_v63 = vmax.bf16 %v10309_v50, %v367_v55 }
 0x238   : > { %7159 = vmatpush1.bf16.msra.mxu0 %v9967_v59  ;;  %6002 = vmatprep.subr.bf16.mxu1 %v9972_v0  ;;  %v385_v58 = vld [vmem:[%s10501_s30 + $0x528] sm:$0xff]  ;;  %v763_v0 = vmax.bf16 %v10309_v50, %v379_v56 }
 0x239   : > { %7160 = vmatprep.subr.bf16.mxu0 %v9975_v1  ;;  %v10000_v59 = vld [vmem:[#allocation5 + $0x480] ss:$8 sps:$4 sm:$0xff]   ;;  %v757_v1 = vmax.bf16 %v10309_v50, %v373_v57  ;;  %v769_v2 = vmax.bf16 %v10309_v50, %v385_v58  ;;  %v10044_v58 = vld [vmem:[#allocation5 + $0x4f4] ss:$8 sps:$4 sm:$0xff]  }
 0x23a   : > { %v457_v55 = vld [vmem:[%s10501_s30 + $0x768] sm:$0xff] }
 0x23b   : > { %6003 = vmatpush1.bf16.msra.mxu1 %v9970_v6  ;;  %v10017_v6 = vld [vmem:[#allocation5 + $0xaa4] ss:$8 sps:$4 sm:$0xff]   ;;  %v10036_v56 = vld [vmem:[#allocation5 + $0x4e0] ss:$8 sps:$4 sm:$0xff]  }
 0x23c   : > { %7161 = vmatpush1.bf16.msra.mxu0 %v9973_v7  ;;  %6004 = vmatprep.subr.bf16.mxu1 %v9978_v8  ;;  %v8009_v7 = vcombine.low %v727_v42, %v739_v43  ;;  %v8021_v8 = vcombine.low %v733_v44, %v745_v45  ;;  %v817_v42 = vmax.bf16 %v10309_v50, %v433_v34  ;;  %v10030_v43 = vld [vmem:[#allocation5 + $0x4d0] ss:$8 sps:$4 sm:$0xff]   ;;  %v10038_v45 = vld [vmem:[#allocation5 + $0x4e4] ss:$8 sps:$4 sm:$0xff]   ;;  %v10039_v57 = vld [vmem:[#allocation5 + $0xae0] ss:$8 sps:$4 sm:$0xff]  }
 0x23d   : > { %7162 = vmatprep.subr.bf16.mxu0 %v9981_v9  ;;  %5856 = vmatmul.mubr.bf16.gmra.mrb[8].mxu1 %v7937_v10  ;;  %v8034_v9 = vcombine.high %v751_v63, %v763_v0  ;;  %v8046_v10 = vcombine.high %v757_v1, %v769_v2  ;;  %v10033_v44 = vld [vmem:[#allocation5 + $0xad0] ss:$8 sps:$4 sm:$0xff]   ;;  %v517_v34 = vld [vmem:[%s10501_s30 + $0x948] sm:$0xff] }
 0x23e   : > { %7014 = vmatmul.mubr.bf16.gmra.mrb[8].mxu0 %v7949_v11  ;;  %5865 = vmatprep.mubr.bf16.mxu1 %v7962_v12  ;;  %v391_v11 = vld [vmem:[%s10501_s30 + $0x558] sm:$0xff] }
 0x23f   : > { %7023 = vmatprep.mubr.bf16.mxu0 %v7974_v13  ;;  %6005 = vmatpush1.bf16.msra.mxu1 %v9976_v18  ;;  %v403_v12 = vld [vmem:[%s10501_s30 + $0x5b8] sm:$0xff]  ;;  %v397_v13 = vld [vmem:[%s10501_s30 + $0x588] sm:$0xff] }
 0x240   : > { %7163 = vmatpush1.bf16.msra.mxu0 %v9979_v19  ;;  %6006 = vmatprep.subr.bf16.mxu1 %v9984_v20  ;;  %v10023_v18 = vld [vmem:[#allocation5 + $0xab4] ss:$8 sps:$4 sm:$0xff]   ;;  %v775_v19 = vmax.bf16 %v10309_v50, %v391_v11  ;;  %v787_v20 = vmax.bf16 %v10309_v50, %v403_v12  ;;  %v481_v11 = vld [vmem:[%s10501_s30 + $0x828] sm:$0xff] }
 0x241   : > { %7164 = vmatprep.subr.bf16.mxu0 %v9987_v21  ;;  %v781_v21 = vmax.bf16 %v10309_v50, %v397_v13 }
 0x243   : > { %6007 = vmatpush1.bf16.msra.mxu1 %v9982_v26  ;;  %v10029_v26 = vld [vmem:[#allocation5 + $0xac4] ss:$8 sps:$4 sm:$0xff]  }
 0x244   : > { %7165 = vmatpush1.bf16.msra.mxu0 %v9985_v27  ;;  %6008 = vmatprep.subr.bf16.mxu1 %v9990_v28  ;;  %v8033_v27 = vcombine.low %v751_v63, %v763_v0  ;;  %v8045_v28 = vcombine.low %v757_v1, %v769_v2  ;;  %v841_v63 = vmax.bf16 %v10309_v50, %v457_v55  ;;  %v10042_v0 = vld [vmem:[#allocation5 + $0x4f0] ss:$8 sps:$4 sm:$0xff]   ;;  %v10050_v2 = vld [vmem:[#allocation5 + $0x504] ss:$8 sps:$4 sm:$0xff]  }
 0x245   : > { %7166 = vmatprep.subr.bf16.mxu0 %v9993_v29  ;;  %5866 = vmatmul.mubr.bf16.gmra.mrb[12].mxu1 %v7961_v30  ;;  %v8058_v29 = vcombine.high %v775_v19, %v787_v20  ;;  %v8070_v30 = vcombine.high %v781_v21, %v793_v22  ;;  %v10045_v1 = vld [vmem:[#allocation5 + $0xaf0] ss:$8 sps:$4 sm:$0xff]  }
 0x246   : > { %7024 = vmatmul.mubr.bf16.gmra.mrb[12].mxu0 %v7973_v31  ;;  %5875 = vmatprep.mubr.bf16.mxu1 %v7986_v32  ;;  %v415_v31 = vld [vmem:[%s10501_s30 + $0x618] sm:$0xff] }
 0x247   : > { %7033 = vmatprep.mubr.bf16.mxu0 %v7998_v33  ;;  %6009 = vmatpush1.bf16.msra.mxu1 %v9988_v38  ;;  %v427_v32 = vld [vmem:[%s10501_s30 + $0x678] sm:$0xff]  ;;  %v421_v33 = vld [vmem:[%s10501_s30 + $0x648] sm:$0xff] }
 0x248   : > { %7167 = vmatpush1.bf16.msra.mxu0 %v9991_v39  ;;  %6010 = vmatprep.subr.bf16.mxu1 %v9996_v40  ;;  %v10035_v38 = vld [vmem:[#allocation5 + $0xad4] ss:$8 sps:$4 sm:$0xff]   ;;  %v799_v39 = vmax.bf16 %v10309_v50, %v415_v31  ;;  %v811_v40 = vmax.bf16 %v10309_v50, %v427_v32 }
 0x249   : > { %7168 = vmatprep.subr.bf16.mxu0 %v9999_v41  ;;  %v805_v41 = vmax.bf16 %v10309_v50, %v421_v33  ;;  %v511_v32 = vld [vmem:[%s10501_s30 + $0x918] sm:$0xff] }
 0x24a   : > { %v523_v33 = vld [vmem:[%s10501_s30 + $0x978] sm:$0xff] }
 0x24b   : > { %6011 = vmatpush1.bf16.msra.mxu1 %v9994_v46  ;;  %v10041_v46 = vld [vmem:[#allocation5 + $0xae4] ss:$8 sps:$4 sm:$0xff]  }
 0x24c   : > { %7169 = vmatpush1.bf16.msra.mxu0 %v9997_v47  ;;  %6012 = vmatprep.subr.bf16.mxu1 %v10002_v48  ;;  %v8057_v47 = vcombine.low %v775_v19, %v787_v20  ;;  %v8069_v48 = vcombine.low %v781_v21, %v793_v22  ;;  %v487_v20 = vld [vmem:[%s10501_s30 + $0x858] sm:$0xff]  ;;  %v493_v22 = vld [vmem:[%s10501_s30 + $0x888] sm:$0xff] }
 0x24d   : > { %7170 = vmatprep.subr.bf16.mxu0 %v10005_v49  ;;  %5876 = vmatmul.mubr.bf16.gmra.mrb[16].mxu1 %v7985_v51  ;;  %v8082_v49 = vcombine.high %v799_v39, %v811_v40  ;;  %v8094_v51 = vcombine.high %v805_v41, %v817_v42  ;;  %v499_v21 = vld [vmem:[%s10501_s30 + $0x8b8] sm:$0xff] }
 0x24e   : > { %7034 = vmatmul.mubr.bf16.gmra.mrb[16].mxu0 %v7997_v52  ;;  %5885 = vmatprep.mubr.bf16.mxu1 %v8010_v53  ;;  %v439_v52 = vld [vmem:[%s10501_s30 + $0x6d8] sm:$0xff] }
 0x24f   : > { %7043 = vmatprep.mubr.bf16.mxu0 %v8022_v54  ;;  %6013 = vmatpush1.bf16.msra.mxu1 %v10000_v59  ;;  %v451_v53 = vld [vmem:[%s10501_s30 + $0x738] sm:$0xff]  ;;  %v445_v54 = vld [vmem:[%s10501_s30 + $0x708] sm:$0xff] }
 0x250   : > { %7171 = vmatpush1.bf16.msra.mxu0 %v10003_v60  ;;  %6014 = vmatprep.subr.bf16.mxu1 %v10008_v61  ;;  %v10047_v59 = vld [vmem:[#allocation5 + $0xaf4] ss:$8 sps:$4 sm:$0xff]   ;;  %v823_v60 = vmax.bf16 %v10309_v50, %v439_v52  ;;  %v835_v61 = vmax.bf16 %v10309_v50, %v451_v53 }
 0x251   : > { %7172 = vmatprep.subr.bf16.mxu0 %v10011_v62  ;;  %v829_v62 = vmax.bf16 %v10309_v50, %v445_v54 }
 0x253   : > { %6015 = vmatpush1.bf16.msra.mxu1 %v10006_v3  ;;  %v10053_v3 = vld [vmem:[#allocation5 + $0xb04] ss:$8 sps:$4 sm:$0xff]  }
 0x254   : > { %7173 = vmatpush1.bf16.msra.mxu0 %v10009_v4  ;;  %6016 = vmatprep.subr.bf16.mxu1 %v10014_v5  ;;  %v8081_v4 = vcombine.low %v799_v39, %v811_v40  ;;  %v8093_v5 = vcombine.low %v805_v41, %v817_v42 }
 0x255   : > { %7174 = vmatprep.subr.bf16.mxu0 %v10017_v6  ;;  %5886 = vmatmul.mubr.bf16.gmra.mrb[20].mxu1 %v8009_v7  ;;  %v8106_v6 = vcombine.high %v823_v60, %v835_v61  ;;  %v8118_v7 = vcombine.high %v829_v62, %v841_v63 }
 0x256   : > { %7044 = vmatmul.mubr.bf16.gmra.mrb[20].mxu0 %v8021_v8  ;;  %5895 = vmatprep.mubr.bf16.mxu1 %v8034_v9  ;;  %v463_v8 = vld [vmem:[%s10501_s30 + $0x798] sm:$0xff] }
 0x257   : > { %7053 = vmatprep.mubr.bf16.mxu0 %v8046_v10  ;;  %6017 = vmatpush1.bf16.msra.mxu1 %v10012_v15  ;;  %v475_v9 = vld [vmem:[%s10501_s30 + $0x7f8] sm:$0xff]  ;;  %v469_v10 = vld [vmem:[%s10501_s30 + $0x7c8] sm:$0xff]  ;;  %v847_v12 = vmax.bf16 %v10309_v50, %v463_v8  ;;  %v865_v15 = vmax.bf16 %v10309_v50, %v481_v11 }
 0x258   : > { %7175 = vmatpush1.bf16.msra.mxu0 %v10015_v16  ;;  %6018 = vmatprep.subr.bf16.mxu1 %v10020_v17  ;;  %v859_v13 = vmax.bf16 %v10309_v50, %v475_v9  ;;  %v853_v14 = vmax.bf16 %v10309_v50, %v469_v10  ;;  %v8105_v16 = vcombine.low %v823_v60, %v835_v61  ;;  %v577_v60 = vld [vmem:[%s10501_s30 + $0xb28] sm:$0xff] }
 0x259   : > { %7176 = vmatprep.subr.bf16.mxu0 %v10023_v18  ;;  %v8117_v17 = vcombine.low %v829_v62, %v841_v63  ;;  %v601_v8 = vld [vmem:[%s10501_s30 + $0xbe8] sm:$0xff] }
 0x25a   : > { %v8130_v18 = vcombine.high %v847_v12, %v859_v13  ;;  %v8142_v19 = vcombine.high %v853_v14, %v865_v15 }
 0x25b   : > { %6019 = vmatpush1.bf16.msra.mxu1 %v10018_v23  ;;  %v505_v23 = vld [vmem:[%s10501_s30 + $0x8e8] sm:$0xff] }
 0x25c   : > { %7177 = vmatpush1.bf16.msra.mxu0 %v10021_v24  ;;  %6020 = vmatprep.subr.bf16.mxu1 %v10026_v25  ;;  %v871_v24 = vmax.bf16 %v10309_v50, %v487_v20  ;;  %v883_v25 = vmax.bf16 %v10309_v50, %v499_v21  ;;  %v242_v20 = vld [vmem:[%s10501_s30 + $0xb0] sm:$0xff] }
 0x25d   : > { %7178 = vmatprep.subr.bf16.mxu0 %v10029_v26  ;;  %5896 = vmatmul.mubr.bf16.gmra.mrb[24].mxu1 %v8033_v27  ;;  %v877_v26 = vmax.bf16 %v10309_v50, %v493_v22  ;;  %v889_v27 = vmax.bf16 %v10309_v50, %v505_v23 }
 0x25e   : > { %7054 = vmatmul.mubr.bf16.gmra.mrb[24].mxu0 %v8045_v28  ;;  %5905 = vmatprep.mubr.bf16.mxu1 %v8058_v29  ;;  %v8129_v28 = vcombine.low %v847_v12, %v859_v13  ;;  %v8141_v29 = vcombine.low %v853_v14, %v865_v15  ;;  %v8153_v40 = vcombine.low %v871_v24, %v883_v25 }
 0x25f   : > { %7063 = vmatprep.mubr.bf16.mxu0 %v8070_v30  ;;  %6021 = vmatpush1.bf16.msra.mxu1 %v10024_v35  ;;  %v8154_v30 = vcombine.high %v871_v24, %v883_v25  ;;  %v8166_v31 = vcombine.high %v877_v26, %v889_v27  ;;  %v529_v35 = vld [vmem:[%s10501_s30 + $0x9a8] sm:$0xff]  ;;  %v8165_v41 = vcombine.low %v877_v26, %v889_v27 }
 0x260   : > { %7179 = vmatpush1.bf16.msra.mxu0 %v10027_v36  ;;  %6022 = vmatprep.subr.bf16.mxu1 %v10032_v37  ;;  %v895_v36 = vmax.bf16 %v10309_v50, %v511_v32  ;;  %v907_v37 = vmax.bf16 %v10309_v50, %v523_v33  ;;  %v913_v39 = vmax.bf16 %v10309_v50, %v529_v35  ;;  %v266_v32 = vld [vmem:[%s10501_s30 + $0x170] sm:$0xff] }
 0x261   : > { %7180 = vmatprep.subr.bf16.mxu0 %v10035_v38  ;;  %v901_v38 = vmax.bf16 %v10309_v50, %v517_v34  ;;  %v985_v12 = vmax.bf16 %v10309_v50, %v601_v8  ;;  %v626_v24 = vmax.bf16 %v10309_v50, %v242_v20  ;;  %v326_v20 = vld [vmem:[%s10501_s30 + $0x350] sm:$0xff] }
 0x262   : > { %v8178_v42 = vcombine.high %v895_v36, %v907_v37  ;;  %v8177_v53 = vcombine.low %v895_v36, %v907_v37  ;;  %v650_v36 = vmax.bf16 %v10309_v50, %v266_v32  ;;  %v10086_v32 = vld [vmem:[#allocation5 + $0x564] ss:$8 sps:$4 sm:$0xff]  }
 0x263   : > { %6023 = vmatpush1.bf16.msra.mxu1 %v10030_v43  ;;  %v8190_v43 = vcombine.high %v901_v38, %v913_v39  ;;  %v8189_v54 = vcombine.low %v901_v38, %v913_v39  ;;  %v10048_v39 = vld [vmem:[#allocation5 + $0x500] ss:$8 sps:$4 sm:$0xff]  }
 0x264   : > { %7181 = vmatpush1.bf16.msra.mxu0 %v10033_v44  ;;  %6024 = vmatprep.subr.bf16.mxu1 %v10038_v45  ;;  %v535_v44 = vld [vmem:[%s10501_s30 + $0x9d8] sm:$0xff] }
 0x265   : > { %7182 = vmatprep.subr.bf16.mxu0 %v10041_v46  ;;  %5906 = vmatmul.mubr.bf16.gmra.mrb[28].mxu1 %v8057_v47  ;;  %v547_v45 = vld [vmem:[%s10501_s30 + $0xa38] sm:$0xff]  ;;  %v541_v46 = vld [vmem:[%s10501_s30 + $0xa08] sm:$0xff] }
 0x266   : > { %7064 = vmatmul.mubr.bf16.gmra.mrb[28].mxu0 %v8069_v48  ;;  %5915 = vmatprep.mubr.bf16.mxu1 %v8082_v49  ;;  %v553_v47 = vld [vmem:[%s10501_s30 + $0xa68] sm:$0xff]  ;;  %v919_v48 = vmax.bf16 %v10309_v50, %v535_v44  ;;  %v931_v49 = vmax.bf16 %v10309_v50, %v547_v45  ;;  %v284_v44 = vld [vmem:[%s10501_s30 + $0x200] sm:$0xff]  ;;  %v278_v45 = vld [vmem:[%s10501_s30 + $0x1d0] sm:$0xff] }
 0x267   : > { %7073 = vmatprep.mubr.bf16.mxu0 %v8094_v51  ;;  %6025 = vmatpush1.bf16.msra.mxu1 %v10036_v56  ;;  %v925_v51 = vmax.bf16 %v10309_v50, %v541_v46  ;;  %v937_v52 = vmax.bf16 %v10309_v50, %v553_v47  ;;  %v290_v46 = vld [vmem:[%s10501_s30 + $0x230] sm:$0xff] }
 0x268   : > { %7183 = vmatpush1.bf16.msra.mxu0 %v10039_v57  ;;  %6026 = vmatprep.subr.bf16.mxu1 %v10044_v58  ;;  %v8202_v55 = vcombine.high %v919_v48, %v931_v49  ;;  %v559_v57 = vld [vmem:[%s10501_s30 + $0xa98] sm:$0xff] }
 0x269   : > { %7184 = vmatprep.subr.bf16.mxu0 %v10047_v59  ;;  %v8214_v56 = vcombine.high %v925_v51, %v937_v52  ;;  %v571_v58 = vld [vmem:[%s10501_s30 + $0xaf8] sm:$0xff]  ;;  %v565_v59 = vld [vmem:[%s10501_s30 + $0xac8] sm:$0xff]  ;;  %v943_v61 = vmax.bf16 %v10309_v50, %v559_v57 }
 0x26a   : > { %v955_v62 = vmax.bf16 %v10309_v50, %v571_v58  ;;  %v949_v63 = vmax.bf16 %v10309_v50, %v565_v59  ;;  %v10056_v47 = vld [vmem:[#allocation5 + $0x514] ss:$8 sps:$4 sm:$0xff]   ;;  %v10065_v57 = vld [vmem:[#allocation5 + $0xb24] ss:$8 sps:$4 sm:$0xff]  }
 0x26b   : > { %6027 = vmatpush1.bf16.msra.mxu1 %v10042_v0  ;;  %v961_v0 = vmax.bf16 %v10309_v50, %v577_v60 }
 0x26c   : > { %7185 = vmatpush1.bf16.msra.mxu0 %v10045_v1  ;;  %6189 = vmatprep.subr.bf16.mxu1 %v10050_v2  ;;  %v8201_v1 = vcombine.low %v919_v48, %v931_v49  ;;  %v8213_v2 = vcombine.low %v925_v51, %v937_v52  ;;  %v8225_v13 = vcombine.low %v943_v61, %v955_v62  ;;  %v10059_v48 = vld [vmem:[#allocation5 + $0xb14] ss:$8 sps:$4 sm:$0xff]   ;;  %v10054_v51 = vld [vmem:[#allocation5 + $0x510] ss:$8 sps:$4 sm:$0xff]  }
 0x26d   : > { %7347 = vmatprep.subr.bf16.mxu0 %v10053_v3  ;;  %5916 = vmatmul.mubr.bf16.gmra.mrb[32].mxu1 %v8081_v4  ;;  %v8226_v3 = vcombine.high %v943_v61, %v955_v62  ;;  %v8238_v4 = vcombine.high %v949_v63, %v961_v0  ;;  %v8237_v14 = vcombine.low %v949_v63, %v961_v0  ;;  %v10057_v52 = vld [vmem:[#allocation5 + $0xb10] ss:$8 sps:$4 sm:$0xff]   ;;  %v10060_v62 = vld [vmem:[#allocation5 + $0x520] ss:$8 sps:$4 sm:$0xff]  }
 0x26e   : > { %7074 = vmatmul.mubr.bf16.gmra.mrb[32].mxu0 %v8093_v5  ;;  %5925 = vmatprep.mubr.bf16.mxu1 %v8106_v6  ;;  %v583_v5 = vld [vmem:[%s10501_s30 + $0xb58] sm:$0xff]  ;;  %v10063_v63 = vld [vmem:[#allocation5 + $0xb20] ss:$8 sps:$4 sm:$0xff]  }
 0x26f   : > { %7083 = vmatprep.mubr.bf16.mxu0 %v8118_v7  ;;  %v595_v6 = vld [vmem:[%s10501_s30 + $0xbb8] sm:$0xff]  ;;  %v589_v7 = vld [vmem:[%s10501_s30 + $0xb88] sm:$0xff]  ;;  %v967_v9 = vmax.bf16 %v10309_v50, %v583_v5  ;;  %v296_v0 = vld [vmem:[%s10501_s30 + $0x260] sm:$0xff] }
 0x270   : > { %v979_v10 = vmax.bf16 %v10309_v50, %v595_v6  ;;  %v973_v11 = vmax.bf16 %v10309_v50, %v589_v7  ;;  %v10071_v5 = vld [vmem:[#allocation5 + $0xb34] ss:$8 sps:$4 sm:$0xff]   ;;  %v680_v6 = vmax.bf16 %v10309_v50, %v296_v0  ;;  %v10099_v0 = vld [vmem:[#allocation5 + $0xb80] ss:$8 sps:$4 sm:$0xff]  }
 0x272   : > { %v8250_v15 = vcombine.high %v967_v9, %v979_v10  ;;  %v8249_v25 = vcombine.low %v967_v9, %v979_v10  ;;  %v8261_v26 = vcombine.low %v973_v11, %v985_v12  ;;  %v10066_v10 = vld [vmem:[#allocation5 + $0x530] ss:$8 sps:$4 sm:$0xff]  }
 0x275   : > { %5926 = vmatmul.mubr.bf16.gmra.mrb[36].mxu1 %v8105_v16  ;;  %v8262_v16 = vcombine.high %v973_v11, %v985_v12  ;;  %v10069_v11 = vld [vmem:[#allocation5 + $0xb30] ss:$8 sps:$4 sm:$0xff]   ;;  %v10074_v12 = vld [vmem:[#allocation5 + $0x544] ss:$8 sps:$4 sm:$0xff]  }
 0x276   : > { %7084 = vmatmul.mubr.bf16.gmra.mrb[36].mxu0 %v8117_v17  ;;  %5935 = vmatprep.mubr.bf16.mxu1 %v8130_v18  ;;  %v224_v17 = vld [vmem:[%s10501_s30 + $0x20] sm:$0xff] }
 0x277   : > { %7093 = vmatprep.mubr.bf16.mxu0 %v8142_v19  ;;  %v236_v18 = vld [vmem:[%s10501_s30 + $0x80] sm:$0xff]  ;;  %v230_v19 = vld [vmem:[%s10501_s30 + $0x50] sm:$0xff]  ;;  %v608_v21 = vmax.bf16 %v10309_v50, %v224_v17 }
 0x278   : > { %v620_v22 = vmax.bf16 %v10309_v50, %v236_v18  ;;  %v614_v23 = vmax.bf16 %v10309_v50, %v230_v19  ;;  %v320_v18 = vld [vmem:[%s10501_s30 + $0x320] sm:$0xff] }
 0x279   : > { %v332_v19 = vld [vmem:[%s10501_s30 + $0x380] sm:$0xff] }
 0x27a   : > { %v7892_v27 = vcombine.high %v608_v21, %v620_v22  ;;  %v7891_v37 = vcombine.low %v608_v21, %v620_v22  ;;  %v7903_v38 = vcombine.low %v614_v23, %v626_v24  ;;  %v338_v21 = vld [vmem:[%s10501_s30 + $0x3b0] sm:$0xff]  ;;  %v10072_v22 = vld [vmem:[#allocation5 + $0x540] ss:$8 sps:$4 sm:$0xff]  }
 0x27d   : > { %5936 = vmatmul.mubr.bf16.gmra.mrb[40].mxu1 %v8129_v28  ;;  %v7904_v28 = vcombine.high %v614_v23, %v626_v24  ;;  %v10075_v23 = vld [vmem:[#allocation5 + $0xb40] ss:$8 sps:$4 sm:$0xff]   ;;  %v10080_v24 = vld [vmem:[#allocation5 + $0x554] ss:$8 sps:$4 sm:$0xff]  }
 0x27e   : > { %7094 = vmatmul.mubr.bf16.gmra.mrb[40].mxu0 %v8141_v29  ;;  %5945 = vmatprep.mubr.bf16.mxu1 %v8154_v30  ;;  %v248_v29 = vld [vmem:[%s10501_s30 + $0xe0] sm:$0xff] }
 0x27f   : > { %7103 = vmatprep.mubr.bf16.mxu0 %v8166_v31  ;;  %v260_v30 = vld [vmem:[%s10501_s30 + $0x140] sm:$0xff]  ;;  %v254_v31 = vld [vmem:[%s10501_s30 + $0x110] sm:$0xff]  ;;  %v632_v33 = vmax.bf16 %v10309_v50, %v248_v29  ;;  %v722_v29 = vmax.bf16 %v10309_v50, %v338_v21 }
 0x280   : > { %v644_v34 = vmax.bf16 %v10309_v50, %v260_v30  ;;  %v638_v35 = vmax.bf16 %v10309_v50, %v254_v31  ;;  %v10078_v30 = vld [vmem:[#allocation5 + $0x550] ss:$8 sps:$4 sm:$0xff]   ;;  %v10116_v21 = vld [vmem:[#allocation5 + $0x5b4] ss:$8 sps:$4 sm:$0xff]  }
 0x281   : > { %v10081_v31 = vld [vmem:[#allocation5 + $0xb50] ss:$8 sps:$4 sm:$0xff]  }
 0x282   : > { %v7915_v58 = vcombine.low %v632_v33, %v644_v34  ;;  %v7927_v59 = vcombine.low %v638_v35, %v650_v36 }
 0x285   : > { %5946 = vmatmul.mubr.bf16.gmra.mrb[44].mxu1 %v8153_v40  ;;  %v10051_v40 = vld [vmem:[#allocation5 + $0xb00] ss:$8 sps:$4 sm:$0xff]  }
 0x286   : > { %7104 = vmatmul.mubr.bf16.gmra.mrb[44].mxu0 %v8165_v41  ;;  %5955 = vmatprep.mubr.bf16.mxu1 %v8178_v42  ;;  %v272_v41 = vld [vmem:[%s10501_s30 + $0x1a0] sm:$0xff]  ;;  %v7916_v42 = vcombine.high %v632_v33, %v644_v34 }
 0x287   : > { %7113 = vmatprep.mubr.bf16.mxu0 %v8190_v43  ;;  %v7928_v43 = vcombine.high %v638_v35, %v650_v36  ;;  %v656_v49 = vmax.bf16 %v10309_v50, %v272_v41  ;;  %v10089_v33 = vld [vmem:[#allocation5 + $0xb64] ss:$8 sps:$4 sm:$0xff]   ;;  %v362_v41 = vld [vmem:[%s10501_s30 + $0x470] sm:$0xff] }
 0x28d   : > { %5956 = vmatmul.mubr.bf16.gmra.mrb[48].mxu1 %v8177_v53  ;;  %v668_v53 = vmax.bf16 %v10309_v50, %v284_v44  ;;  %v10092_v44 = vld [vmem:[#allocation5 + $0x574] ss:$8 sps:$4 sm:$0xff]  }
 0x28e   : > { %7114 = vmatmul.mubr.bf16.gmra.mrb[48].mxu0 %v8189_v54  ;;  %5965 = vmatprep.mubr.bf16.mxu1 %v8202_v55  ;;  %v662_v54 = vmax.bf16 %v10309_v50, %v278_v45  ;;  %v674_v55 = vmax.bf16 %v10309_v50, %v290_v46  ;;  %v10095_v45 = vld [vmem:[#allocation5 + $0xb74] ss:$8 sps:$4 sm:$0xff]  }
 0x28f   : > { %7123 = vmatprep.mubr.bf16.mxu0 %v8214_v56  ;;  %v10062_v56 = vld [vmem:[#allocation5 + $0x524] ss:$8 sps:$4 sm:$0xff]   ;;  %v7940_v60 = vcombine.high %v656_v49, %v668_v53 }
 0x290   : > { %v7952_v61 = vcombine.high %v662_v54, %v674_v55 }
 0x295   : > { %5966 = vmatmul.mubr.bf16.gmra.mrb[52].mxu1 %v8201_v1  ;;  %v308_v1 = vld [vmem:[%s10501_s30 + $0x2c0] sm:$0xff] }
 0x296   : > { %7124 = vmatmul.mubr.bf16.gmra.mrb[52].mxu0 %v8213_v2  ;;  %5975 = vmatprep.mubr.bf16.mxu1 %v8226_v3  ;;  %v302_v2 = vld [vmem:[%s10501_s30 + $0x290] sm:$0xff]  ;;  %v692_v7 = vmax.bf16 %v10309_v50, %v308_v1 }
 0x297   : > { %7133 = vmatprep.mubr.bf16.mxu0 %v8238_v4  ;;  %v314_v3 = vld [vmem:[%s10501_s30 + $0x2f0] sm:$0xff]  ;;  %v686_v8 = vmax.bf16 %v10309_v50, %v302_v2 }
 0x298   : > { %v10068_v4 = vld [vmem:[#allocation5 + $0x534] ss:$8 sps:$4 sm:$0xff]   ;;  %v698_v9 = vmax.bf16 %v10309_v50, %v314_v3  ;;  %v7963_v34 = vcombine.low %v680_v6, %v692_v7 }
 0x299   : > { %v10104_v1 = vld [vmem:[#allocation5 + $0x594] ss:$8 sps:$4 sm:$0xff]  }
 0x29a   : > { %v7976_v17 = vcombine.high %v686_v8, %v698_v9  ;;  %v7975_v35 = vcombine.low %v686_v8, %v698_v9  ;;  %v10107_v2 = vld [vmem:[#allocation5 + $0xb94] ss:$8 sps:$4 sm:$0xff]   ;;  %v10105_v8 = vld [vmem:[#allocation5 + $0xb90] ss:$8 sps:$4 sm:$0xff]   ;;  %v10110_v9 = vld [vmem:[#allocation5 + $0x5a4] ss:$8 sps:$4 sm:$0xff]  }
 0x29d   : > { %5976 = vmatmul.mubr.bf16.gmra.mrb[56].mxu1 %v8225_v13  ;;  %v10077_v13 = vld [vmem:[#allocation5 + $0xb44] ss:$8 sps:$4 sm:$0xff]  }
 0x29e   : > { %7134 = vmatmul.mubr.bf16.gmra.mrb[56].mxu0 %v8237_v14  ;;  %5985 = vmatprep.mubr.bf16.mxu1 %v8250_v15  ;;  %v7939_v14 = vcombine.low %v656_v49, %v668_v53  ;;  %v7951_v15 = vcombine.low %v662_v54, %v674_v55  ;;  %v746_v49 = vmax.bf16 %v10309_v50, %v362_v41  ;;  %v10098_v53 = vld [vmem:[#allocation5 + $0x584] ss:$8 sps:$4 sm:$0xff]   ;;  %v10128_v41 = vld [vmem:[#allocation5 + $0x5d4] ss:$8 sps:$4 sm:$0xff]  }
 0x29f   : > { %7143 = vmatprep.mubr.bf16.mxu0 %v8262_v16  ;;  %v7964_v16 = vcombine.high %v680_v6, %v692_v7  ;;  %v10101_v54 = vld [vmem:[#allocation5 + $0xb84] ss:$8 sps:$4 sm:$0xff]   ;;  %v10102_v7 = vld [vmem:[#allocation5 + $0x590] ss:$8 sps:$4 sm:$0xff]  }
 0x2a5   : > { %5986 = vmatmul.mubr.bf16.gmra.mrb[60].mxu1 %v8249_v25  ;;  %v10083_v25 = vld [vmem:[#allocation5 + $0xb54] ss:$8 sps:$4 sm:$0xff]  }
 0x2a6   : > { %7144 = vmatmul.mubr.bf16.gmra.mrb[60].mxu0 %v8261_v26  ;;  %6028 = vmatprep.mubr.bf16.mxu1 %v7892_v27  ;;  %v704_v26 = vmax.bf16 %v10309_v50, %v320_v18  ;;  %v716_v27 = vmax.bf16 %v10309_v50, %v332_v19  ;;  %v410_v18 = vld [vmem:[%s10501_s30 + $0x5f0] sm:$0xff]  ;;  %v10108_v19 = vld [vmem:[#allocation5 + $0x5a0] ss:$8 sps:$4 sm:$0xff]  }
 0x2a7   : > { %7186 = vmatprep.mubr.bf16.mxu0 %v7904_v28  ;;  %v710_v28 = vmax.bf16 %v10309_v50, %v326_v20  ;;  %v10111_v20 = vld [vmem:[#allocation5 + $0xba0] ss:$8 sps:$4 sm:$0xff]  }
 0x2a8   : > { %v7988_v36 = vcombine.high %v704_v26, %v716_v27  ;;  %v7987_v55 = vcombine.low %v704_v26, %v716_v27  ;;  %v794_v26 = vmax.bf16 %v10309_v50, %v410_v18  ;;  %v10114_v27 = vld [vmem:[#allocation5 + $0x5b0] ss:$8 sps:$4 sm:$0xff]  }
 0x2ad   : > { %6029 = vmatmul.mubr.bf16.vlgmr.msra.gmra.mrb[0].mxu1 %v7891_v37  ;;  %v8000_v37 = vcombine.high %v710_v28, %v722_v29 }
 0x2ae   : > { %7187 = vmatmul.mubr.bf16.vlgmr.msra.gmra.mrb[0].mxu0 %v7903_v38  ;;  %6190 = vmatpush1.bf16.msra.mxu1 %v10048_v39  ;;  %v344_v38 = vld [vmem:[%s10501_s30 + $0x3e0] sm:$0xff] }
 0x2af   : > { %7348 = vmatpush1.bf16.msra.mxu0 %v10051_v40  ;;  %6038 = vmatprep.mubr.bf16.mxu1 %v7916_v42  ;;  %v356_v39 = vld [vmem:[%s10501_s30 + $0x440] sm:$0xff]  ;;  %v350_v40 = vld [vmem:[%s10501_s30 + $0x410] sm:$0xff]  ;;  %v728_v46 = vmax.bf16 %v10309_v50, %v344_v38 }
 0x2b0   : > { %7196 = vmatprep.mubr.bf16.mxu0 %v7928_v43  ;;  %6191 = vmatprep.subr.bf16.mxu1 %v10056_v47  ;;  %v10084_v42 = vld [vmem:[#allocation5 + $0x560] ss:$8 sps:$4 sm:$0xff]   ;;  %v740_v47 = vmax.bf16 %v10309_v50, %v356_v39  ;;  %v434_v38 = vld [vmem:[%s10501_s30 + $0x6b0] sm:$0xff] }
 0x2b1   : > { %7349 = vmatprep.subr.bf16.mxu0 %v10059_v48  ;;  %v10087_v43 = vld [vmem:[#allocation5 + $0xb60] ss:$8 sps:$4 sm:$0xff]   ;;  %v734_v48 = vmax.bf16 %v10309_v50, %v350_v40 }
 0x2b2   : > { %6192 = vmatpush1.bf16.msra.mxu1 %v10054_v51  ;;  %v10090_v51 = vld [vmem:[#allocation5 + $0x570] ss:$8 sps:$4 sm:$0xff]   ;;  %v10120_v39 = vld [vmem:[#allocation5 + $0x5c0] ss:$8 sps:$4 sm:$0xff]  }
 0x2b3   : > { %7350 = vmatpush1.bf16.msra.mxu0 %v10057_v52  ;;  %6193 = vmatprep.subr.bf16.mxu1 %v10062_v56  ;;  %v10093_v52 = vld [vmem:[#allocation5 + $0xb70] ss:$8 sps:$4 sm:$0xff]   ;;  %v7999_v56 = vcombine.low %v710_v28, %v722_v29  ;;  %v10122_v29 = vld [vmem:[#allocation5 + $0x5c4] ss:$8 sps:$4 sm:$0xff]   ;;  %v10123_v40 = vld [vmem:[#allocation5 + $0xbc0] ss:$8 sps:$4 sm:$0xff]  }
 0x2b4   : > { %7351 = vmatprep.subr.bf16.mxu0 %v10065_v57  ;;  %v8012_v57 = vcombine.high %v728_v46, %v740_v47  ;;  %v10117_v28 = vld [vmem:[#allocation5 + $0xbb0] ss:$8 sps:$4 sm:$0xff]  }
 0x2b5   : > { %6039 = vmatmul.mubr.bf16.gmra.mrb[4].mxu1 %v7915_v58  ;;  %v8024_v58 = vcombine.high %v734_v48, %v746_v49 }
 0x2b6   : > { %7197 = vmatmul.mubr.bf16.gmra.mrb[4].mxu0 %v7927_v59  ;;  %6048 = vmatprep.mubr.bf16.mxu1 %v7940_v60  ;;  %v368_v59 = vld [vmem:[%s10501_s30 + $0x4a0] sm:$0xff] }
 0x2b7   : > { %7206 = vmatprep.mubr.bf16.mxu0 %v7952_v61  ;;  %6194 = vmatpush1.bf16.msra.mxu1 %v10060_v62  ;;  %v380_v60 = vld [vmem:[%s10501_s30 + $0x500] sm:$0xff]  ;;  %v374_v61 = vld [vmem:[%s10501_s30 + $0x4d0] sm:$0xff]  ;;  %v752_v3 = vmax.bf16 %v10309_v50, %v368_v59 }
 0x2b8   : > { %7352 = vmatpush1.bf16.msra.mxu0 %v10063_v63  ;;  %6195 = vmatprep.subr.bf16.mxu1 %v10068_v4  ;;  %v386_v62 = vld [vmem:[%s10501_s30 + $0x530] sm:$0xff]  ;;  %v10096_v63 = vld [vmem:[#allocation5 + $0x580] ss:$8 sps:$4 sm:$0xff]   ;;  %v764_v4 = vmax.bf16 %v10309_v50, %v380_v60 }
 0x2b9   : > { %7353 = vmatprep.subr.bf16.mxu0 %v10071_v5  ;;  %v758_v5 = vmax.bf16 %v10309_v50, %v374_v61  ;;  %v770_v6 = vmax.bf16 %v10309_v50, %v386_v62  ;;  %v458_v59 = vld [vmem:[%s10501_s30 + $0x770] sm:$0xff]  ;;  %v10132_v60 = vld [vmem:[#allocation5 + $0x5e0] ss:$8 sps:$4 sm:$0xff]  }
 0x2ba   : > { %v10135_v61 = vld [vmem:[#allocation5 + $0xbe0] ss:$8 sps:$4 sm:$0xff]   ;;  %v10140_v62 = vld [vmem:[#allocation5 + $0x5f4] ss:$8 sps:$4 sm:$0xff]  }
 0x2bb   : > { %6196 = vmatpush1.bf16.msra.mxu1 %v10066_v10  ;;  %v10113_v10 = vld [vmem:[#allocation5 + $0xba4] ss:$8 sps:$4 sm:$0xff]  }
 0x2bc   : > { %7354 = vmatpush1.bf16.msra.mxu0 %v10069_v11  ;;  %6197 = vmatprep.subr.bf16.mxu1 %v10074_v12  ;;  %v8011_v11 = vcombine.low %v728_v46, %v740_v47  ;;  %v8023_v12 = vcombine.low %v734_v48, %v746_v49  ;;  %v818_v46 = vmax.bf16 %v10309_v50, %v434_v38  ;;  %v10126_v47 = vld [vmem:[#allocation5 + $0x5d0] ss:$8 sps:$4 sm:$0xff]   ;;  %v10134_v49 = vld [vmem:[#allocation5 + $0x5e4] ss:$8 sps:$4 sm:$0xff]  }
 0x2bd   : > { %7355 = vmatprep.subr.bf16.mxu0 %v10077_v13  ;;  %6049 = vmatmul.mubr.bf16.gmra.mrb[8].mxu1 %v7939_v14  ;;  %v8036_v13 = vcombine.high %v752_v3, %v764_v4  ;;  %v8048_v14 = vcombine.high %v758_v5, %v770_v6  ;;  %v10129_v48 = vld [vmem:[#allocation5 + $0xbd0] ss:$8 sps:$4 sm:$0xff]  }
 0x2be   : > { %7207 = vmatmul.mubr.bf16.gmra.mrb[8].mxu0 %v7951_v15  ;;  %6058 = vmatprep.mubr.bf16.mxu1 %v7964_v16  ;;  %v392_v15 = vld [vmem:[%s10501_s30 + $0x560] sm:$0xff] }
 0x2bf   : > { %7216 = vmatprep.mubr.bf16.mxu0 %v7976_v17  ;;  %6198 = vmatpush1.bf16.msra.mxu1 %v10072_v22  ;;  %v404_v16 = vld [vmem:[%s10501_s30 + $0x5c0] sm:$0xff]  ;;  %v398_v17 = vld [vmem:[%s10501_s30 + $0x590] sm:$0xff] }
 0x2c0   : > { %7356 = vmatpush1.bf16.msra.mxu0 %v10075_v23  ;;  %6199 = vmatprep.subr.bf16.mxu1 %v10080_v24  ;;  %v10119_v22 = vld [vmem:[#allocation5 + $0xbb4] ss:$8 sps:$4 sm:$0xff]   ;;  %v776_v23 = vmax.bf16 %v10309_v50, %v392_v15  ;;  %v788_v24 = vmax.bf16 %v10309_v50, %v404_v16 }
 0x2c1   : > { %7357 = vmatprep.subr.bf16.mxu0 %v10083_v25  ;;  %v782_v25 = vmax.bf16 %v10309_v50, %v398_v17 }
 0x2c3   : > { %6200 = vmatpush1.bf16.msra.mxu1 %v10078_v30  ;;  %v10125_v30 = vld [vmem:[#allocation5 + $0xbc4] ss:$8 sps:$4 sm:$0xff]  }
 0x2c4   : > { %7358 = vmatpush1.bf16.msra.mxu0 %v10081_v31  ;;  %6201 = vmatprep.subr.bf16.mxu1 %v10086_v32  ;;  %v8035_v31 = vcombine.low %v752_v3, %v764_v4  ;;  %v8047_v32 = vcombine.low %v758_v5, %v770_v6  ;;  %v842_v3 = vmax.bf16 %v10309_v50, %v458_v59  ;;  %v10138_v4 = vld [vmem:[#allocation5 + $0x5f0] ss:$8 sps:$4 sm:$0xff]   ;;  %v560_v59 = vld [vmem:[%s10501_s30 + $0xaa0] sm:$0xff] }
 0x2c5   : > { %7359 = vmatprep.subr.bf16.mxu0 %v10089_v33  ;;  %6059 = vmatmul.mubr.bf16.gmra.mrb[12].mxu1 %v7963_v34  ;;  %v8060_v33 = vcombine.high %v776_v23, %v788_v24  ;;  %v8072_v34 = vcombine.high %v782_v25, %v794_v26  ;;  %v10141_v5 = vld [vmem:[#allocation5 + $0xbf0] ss:$8 sps:$4 sm:$0xff]  }
 0x2c6   : > { %7217 = vmatmul.mubr.bf16.gmra.mrb[12].mxu0 %v7975_v35  ;;  %6068 = vmatprep.mubr.bf16.mxu1 %v7988_v36  ;;  %v416_v35 = vld [vmem:[%s10501_s30 + $0x620] sm:$0xff] }
 0x2c7   : > { %7226 = vmatprep.mubr.bf16.mxu0 %v8000_v37  ;;  %6202 = vmatpush1.bf16.msra.mxu1 %v10084_v42  ;;  %v428_v36 = vld [vmem:[%s10501_s30 + $0x680] sm:$0xff]  ;;  %v422_v37 = vld [vmem:[%s10501_s30 + $0x650] sm:$0xff] }
 0x2c8   : > { %7360 = vmatpush1.bf16.msra.mxu0 %v10087_v43  ;;  %6203 = vmatprep.subr.bf16.mxu1 %v10092_v44  ;;  %v10131_v42 = vld [vmem:[#allocation5 + $0xbd4] ss:$8 sps:$4 sm:$0xff]   ;;  %v800_v43 = vmax.bf16 %v10309_v50, %v416_v35  ;;  %v812_v44 = vmax.bf16 %v10309_v50, %v428_v36  ;;  %v524_v35 = vld [vmem:[%s10501_s30 + $0x980] sm:$0xff] }
 0x2c9   : > { %7361 = vmatprep.subr.bf16.mxu0 %v10095_v45  ;;  %v806_v45 = vmax.bf16 %v10309_v50, %v422_v37  ;;  %v518_v36 = vld [vmem:[%s10501_s30 + $0x950] sm:$0xff] }
 0x2ca   : > { %v8083_v6 = vcombine.low %v800_v43, %v812_v44  ;;  %v530_v37 = vld [vmem:[%s10501_s30 + $0x9b0] sm:$0xff] }
 0x2cb   : > { %6204 = vmatpush1.bf16.msra.mxu1 %v10090_v51  ;;  %v10137_v51 = vld [vmem:[#allocation5 + $0xbe4] ss:$8 sps:$4 sm:$0xff]  }
 0x2cc   : > { %7362 = vmatpush1.bf16.msra.mxu0 %v10093_v52  ;;  %6205 = vmatprep.subr.bf16.mxu1 %v10098_v53  ;;  %v8059_v52 = vcombine.low %v776_v23, %v788_v24  ;;  %v8071_v53 = vcombine.low %v782_v25, %v794_v26  ;;  %v500_v23 = vld [vmem:[%s10501_s30 + $0x8c0] sm:$0xff]  ;;  %v494_v24 = vld [vmem:[%s10501_s30 + $0x890] sm:$0xff] }
 0x2cd   : > { %7363 = vmatprep.subr.bf16.mxu0 %v10101_v54  ;;  %6069 = vmatmul.mubr.bf16.gmra.mrb[16].mxu1 %v7987_v55  ;;  %v8084_v54 = vcombine.high %v800_v43, %v812_v44  ;;  %v8096_v55 = vcombine.high %v806_v45, %v818_v46  ;;  %v506_v25 = vld [vmem:[%s10501_s30 + $0x8f0] sm:$0xff] }
 0x2ce   : > { %7227 = vmatmul.mubr.bf16.gmra.mrb[16].mxu0 %v7999_v56  ;;  %6078 = vmatprep.mubr.bf16.mxu1 %v8012_v57  ;;  %v440_v56 = vld [vmem:[%s10501_s30 + $0x6e0] sm:$0xff] }
 0x2cf   : > { %7236 = vmatprep.mubr.bf16.mxu0 %v8024_v58  ;;  %6206 = vmatpush1.bf16.msra.mxu1 %v10096_v63  ;;  %v452_v57 = vld [vmem:[%s10501_s30 + $0x740] sm:$0xff]  ;;  %v446_v58 = vld [vmem:[%s10501_s30 + $0x710] sm:$0xff] }
 0x2d0   : > { %7364 = vmatpush1.bf16.msra.mxu0 %v10099_v0  ;;  %6207 = vmatprep.subr.bf16.mxu1 %v10104_v1  ;;  %v10143_v63 = vld [vmem:[#allocation5 + $0xbf4] ss:$8 sps:$4 sm:$0xff]   ;;  %v824_v0 = vmax.bf16 %v10309_v50, %v440_v56  ;;  %v836_v1 = vmax.bf16 %v10309_v50, %v452_v57 }
 0x2d1   : > { %7365 = vmatprep.subr.bf16.mxu0 %v10107_v2  ;;  %v830_v2 = vmax.bf16 %v10309_v50, %v446_v58 }
 0x2d2   : > { %v8107_v18 = vcombine.low %v824_v0, %v836_v1 }
 0x2d3   : > { %6208 = vmatpush1.bf16.msra.mxu1 %v10102_v7  ;;  %v8095_v7 = vcombine.low %v806_v45, %v818_v46  ;;  %v536_v46 = vld [vmem:[%s10501_s30 + $0x9e0] sm:$0xff] }
 0x2d4   : > { %7366 = vmatpush1.bf16.msra.mxu0 %v10105_v8  ;;  %6209 = vmatprep.subr.bf16.mxu1 %v10110_v9  ;;  %v8108_v8 = vcombine.high %v824_v0, %v836_v1  ;;  %v8120_v9 = vcombine.high %v830_v2, %v842_v3 }
 0x2d5   : > { %7367 = vmatprep.subr.bf16.mxu0 %v10113_v10  ;;  %6079 = vmatmul.mubr.bf16.gmra.mrb[20].mxu1 %v8011_v11  ;;  %v464_v10 = vld [vmem:[%s10501_s30 + $0x7a0] sm:$0xff] }
 0x2d6   : > { %7237 = vmatmul.mubr.bf16.gmra.mrb[20].mxu0 %v8023_v12  ;;  %6088 = vmatprep.mubr.bf16.mxu1 %v8036_v13  ;;  %v476_v11 = vld [vmem:[%s10501_s30 + $0x800] sm:$0xff]  ;;  %v470_v12 = vld [vmem:[%s10501_s30 + $0x7d0] sm:$0xff] }
 0x2d7   : > { %7246 = vmatprep.mubr.bf16.mxu0 %v8048_v14  ;;  %6210 = vmatpush1.bf16.msra.mxu1 %v10108_v19  ;;  %v482_v13 = vld [vmem:[%s10501_s30 + $0x830] sm:$0xff]  ;;  %v848_v14 = vmax.bf16 %v10309_v50, %v464_v10  ;;  %v860_v15 = vmax.bf16 %v10309_v50, %v476_v11  ;;  %v854_v16 = vmax.bf16 %v10309_v50, %v470_v12 }
 0x2d8   : > { %7368 = vmatpush1.bf16.msra.mxu0 %v10111_v20  ;;  %6211 = vmatprep.subr.bf16.mxu1 %v10116_v21  ;;  %v866_v17 = vmax.bf16 %v10309_v50, %v482_v13  ;;  %v8119_v19 = vcombine.low %v830_v2, %v842_v3  ;;  %v602_v10 = vld [vmem:[%s10501_s30 + $0xbf0] sm:$0xff] }
 0x2d9   : > { %7369 = vmatprep.subr.bf16.mxu0 %v10119_v22  ;;  %v8132_v20 = vcombine.high %v848_v14, %v860_v15  ;;  %v488_v22 = vld [vmem:[%s10501_s30 + $0x860] sm:$0xff] }
 0x2da   : > { %v8144_v21 = vcombine.high %v854_v16, %v866_v17  ;;  %v872_v26 = vmax.bf16 %v10309_v50, %v488_v22  ;;  %v243_v22 = vld [vmem:[%s10501_s30 + $0xb8] sm:$0xff] }
 0x2db   : > { %6212 = vmatpush1.bf16.msra.mxu1 %v10114_v27  ;;  %v884_v27 = vmax.bf16 %v10309_v50, %v500_v23 }
 0x2dc   : > { %7370 = vmatpush1.bf16.msra.mxu0 %v10117_v28  ;;  %6213 = vmatprep.subr.bf16.mxu1 %v10122_v29  ;;  %v878_v28 = vmax.bf16 %v10309_v50, %v494_v24  ;;  %v890_v29 = vmax.bf16 %v10309_v50, %v506_v25 }
 0x2dd   : > { %7371 = vmatprep.subr.bf16.mxu0 %v10125_v30  ;;  %6089 = vmatmul.mubr.bf16.gmra.mrb[24].mxu1 %v8035_v31  ;;  %v8131_v30 = vcombine.low %v848_v14, %v860_v15  ;;  %v8143_v31 = vcombine.low %v854_v16, %v866_v17  ;;  %v986_v14 = vmax.bf16 %v10309_v50, %v602_v10 }
 0x2de   : > { %7247 = vmatmul.mubr.bf16.gmra.mrb[24].mxu0 %v8047_v32  ;;  %6098 = vmatprep.mubr.bf16.mxu1 %v8060_v33  ;;  %v8156_v32 = vcombine.high %v872_v26, %v884_v27  ;;  %v8168_v33 = vcombine.high %v878_v28, %v890_v29  ;;  %v8167_v43 = vcombine.low %v878_v28, %v890_v29 }
 0x2df   : > { %7256 = vmatprep.mubr.bf16.mxu0 %v8072_v34  ;;  %6214 = vmatpush1.bf16.msra.mxu1 %v10120_v39  ;;  %v512_v34 = vld [vmem:[%s10501_s30 + $0x920] sm:$0xff]  ;;  %v908_v39 = vmax.bf16 %v10309_v50, %v524_v35 }
 0x2e0   : > { %7372 = vmatpush1.bf16.msra.mxu0 %v10123_v40  ;;  %6215 = vmatprep.subr.bf16.mxu1 %v10128_v41  ;;  %v896_v38 = vmax.bf16 %v10309_v50, %v512_v34  ;;  %v902_v40 = vmax.bf16 %v10309_v50, %v518_v36  ;;  %v914_v41 = vmax.bf16 %v10309_v50, %v530_v37  ;;  %v267_v34 = vld [vmem:[%s10501_s30 + $0x178] sm:$0xff] }
 0x2e1   : > { %7373 = vmatprep.subr.bf16.mxu0 %v10131_v42  ;;  %v8155_v42 = vcombine.low %v872_v26, %v884_v27  ;;  %v627_v26 = vmax.bf16 %v10309_v50, %v243_v22 }
 0x2e2   : > { %v8180_v44 = vcombine.high %v896_v38, %v908_v39  ;;  %v8192_v45 = vcombine.high %v902_v40, %v914_v41  ;;  %v8191_v56 = vcombine.low %v902_v40, %v914_v41 }
 0x2e3   : > { %6216 = vmatpush1.bf16.msra.mxu1 %v10126_v47  ;;  %v548_v47 = vld [vmem:[%s10501_s30 + $0xa40] sm:$0xff] }
 0x2e4   : > { %7374 = vmatpush1.bf16.msra.mxu0 %v10129_v48  ;;  %6217 = vmatprep.subr.bf16.mxu1 %v10134_v49  ;;  %v542_v48 = vld [vmem:[%s10501_s30 + $0xa10] sm:$0xff] }
 0x2e5   : > { %7375 = vmatprep.subr.bf16.mxu0 %v10137_v51  ;;  %6099 = vmatmul.mubr.bf16.gmra.mrb[28].mxu1 %v8059_v52  ;;  %v554_v49 = vld [vmem:[%s10501_s30 + $0xa70] sm:$0xff]  ;;  %v920_v51 = vmax.bf16 %v10309_v50, %v536_v46  ;;  %v932_v52 = vmax.bf16 %v10309_v50, %v548_v47  ;;  %v291_v46 = vld [vmem:[%s10501_s30 + $0x238] sm:$0xff] }
 0x2e6   : > { %7257 = vmatmul.mubr.bf16.gmra.mrb[28].mxu0 %v8071_v53  ;;  %6108 = vmatprep.mubr.bf16.mxu1 %v8084_v54  ;;  %v926_v53 = vmax.bf16 %v10309_v50, %v542_v48  ;;  %v938_v54 = vmax.bf16 %v10309_v50, %v554_v49 }
 0x2e7   : > { %7266 = vmatprep.mubr.bf16.mxu0 %v8096_v55  ;;  %6218 = vmatpush1.bf16.msra.mxu1 %v10132_v60  ;;  %v8179_v55 = vcombine.low %v896_v38, %v908_v39  ;;  %v8204_v57 = vcombine.high %v920_v51, %v932_v52  ;;  %v572_v60 = vld [vmem:[%s10501_s30 + $0xb00] sm:$0xff]  ;;  %v8203_v3 = vcombine.low %v920_v51, %v932_v52 }
 0x2e8   : > { %7376 = vmatpush1.bf16.msra.mxu0 %v10135_v61  ;;  %6219 = vmatprep.subr.bf16.mxu1 %v10140_v62  ;;  %v8216_v58 = vcombine.high %v926_v53, %v938_v54  ;;  %v566_v61 = vld [vmem:[%s10501_s30 + $0xad0] sm:$0xff]  ;;  %v956_v0 = vmax.bf16 %v10309_v50, %v572_v60  ;;  %v651_v38 = vmax.bf16 %v10309_v50, %v267_v34 }
 0x2e9   : > { %7377 = vmatprep.subr.bf16.mxu0 %v10143_v63  ;;  %v578_v62 = vld [vmem:[%s10501_s30 + $0xb30] sm:$0xff]  ;;  %v944_v63 = vmax.bf16 %v10309_v50, %v560_v59  ;;  %v950_v1 = vmax.bf16 %v10309_v50, %v566_v61  ;;  %v675_v51 = vmax.bf16 %v10309_v50, %v291_v46  ;;  %v315_v59 = vld [vmem:[%s10501_s30 + $0x2f8] sm:$0xff] }
 0x2ea   : > { %v962_v2 = vmax.bf16 %v10309_v50, %v578_v62 }
 0x2eb   : > { %6220 = vmatpush1.bf16.msra.mxu1 %v10138_v4  ;;  %v8215_v4 = vcombine.low %v926_v53, %v938_v54  ;;  %v8227_v15 = vcombine.low %v944_v63, %v956_v0 }
 0x2ec   : > { %7378 = vmatpush1.bf16.msra.mxu0 %v10141_v5  ;;  %v8228_v5 = vcombine.high %v944_v63, %v956_v0  ;;  %v8239_v16 = vcombine.low %v950_v1, %v962_v2  ;;  %v699_v63 = vmax.bf16 %v10309_v50, %v315_v59 }
 0x2ed   : > { %6109 = vmatmul.mubr.bf16.gmra.mrb[32].mxu1 %v8083_v6  ;;  %v8240_v6 = vcombine.high %v950_v1, %v962_v2 }
 0x2ee   : > { %7267 = vmatmul.mubr.bf16.gmra.mrb[32].mxu0 %v8095_v7  ;;  %6118 = vmatprep.mubr.bf16.mxu1 %v8108_v8  ;;  %v584_v7 = vld [vmem:[%s10501_s30 + $0xb60] sm:$0xff] }
 0x2ef   : > { %7276 = vmatprep.mubr.bf16.mxu0 %v8120_v9  ;;  %v596_v8 = vld [vmem:[%s10501_s30 + $0xbc0] sm:$0xff]  ;;  %v590_v9 = vld [vmem:[%s10501_s30 + $0xb90] sm:$0xff]  ;;  %v968_v11 = vmax.bf16 %v10309_v50, %v584_v7  ;;  %v339_v7 = vld [vmem:[%s10501_s30 + $0x3b8] sm:$0xff] }
 0x2f0   : > { %v980_v12 = vmax.bf16 %v10309_v50, %v596_v8  ;;  %v974_v13 = vmax.bf16 %v10309_v50, %v590_v9 }
 0x2f2   : > { %v8252_v17 = vcombine.high %v968_v11, %v980_v12  ;;  %v8251_v27 = vcombine.low %v968_v11, %v980_v12  ;;  %v8263_v28 = vcombine.low %v974_v13, %v986_v14  ;;  %v723_v11 = vmax.bf16 %v10309_v50, %v339_v7 }
 0x2f5   : > { %6119 = vmatmul.mubr.bf16.gmra.mrb[36].mxu1 %v8107_v18  ;;  %v8264_v18 = vcombine.high %v974_v13, %v986_v14 }
 0x2f6   : > { %7277 = vmatmul.mubr.bf16.gmra.mrb[36].mxu0 %v8119_v19  ;;  %6128 = vmatprep.mubr.bf16.mxu1 %v8132_v20  ;;  %v225_v19 = vld [vmem:[%s10501_s30 + $0x28] sm:$0xff] }
 0x2f7   : > { %7286 = vmatprep.mubr.bf16.mxu0 %v8144_v21  ;;  %v237_v20 = vld [vmem:[%s10501_s30 + $0x88] sm:$0xff]  ;;  %v231_v21 = vld [vmem:[%s10501_s30 + $0x58] sm:$0xff]  ;;  %v609_v23 = vmax.bf16 %v10309_v50, %v225_v19 }
 0x2f8   : > { %v621_v24 = vmax.bf16 %v10309_v50, %v237_v20  ;;  %v615_v25 = vmax.bf16 %v10309_v50, %v231_v21  ;;  %v363_v19 = vld [vmem:[%s10501_s30 + $0x478] sm:$0xff] }
 0x2fa   : > { %v7894_v29 = vcombine.high %v609_v23, %v621_v24  ;;  %v7893_v39 = vcombine.low %v609_v23, %v621_v24  ;;  %v7905_v40 = vcombine.low %v615_v25, %v627_v26  ;;  %v747_v23 = vmax.bf16 %v10309_v50, %v363_v19 }
 0x2fd   : > { %6129 = vmatmul.mubr.bf16.gmra.mrb[40].mxu1 %v8131_v30  ;;  %v7906_v30 = vcombine.high %v615_v25, %v627_v26 }
 0x2fe   : > { %7287 = vmatmul.mubr.bf16.gmra.mrb[40].mxu0 %v8143_v31  ;;  %6138 = vmatprep.mubr.bf16.mxu1 %v8156_v32  ;;  %v249_v31 = vld [vmem:[%s10501_s30 + $0xe8] sm:$0xff] }
 0x2ff   : > { %7296 = vmatprep.mubr.bf16.mxu0 %v8168_v33  ;;  %v261_v32 = vld [vmem:[%s10501_s30 + $0x148] sm:$0xff]  ;;  %v255_v33 = vld [vmem:[%s10501_s30 + $0x118] sm:$0xff]  ;;  %v633_v35 = vmax.bf16 %v10309_v50, %v249_v31 }
 0x300   : > { %v645_v36 = vmax.bf16 %v10309_v50, %v261_v32  ;;  %v639_v37 = vmax.bf16 %v10309_v50, %v255_v33  ;;  %v387_v31 = vld [vmem:[%s10501_s30 + $0x538] sm:$0xff] }
 0x302   : > { %v7918_v41 = vcombine.high %v633_v35, %v645_v36  ;;  %v7917_v52 = vcombine.low %v633_v35, %v645_v36  ;;  %v7929_v53 = vcombine.low %v639_v37, %v651_v38  ;;  %v771_v35 = vmax.bf16 %v10309_v50, %v387_v31 }
 0x305   : > { %6139 = vmatmul.mubr.bf16.gmra.mrb[44].mxu1 %v8155_v42  ;;  %v7930_v42 = vcombine.high %v639_v37, %v651_v38 }
 0x306   : > { %7297 = vmatmul.mubr.bf16.gmra.mrb[44].mxu0 %v8167_v43  ;;  %6148 = vmatprep.mubr.bf16.mxu1 %v8180_v44  ;;  %v273_v43 = vld [vmem:[%s10501_s30 + $0x1a8] sm:$0xff] }
 0x307   : > { %7306 = vmatprep.mubr.bf16.mxu0 %v8192_v45  ;;  %v285_v44 = vld [vmem:[%s10501_s30 + $0x208] sm:$0xff]  ;;  %v279_v45 = vld [vmem:[%s10501_s30 + $0x1d8] sm:$0xff]  ;;  %v657_v47 = vmax.bf16 %v10309_v50, %v273_v43 }
 0x308   : > { %v669_v48 = vmax.bf16 %v10309_v50, %v285_v44  ;;  %v663_v49 = vmax.bf16 %v10309_v50, %v279_v45  ;;  %v411_v43 = vld [vmem:[%s10501_s30 + $0x5f8] sm:$0xff] }
 0x30a   : > { %v7942_v54 = vcombine.high %v657_v47, %v669_v48  ;;  %v7941_v0 = vcombine.low %v657_v47, %v669_v48  ;;  %v7953_v1 = vcombine.low %v663_v49, %v675_v51  ;;  %v795_v47 = vmax.bf16 %v10309_v50, %v411_v43 }
 0x30d   : > { %6149 = vmatmul.mubr.bf16.gmra.mrb[48].mxu1 %v8179_v55  ;;  %v7954_v55 = vcombine.high %v663_v49, %v675_v51 }
 0x30e   : > { %7307 = vmatmul.mubr.bf16.gmra.mrb[48].mxu0 %v8191_v56  ;;  %6158 = vmatprep.mubr.bf16.mxu1 %v8204_v57  ;;  %v297_v56 = vld [vmem:[%s10501_s30 + $0x268] sm:$0xff] }
 0x30f   : > { %7316 = vmatprep.mubr.bf16.mxu0 %v8216_v58  ;;  %v309_v57 = vld [vmem:[%s10501_s30 + $0x2c8] sm:$0xff]  ;;  %v303_v58 = vld [vmem:[%s10501_s30 + $0x298] sm:$0xff]  ;;  %v681_v60 = vmax.bf16 %v10309_v50, %v297_v56 }
 0x310   : > { %v693_v61 = vmax.bf16 %v10309_v50, %v309_v57  ;;  %v687_v62 = vmax.bf16 %v10309_v50, %v303_v58  ;;  %v435_v56 = vld [vmem:[%s10501_s30 + $0x6b8] sm:$0xff] }
 0x312   : > { %v7966_v2 = vcombine.high %v681_v60, %v693_v61  ;;  %v7965_v12 = vcombine.low %v681_v60, %v693_v61  ;;  %v7977_v13 = vcombine.low %v687_v62, %v699_v63  ;;  %v819_v60 = vmax.bf16 %v10309_v50, %v435_v56 }
 0x315   : > { %6159 = vmatmul.mubr.bf16.gmra.mrb[52].mxu1 %v8203_v3  ;;  %v7978_v3 = vcombine.high %v687_v62, %v699_v63 }
 0x316   : > { %7317 = vmatmul.mubr.bf16.gmra.mrb[52].mxu0 %v8215_v4  ;;  %6168 = vmatprep.mubr.bf16.mxu1 %v8228_v5  ;;  %v321_v4 = vld [vmem:[%s10501_s30 + $0x328] sm:$0xff] }
 0x317   : > { %7326 = vmatprep.mubr.bf16.mxu0 %v8240_v6  ;;  %v333_v5 = vld [vmem:[%s10501_s30 + $0x388] sm:$0xff]  ;;  %v327_v6 = vld [vmem:[%s10501_s30 + $0x358] sm:$0xff]  ;;  %v705_v8 = vmax.bf16 %v10309_v50, %v321_v4 }
 0x318   : > { %v717_v9 = vmax.bf16 %v10309_v50, %v333_v5  ;;  %v711_v10 = vmax.bf16 %v10309_v50, %v327_v6  ;;  %v459_v4 = vld [vmem:[%s10501_s30 + $0x778] sm:$0xff] }
 0x31a   : > { %v7990_v14 = vcombine.high %v705_v8, %v717_v9  ;;  %v7989_v24 = vcombine.low %v705_v8, %v717_v9  ;;  %v8001_v25 = vcombine.low %v711_v10, %v723_v11  ;;  %v843_v8 = vmax.bf16 %v10309_v50, %v459_v4 }
 0x31d   : > { %6169 = vmatmul.mubr.bf16.gmra.mrb[56].mxu1 %v8227_v15  ;;  %v8002_v15 = vcombine.high %v711_v10, %v723_v11 }
 0x31e   : > { %7327 = vmatmul.mubr.bf16.gmra.mrb[56].mxu0 %v8239_v16  ;;  %6178 = vmatprep.mubr.bf16.mxu1 %v8252_v17  ;;  %v345_v16 = vld [vmem:[%s10501_s30 + $0x3e8] sm:$0xff] }
 0x31f   : > { %7336 = vmatprep.mubr.bf16.mxu0 %v8264_v18  ;;  %v357_v17 = vld [vmem:[%s10501_s30 + $0x448] sm:$0xff]  ;;  %v351_v18 = vld [vmem:[%s10501_s30 + $0x418] sm:$0xff]  ;;  %v729_v20 = vmax.bf16 %v10309_v50, %v345_v16 }
 0x320   : > { %v741_v21 = vmax.bf16 %v10309_v50, %v357_v17  ;;  %v735_v22 = vmax.bf16 %v10309_v50, %v351_v18  ;;  %v483_v16 = vld [vmem:[%s10501_s30 + $0x838] sm:$0xff] }
 0x322   : > { %v8014_v26 = vcombine.high %v729_v20, %v741_v21  ;;  %v8013_v36 = vcombine.low %v729_v20, %v741_v21  ;;  %v8025_v37 = vcombine.low %v735_v22, %v747_v23  ;;  %v867_v20 = vmax.bf16 %v10309_v50, %v483_v16 }
 0x325   : > { %6179 = vmatmul.mubr.bf16.gmra.mrb[60].mxu1 %v8251_v27  ;;  %v8026_v27 = vcombine.high %v735_v22, %v747_v23 }
 0x326   : > { %7337 = vmatmul.mubr.bf16.gmra.mrb[60].mxu0 %v8263_v28  ;;  %6221 = vmatprep.mubr.bf16.mxu1 %v7894_v29  ;;  %v369_v28 = vld [vmem:[%s10501_s30 + $0x4a8] sm:$0xff] }
 0x327   : > { %7379 = vmatprep.mubr.bf16.mxu0 %v7906_v30  ;;  %v381_v29 = vld [vmem:[%s10501_s30 + $0x508] sm:$0xff]  ;;  %v375_v30 = vld [vmem:[%s10501_s30 + $0x4d8] sm:$0xff]  ;;  %v753_v32 = vmax.bf16 %v10309_v50, %v369_v28 }
 0x328   : > { %v765_v33 = vmax.bf16 %v10309_v50, %v381_v29  ;;  %v759_v34 = vmax.bf16 %v10309_v50, %v375_v30  ;;  %v507_v28 = vld [vmem:[%s10501_s30 + $0x8f8] sm:$0xff] }
 0x32a   : > { %v8038_v38 = vcombine.high %v753_v32, %v765_v33  ;;  %v8037_v48 = vcombine.low %v753_v32, %v765_v33  ;;  %v8049_v49 = vcombine.low %v759_v34, %v771_v35  ;;  %v891_v32 = vmax.bf16 %v10309_v50, %v507_v28 }
 0x32d   : > { %6222 = vmatmul.mubr.bf16.vlgmr.msra.gmra.mrb[0].mxu1 %v7893_v39  ;;  %v8050_v39 = vcombine.high %v759_v34, %v771_v35 }
 0x32e   : > { %7380 = vmatmul.mubr.bf16.vlgmr.msra.gmra.mrb[0].mxu0 %v7905_v40  ;;  %6231 = vmatprep.mubr.bf16.mxu1 %v7918_v41  ;;  %v393_v40 = vld [vmem:[%s10501_s30 + $0x568] sm:$0xff] }
 0x32f   : > { %7389 = vmatprep.mubr.bf16.mxu0 %v7930_v42  ;;  %v405_v41 = vld [vmem:[%s10501_s30 + $0x5c8] sm:$0xff]  ;;  %v399_v42 = vld [vmem:[%s10501_s30 + $0x598] sm:$0xff]  ;;  %v777_v44 = vmax.bf16 %v10309_v50, %v393_v40 }
 0x330   : > { %v789_v45 = vmax.bf16 %v10309_v50, %v405_v41  ;;  %v783_v46 = vmax.bf16 %v10309_v50, %v399_v42  ;;  %v531_v40 = vld [vmem:[%s10501_s30 + $0x9b8] sm:$0xff] }
 0x332   : > { %v8062_v51 = vcombine.high %v777_v44, %v789_v45  ;;  %v8061_v61 = vcombine.low %v777_v44, %v789_v45  ;;  %v8073_v62 = vcombine.low %v783_v46, %v795_v47  ;;  %v915_v44 = vmax.bf16 %v10309_v50, %v531_v40 }
 0x335   : > { %6232 = vmatmul.mubr.bf16.gmra.mrb[4].mxu1 %v7917_v52  ;;  %v8074_v52 = vcombine.high %v783_v46, %v795_v47 }
 0x336   : > { %7390 = vmatmul.mubr.bf16.gmra.mrb[4].mxu0 %v7929_v53  ;;  %6241 = vmatprep.mubr.bf16.mxu1 %v7942_v54  ;;  %v417_v53 = vld [vmem:[%s10501_s30 + $0x628] sm:$0xff] }
 0x337   : > { %7399 = vmatprep.mubr.bf16.mxu0 %v7954_v55  ;;  %v429_v54 = vld [vmem:[%s10501_s30 + $0x688] sm:$0xff]  ;;  %v423_v55 = vld [vmem:[%s10501_s30 + $0x658] sm:$0xff]  ;;  %v801_v57 = vmax.bf16 %v10309_v50, %v417_v53 }
 0x338   : > { %v813_v58 = vmax.bf16 %v10309_v50, %v429_v54  ;;  %v807_v59 = vmax.bf16 %v10309_v50, %v423_v55  ;;  %v555_v53 = vld [vmem:[%s10501_s30 + $0xa78] sm:$0xff] }
 0x33a   : > { %v8086_v63 = vcombine.high %v801_v57, %v813_v58  ;;  %v8085_v9 = vcombine.low %v801_v57, %v813_v58  ;;  %v8097_v10 = vcombine.low %v807_v59, %v819_v60  ;;  %v939_v57 = vmax.bf16 %v10309_v50, %v555_v53 }
 0x33d   : > { %6242 = vmatmul.mubr.bf16.gmra.mrb[8].mxu1 %v7941_v0  ;;  %v8098_v0 = vcombine.high %v807_v59, %v819_v60 }
 0x33e   : > { %7400 = vmatmul.mubr.bf16.gmra.mrb[8].mxu0 %v7953_v1  ;;  %6251 = vmatprep.mubr.bf16.mxu1 %v7966_v2  ;;  %v441_v1 = vld [vmem:[%s10501_s30 + $0x6e8] sm:$0xff] }
 0x33f   : > { %7409 = vmatprep.mubr.bf16.mxu0 %v7978_v3  ;;  %v453_v2 = vld [vmem:[%s10501_s30 + $0x748] sm:$0xff]  ;;  %v447_v3 = vld [vmem:[%s10501_s30 + $0x718] sm:$0xff]  ;;  %v825_v5 = vmax.bf16 %v10309_v50, %v441_v1 }
 0x340   : > { %v837_v6 = vmax.bf16 %v10309_v50, %v453_v2  ;;  %v831_v7 = vmax.bf16 %v10309_v50, %v447_v3  ;;  %v579_v1 = vld [vmem:[%s10501_s30 + $0xb38] sm:$0xff] }
 0x342   : > { %v8110_v11 = vcombine.high %v825_v5, %v837_v6  ;;  %v8109_v21 = vcombine.low %v825_v5, %v837_v6  ;;  %v8121_v22 = vcombine.low %v831_v7, %v843_v8  ;;  %v963_v5 = vmax.bf16 %v10309_v50, %v579_v1 }
 0x345   : > { %6252 = vmatmul.mubr.bf16.gmra.mrb[12].mxu1 %v7965_v12  ;;  %v8122_v12 = vcombine.high %v831_v7, %v843_v8 }
 0x346   : > { %7410 = vmatmul.mubr.bf16.gmra.mrb[12].mxu0 %v7977_v13  ;;  %6261 = vmatprep.mubr.bf16.mxu1 %v7990_v14  ;;  %v465_v13 = vld [vmem:[%s10501_s30 + $0x7a8] sm:$0xff] }
 0x347   : > { %7419 = vmatprep.mubr.bf16.mxu0 %v8002_v15  ;;  %v477_v14 = vld [vmem:[%s10501_s30 + $0x808] sm:$0xff]  ;;  %v471_v15 = vld [vmem:[%s10501_s30 + $0x7d8] sm:$0xff]  ;;  %v849_v17 = vmax.bf16 %v10309_v50, %v465_v13 }
 0x348   : > { %v861_v18 = vmax.bf16 %v10309_v50, %v477_v14  ;;  %v855_v19 = vmax.bf16 %v10309_v50, %v471_v15  ;;  %v603_v13 = vld [vmem:[%s10501_s30 + $0xbf8] sm:$0xff] }
 0x34a   : > { %v8134_v23 = vcombine.high %v849_v17, %v861_v18  ;;  %v8133_v33 = vcombine.low %v849_v17, %v861_v18  ;;  %v8145_v34 = vcombine.low %v855_v19, %v867_v20  ;;  %v987_v17 = vmax.bf16 %v10309_v50, %v603_v13 }
 0x34d   : > { %6262 = vmatmul.mubr.bf16.gmra.mrb[16].mxu1 %v7989_v24  ;;  %v8146_v24 = vcombine.high %v855_v19, %v867_v20 }
 0x34e   : > { %7420 = vmatmul.mubr.bf16.gmra.mrb[16].mxu0 %v8001_v25  ;;  %6271 = vmatprep.mubr.bf16.mxu1 %v8014_v26  ;;  %v489_v25 = vld [vmem:[%s10501_s30 + $0x868] sm:$0xff] }
 0x34f   : > { %7429 = vmatprep.mubr.bf16.mxu0 %v8026_v27  ;;  %v501_v26 = vld [vmem:[%s10501_s30 + $0x8c8] sm:$0xff]  ;;  %v495_v27 = vld [vmem:[%s10501_s30 + $0x898] sm:$0xff]  ;;  %v873_v29 = vmax.bf16 %v10309_v50, %v489_v25 }
 0x350   : > { %v885_v30 = vmax.bf16 %v10309_v50, %v501_v26  ;;  %v879_v31 = vmax.bf16 %v10309_v50, %v495_v27  ;;  %v1372_v27 = vld [vmem:[#allocation7] sm:$0x3] }
 0x352   : > { %v8158_v35 = vcombine.high %v873_v29, %v885_v30  ;;  %v8157_v45 = vcombine.low %v873_v29, %v885_v30  ;;  %v8169_v46 = vcombine.low %v879_v31, %v891_v32 }
 0x355   : > { %6272 = vmatmul.mubr.bf16.gmra.mrb[20].mxu1 %v8013_v36  ;;  %v8170_v36 = vcombine.high %v879_v31, %v891_v32 }
 0x356   : > { %7430 = vmatmul.mubr.bf16.gmra.mrb[20].mxu0 %v8025_v37  ;;  %6281 = vmatprep.mubr.bf16.mxu1 %v8038_v38  ;;  %v513_v37 = vld [vmem:[%s10501_s30 + $0x928] sm:$0xff] }
 0x357   : > { %7439 = vmatprep.mubr.bf16.mxu0 %v8050_v39  ;;  %v525_v38 = vld [vmem:[%s10501_s30 + $0x988] sm:$0xff]  ;;  %v519_v39 = vld [vmem:[%s10501_s30 + $0x958] sm:$0xff]  ;;  %v897_v41 = vmax.bf16 %v10309_v50, %v513_v37 }
 0x358   : > { %v909_v42 = vmax.bf16 %v10309_v50, %v525_v38  ;;  %v903_v43 = vmax.bf16 %v10309_v50, %v519_v39 }
 0x35a   : > { %v8182_v47 = vcombine.high %v897_v41, %v909_v42  ;;  %v8181_v58 = vcombine.low %v897_v41, %v909_v42  ;;  %v8193_v59 = vcombine.low %v903_v43, %v915_v44 }
 0x35d   : > { %6282 = vmatmul.mubr.bf16.gmra.mrb[24].mxu1 %v8037_v48  ;;  %v8194_v48 = vcombine.high %v903_v43, %v915_v44 }
 0x35e   : > { %7440 = vmatmul.mubr.bf16.gmra.mrb[24].mxu0 %v8049_v49  ;;  %6291 = vmatprep.mubr.bf16.mxu1 %v8062_v51  ;;  %v537_v49 = vld [vmem:[%s10501_s30 + $0x9e8] sm:$0xff] }
 0x35f   : > { %7449 = vmatprep.mubr.bf16.mxu0 %v8074_v52  ;;  %v549_v51 = vld [vmem:[%s10501_s30 + $0xa48] sm:$0xff]  ;;  %v543_v52 = vld [vmem:[%s10501_s30 + $0xa18] sm:$0xff]  ;;  %v921_v54 = vmax.bf16 %v10309_v50, %v537_v49 }
 0x360   : > { %v933_v55 = vmax.bf16 %v10309_v50, %v549_v51  ;;  %v927_v56 = vmax.bf16 %v10309_v50, %v543_v52 }
 0x362   : > { %v8206_v60 = vcombine.high %v921_v54, %v933_v55  ;;  %v8205_v6 = vcombine.low %v921_v54, %v933_v55  ;;  %v8217_v7 = vcombine.low %v927_v56, %v939_v57 }
 0x365   : > { %6292 = vmatmul.mubr.bf16.gmra.mrb[28].mxu1 %v8061_v61  ;;  %v8218_v61 = vcombine.high %v927_v56, %v939_v57 }
 0x366   : > { %7450 = vmatmul.mubr.bf16.gmra.mrb[28].mxu0 %v8073_v62  ;;  %6301 = vmatprep.mubr.bf16.mxu1 %v8086_v63  ;;  %v561_v62 = vld [vmem:[%s10501_s30 + $0xaa8] sm:$0xff] }
 0x367   : > { %7459 = vmatprep.mubr.bf16.mxu0 %v8098_v0  ;;  %v573_v63 = vld [vmem:[%s10501_s30 + $0xb08] sm:$0xff]  ;;  %v567_v0 = vld [vmem:[%s10501_s30 + $0xad8] sm:$0xff]  ;;  %v945_v2 = vmax.bf16 %v10309_v50, %v561_v62 }
 0x368   : > { %v957_v3 = vmax.bf16 %v10309_v50, %v573_v63  ;;  %v951_v4 = vmax.bf16 %v10309_v50, %v567_v0 }
 0x36a   : > { %v8230_v8 = vcombine.high %v945_v2, %v957_v3  ;;  %v8229_v18 = vcombine.low %v945_v2, %v957_v3  ;;  %v8241_v19 = vcombine.low %v951_v4, %v963_v5 }
 0x36d   : > { %6302 = vmatmul.mubr.bf16.gmra.mrb[32].mxu1 %v8085_v9  ;;  %v8242_v9 = vcombine.high %v951_v4, %v963_v5 }
 0x36e   : > { %7460 = vmatmul.mubr.bf16.gmra.mrb[32].mxu0 %v8097_v10  ;;  %6311 = vmatprep.mubr.bf16.mxu1 %v8110_v11  ;;  %v585_v10 = vld [vmem:[%s10501_s30 + $0xb68] sm:$0xff] }
 0x36f   : > { %7469 = vmatprep.mubr.bf16.mxu0 %v8122_v12  ;;  %v597_v11 = vld [vmem:[%s10501_s30 + $0xbc8] sm:$0xff]  ;;  %v591_v12 = vld [vmem:[%s10501_s30 + $0xb98] sm:$0xff]  ;;  %v969_v14 = vmax.bf16 %v10309_v50, %v585_v10 }
 0x370   : > { %v981_v15 = vmax.bf16 %v10309_v50, %v597_v11  ;;  %v975_v16 = vmax.bf16 %v10309_v50, %v591_v12 }
 0x372   : > { %v8254_v20 = vcombine.high %v969_v14, %v981_v15 }
 0x375   : > { %6312 = vmatmul.mubr.bf16.gmra.mrb[36].mxu1 %v8109_v21  ;;  %v8266_v21 = vcombine.high %v975_v16, %v987_v17 }
 0x376   : > { %7470 = vmatmul.mubr.bf16.gmra.mrb[36].mxu0 %v8121_v22  ;;  %6321 = vmatprep.mubr.bf16.mxu1 %v8134_v23  ;;  %v8253_v22 = vcombine.low %v969_v14, %v981_v15  ;;  %v8265_v23 = vcombine.low %v975_v16, %v987_v17 }
 0x377   : > { %7479 = vmatprep.mubr.bf16.mxu0 %v8146_v24  ;;  %v1374_v24 = vlaneseq }
 0x379   : > { %v1375_v25 = vshrl.u32 %v1374_v24, 7 }
 0x37b   : > { %v1376_v26 = vsub.s32 0, %v1375_v25  ;;  %v1380_v28 = vsub.s32 1, %v1375_v25 }
 0x37d   : > { %6322 = vmatmul.mubr.bf16.gmra.mrb[40].mxu1 %v8133_v33  ;;  %v11295_v29 = vrot.slane %v1372_v27, %v1376_v26  ;;  %v11297_v50 = vrot.slane %v1372_v27, %v1380_v28 }
 0x37e   : > { %7480 = vmatmul.mubr.bf16.gmra.mrb[40].mxu0 %v8145_v34  ;;  %6331 = vmatprep.mubr.bf16.mxu1 %v8158_v35 }
 0x37f   : > { %7489 = vmatprep.mubr.bf16.mxu0 %v8170_v36 }
 0x385   : > { %6332 = vmatmul.mubr.bf16.gmra.mrb[44].mxu1 %v8157_v45 }
 0x386   : > { %7490 = vmatmul.mubr.bf16.gmra.mrb[44].mxu0 %v8169_v46  ;;  %6341 = vmatprep.mubr.bf16.mxu1 %v8182_v47 }
 0x387   : > { %7499 = vmatprep.mubr.bf16.mxu0 %v8194_v48 }
 0x38d   : > { %6342 = vmatmul.mubr.bf16.gmra.mrb[48].mxu1 %v8181_v58 }
 0x38e   : > { %7500 = vmatmul.mubr.bf16.gmra.mrb[48].mxu0 %v8193_v59  ;;  %6351 = vmatprep.mubr.bf16.mxu1 %v8206_v60 }
 0x38f   : > { %7509 = vmatprep.mubr.bf16.mxu0 %v8218_v61 }
 0x395   : > { %6352 = vmatmul.mubr.bf16.gmra.mrb[52].mxu1 %v8205_v6 }
 0x396   : > { %7510 = vmatmul.mubr.bf16.gmra.mrb[52].mxu0 %v8217_v7  ;;  %6361 = vmatprep.mubr.bf16.mxu1 %v8230_v8 }
 0x397   : > { %7519 = vmatprep.mubr.bf16.mxu0 %v8242_v9 }
 0x39d   : > { %6362 = vmatmul.mubr.bf16.gmra.mrb[56].mxu1 %v8229_v18 }
 0x39e   : > { %7520 = vmatmul.mubr.bf16.gmra.mrb[56].mxu0 %v8241_v19  ;;  %6371 = vmatprep.mubr.bf16.mxu1 %v8254_v20 }
 0x39f   : > { %7529 = vmatprep.mubr.bf16.mxu0 %v8266_v21 }
 0x3a5   : > { %6372 = vmatmul.mubr.bf16.gmra.mrb[60].mxu1 %v8253_v22 }
 0x3a6   : > { %7530 = vmatmul.mubr.bf16.gmra.mrb[60].mxu0 %v8265_v23 }
 0x400   : > { %v6223_v30 = vpop.f32.mrb[0].mxu1 }
 0x401   : > { %v7381_v31 = vpop.f32.mrb[0].mxu0  ;;  %v8723_v32 = vadd.f32 %v6223_v30, %v11295_v29  ;;  %v6225_v33 = vpop.f32.mrb[1].mxu1 }
 0x402   : > { %v7383_v34 = vpop.f32.mrb[1].mxu0  ;;  %v8725_v35 = vadd.f32 %v6225_v33, %v11297_v50  ;;  %v6227_v36 = vpop.f32.mrb[2].mxu1 }
 0x403   : > { %v7385_v37 = vpop.f32.mrb[2].mxu0  ;;  %v8724_v38 = vadd.f32 %v8723_v32, %v7381_v31  ;;  %v8727_v39 = vadd.f32 %v6227_v36, %v11295_v29  ;;  %v6229_v40 = vpop.f32.mrb[3].mxu1 }
 0x404   : > { %v7387_v41 = vpop.f32.mrb[3].mxu0  ;;  %v8726_v42 = vadd.f32 %v8725_v35, %v7383_v34  ;;  %v8729_v43 = vadd.f32 %v6229_v40, %v11297_v50 }
 0x405   : > { %v8728_v44 = vadd.f32 %v8727_v39, %v7385_v37 }
 0x406   : > { %v8689_v45 = vpack.c.bf16 %v8726_v42, %v8724_v38  ;;  %v8730_v46 = vadd.f32 %v8729_v43, %v7387_v41 }
 0x408   : > { %7732 = vst [vmem:[%s11304_s20] sm:$0xff] %v8689_v45  ;;  %v8690_v47 = vpack.c.bf16 %v8730_v46, %v8728_v44  ;;  %v6233_v48 = vpop.f32.mrb[4].mxu1 }
 0x409   : > { %v7391_v49 = vpop.f32.mrb[4].mxu0  ;;  %v8731_v51 = vadd.f32 %v6233_v48, %v11295_v29  ;;  %v6235_v52 = vpop.f32.mrb[5].mxu1 }
 0x40a   : > { %v7393_v53 = vpop.f32.mrb[5].mxu0  ;;  %7733 = vst [vmem:[%s11304_s20 + $0x8] sm:$0xff] %v8690_v47  ;;  %v8733_v54 = vadd.f32 %v6235_v52, %v11297_v50  ;;  %v6237_v55 = vpop.f32.mrb[6].mxu1 }
 0x40b   : > { %v7395_v56 = vpop.f32.mrb[6].mxu0  ;;  %v8732_v57 = vadd.f32 %v8731_v51, %v7391_v49  ;;  %v8735_v58 = vadd.f32 %v6237_v55, %v11295_v29  ;;  %v6239_v59 = vpop.f32.mrb[7].mxu1 }
 0x40c   : > { %v7397_v60 = vpop.f32.mrb[7].mxu0  ;;  %v8734_v61 = vadd.f32 %v8733_v54, %v7393_v53  ;;  %v8737_v62 = vadd.f32 %v6239_v59, %v11297_v50 }
 0x40d   : > { %v8736_v63 = vadd.f32 %v8735_v58, %v7395_v56 }
 0x40e   : > { %v8691_v0 = vpack.c.bf16 %v8734_v61, %v8732_v57  ;;  %v8738_v1 = vadd.f32 %v8737_v62, %v7397_v60 }
 0x410   : > { %7734 = vst [vmem:[%s11304_s20 + $0x10] sm:$0xff] %v8691_v0  ;;  %v8692_v2 = vpack.c.bf16 %v8738_v1, %v8736_v63  ;;  %v6243_v3 = vpop.f32.mrb[8].mxu1 }
 0x411   : > { %v7401_v4 = vpop.f32.mrb[8].mxu0  ;;  %v8739_v5 = vadd.f32 %v6243_v3, %v11295_v29  ;;  %v6245_v6 = vpop.f32.mrb[9].mxu1 }
 0x412   : > { %v7403_v7 = vpop.f32.mrb[9].mxu0  ;;  %7735 = vst [vmem:[%s11304_s20 + $0x18] sm:$0xff] %v8692_v2  ;;  %v8741_v8 = vadd.f32 %v6245_v6, %v11297_v50  ;;  %v6247_v9 = vpop.f32.mrb[10].mxu1 }
 0x413   : > { %v7405_v10 = vpop.f32.mrb[10].mxu0  ;;  %v8740_v11 = vadd.f32 %v8739_v5, %v7401_v4  ;;  %v8743_v12 = vadd.f32 %v6247_v9, %v11295_v29  ;;  %v6249_v13 = vpop.f32.mrb[11].mxu1 }
 0x414   : > { %v7407_v14 = vpop.f32.mrb[11].mxu0  ;;  %v8742_v15 = vadd.f32 %v8741_v8, %v7403_v7  ;;  %v8745_v16 = vadd.f32 %v6249_v13, %v11297_v50 }
 0x415   : > { %v8744_v17 = vadd.f32 %v8743_v12, %v7405_v10 }
 0x416   : > { %v8693_v18 = vpack.c.bf16 %v8742_v15, %v8740_v11  ;;  %v8746_v19 = vadd.f32 %v8745_v16, %v7407_v14 }
 0x418   : > { %7736 = vst [vmem:[%s11304_s20 + $0x20] sm:$0xff] %v8693_v18  ;;  %v8694_v20 = vpack.c.bf16 %v8746_v19, %v8744_v17  ;;  %v6253_v21 = vpop.f32.mrb[12].mxu1 }
 0x419   : > { %v7411_v22 = vpop.f32.mrb[12].mxu0  ;;  %v8747_v23 = vadd.f32 %v6253_v21, %v11295_v29  ;;  %v6255_v24 = vpop.f32.mrb[13].mxu1 }
 0x41a   : > { %v7413_v25 = vpop.f32.mrb[13].mxu0  ;;  %7737 = vst [vmem:[%s11304_s20 + $0x28] sm:$0xff] %v8694_v20  ;;  %v8749_v26 = vadd.f32 %v6255_v24, %v11297_v50  ;;  %v6257_v27 = vpop.f32.mrb[14].mxu1 }
 0x41b   : > { %v7415_v28 = vpop.f32.mrb[14].mxu0  ;;  %v8748_v30 = vadd.f32 %v8747_v23, %v7411_v22  ;;  %v8751_v31 = vadd.f32 %v6257_v27, %v11295_v29  ;;  %v6259_v32 = vpop.f32.mrb[15].mxu1 }
 0x41c   : > { %v7417_v33 = vpop.f32.mrb[15].mxu0  ;;  %v8750_v34 = vadd.f32 %v8749_v26, %v7413_v25  ;;  %v8753_v35 = vadd.f32 %v6259_v32, %v11297_v50 }
 0x41d   : > { %v8752_v36 = vadd.f32 %v8751_v31, %v7415_v28 }
 0x41e   : > { %v8695_v37 = vpack.c.bf16 %v8750_v34, %v8748_v30  ;;  %v8754_v38 = vadd.f32 %v8753_v35, %v7417_v33 }
 0x420   : > { %7738 = vst [vmem:[%s11304_s20 + $0x30] sm:$0xff] %v8695_v37  ;;  %v8696_v39 = vpack.c.bf16 %v8754_v38, %v8752_v36  ;;  %v6263_v40 = vpop.f32.mrb[16].mxu1 }
 0x421   : > { %v7421_v41 = vpop.f32.mrb[16].mxu0  ;;  %v8755_v42 = vadd.f32 %v6263_v40, %v11295_v29  ;;  %v6265_v43 = vpop.f32.mrb[17].mxu1 }
 0x422   : > { %v7423_v44 = vpop.f32.mrb[17].mxu0  ;;  %7739 = vst [vmem:[%s11304_s20 + $0x38] sm:$0xff] %v8696_v39  ;;  %v8757_v45 = vadd.f32 %v6265_v43, %v11297_v50  ;;  %v6267_v46 = vpop.f32.mrb[18].mxu1 }
 0x423   : > { %v7425_v47 = vpop.f32.mrb[18].mxu0  ;;  %v8756_v48 = vadd.f32 %v8755_v42, %v7421_v41  ;;  %v8759_v49 = vadd.f32 %v6267_v46, %v11295_v29  ;;  %v6269_v51 = vpop.f32.mrb[19].mxu1 }
 0x424   : > { %v7427_v52 = vpop.f32.mrb[19].mxu0  ;;  %v8758_v53 = vadd.f32 %v8757_v45, %v7423_v44  ;;  %v8761_v54 = vadd.f32 %v6269_v51, %v11297_v50 }
 0x425   : > { %v8760_v55 = vadd.f32 %v8759_v49, %v7425_v47 }
 0x426   : > { %v8697_v56 = vpack.c.bf16 %v8758_v53, %v8756_v48  ;;  %v8762_v57 = vadd.f32 %v8761_v54, %v7427_v52 }
 0x428   : > { %7740 = vst [vmem:[%s11304_s20 + $0x40] sm:$0xff] %v8697_v56  ;;  %v8698_v58 = vpack.c.bf16 %v8762_v57, %v8760_v55  ;;  %v6273_v59 = vpop.f32.mrb[20].mxu1 }
 0x429   : > { %v7431_v60 = vpop.f32.mrb[20].mxu0  ;;  %v8763_v61 = vadd.f32 %v6273_v59, %v11295_v29  ;;  %v6275_v62 = vpop.f32.mrb[21].mxu1 }
 0x42a   : > { %v7433_v63 = vpop.f32.mrb[21].mxu0  ;;  %7741 = vst [vmem:[%s11304_s20 + $0x48] sm:$0xff] %v8698_v58  ;;  %v8765_v0 = vadd.f32 %v6275_v62, %v11297_v50  ;;  %v6277_v1 = vpop.f32.mrb[22].mxu1 }
 0x42b   : > { %v7435_v2 = vpop.f32.mrb[22].mxu0  ;;  %v8764_v3 = vadd.f32 %v8763_v61, %v7431_v60  ;;  %v8767_v4 = vadd.f32 %v6277_v1, %v11295_v29  ;;  %v6279_v5 = vpop.f32.mrb[23].mxu1 }
 0x42c   : > { %v7437_v6 = vpop.f32.mrb[23].mxu0  ;;  %v8766_v7 = vadd.f32 %v8765_v0, %v7433_v63  ;;  %v8769_v8 = vadd.f32 %v6279_v5, %v11297_v50 }
 0x42d   : > { %v8768_v9 = vadd.f32 %v8767_v4, %v7435_v2 }
 0x42e   : > { %v8699_v10 = vpack.c.bf16 %v8766_v7, %v8764_v3  ;;  %v8770_v11 = vadd.f32 %v8769_v8, %v7437_v6 }
 0x430   : > { %7742 = vst [vmem:[%s11304_s20 + $0x50] sm:$0xff] %v8699_v10  ;;  %v8700_v12 = vpack.c.bf16 %v8770_v11, %v8768_v9  ;;  %v6283_v13 = vpop.f32.mrb[24].mxu1 }
 0x431   : > { %v7441_v14 = vpop.f32.mrb[24].mxu0  ;;  %v8771_v15 = vadd.f32 %v6283_v13, %v11295_v29  ;;  %v6285_v16 = vpop.f32.mrb[25].mxu1 }
 0x432   : > { %v7443_v17 = vpop.f32.mrb[25].mxu0  ;;  %7743 = vst [vmem:[%s11304_s20 + $0x58] sm:$0xff] %v8700_v12  ;;  %v8773_v18 = vadd.f32 %v6285_v16, %v11297_v50  ;;  %v6287_v19 = vpop.f32.mrb[26].mxu1 }
 0x433   : > { %v7445_v20 = vpop.f32.mrb[26].mxu0  ;;  %v8772_v21 = vadd.f32 %v8771_v15, %v7441_v14  ;;  %v8775_v22 = vadd.f32 %v6287_v19, %v11295_v29  ;;  %v6289_v23 = vpop.f32.mrb[27].mxu1 }
 0x434   : > { %v7447_v24 = vpop.f32.mrb[27].mxu0  ;;  %v8774_v25 = vadd.f32 %v8773_v18, %v7443_v17  ;;  %v8777_v26 = vadd.f32 %v6289_v23, %v11297_v50 }
 0x435   : > { %v8776_v27 = vadd.f32 %v8775_v22, %v7445_v20 }
 0x436   : > { %v8701_v28 = vpack.c.bf16 %v8774_v25, %v8772_v21  ;;  %v8778_v30 = vadd.f32 %v8777_v26, %v7447_v24 }
 0x438   : > { %7744 = vst [vmem:[%s11304_s20 + $0x60] sm:$0xff] %v8701_v28  ;;  %v8702_v31 = vpack.c.bf16 %v8778_v30, %v8776_v27  ;;  %v6293_v32 = vpop.f32.mrb[28].mxu1 }
 0x439   : > { %v7451_v33 = vpop.f32.mrb[28].mxu0  ;;  %v8779_v34 = vadd.f32 %v6293_v32, %v11295_v29  ;;  %v6295_v35 = vpop.f32.mrb[29].mxu1 }
 0x43a   : > { %v7453_v36 = vpop.f32.mrb[29].mxu0  ;;  %7745 = vst [vmem:[%s11304_s20 + $0x68] sm:$0xff] %v8702_v31  ;;  %v8781_v37 = vadd.f32 %v6295_v35, %v11297_v50  ;;  %v6297_v38 = vpop.f32.mrb[30].mxu1 }
 0x43b   : > { %v7455_v39 = vpop.f32.mrb[30].mxu0  ;;  %v8780_v40 = vadd.f32 %v8779_v34, %v7451_v33  ;;  %v8783_v41 = vadd.f32 %v6297_v38, %v11295_v29  ;;  %v6299_v42 = vpop.f32.mrb[31].mxu1 }
 0x43c   : > { %v7457_v43 = vpop.f32.mrb[31].mxu0  ;;  %v8782_v44 = vadd.f32 %v8781_v37, %v7453_v36  ;;  %v8785_v45 = vadd.f32 %v6299_v42, %v11297_v50 }
 0x43d   : > { %v8784_v46 = vadd.f32 %v8783_v41, %v7455_v39 }
 0x43e   : > { %v8703_v47 = vpack.c.bf16 %v8782_v44, %v8780_v40  ;;  %v8786_v48 = vadd.f32 %v8785_v45, %v7457_v43 }
 0x440   : > { %7746 = vst [vmem:[%s11304_s20 + $0x70] sm:$0xff] %v8703_v47  ;;  %v8704_v49 = vpack.c.bf16 %v8786_v48, %v8784_v46  ;;  %v6303_v51 = vpop.f32.mrb[32].mxu1 }
 0x441   : > { %v7461_v52 = vpop.f32.mrb[32].mxu0  ;;  %v8787_v53 = vadd.f32 %v6303_v51, %v11295_v29  ;;  %v6305_v54 = vpop.f32.mrb[33].mxu1 }
 0x442   : > { %v7463_v55 = vpop.f32.mrb[33].mxu0  ;;  %7747 = vst [vmem:[%s11304_s20 + $0x78] sm:$0xff] %v8704_v49  ;;  %v8789_v56 = vadd.f32 %v6305_v54, %v11297_v50  ;;  %v6307_v57 = vpop.f32.mrb[34].mxu1 }
 0x443   : > { %v7465_v58 = vpop.f32.mrb[34].mxu0  ;;  %v8788_v59 = vadd.f32 %v8787_v53, %v7461_v52  ;;  %v8791_v60 = vadd.f32 %v6307_v57, %v11295_v29  ;;  %v6309_v61 = vpop.f32.mrb[35].mxu1 }
 0x444   : > { %v7467_v62 = vpop.f32.mrb[35].mxu0  ;;  %v8790_v63 = vadd.f32 %v8789_v56, %v7463_v55  ;;  %v8793_v0 = vadd.f32 %v6309_v61, %v11297_v50 }
 0x445   : > { %v8792_v1 = vadd.f32 %v8791_v60, %v7465_v58 }
 0x446   : > { %v8705_v2 = vpack.c.bf16 %v8790_v63, %v8788_v59  ;;  %v8794_v3 = vadd.f32 %v8793_v0, %v7467_v62 }
 0x448   : > { %7748 = vst [vmem:[%s11304_s20 + $0x80] sm:$0xff] %v8705_v2  ;;  %v8706_v4 = vpack.c.bf16 %v8794_v3, %v8792_v1  ;;  %v6313_v5 = vpop.f32.mrb[36].mxu1 }
 0x449   : > { %v7471_v6 = vpop.f32.mrb[36].mxu0  ;;  %v8795_v7 = vadd.f32 %v6313_v5, %v11295_v29  ;;  %v6315_v8 = vpop.f32.mrb[37].mxu1 }
 0x44a   : > { %v7473_v9 = vpop.f32.mrb[37].mxu0  ;;  %7749 = vst [vmem:[%s11304_s20 + $0x88] sm:$0xff] %v8706_v4  ;;  %v8797_v10 = vadd.f32 %v6315_v8, %v11297_v50  ;;  %v6317_v11 = vpop.f32.mrb[38].mxu1 }
 0x44b   : > { %v7475_v12 = vpop.f32.mrb[38].mxu0  ;;  %v8796_v13 = vadd.f32 %v8795_v7, %v7471_v6  ;;  %v8799_v14 = vadd.f32 %v6317_v11, %v11295_v29  ;;  %v6319_v15 = vpop.f32.mrb[39].mxu1 }
 0x44c   : > { %v7477_v16 = vpop.f32.mrb[39].mxu0  ;;  %v8798_v17 = vadd.f32 %v8797_v10, %v7473_v9  ;;  %v8801_v18 = vadd.f32 %v6319_v15, %v11297_v50 }
 0x44d   : > { %v8800_v19 = vadd.f32 %v8799_v14, %v7475_v12 }
 0x44e   : > { %v8707_v20 = vpack.c.bf16 %v8798_v17, %v8796_v13  ;;  %v8802_v21 = vadd.f32 %v8801_v18, %v7477_v16 }
 0x450   : > { %7750 = vst [vmem:[%s11304_s20 + $0x90] sm:$0xff] %v8707_v20  ;;  %v8708_v22 = vpack.c.bf16 %v8802_v21, %v8800_v19  ;;  %v6323_v23 = vpop.f32.mrb[40].mxu1 }
 0x451   : > { %v7481_v24 = vpop.f32.mrb[40].mxu0  ;;  %v8803_v25 = vadd.f32 %v6323_v23, %v11295_v29  ;;  %v6325_v26 = vpop.f32.mrb[41].mxu1 }
 0x452   : > { %v7483_v27 = vpop.f32.mrb[41].mxu0  ;;  %7751 = vst [vmem:[%s11304_s20 + $0x98] sm:$0xff] %v8708_v22  ;;  %v8805_v28 = vadd.f32 %v6325_v26, %v11297_v50  ;;  %v6327_v30 = vpop.f32.mrb[42].mxu1 }
 0x453   : > { %v7485_v31 = vpop.f32.mrb[42].mxu0  ;;  %v8804_v32 = vadd.f32 %v8803_v25, %v7481_v24  ;;  %v8807_v33 = vadd.f32 %v6327_v30, %v11295_v29  ;;  %v6329_v34 = vpop.f32.mrb[43].mxu1 }
 0x454   : > { %v7487_v35 = vpop.f32.mrb[43].mxu0  ;;  %v8806_v36 = vadd.f32 %v8805_v28, %v7483_v27  ;;  %v8809_v37 = vadd.f32 %v6329_v34, %v11297_v50 }
 0x455   : > { %v8808_v38 = vadd.f32 %v8807_v33, %v7485_v31 }
 0x456   : > { %v8709_v39 = vpack.c.bf16 %v8806_v36, %v8804_v32  ;;  %v8810_v40 = vadd.f32 %v8809_v37, %v7487_v35 }
 0x458   : > { %7752 = vst [vmem:[%s11304_s20 + $0xa0] sm:$0xff] %v8709_v39  ;;  %v8710_v41 = vpack.c.bf16 %v8810_v40, %v8808_v38  ;;  %v6333_v42 = vpop.f32.mrb[44].mxu1 }
 0x459   : > { %v7491_v43 = vpop.f32.mrb[44].mxu0  ;;  %v8811_v44 = vadd.f32 %v6333_v42, %v11295_v29  ;;  %v6335_v45 = vpop.f32.mrb[45].mxu1 }
 0x45a   : > { %v7493_v46 = vpop.f32.mrb[45].mxu0  ;;  %7753 = vst [vmem:[%s11304_s20 + $0xa8] sm:$0xff] %v8710_v41  ;;  %v8813_v47 = vadd.f32 %v6335_v45, %v11297_v50  ;;  %v6337_v48 = vpop.f32.mrb[46].mxu1 }
 0x45b   : > { %v7495_v49 = vpop.f32.mrb[46].mxu0  ;;  %v8812_v51 = vadd.f32 %v8811_v44, %v7491_v43  ;;  %v8815_v52 = vadd.f32 %v6337_v48, %v11295_v29  ;;  %v6339_v53 = vpop.f32.mrb[47].mxu1 }
 0x45c   : > { %v7497_v54 = vpop.f32.mrb[47].mxu0  ;;  %v8814_v55 = vadd.f32 %v8813_v47, %v7493_v46  ;;  %v8817_v56 = vadd.f32 %v6339_v53, %v11297_v50 }
 0x45d   : > { %v8816_v57 = vadd.f32 %v8815_v52, %v7495_v49 }
 0x45e   : > { %v8711_v58 = vpack.c.bf16 %v8814_v55, %v8812_v51  ;;  %v8818_v59 = vadd.f32 %v8817_v56, %v7497_v54 }
 0x460   : > { %7754 = vst [vmem:[%s11304_s20 + $0xb0] sm:$0xff] %v8711_v58  ;;  %v8712_v60 = vpack.c.bf16 %v8818_v59, %v8816_v57  ;;  %v6343_v61 = vpop.f32.mrb[48].mxu1 }
 0x461   : > { %v7501_v62 = vpop.f32.mrb[48].mxu0  ;;  %v8819_v63 = vadd.f32 %v6343_v61, %v11295_v29  ;;  %v6345_v0 = vpop.f32.mrb[49].mxu1 }
 0x462   : > { %v7503_v1 = vpop.f32.mrb[49].mxu0  ;;  %7755 = vst [vmem:[%s11304_s20 + $0xb8] sm:$0xff] %v8712_v60  ;;  %v8821_v2 = vadd.f32 %v6345_v0, %v11297_v50  ;;  %v6347_v3 = vpop.f32.mrb[50].mxu1 }
 0x463   : > { %v7505_v4 = vpop.f32.mrb[50].mxu0  ;;  %v8820_v5 = vadd.f32 %v8819_v63, %v7501_v62  ;;  %v8823_v6 = vadd.f32 %v6347_v3, %v11295_v29  ;;  %v6349_v7 = vpop.f32.mrb[51].mxu1 }
 0x464   : > { %v7507_v8 = vpop.f32.mrb[51].mxu0  ;;  %v8822_v9 = vadd.f32 %v8821_v2, %v7503_v1  ;;  %v8825_v10 = vadd.f32 %v6349_v7, %v11297_v50 }
 0x465   : > { %v8824_v11 = vadd.f32 %v8823_v6, %v7505_v4 }
 0x466   : > { %v8713_v12 = vpack.c.bf16 %v8822_v9, %v8820_v5  ;;  %v8826_v13 = vadd.f32 %v8825_v10, %v7507_v8 }
 0x468   : > { %7756 = vst [vmem:[%s11304_s20 + $0xc0] sm:$0xff] %v8713_v12  ;;  %v8714_v14 = vpack.c.bf16 %v8826_v13, %v8824_v11  ;;  %v6353_v15 = vpop.f32.mrb[52].mxu1 }
 0x469   : > { %v7511_v16 = vpop.f32.mrb[52].mxu0  ;;  %v8827_v17 = vadd.f32 %v6353_v15, %v11295_v29  ;;  %v6355_v18 = vpop.f32.mrb[53].mxu1 }
 0x46a   : > { %v7513_v19 = vpop.f32.mrb[53].mxu0  ;;  %7757 = vst [vmem:[%s11304_s20 + $0xc8] sm:$0xff] %v8714_v14  ;;  %v8829_v20 = vadd.f32 %v6355_v18, %v11297_v50  ;;  %v6357_v21 = vpop.f32.mrb[54].mxu1 }
 0x46b   : > { %v7515_v22 = vpop.f32.mrb[54].mxu0  ;;  %v8828_v23 = vadd.f32 %v8827_v17, %v7511_v16  ;;  %v8831_v24 = vadd.f32 %v6357_v21, %v11295_v29  ;;  %v6359_v25 = vpop.f32.mrb[55].mxu1 }
 0x46c   : > { %v7517_v26 = vpop.f32.mrb[55].mxu0  ;;  %v8830_v27 = vadd.f32 %v8829_v20, %v7513_v19  ;;  %v8833_v28 = vadd.f32 %v6359_v25, %v11297_v50 }
 0x46d   : > { %v8832_v30 = vadd.f32 %v8831_v24, %v7515_v22 }
 0x46e   : > { %v8715_v31 = vpack.c.bf16 %v8830_v27, %v8828_v23  ;;  %v8834_v32 = vadd.f32 %v8833_v28, %v7517_v26 }
 0x470   : > { %7758 = vst [vmem:[%s11304_s20 + $0xd0] sm:$0xff] %v8715_v31  ;;  %v8716_v33 = vpack.c.bf16 %v8834_v32, %v8832_v30  ;;  %v6363_v34 = vpop.f32.mrb[56].mxu1 }
 0x471   : > { %v7521_v35 = vpop.f32.mrb[56].mxu0  ;;  %v8835_v36 = vadd.f32 %v6363_v34, %v11295_v29  ;;  %v6365_v37 = vpop.f32.mrb[57].mxu1 }
 0x472   : > { %v7523_v38 = vpop.f32.mrb[57].mxu0  ;;  %7759 = vst [vmem:[%s11304_s20 + $0xd8] sm:$0xff] %v8716_v33  ;;  %v8837_v39 = vadd.f32 %v6365_v37, %v11297_v50  ;;  %v6367_v40 = vpop.f32.mrb[58].mxu1 }
 0x473   : > { %v7525_v41 = vpop.f32.mrb[58].mxu0  ;;  %v8836_v42 = vadd.f32 %v8835_v36, %v7521_v35  ;;  %v8839_v43 = vadd.f32 %v6367_v40, %v11295_v29  ;;  %v6369_v44 = vpop.f32.mrb[59].mxu1 }
 0x474   : > { %v7527_v45 = vpop.f32.mrb[59].mxu0  ;;  %v8838_v46 = vadd.f32 %v8837_v39, %v7523_v38  ;;  %v8841_v47 = vadd.f32 %v6369_v44, %v11297_v50 }
 0x475   : > { %v8840_v48 = vadd.f32 %v8839_v43, %v7525_v41 }
 0x476   : > { %v8717_v49 = vpack.c.bf16 %v8838_v46, %v8836_v42  ;;  %v8842_v51 = vadd.f32 %v8841_v47, %v7527_v45 }
 0x478   : > { %7760 = vst [vmem:[%s11304_s20 + $0xe0] sm:$0xff] %v8717_v49  ;;  %v8718_v52 = vpack.c.bf16 %v8842_v51, %v8840_v48  ;;  %v6373_v53 = vpop.f32.mrb[60].mxu1 }
 0x479   : > { %v7531_v54 = vpop.f32.mrb[60].mxu0  ;;  %v8843_v55 = vadd.f32 %v6373_v53, %v11295_v29  ;;  %v6375_v56 = vpop.f32.mrb[61].mxu1 }
 0x47a   : > { %v7533_v57 = vpop.f32.mrb[61].mxu0  ;;  %7761 = vst [vmem:[%s11304_s20 + $0xe8] sm:$0xff] %v8718_v52  ;;  %v8845_v58 = vadd.f32 %v6375_v56, %v11297_v50  ;;  %v6377_v59 = vpop.f32.mrb[62].mxu1 }
 0x47b   : > { %v7535_v60 = vpop.f32.mrb[62].mxu0  ;;  %v8844_v61 = vadd.f32 %v8843_v55, %v7531_v54  ;;  %v8847_v62 = vadd.f32 %v6377_v59, %v11295_v29  ;;  %v6379_v63 = vpop.f32.mrb[63].mxu1 }
 0x47c   : > { %v7537_v0 = vpop.f32.mrb[63].mxu0  ;;  %v8846_v1 = vadd.f32 %v8845_v58, %v7533_v57  ;;  %v8849_v2 = vadd.f32 %v6379_v63, %v11297_v50 }
 0x47d   : > { %v8848_v3 = vadd.f32 %v8847_v62, %v7535_v60 }
 0x47e   : > { %v8719_v4 = vpack.c.bf16 %v8846_v1, %v8844_v61  ;;  %v8850_v5 = vadd.f32 %v8849_v2, %v7537_v0 }
 0x480   : > { %7762 = vst [vmem:[%s11304_s20 + $0xf0] sm:$0xff] %v8719_v4  ;;  %v8720_v29 = vpack.c.bf16 %v8850_v5, %v8848_v3 }
 0x482   : > { %7763 = vst [vmem:[%s11304_s20 + $0xf8] sm:$0xff] %v8720_v29 }
 0x483   : > { %10243 = shalt.err (!%p10240_p7)
}
 0x484   : > { %s10244_s11 = scalar_lea.hbm %s11401_s23, 4096  ;;  %s10248_s22 = scalar_lea.hbm %s11451_s3, 32768 }
 0x485   : > { %p10245_p9 = scmp.ne.s32.totalorder %s11401_s23, %s10244_s11  ;;  %p10249_p5 = scmp.lt.u32.totalorder %s11401_s23, %s11451_s3 }
 0x486   : > { %p10250_p10 = scmp.lt.u32.totalorder %s10248_s22, %s10244_s11  ;;  %p10252_p1 = scmp.lt.u32.totalorder %s10244_s11, %s11401_s23 }
 0x487   : > { %p10246_p12 = pnand %p10245_p9, %p10445_p4 }
 0x488   : > { %p10251_p11 = por %p10250_p10, %p10249_p5 }
 0x489   : > { %p10247_p0 = pneg %p10246_p12 }
 0x48a   : > { %p10253_p2 = por %p10252_p1, %p10251_p11 }
 0x48c   : > { %p10254_p6 = pnand %p10253_p2, %p10247_p0 }
 0x48e   : > { %10257 = shalt.err (!%p10254_p6)
}
 0x48f   : > { %s10311_s18 = smov 128   ;;  %s10312_s20 = smov 8  }
 0x490   : > { %9504 = dma.vmem_to_hbm [thread:$0]  (%p10445_p4), %s11403_s21, 4096, %s11401_s23, %s7765_s5, %s10311_s18, %s10311_s18, %s10312_s20  }
 0x491 PF: > { %p9526_p8 = scmp.ge.s32.totalorder %s10300_s15, 2  ;;  %s7794_s10 = sand.u32 1, %s10288_s12  }
 0x492   : > { %p11466_p13 = scmp.ne.s32.totalorder %s11456_s19, 0  ;;  %s7795_s26 = scalar_lea.sflag [#allocation4], %s7794_s10 }
 0x494   : > { %p9518_p3 = pnand %p9526_p8, %p11466_p13 }
 0x496   : > { %10283 = dma.done.wait (!%p9518_p3), %s7795_s26, 4096  }
 0x497   : > { %10285 = vsyncadd (!%p9518_p3), %s7795_s26, 4294963200  ;;  %p17_p7 = scmp.ge.s32.totalorder %s10435_s4, 10   ;;  %s11467_s12 = smov %s10292_s13 }
 0x498   : > { %s11468_s13 = smov %s10296_s14  ;;  %s11469_s14 = smov %s10451_s7 }
 0x499   : > { %s11470_s15 = smov %s10435_s4  ;;  %19 = sbr.rel (!%p17_p7) target bundleno = 6 (0x6), region = 85 }
 0x4a0   :  { %7800 = vsyncpa [#allocation3], 1 }
 0x4a1   :  { %7802 = vsyncpa [#allocation3 + $0x1], 1 }
 0x4a2   :  { %7803 = vsyncpa [#allocation6], 1 }
 0x4a3   :  { %7804 = vsyncpa [#allocation4], 1 }
 0x4a4   :  { %7806 = vsyncpa [#allocation4 + $0x1], 1 }

// kernel: global_aggregation_cell.1
= control target key start
LH: loop header
LB: loop body
LE: loop exit
PB: predicated region body
PF: predicated region fallthrough
CT: control target
= control target key end

     0   :  { %8 = vsyncpa [#allocation3], 0  ;;  %s11448_s0 = inlined_call_operand.hbm [shape: bf16[2048,3072], index: 0, kind: input, shape index: {}]   ;;  %s11449_s1 = inlined_call_operand.hbm [shape: bf16[3072,256], index: 1, kind: input, shape index: {}]   ;;  %s11450_s2 = inlined_call_operand.hbm [shape: f32[1,256], index: 2, kind: input, shape index: {}]   ;;  %s11451_s3 = inlined_call_operand.hbm [shape: bf16[2048,256], index: 3, kind: output, shape index: {}]  }
   0x1   :  { %10 = vsyncpa [#allocation3 + $0x1], 0 }
   0x2   :  { %11 = vsyncpa [#allocation6], 0 }
   0x3   :  { %12 = vsyncpa [#allocation4], 0 }
   0x4   :  { %14 = vsyncpa [#allocation4 + $0x1], 0  ;;  %s10333_s12 = smov 0   ;;  %s10335_s13 = smov 0  }
   0x5   :  { %s10337_s14 = smov 0   ;;  %s10339_s15 = smov 0  }
   0x6 LB: > { %s10354_s16 = sadd.s32 4294967295, %s10300_s15   ;;  %s7871_s17 = sadd.s32 4294967294, %s10300_s15   ;;  %s10300_s15 = sphi %s10339_s15, %s11470_s15   ;;  %s10296_s14 = sphi %s10337_s14, %s11469_s14   ;;  %s10292_s13 = sphi %s10335_s13, %s11468_s13   ;;  %s10288_s12 = sphi %s10333_s12, %s11467_s12  }
   0x7   : > { %p40_p0 = scmp.ne.s32.totalorder %s10292_s13, %s10288_s12  ;;  %p11452_p1 = scmp.eq.s32.totalorder %s10354_s16, 0 }
   0x8   : > { %p112_p3 = scmp.eq.s32.totalorder %s7871_s17, 7  ;;  %p7872_p5 = scmp.ge.s32.totalorder %s10300_s15, 1 }
   0x9   : > { %p10363_p4 = por %p11452_p1, %p40_p0  ;;  %p119_p7 = scmp.lt.s32.totalorder %s10300_s15, 9 }
   0xa   : > { %p10368_p6 = por %p112_p3, %p40_p0  ;;  %s10302_s21 = smov [#allocation5]  }
   0xb   : > { %s11455_s18 = scalar_select %p10363_p4, 1, 0 }
   0xc   : > { %s11456_s19 = scalar_select %p10368_p6, 1, 0 }
   0xd   : > { %p10373_p8 = pnand %p7872_p5, %p119_p7  ;;  %s131_s22 = sshll.u32 %s10302_s21, 4  ;;  %s132_s22 = int_to_ptr.vmem [resolvable:$true] %s131_s22 }
   0xe   : > { %s10303_s24 = smov [#allocation7]   ;;  %s10144_s28 = scalar_lea.hbm %s11449_s1, 49152 }
   0xf   : > { %s11457_s20 = scalar_select %p10373_p8, 1, 0 }
  0x10   : > { %p9506_p9 = pneg %p10373_p8  ;;  %s145_s25 = sshll.u32 %s10303_s24, 4  ;;  %s10385_s25 = int_to_ptr.vmem [resolvable:$true] %s145_s25 }
  0x11   : > { %p10145_p11 = scmp.ne.s32.totalorder %s11449_s1, %s10144_s28  ;;  %p10151_p3 = scmp.lt.u32.totalorder %s10144_s28, %s11449_s1 }
  0x12   : > { %p10381_p10 = pnand %p9506_p9, %p11452_p1 }
  0x14   : > { %p10146_p12 = pneg %p10381_p10 }
  0x16   : > { %p10147_p13 = pnand %p10146_p12, %p10145_p11 }
  0x18   : > { %p10148_p0 = pneg %p10147_p13 }
  0x1a   : > { %p10153_p5 = pnand %p10151_p3, %p10148_p0 }
  0x1c   : > { %10156 = shalt.err (!%p10153_p5)
}
  0x1d   : > { %s10157_s6 = scalar_lea.vmem %s132_s22, 49152  ;;  %p10165_p2 = scmp.lt.s32.totalorder %s132_s22, %s132_s22 }
  0x1e   : > { %p10158_p7 = scmp.ne.s32.totalorder %s132_s22, %s10157_s6  ;;  %p10166_p6 = scmp.lt.s32.totalorder %s10157_s6, %s10157_s6 }
  0x20   : > { %p10160_p9 = pnand %p10158_p7, %p10146_p12  ;;  %p10167_p4 = por %p10166_p6, %p10165_p2 }
  0x22   : > { %p10161_p1 = pneg %p10160_p9 }
  0x24   : > { %p10168_p8 = pnand %p10167_p4, %p10161_p1 }
  0x26   : > { %10171 = shalt.err (!%p10168_p8)
}
  0x27   : > { %s10304_s7 = smov 128   ;;  %s10305_s8 = smov 8  }
  0x28   : > { %9509 = dma.hbm_to_vmem [thread:$0]  (!%p10381_p10), %s11449_s1, 49152, %s132_s22, [#allocation6], %s10304_s7, %s10304_s7, %s10305_s8  }
  0x29   : > { %s10172_s21 = scalar_lea.hbm %s11450_s2, 32 }
  0x2a   : > { %p10173_p11 = scmp.ne.s32.totalorder %s11450_s2, %s10172_s21  ;;  %p10179_p4 = scmp.lt.u32.totalorder %s10172_s21, %s11450_s2 }
  0x2c   : > { %p10175_p1 = pnand %p10173_p11, %p10146_p12 }
  0x2e   : > { %p10176_p2 = pneg %p10175_p1 }
  0x30   : > { %p10181_p6 = pnand %p10179_p4, %p10176_p2 }
  0x32   : > { %10184 = shalt.err (!%p10181_p6)
}
  0x33   : > { %s10185_s22 = scalar_lea.vmem %s10385_s25, 32  ;;  %p10193_p3 = scmp.lt.s32.totalorder %s10385_s25, %s10385_s25 }
  0x34   : > { %p10186_p8 = scmp.ne.s32.totalorder %s10385_s25, %s10185_s22  ;;  %p10194_p5 = scmp.lt.s32.totalorder %s10185_s22, %s10185_s22 }
  0x36   : > { %p10188_p13 = pnand %p10186_p8, %p10146_p12  ;;  %p10195_p7 = por %p10194_p5, %p10193_p3 }
  0x38   : > { %p10189_p0 = pneg %p10188_p13 }
  0x3a   : > { %p10196_p9 = pnand %p10195_p7, %p10189_p0 }
  0x3c   : > { %10199 = shalt.err (!%p10196_p9)
}
  0x3d   : > { %9512 = dma.hbm_to_vmem [thread:$0]  (!%p10381_p10), %s11450_s2, 32, %s10385_s25, [#allocation6]  }
  0x3e   : > { %s10435_s4 = sadd.s32 1, %s10300_s15   ;;  %s27_s23 = sadd.s32 1, %s10296_s14 }
  0x3f   : > { %s24_s5 = ssub.s32 %s10300_s15, %s10435_s4  ;;  %p34_p12 = scmp.ne.s32.totalorder %s10296_s14, %s10292_s13 }
  0x40   : > { %p25_p11 = scmp.eq.s32.totalorder %s24_s5, 0  ;;  %p35_p1 = scmp.eq.s32.totalorder %s10300_s15, 0 }
  0x41   : > { %p11459_p2 = scmp.eq.s32.totalorder %s10354_s16, 7  ;;  %p9523_p6 = scmp.lt.s32.totalorder %s10300_s15, 8 }
  0x42   : > { %s10451_s7 = scalar_select %p25_p11, %s10296_s14, %s27_s23  }
  0x43   : > { %p10445_p4 = por %p11459_p2, %p34_p12  ;;  %p36_p8 = por %p35_p1, %p34_p12 }
  0x44   : > { %s156_s8 = sand.u32 1, %s10296_s14   ;;  %s9492_s25 = smul.u32 49152, %s10300_s15 }
  0x45   : > { %s9491_s9 = smul.u32 3072, %s156_s8  ;;  %p10455_p10 = pnand %p9523_p6, %p36_p8 }
  0x46   : > { %s10462_s21 = scalar_lea.hbm %s11448_s0, %s9492_s25  ;;  %s10466_s27 = scalar_lea.sflag [#allocation3], %s156_s8 }
  0x47   : > { %s160_s24 = scalar_lea.vmem [#allocation2], %s9491_s9  ;;  %s10200_s28 = scalar_lea.hbm %s10462_s21, 49152 }
  0x48   : > { %s168_s26 = sshll.u32 %s160_s24, 4  ;;  %p10201_p13 = scmp.ne.s32.totalorder %s10462_s21, %s10200_s28  ;;  %s10464_s26 = int_to_ptr.vmem [resolvable:$true] %s168_s26 }
  0x49   : > { %p10202_p0 = pneg %p10455_p10  ;;  %s10205_s30 = scalar_lea.hbm %s11448_s0, 393216 }
  0x4a   : > { %p10206_p7 = scmp.lt.u32.totalorder %s10462_s21, %s11448_s0  ;;  %p10207_p9 = scmp.lt.u32.totalorder %s10205_s30, %s10200_s28 }
  0x4b   : > { %p10203_p3 = pnand %p10202_p0, %p10201_p13  ;;  %p10209_p11 = scmp.lt.u32.totalorder %s10200_s28, %s10462_s21 }
  0x4c   : > { %p10208_p12 = por %p10207_p9, %p10206_p7 }
  0x4d   : > { %p10204_p5 = pneg %p10203_p3 }
  0x4e   : > { %p10210_p1 = por %p10209_p11, %p10208_p12 }
  0x50   : > { %p10211_p2 = pnand %p10210_p1, %p10204_p5 }
  0x52   : > { %10214 = shalt.err (!%p10211_p2)
}
  0x53   : > { %s10215_s8 = scalar_lea.vmem %s10464_s26, 49152  ;;  %s10306_s9 = smov [#allocation2]  }
  0x54   : > { %p10216_p6 = scmp.ne.s32.totalorder %s10464_s26, %s10215_s8  ;;  %s10220_s25 = sshll.u32 %s10306_s9, 4  ;;  %s10221_s25 = int_to_ptr.vmem [resolvable:$false] %s10220_s25 }
  0x55   : > { %s10222_s11 = scalar_lea.vmem %s10221_s25, 98304  ;;  %p10223_p3 = scmp.lt.s32.totalorder %s10464_s26, %s10221_s25 }
  0x56   : > { %p10218_p8 = pnand %p10216_p6, %p10202_p0  ;;  %p10224_p7 = scmp.lt.s32.totalorder %s10222_s11, %s10215_s8 }
  0x58   : > { %p10219_p13 = pneg %p10218_p8  ;;  %p10225_p9 = por %p10224_p7, %p10223_p3 }
  0x5a   : > { %p10226_p12 = pnand %p10225_p9, %p10219_p13 }
  0x5c   : > { %10229 = shalt.err (!%p10226_p12)
}
  0x5d   : > { %s10307_s17 = smov 1536   ;;  %s10308_s24 = smov 96  }
  0x5e   : > { %9516 = dma.hbm_to_vmem [thread:$0]  (!%p10455_p10), %s10462_s21, 49152, %s10464_s26, %s10466_s27, %s10307_s17, %s10307_s17, %s10308_s24  }
  0x5f   : > { %p11462_p0 = scmp.ne.s32.totalorder %s11457_s20, 0 }
  0x60   : > { %s10497_s28 = sand.u32 (!%p11462_p0), 1, %s10292_s13   ;;  %p11463_p5 = scmp.ne.s32.totalorder (!%p11462_p0), %s11455_s18, 0 }
  0x61   : > { %180 = sbr.rel (%p11462_p0) target bundleno = 1169 (0x491), region = 32  ;;  %s183_s29 = scalar_lea.sflag (!%p11462_p0), [#allocation3], %s10497_s28 }
  0x62   : > { %s9493_s22 = smul.u32 (!%p11462_p0), 3072, %s10497_s28 }
  0x64   : > { %s10501_s30 = scalar_lea.vmem (!%p11462_p0), [#allocation2], %s9493_s22 }
  0x68   : > { %10275 = dma.done.wait (%p11463_p5), %s183_s29, 49152  }
  0x69   : > { %10277 = vsyncadd (%p11463_p5), %s183_s29, 4294918144  ;;  %p11464_p10 = scmp.eq.s32.totalorder %s10354_s16, 0 }
  0x6b   : > { %10279 = dma.done.wait (%p11464_p10), [#allocation6], 49184   ;;  %p11465_p11 = pmov %p11464_p10 }
  0x6c   : > { %v9568_v0 = vld [vmem:[#allocation5 + $0x4] ss:$8 sps:$4 sm:$0xff]   ;;  %v9572_v2 = vld [vmem:[#allocation5] ss:$8 sps:$4 sm:$0xff]   ;;  %v9574_v4 = vld [vmem:[#allocation5 + $0x14] ss:$8 sps:$4 sm:$0xff]  }
  0x6d   : > { %10281 = vsyncadd (%p11465_p11), [#allocation6], 4294918112  ;;  %v9570_v1 = vld [vmem:[#allocation5 + $0x604] ss:$8 sps:$4 sm:$0xff]   ;;  %5224 = vmatprep.subr.bf16.mxu1 %v9568_v0  ;;  %v9573_v3 = vld [vmem:[#allocation5 + $0x600] ss:$8 sps:$4 sm:$0xff]  }
  0x6e   : > { %6382 = vmatprep.subr.bf16.mxu0 %v9570_v1  ;;  %5225 = vmatpush1.bf16.msra.mxu1 %v9572_v2  ;;  %v9576_v5 = vld [vmem:[#allocation5 + $0x614] ss:$8 sps:$4 sm:$0xff]   ;;  %v9578_v6 = vld [vmem:[#allocation5 + $0x10] ss:$8 sps:$4 sm:$0xff]   ;;  %v9580_v8 = vld [vmem:[#allocation5 + $0x24] ss:$8 sps:$4 sm:$0xff]  }
  0x6f   : > { %6383 = vmatpush1.bf16.msra.mxu0 %v9573_v3  ;;  %5226 = vmatprep.subr.bf16.mxu1 %v9574_v4  ;;  %v9579_v7 = vld [vmem:[#allocation5 + $0x610] ss:$8 sps:$4 sm:$0xff]   ;;  %v9582_v9 = vld [vmem:[#allocation5 + $0x624] ss:$8 sps:$4 sm:$0xff]   ;;  %v9584_v10 = vld [vmem:[#allocation5 + $0x20] ss:$8 sps:$4 sm:$0xff]  }
  0x70   : > { %6384 = vmatprep.subr.bf16.mxu0 %v9576_v5  ;;  %v9585_v11 = vld [vmem:[#allocation5 + $0x620] ss:$8 sps:$4 sm:$0xff]   ;;  %v9586_v12 = vld [vmem:[#allocation5 + $0x34] ss:$8 sps:$4 sm:$0xff]   ;;  %v9590_v14 = vld [vmem:[#allocation5 + $0x30] ss:$8 sps:$4 sm:$0xff]  }
  0x71   : > { %v9588_v13 = vld [vmem:[#allocation5 + $0x634] ss:$8 sps:$4 sm:$0xff]   ;;  %v9591_v15 = vld [vmem:[#allocation5 + $0x630] ss:$8 sps:$4 sm:$0xff]   ;;  %v9592_v16 = vld [vmem:[#allocation5 + $0x44] ss:$8 sps:$4 sm:$0xff]  }
  0x72   : > { %5227 = vmatpush1.bf16.msra.mxu1 %v9578_v6  ;;  %v9594_v17 = vld [vmem:[#allocation5 + $0x644] ss:$8 sps:$4 sm:$0xff]   ;;  %v9596_v18 = vld [vmem:[#allocation5 + $0x40] ss:$8 sps:$4 sm:$0xff]   ;;  %v9598_v20 = vld [vmem:[#allocation5 + $0x54] ss:$8 sps:$4 sm:$0xff]  }
  0x73   : > { %6385 = vmatpush1.bf16.msra.mxu0 %v9579_v7  ;;  %5228 = vmatprep.subr.bf16.mxu1 %v9580_v8  ;;  %v9597_v19 = vld [vmem:[#allocation5 + $0x640] ss:$8 sps:$4 sm:$0xff]   ;;  %v9600_v21 = vld [vmem:[#allocation5 + $0x654] ss:$8 sps:$4 sm:$0xff]   ;;  %v9602_v22 = vld [vmem:[#allocation5 + $0x50] ss:$8 sps:$4 sm:$0xff]  }
  0x74   : > { %6386 = vmatprep.subr.bf16.mxu0 %v9582_v9  ;;  %v9603_v23 = vld [vmem:[#allocation5 + $0x650] ss:$8 sps:$4 sm:$0xff]   ;;  %v9604_v24 = vld [vmem:[#allocation5 + $0x64] ss:$8 sps:$4 sm:$0xff]   ;;  %v9608_v26 = vld [vmem:[#allocation5 + $0x60] ss:$8 sps:$4 sm:$0xff]  }
  0x75   : > { %v9606_v25 = vld [vmem:[#allocation5 + $0x664] ss:$8 sps:$4 sm:$0xff]   ;;  %v9609_v27 = vld [vmem:[#allocation5 + $0x660] ss:$8 sps:$4 sm:$0xff]   ;;  %v9610_v28 = vld [vmem:[#allocation5 + $0x74] ss:$8 sps:$4 sm:$0xff]  }
  0x76   : > { %5229 = vmatpush1.bf16.msra.mxu1 %v9584_v10  ;;  %v9612_v29 = vld [vmem:[#allocation5 + $0x674] ss:$8 sps:$4 sm:$0xff]   ;;  %v9614_v30 = vld [vmem:[#allocation5 + $0x70] ss:$8 sps:$4 sm:$0xff]   ;;  %v9616_v32 = vld [vmem:[#allocation5 + $0x84] ss:$8 sps:$4 sm:$0xff]  }
  0x77   : > { %6387 = vmatpush1.bf16.msra.mxu0 %v9585_v11  ;;  %5230 = vmatprep.subr.bf16.mxu1 %v9586_v12  ;;  %v9615_v31 = vld [vmem:[#allocation5 + $0x670] ss:$8 sps:$4 sm:$0xff]   ;;  %v9618_v33 = vld [vmem:[#allocation5 + $0x684] ss:$8 sps:$4 sm:$0xff]   ;;  %v9620_v34 = vld [vmem:[#allocation5 + $0x80] ss:$8 sps:$4 sm:$0xff]  }
  0x78   : > { %6388 = vmatprep.subr.bf16.mxu0 %v9588_v13  ;;  %v9621_v35 = vld [vmem:[#allocation5 + $0x680] ss:$8 sps:$4 sm:$0xff]   ;;  %v9622_v36 = vld [vmem:[#allocation5 + $0x94] ss:$8 sps:$4 sm:$0xff]   ;;  %v9626_v38 = vld [vmem:[#allocation5 + $0x90] ss:$8 sps:$4 sm:$0xff]  }
  0x79   : > { %v9624_v37 = vld [vmem:[#allocation5 + $0x694] ss:$8 sps:$4 sm:$0xff]   ;;  %v9627_v39 = vld [vmem:[#allocation5 + $0x690] ss:$8 sps:$4 sm:$0xff]   ;;  %v9628_v40 = vld [vmem:[#allocation5 + $0xa4] ss:$8 sps:$4 sm:$0xff]  }
  0x7a   : > { %5231 = vmatpush1.bf16.msra.mxu1 %v9590_v14  ;;  %v9630_v41 = vld [vmem:[#allocation5 + $0x6a4] ss:$8 sps:$4 sm:$0xff]   ;;  %v9632_v42 = vld [vmem:[#allocation5 + $0xa0] ss:$8 sps:$4 sm:$0xff]   ;;  %v9634_v44 = vld [vmem:[#allocation5 + $0xb4] ss:$8 sps:$4 sm:$0xff]  }
  0x7b   : > { %6389 = vmatpush1.bf16.msra.mxu0 %v9591_v15  ;;  %5232 = vmatprep.subr.bf16.mxu1 %v9592_v16  ;;  %v9633_v43 = vld [vmem:[#allocation5 + $0x6a0] ss:$8 sps:$4 sm:$0xff]   ;;  %v9636_v45 = vld [vmem:[#allocation5 + $0x6b4] ss:$8 sps:$4 sm:$0xff]   ;;  %v9638_v46 = vld [vmem:[#allocation5 + $0xb0] ss:$8 sps:$4 sm:$0xff]  }
  0x7c   : > { %6390 = vmatprep.subr.bf16.mxu0 %v9594_v17  ;;  %v9639_v47 = vld [vmem:[#allocation5 + $0x6b0] ss:$8 sps:$4 sm:$0xff]   ;;  %v220_v48 = vld [vmem:[%s10501_s30] sm:$0xff]  ;;  %v10309_v50 = vmov 0   ;;  %v9646_v63 = vld [vmem:[#allocation5 + $0xd4] ss:$8 sps:$4 sm:$0xff]  }
  0x7d   : > { %v232_v49 = vld [vmem:[%s10501_s30 + $0x60] sm:$0xff]  ;;  %v10514_v51 = vmax.bf16 %v10309_v50, %v220_v48  ;;  %v226_v52 = vld [vmem:[%s10501_s30 + $0x30] sm:$0xff]  ;;  %s7882_s18 = sshll.u32 %s10497_s28, 8  ;;  %s8722_s10 = sshll.u32 %s10354_s16, 12 }
  0x7e   : > { %5233 = vmatpush1.bf16.msra.mxu1 %v9596_v18  ;;  %v238_v53 = vld [vmem:[%s10501_s30 + $0x90] sm:$0xff]  ;;  %v9640_v54 = vld [vmem:[#allocation5 + $0xc4] ss:$8 sps:$4 sm:$0xff]   ;;  %v10519_v55 = vmax.bf16 %v10309_v50, %v232_v49  ;;  %v10522_v56 = vmax.bf16 %v10309_v50, %v226_v52  ;;  %v9644_v61 = vld [vmem:[#allocation5 + $0xc0] ss:$8 sps:$4 sm:$0xff]   ;;  %s11304_s20 = scalar_lea.vmem [#allocation8], %s7882_s18  ;;  %s11401_s23 = scalar_lea.hbm %s11451_s3, %s8722_s10 }
  0x7f   : > { %6391 = vmatpush1.bf16.msra.mxu0 %v9597_v19  ;;  %5234 = vmatprep.subr.bf16.mxu1 %v9598_v20  ;;  %v10525_v57 = vmax.bf16 %v10309_v50, %v238_v53  ;;  %v9642_v58 = vld [vmem:[#allocation5 + $0x6c4] ss:$8 sps:$4 sm:$0xff]   ;;  %v9645_v62 = vld [vmem:[#allocation5 + $0x6c0] ss:$8 sps:$4 sm:$0xff]   ;;  %v9648_v0 = vld [vmem:[#allocation5 + $0x6d4] ss:$8 sps:$4 sm:$0xff]  }
  0x80   : > { %6392 = vmatprep.subr.bf16.mxu0 %v9600_v21  ;;  %v7884_v59 = vcombine.high %v10514_v51, %v10519_v55  ;;  %v9650_v1 = vld [vmem:[#allocation5 + $0xd0] ss:$8 sps:$4 sm:$0xff]   ;;  %v9652_v3 = vld [vmem:[#allocation5 + $0xe4] ss:$8 sps:$4 sm:$0xff]   ;;  %v9656_v5 = vld [vmem:[#allocation5 + $0xe0] ss:$8 sps:$4 sm:$0xff]  }
  0x81   : > { %v7896_v60 = vcombine.high %v10522_v56, %v10525_v57  ;;  %v9651_v2 = vld [vmem:[#allocation5 + $0x6d0] ss:$8 sps:$4 sm:$0xff]   ;;  %v9654_v4 = vld [vmem:[#allocation5 + $0x6e4] ss:$8 sps:$4 sm:$0xff]   ;;  %v9657_v6 = vld [vmem:[#allocation5 + $0x6e0] ss:$8 sps:$4 sm:$0xff]  }
  0x82   : > { %5235 = vmatpush1.bf16.msra.mxu1 %v9602_v22  ;;  %5256 = vmatprep.mubr.bf16.mxu1 %v7884_v59  ;;  %v9658_v7 = vld [vmem:[#allocation5 + $0xf4] ss:$8 sps:$4 sm:$0xff]   ;;  %v244_v9 = vld [vmem:[%s10501_s30 + $0xc0] sm:$0xff]  ;;  %v9662_v13 = vld [vmem:[#allocation5 + $0xf0] ss:$8 sps:$4 sm:$0xff]   ;;  %v7883_v22 = vcombine.low %v10514_v51, %v10519_v55  ;;  %s7779_s21 = sshll.u32 %s11304_s20, 4  ;;  %s11403_s21 = int_to_ptr.vmem [resolvable:$true] %s7779_s21 }
  0x83   : > { %6393 = vmatpush1.bf16.msra.mxu0 %v9603_v23  ;;  %5236 = vmatprep.subr.bf16.mxu1 %v9604_v24  ;;  %v9660_v8 = vld [vmem:[#allocation5 + $0x6f4] ss:$8 sps:$4 sm:$0xff]   ;;  %v256_v10 = vld [vmem:[%s10501_s30 + $0x120] sm:$0xff]  ;;  %v9663_v14 = vld [vmem:[#allocation5 + $0x6f0] ss:$8 sps:$4 sm:$0xff]   ;;  %v628_v16 = vmax.bf16 %v10309_v50, %v244_v9  ;;  %v7895_v23 = vcombine.low %v10522_v56, %v10525_v57  ;;  %s7765_s5 = scalar_lea.sflag [#allocation4], %s10497_s28 }
  0x84   : > { %6394 = vmatprep.subr.bf16.mxu0 %v9606_v25  ;;  %6414 = vmatprep.mubr.bf16.mxu0 %v7896_v60  ;;  %v250_v11 = vld [vmem:[%s10501_s30 + $0xf0] sm:$0xff]  ;;  %v9666_v15 = vld [vmem:[#allocation5 + $0x104] ss:$8 sps:$4 sm:$0xff]   ;;  %v640_v18 = vmax.bf16 %v10309_v50, %v256_v10  ;;  %v9664_v21 = vld [vmem:[#allocation5 + $0x100] ss:$8 sps:$4 sm:$0xff]   ;;  %s10230_s8 = scalar_lea.vmem %s11403_s21, 4096 }
  0x85   : > { %v262_v12 = vld [vmem:[%s10501_s30 + $0x150] sm:$0xff]  ;;  %v9669_v17 = vld [vmem:[#allocation5 + $0x704] ss:$8 sps:$4 sm:$0xff]   ;;  %v634_v19 = vmax.bf16 %v10309_v50, %v250_v11  ;;  %v9667_v24 = vld [vmem:[#allocation5 + $0x700] ss:$8 sps:$4 sm:$0xff]   ;;  %p10231_p1 = scmp.ne.s32.totalorder %s11403_s21, %s10230_s8  ;;  %s10310_s16 = smov [#allocation8]  }
  0x86   : > { %5237 = vmatpush1.bf16.msra.mxu1 %v9608_v26  ;;  %v646_v20 = vmax.bf16 %v10309_v50, %v262_v12  ;;  %v268_v25 = vld [vmem:[%s10501_s30 + $0x180] sm:$0xff]  ;;  %v298_v49 = vld [vmem:[%s10501_s30 + $0x270] sm:$0xff]  ;;  %s10234_s9 = sshll.u32 %s10310_s16, 4  ;;  %s10235_s9 = int_to_ptr.vmem [resolvable:$false] %s10234_s9 }
  0x87   : > { %6395 = vmatpush1.bf16.msra.mxu0 %v9609_v27  ;;  %5238 = vmatprep.subr.bf16.mxu1 %v9610_v28  ;;  %v280_v26 = vld [vmem:[%s10501_s30 + $0x1e0] sm:$0xff]  ;;  %v274_v27 = vld [vmem:[%s10501_s30 + $0x1b0] sm:$0xff]  ;;  %v7908_v28 = vcombine.high %v628_v16, %v640_v18  ;;  %v682_v56 = vmax.bf16 %v10309_v50, %v298_v49  ;;  %p10232_p2 = pnand %p10231_p1, %p10445_p4  ;;  %s10236_s25 = scalar_lea.vmem %s10235_s9, 8192 }
  0x88   : > { %6396 = vmatprep.subr.bf16.mxu0 %v9612_v29  ;;  %v7920_v29 = vcombine.high %v634_v19, %v646_v20  ;;  %v310_v51 = vld [vmem:[%s10501_s30 + $0x2d0] sm:$0xff]  ;;  %v316_v60 = vld [vmem:[%s10501_s30 + $0x300] sm:$0xff]  ;;  %p10237_p8 = scmp.lt.s32.totalorder %s11403_s21, %s10235_s9  ;;  %p10238_p13 = scmp.lt.s32.totalorder %s10236_s25, %s10230_s8 }
  0x89   : > { %v9684_v52 = vld [vmem:[#allocation5 + $0x134] ss:$8 sps:$4 sm:$0xff]   ;;  %v694_v57 = vmax.bf16 %v10309_v50, %v310_v51  ;;  %v9685_v59 = vld [vmem:[#allocation5 + $0x730] ss:$8 sps:$4 sm:$0xff]   ;;  %v700_v10 = vmax.bf16 %v10309_v50, %v316_v60  ;;  %p10233_p6 = pneg %p10232_p2 }
  0x8a   : > { %5239 = vmatpush1.bf16.msra.mxu1 %v9614_v30  ;;  %v286_v30 = vld [vmem:[%s10501_s30 + $0x210] sm:$0xff]  ;;  %p10239_p3 = por %p10238_p13, %p10237_p8 }
  0x8b   : > { %6397 = vmatpush1.bf16.msra.mxu0 %v9615_v31  ;;  %5240 = vmatprep.subr.bf16.mxu1 %v9616_v32  ;;  %v9672_v31 = vld [vmem:[#allocation5 + $0x114] ss:$8 sps:$4 sm:$0xff]  }
  0x8c   : > { %6398 = vmatprep.subr.bf16.mxu0 %v9618_v33  ;;  %v9675_v32 = vld [vmem:[#allocation5 + $0x714] ss:$8 sps:$4 sm:$0xff]   ;;  %v9670_v33 = vld [vmem:[#allocation5 + $0x110] ss:$8 sps:$4 sm:$0xff]   ;;  %p10240_p7 = pnand %p10239_p3, %p10233_p6 }
  0x8d   : > { %v9687_v53 = vld [vmem:[#allocation5 + $0x734] ss:$8 sps:$4 sm:$0xff]  }
  0x8e   : > { %5241 = vmatpush1.bf16.msra.mxu1 %v9620_v34  ;;  %v9673_v34 = vld [vmem:[#allocation5 + $0x710] ss:$8 sps:$4 sm:$0xff]   ;;  %v9699_v9 = vld [vmem:[#allocation5 + $0x754] ss:$8 sps:$4 sm:$0xff]  }
  0x8f   : > { %6399 = vmatpush1.bf16.msra.mxu0 %v9621_v35  ;;  %5242 = vmatprep.subr.bf16.mxu1 %v9622_v36  ;;  %v652_v35 = vmax.bf16 %v10309_v50, %v268_v25  ;;  %v664_v36 = vmax.bf16 %v10309_v50, %v280_v26  ;;  %v9700_v26 = vld [vmem:[#allocation5 + $0x160] ss:$8 sps:$4 sm:$0xff]   ;;  %v9723_v49 = vld [vmem:[#allocation5 + $0x794] ss:$8 sps:$4 sm:$0xff]  }
  0x90   : > { %6400 = vmatprep.subr.bf16.mxu0 %v9624_v37  ;;  %v658_v37 = vmax.bf16 %v10309_v50, %v274_v27  ;;  %v9703_v27 = vld [vmem:[#allocation5 + $0x760] ss:$8 sps:$4 sm:$0xff]  }
  0x92   : > { %5243 = vmatpush1.bf16.msra.mxu1 %v9626_v38  ;;  %v670_v38 = vmax.bf16 %v10309_v50, %v286_v30 }
  0x93   : > { %6401 = vmatpush1.bf16.msra.mxu0 %v9627_v39  ;;  %5244 = vmatprep.subr.bf16.mxu1 %v9628_v40  ;;  %v9678_v39 = vld [vmem:[#allocation5 + $0x124] ss:$8 sps:$4 sm:$0xff]  }
  0x94   : > { %6402 = vmatprep.subr.bf16.mxu0 %v9630_v41  ;;  %v9681_v40 = vld [vmem:[#allocation5 + $0x724] ss:$8 sps:$4 sm:$0xff]   ;;  %v7907_v41 = vcombine.low %v628_v16, %v640_v18  ;;  %v7944_v48 = vcombine.high %v658_v37, %v670_v38 }
  0x95   : > { %v340_v16 = vld [vmem:[%s10501_s30 + $0x3c0] sm:$0xff] }
  0x96   : > { %5245 = vmatpush1.bf16.msra.mxu1 %v9632_v42  ;;  %v7919_v42 = vcombine.low %v634_v19, %v646_v20  ;;  %v9705_v18 = vld [vmem:[#allocation5 + $0x764] ss:$8 sps:$4 sm:$0xff]   ;;  %v7967_v20 = vcombine.low %v682_v56, %v694_v57  ;;  %v724_v30 = vmax.bf16 %v10309_v50, %v340_v16 }
  0x97   : > { %6403 = vmatpush1.bf16.msra.mxu0 %v9633_v43  ;;  %5246 = vmatprep.subr.bf16.mxu1 %v9634_v44  ;;  %v9676_v43 = vld [vmem:[#allocation5 + $0x120] ss:$8 sps:$4 sm:$0xff]  }
  0x98   : > { %6404 = vmatprep.subr.bf16.mxu0 %v9636_v45  ;;  %v9679_v44 = vld [vmem:[#allocation5 + $0x720] ss:$8 sps:$4 sm:$0xff]  }
  0x99   : > { %v292_v45 = vld [vmem:[%s10501_s30 + $0x240] sm:$0xff] }
  0x9a   : > { %5247 = vmatpush1.bf16.msra.mxu1 %v9638_v46  ;;  %v304_v46 = vld [vmem:[%s10501_s30 + $0x2a0] sm:$0xff] }
  0x9b   : > { %6405 = vmatpush1.bf16.msra.mxu0 %v9639_v47  ;;  %5248 = vmatprep.subr.bf16.mxu1 %v9640_v54  ;;  %v7932_v47 = vcombine.high %v652_v35, %v664_v36  ;;  %v676_v54 = vmax.bf16 %v10309_v50, %v292_v45  ;;  %v688_v55 = vmax.bf16 %v10309_v50, %v304_v46  ;;  %v9712_v46 = vld [vmem:[#allocation5 + $0x180] ss:$8 sps:$4 sm:$0xff]  }
  0x9c   : > { %6406 = vmatprep.subr.bf16.mxu0 %v9642_v58  ;;  %v9682_v58 = vld [vmem:[#allocation5 + $0x130] ss:$8 sps:$4 sm:$0xff]  }
  0x9d   : > { %v7955_v19 = vcombine.low %v676_v54, %v688_v55 }
  0x9e   : > { %5249 = vmatpush1.bf16.msra.mxu1 %v9644_v61  ;;  %v9690_v61 = vld [vmem:[#allocation5 + $0x144] ss:$8 sps:$4 sm:$0xff]  }
  0x9f   : > { %6407 = vmatpush1.bf16.msra.mxu0 %v9645_v62  ;;  %5250 = vmatprep.subr.bf16.mxu1 %v9646_v63  ;;  %v9693_v62 = vld [vmem:[#allocation5 + $0x744] ss:$8 sps:$4 sm:$0xff]   ;;  %v7931_v63 = vcombine.low %v652_v35, %v664_v36  ;;  %v9709_v35 = vld [vmem:[#allocation5 + $0x770] ss:$8 sps:$4 sm:$0xff]  }
  0xa0   : > { %6408 = vmatprep.subr.bf16.mxu0 %v9648_v0  ;;  %v7943_v0 = vcombine.low %v658_v37, %v670_v38  ;;  %v364_v36 = vld [vmem:[%s10501_s30 + $0x480] sm:$0xff] }
  0xa1   : > { %v9714_v37 = vld [vmem:[#allocation5 + $0x184] ss:$8 sps:$4 sm:$0xff]   ;;  %v748_v51 = vmax.bf16 %v10309_v50, %v364_v36 }
  0xa2   : > { %5251 = vmatpush1.bf16.msra.mxu1 %v9650_v1  ;;  %v328_v1 = vld [vmem:[%s10501_s30 + $0x360] sm:$0xff] }
  0xa3   : > { %6409 = vmatpush1.bf16.msra.mxu0 %v9651_v2  ;;  %5252 = vmatprep.subr.bf16.mxu1 %v9652_v3  ;;  %v322_v2 = vld [vmem:[%s10501_s30 + $0x330] sm:$0xff]  ;;  %v712_v11 = vmax.bf16 %v10309_v50, %v328_v1  ;;  %v9717_v38 = vld [vmem:[#allocation5 + $0x784] ss:$8 sps:$4 sm:$0xff]  }
  0xa4   : > { %6410 = vmatprep.subr.bf16.mxu0 %v9654_v4  ;;  %v334_v3 = vld [vmem:[%s10501_s30 + $0x390] sm:$0xff]  ;;  %v7956_v4 = vcombine.high %v676_v54, %v688_v55  ;;  %v706_v12 = vmax.bf16 %v10309_v50, %v322_v2 }
  0xa5   : > { %v9718_v55 = vld [vmem:[#allocation5 + $0x190] ss:$8 sps:$4 sm:$0xff]  }
  0xa6   : > { %5253 = vmatpush1.bf16.msra.mxu1 %v9656_v5  ;;  %v7968_v5 = vcombine.high %v682_v56, %v694_v57  ;;  %v9721_v56 = vld [vmem:[#allocation5 + $0x790] ss:$8 sps:$4 sm:$0xff]   ;;  %v388_v57 = vld [vmem:[%s10501_s30 + $0x540] sm:$0xff] }
  0xa7   : > { %6411 = vmatpush1.bf16.msra.mxu0 %v9657_v6  ;;  %5254 = vmatprep.subr.bf16.mxu1 %v9658_v7  ;;  %v9688_v6 = vld [vmem:[#allocation5 + $0x140] ss:$8 sps:$4 sm:$0xff]  }
  0xa8   : > { %6412 = vmatprep.subr.bf16.mxu0 %v9660_v8  ;;  %v9691_v7 = vld [vmem:[#allocation5 + $0x740] ss:$8 sps:$4 sm:$0xff]   ;;  %v9696_v8 = vld [vmem:[#allocation5 + $0x154] ss:$8 sps:$4 sm:$0xff]  }
  0xaa   : > { %5255 = vmatpush1.bf16.msra.mxu1 %v9662_v13  ;;  %v718_v13 = vmax.bf16 %v10309_v50, %v334_v3  ;;  %v9724_v3 = vld [vmem:[#allocation5 + $0x1a0] ss:$8 sps:$4 sm:$0xff]  }
  0xab   : > { %6413 = vmatpush1.bf16.msra.mxu0 %v9663_v14  ;;  %5417 = vmatprep.subr.bf16.mxu1 %v9666_v15  ;;  %v9694_v14 = vld [vmem:[#allocation5 + $0x150] ss:$8 sps:$4 sm:$0xff]  }
  0xac   : > { %6575 = vmatprep.subr.bf16.mxu0 %v9669_v17  ;;  %v9697_v15 = vld [vmem:[#allocation5 + $0x750] ss:$8 sps:$4 sm:$0xff]   ;;  %v9702_v17 = vld [vmem:[#allocation5 + $0x164] ss:$8 sps:$4 sm:$0xff]   ;;  %v7992_v25 = vcombine.high %v706_v12, %v718_v13 }
  0xad   : > { %5257 = vmatmul.mubr.bf16.vlgmr.msra.gmra.mrb[0].mxu1 %v7883_v22  ;;  %v346_v22 = vld [vmem:[%s10501_s30 + $0x3f0] sm:$0xff] }
  0xae   : > { %6415 = vmatmul.mubr.bf16.vlgmr.msra.gmra.mrb[0].mxu0 %v7895_v23  ;;  %5418 = vmatpush1.bf16.msra.mxu1 %v9664_v21  ;;  %v352_v21 = vld [vmem:[%s10501_s30 + $0x420] sm:$0xff]  ;;  %v358_v23 = vld [vmem:[%s10501_s30 + $0x450] sm:$0xff] }
  0xaf   : > { %6576 = vmatpush1.bf16.msra.mxu0 %v9667_v24  ;;  %5266 = vmatprep.mubr.bf16.mxu1 %v7908_v28  ;;  %v7980_v24 = vcombine.high %v700_v10, %v712_v11  ;;  %v9708_v28 = vld [vmem:[#allocation5 + $0x174] ss:$8 sps:$4 sm:$0xff]  }
  0xb0   : > { %6424 = vmatprep.mubr.bf16.mxu0 %v7920_v29  ;;  %5419 = vmatprep.subr.bf16.mxu1 %v9672_v31  ;;  %v9711_v29 = vld [vmem:[#allocation5 + $0x774] ss:$8 sps:$4 sm:$0xff]   ;;  %v736_v31 = vmax.bf16 %v10309_v50, %v352_v21 }
  0xb1   : > { %6577 = vmatprep.subr.bf16.mxu0 %v9675_v32  ;;  %v730_v32 = vmax.bf16 %v10309_v50, %v346_v22 }
  0xb2   : > { %5420 = vmatpush1.bf16.msra.mxu1 %v9670_v33  ;;  %v742_v33 = vmax.bf16 %v10309_v50, %v358_v23  ;;  %v8003_v60 = vcombine.low %v724_v30, %v736_v31  ;;  %v9736_v23 = vld [vmem:[#allocation5 + $0x1c0] ss:$8 sps:$4 sm:$0xff]  }
  0xb3   : > { %6578 = vmatpush1.bf16.msra.mxu0 %v9673_v34  ;;  %5421 = vmatprep.subr.bf16.mxu1 %v9678_v39  ;;  %v9706_v34 = vld [vmem:[#allocation5 + $0x170] ss:$8 sps:$4 sm:$0xff]   ;;  %v7979_v39 = vcombine.low %v700_v10, %v712_v11 }
  0xb4   : > { %6579 = vmatprep.subr.bf16.mxu0 %v9681_v40  ;;  %v7991_v40 = vcombine.low %v706_v12, %v718_v13  ;;  %v8016_v45 = vcombine.high %v730_v32, %v742_v33  ;;  %v9730_v11 = vld [vmem:[#allocation5 + $0x1b0] ss:$8 sps:$4 sm:$0xff]   ;;  %v412_v13 = vld [vmem:[%s10501_s30 + $0x600] sm:$0xff] }
  0xb5   : > { %5267 = vmatmul.mubr.bf16.gmra.mrb[4].mxu1 %v7907_v41  ;;  %v376_v41 = vld [vmem:[%s10501_s30 + $0x4e0] sm:$0xff]  ;;  %v9733_v12 = vld [vmem:[#allocation5 + $0x7b0] ss:$8 sps:$4 sm:$0xff]  }
  0xb6   : > { %6425 = vmatmul.mubr.bf16.gmra.mrb[4].mxu0 %v7919_v42  ;;  %5276 = vmatprep.mubr.bf16.mxu1 %v7932_v47  ;;  %v370_v42 = vld [vmem:[%s10501_s30 + $0x4b0] sm:$0xff]  ;;  %v9715_v47 = vld [vmem:[#allocation5 + $0x780] ss:$8 sps:$4 sm:$0xff]  }
  0xb7   : > { %6434 = vmatprep.mubr.bf16.mxu0 %v7944_v48  ;;  %5422 = vmatpush1.bf16.msra.mxu1 %v9676_v43  ;;  %v382_v43 = vld [vmem:[%s10501_s30 + $0x510] sm:$0xff] }
  0xb8   : > { %6580 = vmatpush1.bf16.msra.mxu0 %v9679_v44  ;;  %5423 = vmatprep.subr.bf16.mxu1 %v9684_v52  ;;  %v8004_v44 = vcombine.high %v724_v30, %v736_v31  ;;  %v9720_v48 = vld [vmem:[#allocation5 + $0x194] ss:$8 sps:$4 sm:$0xff]   ;;  %v760_v52 = vmax.bf16 %v10309_v50, %v376_v41  ;;  %v766_v54 = vmax.bf16 %v10309_v50, %v382_v43  ;;  %v9742_v31 = vld [vmem:[#allocation5 + $0x1d0] ss:$8 sps:$4 sm:$0xff]   ;;  %v9748_v43 = vld [vmem:[#allocation5 + $0x1e0] ss:$8 sps:$4 sm:$0xff]  }
  0xb9   : > { %6581 = vmatprep.subr.bf16.mxu0 %v9687_v53  ;;  %v754_v53 = vmax.bf16 %v10309_v50, %v370_v42 }
  0xba   : > { %v8028_v1 = vcombine.high %v748_v51, %v760_v52  ;;  %v8027_v16 = vcombine.low %v748_v51, %v760_v52  ;;  %v9754_v52 = vld [vmem:[#allocation5 + $0x1f0] ss:$8 sps:$4 sm:$0xff]  }
  0xbb   : > { %5424 = vmatpush1.bf16.msra.mxu1 %v9682_v58  ;;  %v9726_v58 = vld [vmem:[#allocation5 + $0x1a4] ss:$8 sps:$4 sm:$0xff]   ;;  %v8040_v2 = vcombine.high %v754_v53, %v766_v54 }
  0xbc   : > { %6582 = vmatpush1.bf16.msra.mxu0 %v9685_v59  ;;  %5425 = vmatprep.subr.bf16.mxu1 %v9690_v61  ;;  %v9729_v59 = vld [vmem:[#allocation5 + $0x7a4] ss:$8 sps:$4 sm:$0xff]   ;;  %v8015_v61 = vcombine.low %v730_v32, %v742_v33  ;;  %v9745_v32 = vld [vmem:[#allocation5 + $0x7d0] ss:$8 sps:$4 sm:$0xff]  }
  0xbd   : > { %6583 = vmatprep.subr.bf16.mxu0 %v9693_v62  ;;  %5277 = vmatmul.mubr.bf16.gmra.mrb[8].mxu1 %v7931_v63  ;;  %v400_v62 = vld [vmem:[%s10501_s30 + $0x5a0] sm:$0xff]  ;;  %v394_v63 = vld [vmem:[%s10501_s30 + $0x570] sm:$0xff] }
  0xbe   : > { %6435 = vmatmul.mubr.bf16.gmra.mrb[8].mxu0 %v7943_v0  ;;  %5286 = vmatprep.mubr.bf16.mxu1 %v7956_v4  ;;  %v406_v0 = vld [vmem:[%s10501_s30 + $0x5d0] sm:$0xff]  ;;  %v9727_v4 = vld [vmem:[#allocation5 + $0x7a0] ss:$8 sps:$4 sm:$0xff]  }
  0xbf   : > { %6444 = vmatprep.mubr.bf16.mxu0 %v7968_v5  ;;  %5426 = vmatpush1.bf16.msra.mxu1 %v9688_v6  ;;  %v9732_v5 = vld [vmem:[#allocation5 + $0x1b4] ss:$8 sps:$4 sm:$0xff]   ;;  %v790_v10 = vmax.bf16 %v10309_v50, %v406_v0  ;;  %v436_v33 = vld [vmem:[%s10501_s30 + $0x6c0] sm:$0xff] }
  0xc0   : > { %6584 = vmatpush1.bf16.msra.mxu0 %v9691_v7  ;;  %5427 = vmatprep.subr.bf16.mxu1 %v9696_v8  ;;  %v9735_v6 = vld [vmem:[#allocation5 + $0x7b4] ss:$8 sps:$4 sm:$0xff]   ;;  %v772_v7 = vmax.bf16 %v10309_v50, %v388_v57  ;;  %v784_v8 = vmax.bf16 %v10309_v50, %v400_v62 }
  0xc1   : > { %6585 = vmatprep.subr.bf16.mxu0 %v9699_v9  ;;  %v778_v9 = vmax.bf16 %v10309_v50, %v394_v63  ;;  %v466_v62 = vld [vmem:[%s10501_s30 + $0x7b0] sm:$0xff] }
  0xc2   : > { %v8052_v21 = vcombine.high %v772_v7, %v784_v8  ;;  %v8051_v36 = vcombine.low %v772_v7, %v784_v8  ;;  %v478_v63 = vld [vmem:[%s10501_s30 + $0x810] sm:$0xff]  ;;  %v496_v7 = vld [vmem:[%s10501_s30 + $0x8a0] sm:$0xff] }
  0xc3   : > { %5428 = vmatpush1.bf16.msra.mxu1 %v9694_v14  ;;  %v9738_v14 = vld [vmem:[#allocation5 + $0x1c4] ss:$8 sps:$4 sm:$0xff]   ;;  %v8064_v22 = vcombine.high %v778_v9, %v790_v10 }
  0xc4   : > { %6586 = vmatpush1.bf16.msra.mxu0 %v9697_v15  ;;  %5429 = vmatprep.subr.bf16.mxu1 %v9702_v17  ;;  %v9741_v15 = vld [vmem:[#allocation5 + $0x7c4] ss:$8 sps:$4 sm:$0xff]   ;;  %v8039_v17 = vcombine.low %v754_v53, %v766_v54  ;;  %v9757_v53 = vld [vmem:[#allocation5 + $0x7f0] ss:$8 sps:$4 sm:$0xff]  }
  0xc5   : > { %6587 = vmatprep.subr.bf16.mxu0 %v9705_v18  ;;  %5287 = vmatmul.mubr.bf16.gmra.mrb[12].mxu1 %v7955_v19  ;;  %v424_v18 = vld [vmem:[%s10501_s30 + $0x660] sm:$0xff]  ;;  %v418_v19 = vld [vmem:[%s10501_s30 + $0x630] sm:$0xff] }
  0xc6   : > { %6445 = vmatmul.mubr.bf16.gmra.mrb[12].mxu0 %v7967_v20  ;;  %5296 = vmatprep.mubr.bf16.mxu1 %v7980_v24  ;;  %v430_v20 = vld [vmem:[%s10501_s30 + $0x690] sm:$0xff]  ;;  %v9739_v24 = vld [vmem:[#allocation5 + $0x7c0] ss:$8 sps:$4 sm:$0xff]   ;;  %v9762_v54 = vld [vmem:[#allocation5 + $0x204] ss:$8 sps:$4 sm:$0xff]  }
  0xc7   : > { %6454 = vmatprep.mubr.bf16.mxu0 %v7992_v25  ;;  %5430 = vmatpush1.bf16.msra.mxu1 %v9700_v26  ;;  %v9744_v25 = vld [vmem:[#allocation5 + $0x1d4] ss:$8 sps:$4 sm:$0xff]   ;;  %v814_v30 = vmax.bf16 %v10309_v50, %v430_v20 }
  0xc8   : > { %6588 = vmatpush1.bf16.msra.mxu0 %v9703_v27  ;;  %5431 = vmatprep.subr.bf16.mxu1 %v9708_v28  ;;  %v9747_v26 = vld [vmem:[#allocation5 + $0x7d4] ss:$8 sps:$4 sm:$0xff]   ;;  %v796_v27 = vmax.bf16 %v10309_v50, %v412_v13  ;;  %v808_v28 = vmax.bf16 %v10309_v50, %v424_v18  ;;  %v880_v13 = vmax.bf16 %v10309_v50, %v496_v7  ;;  %v508_v18 = vld [vmem:[%s10501_s30 + $0x900] sm:$0xff] }
  0xc9   : > { %6589 = vmatprep.subr.bf16.mxu0 %v9711_v29  ;;  %v802_v29 = vmax.bf16 %v10309_v50, %v418_v19  ;;  %v520_v19 = vld [vmem:[%s10501_s30 + $0x960] sm:$0xff] }
  0xca   : > { %v8076_v41 = vcombine.high %v796_v27, %v808_v28 }
  0xcb   : > { %5432 = vmatpush1.bf16.msra.mxu1 %v9706_v34  ;;  %v9750_v34 = vld [vmem:[#allocation5 + $0x1e4] ss:$8 sps:$4 sm:$0xff]   ;;  %v8088_v42 = vcombine.high %v802_v29, %v814_v30  ;;  %v8087_v57 = vcombine.low %v802_v29, %v814_v30 }
  0xcc   : > { %6590 = vmatpush1.bf16.msra.mxu0 %v9709_v35  ;;  %5433 = vmatprep.subr.bf16.mxu1 %v9714_v37  ;;  %v9753_v35 = vld [vmem:[#allocation5 + $0x7e4] ss:$8 sps:$4 sm:$0xff]   ;;  %v8063_v37 = vcombine.low %v778_v9, %v790_v10  ;;  %v490_v10 = vld [vmem:[%s10501_s30 + $0x870] sm:$0xff] }
  0xcd   : > { %6591 = vmatprep.subr.bf16.mxu0 %v9717_v38  ;;  %5297 = vmatmul.mubr.bf16.gmra.mrb[16].mxu1 %v7979_v39  ;;  %v448_v38 = vld [vmem:[%s10501_s30 + $0x720] sm:$0xff]  ;;  %v442_v39 = vld [vmem:[%s10501_s30 + $0x6f0] sm:$0xff] }
  0xce   : > { %6455 = vmatmul.mubr.bf16.gmra.mrb[16].mxu0 %v7991_v40  ;;  %5306 = vmatprep.mubr.bf16.mxu1 %v8004_v44  ;;  %v454_v40 = vld [vmem:[%s10501_s30 + $0x750] sm:$0xff]  ;;  %v9751_v44 = vld [vmem:[#allocation5 + $0x7e0] ss:$8 sps:$4 sm:$0xff]  }
  0xcf   : > { %6464 = vmatprep.mubr.bf16.mxu0 %v8016_v45  ;;  %5434 = vmatpush1.bf16.msra.mxu1 %v9712_v46  ;;  %v9756_v45 = vld [vmem:[#allocation5 + $0x1f4] ss:$8 sps:$4 sm:$0xff]   ;;  %v838_v51 = vmax.bf16 %v10309_v50, %v454_v40  ;;  %v556_v40 = vld [vmem:[%s10501_s30 + $0xa80] sm:$0xff] }
  0xd0   : > { %6592 = vmatpush1.bf16.msra.mxu0 %v9715_v47  ;;  %5435 = vmatprep.subr.bf16.mxu1 %v9720_v48  ;;  %v9759_v46 = vld [vmem:[#allocation5 + $0x7f4] ss:$8 sps:$4 sm:$0xff]   ;;  %v820_v47 = vmax.bf16 %v10309_v50, %v436_v33  ;;  %v832_v48 = vmax.bf16 %v10309_v50, %v448_v38 }
  0xd1   : > { %6593 = vmatprep.subr.bf16.mxu0 %v9723_v49  ;;  %v826_v49 = vmax.bf16 %v10309_v50, %v442_v39  ;;  %v550_v33 = vld [vmem:[%s10501_s30 + $0xa50] sm:$0xff] }
  0xd2   : > { %v934_v39 = vmax.bf16 %v10309_v50, %v550_v33  ;;  %v9768_v33 = vld [vmem:[#allocation5 + $0x214] ss:$8 sps:$4 sm:$0xff]  }
  0xd3   : > { %5436 = vmatpush1.bf16.msra.mxu1 %v9718_v55  ;;  %v9765_v55 = vld [vmem:[#allocation5 + $0x804] ss:$8 sps:$4 sm:$0xff]  }
  0xd4   : > { %6594 = vmatpush1.bf16.msra.mxu0 %v9721_v56  ;;  %5437 = vmatprep.subr.bf16.mxu1 %v9726_v58  ;;  %v8075_v56 = vcombine.low %v796_v27, %v808_v28  ;;  %v460_v58 = vld [vmem:[%s10501_s30 + $0x780] sm:$0xff] }
  0xd5   : > { %6595 = vmatprep.subr.bf16.mxu0 %v9729_v59  ;;  %5307 = vmatmul.mubr.bf16.gmra.mrb[20].mxu1 %v8003_v60  ;;  %v472_v59 = vld [vmem:[%s10501_s30 + $0x7e0] sm:$0xff]  ;;  %v8100_v60 = vcombine.high %v820_v47, %v832_v48  ;;  %v844_v0 = vmax.bf16 %v10309_v50, %v460_v58  ;;  %v598_v58 = vld [vmem:[%s10501_s30 + $0xbd0] sm:$0xff] }
  0xd6   : > { %6465 = vmatmul.mubr.bf16.gmra.mrb[20].mxu0 %v8015_v61  ;;  %5316 = vmatprep.mubr.bf16.mxu1 %v8028_v1  ;;  %v8112_v61 = vcombine.high %v826_v49, %v838_v51  ;;  %v856_v1 = vmax.bf16 %v10309_v50, %v472_v59  ;;  %v532_v28 = vld [vmem:[%s10501_s30 + $0x9c0] sm:$0xff] }
  0xd7   : > { %6474 = vmatprep.mubr.bf16.mxu0 %v8040_v2  ;;  %5438 = vmatpush1.bf16.msra.mxu1 %v9724_v3  ;;  %v850_v2 = vmax.bf16 %v10309_v50, %v466_v62  ;;  %v862_v3 = vmax.bf16 %v10309_v50, %v478_v63 }
  0xd8   : > { %6596 = vmatpush1.bf16.msra.mxu0 %v9727_v4  ;;  %5439 = vmatprep.subr.bf16.mxu1 %v9732_v5  ;;  %v8099_v4 = vcombine.low %v820_v47, %v832_v48  ;;  %v8111_v5 = vcombine.low %v826_v49, %v838_v51  ;;  %v8124_v8 = vcombine.high %v844_v0, %v856_v1 }
  0xd9   : > { %6597 = vmatprep.subr.bf16.mxu0 %v9735_v6  ;;  %v484_v6 = vld [vmem:[%s10501_s30 + $0x840] sm:$0xff]  ;;  %v8136_v9 = vcombine.high %v850_v2, %v862_v3  ;;  %v940_v48 = vmax.bf16 %v10309_v50, %v556_v40 }
  0xdb   : > { %5440 = vmatpush1.bf16.msra.mxu1 %v9730_v11  ;;  %v502_v11 = vld [vmem:[%s10501_s30 + $0x8d0] sm:$0xff] }
  0xdc   : > { %6598 = vmatpush1.bf16.msra.mxu0 %v9733_v12  ;;  %5441 = vmatprep.subr.bf16.mxu1 %v9738_v14  ;;  %v868_v12 = vmax.bf16 %v10309_v50, %v484_v6  ;;  %v874_v14 = vmax.bf16 %v10309_v50, %v490_v10  ;;  %v239_v6 = vld [vmem:[%s10501_s30 + $0x98] sm:$0xff] }
  0xdd   : > { %6599 = vmatprep.subr.bf16.mxu0 %v9741_v15  ;;  %5317 = vmatmul.mubr.bf16.gmra.mrb[24].mxu1 %v8027_v16  ;;  %v886_v15 = vmax.bf16 %v10309_v50, %v502_v11  ;;  %v8123_v16 = vcombine.low %v844_v0, %v856_v1  ;;  %v982_v0 = vmax.bf16 %v10309_v50, %v598_v58  ;;  %v221_v1 = vld [vmem:[%s10501_s30 + $0x8] sm:$0xff] }
  0xde   : > { %6475 = vmatmul.mubr.bf16.gmra.mrb[24].mxu0 %v8039_v17  ;;  %5326 = vmatprep.mubr.bf16.mxu1 %v8052_v21  ;;  %v8135_v17 = vcombine.low %v850_v2, %v862_v3  ;;  %v8148_v20 = vcombine.high %v868_v12, %v880_v13  ;;  %v8147_v29 = vcombine.low %v868_v12, %v880_v13 }
  0xdf   : > { %6484 = vmatprep.mubr.bf16.mxu0 %v8064_v22  ;;  %5442 = vmatpush1.bf16.msra.mxu1 %v9736_v23  ;;  %v8160_v21 = vcombine.high %v874_v14, %v886_v15  ;;  %v514_v22 = vld [vmem:[%s10501_s30 + $0x930] sm:$0xff]  ;;  %v8159_v30 = vcombine.low %v874_v14, %v886_v15  ;;  %v623_v12 = vmax.bf16 %v10309_v50, %v239_v6  ;;  %v323_v6 = vld [vmem:[%s10501_s30 + $0x338] sm:$0xff] }
  0xe0   : > { %6600 = vmatpush1.bf16.msra.mxu0 %v9739_v24  ;;  %5443 = vmatprep.subr.bf16.mxu1 %v9744_v25  ;;  %v526_v23 = vld [vmem:[%s10501_s30 + $0x990] sm:$0xff]  ;;  %v892_v24 = vmax.bf16 %v10309_v50, %v508_v18  ;;  %v904_v25 = vmax.bf16 %v10309_v50, %v520_v19  ;;  %v257_v18 = vld [vmem:[%s10501_s30 + $0x128] sm:$0xff]  ;;  %v251_v19 = vld [vmem:[%s10501_s30 + $0xf8] sm:$0xff] }
  0xe1   : > { %6601 = vmatprep.subr.bf16.mxu0 %v9747_v26  ;;  %v898_v26 = vmax.bf16 %v10309_v50, %v514_v22  ;;  %v910_v27 = vmax.bf16 %v10309_v50, %v526_v23  ;;  %v641_v22 = vmax.bf16 %v10309_v50, %v257_v18  ;;  %v635_v23 = vmax.bf16 %v10309_v50, %v251_v19  ;;  %v9790_v18 = vld [vmem:[#allocation5 + $0x250] ss:$8 sps:$4 sm:$0xff]  }
  0xe2   : > { %v9793_v19 = vld [vmem:[#allocation5 + $0x850] ss:$8 sps:$4 sm:$0xff]  }
  0xe3   : > { %5444 = vmatpush1.bf16.msra.mxu1 %v9742_v31  ;;  %v544_v31 = vld [vmem:[%s10501_s30 + $0xa20] sm:$0xff] }
  0xe4   : > { %6602 = vmatpush1.bf16.msra.mxu0 %v9745_v32  ;;  %5445 = vmatprep.subr.bf16.mxu1 %v9750_v34  ;;  %v538_v32 = vld [vmem:[%s10501_s30 + $0x9f0] sm:$0xff]  ;;  %v8172_v34 = vcombine.high %v892_v24, %v904_v25 }
  0xe5   : > { %6603 = vmatprep.subr.bf16.mxu0 %v9753_v35  ;;  %5327 = vmatmul.mubr.bf16.gmra.mrb[28].mxu1 %v8051_v36  ;;  %v8184_v35 = vcombine.high %v898_v26, %v910_v27  ;;  %v916_v36 = vmax.bf16 %v10309_v50, %v532_v28  ;;  %v922_v38 = vmax.bf16 %v10309_v50, %v538_v32  ;;  %v287_v32 = vld [vmem:[%s10501_s30 + $0x218] sm:$0xff] }
  0xe6   : > { %6485 = vmatmul.mubr.bf16.gmra.mrb[28].mxu0 %v8063_v37  ;;  %5336 = vmatprep.mubr.bf16.mxu1 %v8076_v41  ;;  %v928_v37 = vmax.bf16 %v10309_v50, %v544_v31  ;;  %v8171_v41 = vcombine.low %v892_v24, %v904_v25  ;;  %v9760_v25 = vld [vmem:[#allocation5 + $0x200] ss:$8 sps:$4 sm:$0xff]   ;;  %v275_v31 = vld [vmem:[%s10501_s30 + $0x1b8] sm:$0xff] }
  0xe7   : > { %6494 = vmatprep.mubr.bf16.mxu0 %v8088_v42  ;;  %5446 = vmatpush1.bf16.msra.mxu1 %v9748_v43  ;;  %v8183_v42 = vcombine.low %v898_v26, %v910_v27  ;;  %v568_v43 = vld [vmem:[%s10501_s30 + $0xae0] sm:$0xff]  ;;  %v8208_v47 = vcombine.high %v922_v38, %v934_v39  ;;  %v269_v27 = vld [vmem:[%s10501_s30 + $0x188] sm:$0xff] }
  0xe8   : > { %6604 = vmatpush1.bf16.msra.mxu0 %v9751_v44  ;;  %5447 = vmatprep.subr.bf16.mxu1 %v9756_v45  ;;  %v562_v44 = vld [vmem:[%s10501_s30 + $0xab0] sm:$0xff]  ;;  %v952_v49 = vmax.bf16 %v10309_v50, %v568_v43  ;;  %v9763_v26 = vld [vmem:[#allocation5 + $0x800] ss:$8 sps:$4 sm:$0xff]   ;;  %v9774_v43 = vld [vmem:[#allocation5 + $0x224] ss:$8 sps:$4 sm:$0xff]  }
  0xe9   : > { %6605 = vmatprep.subr.bf16.mxu0 %v9759_v46  ;;  %v574_v45 = vld [vmem:[%s10501_s30 + $0xb10] sm:$0xff]  ;;  %v8196_v46 = vcombine.high %v916_v36, %v928_v37  ;;  %v946_v51 = vmax.bf16 %v10309_v50, %v562_v44  ;;  %v9777_v44 = vld [vmem:[#allocation5 + $0x824] ss:$8 sps:$4 sm:$0xff]  }
  0xea   : > { %v8220_v59 = vcombine.high %v940_v48, %v952_v49  ;;  %v8219_v2 = vcombine.low %v940_v48, %v952_v49  ;;  %v9772_v48 = vld [vmem:[#allocation5 + $0x220] ss:$8 sps:$4 sm:$0xff]  }
  0xeb   : > { %5448 = vmatpush1.bf16.msra.mxu1 %v9754_v52  ;;  %v958_v52 = vmax.bf16 %v10309_v50, %v574_v45  ;;  %v293_v45 = vld [vmem:[%s10501_s30 + $0x248] sm:$0xff] }
  0xec   : > { %6606 = vmatpush1.bf16.msra.mxu0 %v9757_v53  ;;  %5610 = vmatprep.subr.bf16.mxu1 %v9762_v54  ;;  %v580_v53 = vld [vmem:[%s10501_s30 + $0xb40] sm:$0xff]  ;;  %v8195_v54 = vcombine.low %v916_v36, %v928_v37  ;;  %v653_v37 = vmax.bf16 %v10309_v50, %v269_v27  ;;  %v677_v58 = vmax.bf16 %v10309_v50, %v293_v45  ;;  %v359_v27 = vld [vmem:[%s10501_s30 + $0x458] sm:$0xff]  ;;  %v377_v45 = vld [vmem:[%s10501_s30 + $0x4e8] sm:$0xff] }
  0xed   : > { %6768 = vmatprep.subr.bf16.mxu0 %v9765_v55  ;;  %5337 = vmatmul.mubr.bf16.gmra.mrb[32].mxu1 %v8075_v56  ;;  %v8207_v55 = vcombine.low %v922_v38, %v934_v39  ;;  %v592_v56 = vld [vmem:[%s10501_s30 + $0xba0] sm:$0xff]  ;;  %v8231_v3 = vcombine.low %v946_v51, %v958_v52  ;;  %v9766_v38 = vld [vmem:[#allocation5 + $0x210] ss:$8 sps:$4 sm:$0xff]  }
  0xee   : > { %6495 = vmatmul.mubr.bf16.gmra.mrb[32].mxu0 %v8087_v57  ;;  %5346 = vmatprep.mubr.bf16.mxu1 %v8100_v60  ;;  %v586_v57 = vld [vmem:[%s10501_s30 + $0xb70] sm:$0xff]  ;;  %v8232_v60 = vcombine.high %v946_v51, %v958_v52  ;;  %v976_v62 = vmax.bf16 %v10309_v50, %v592_v56  ;;  %v9775_v49 = vld [vmem:[#allocation5 + $0x820] ss:$8 sps:$4 sm:$0xff]   ;;  %v299_v52 = vld [vmem:[%s10501_s30 + $0x278] sm:$0xff] }
  0xef   : > { %6504 = vmatprep.mubr.bf16.mxu0 %v8112_v61  ;;  %v964_v61 = vmax.bf16 %v10309_v50, %v580_v53  ;;  %v970_v63 = vmax.bf16 %v10309_v50, %v586_v57  ;;  %v9769_v39 = vld [vmem:[#allocation5 + $0x810] ss:$8 sps:$4 sm:$0xff]   ;;  %v305_v51 = vld [vmem:[%s10501_s30 + $0x2a8] sm:$0xff]  ;;  %v9780_v56 = vld [vmem:[#allocation5 + $0x234] ss:$8 sps:$4 sm:$0xff]  }
  0xf0   : > { %v311_v53 = vld [vmem:[%s10501_s30 + $0x2d8] sm:$0xff] }
  0xf1   : > { %v8244_v7 = vcombine.high %v964_v61, %v976_v62  ;;  %v8243_v13 = vcombine.low %v964_v61, %v976_v62  ;;  %v8255_v14 = vcombine.low %v970_v63, %v982_v0  ;;  %v9783_v57 = vld [vmem:[#allocation5 + $0x834] ss:$8 sps:$4 sm:$0xff]   ;;  %v695_v61 = vmax.bf16 %v10309_v50, %v311_v53  ;;  %v9778_v62 = vld [vmem:[#allocation5 + $0x230] ss:$8 sps:$4 sm:$0xff]  }
  0xf2   : > { %v9816_v53 = vld [vmem:[#allocation5 + $0x294] ss:$8 sps:$4 sm:$0xff]  }
  0xf5   : > { %5347 = vmatmul.mubr.bf16.gmra.mrb[36].mxu1 %v8099_v4  ;;  %v233_v4 = vld [vmem:[%s10501_s30 + $0x68] sm:$0xff] }
  0xf6   : > { %6505 = vmatmul.mubr.bf16.gmra.mrb[36].mxu0 %v8111_v5  ;;  %5356 = vmatprep.mubr.bf16.mxu1 %v8124_v8  ;;  %v227_v5 = vld [vmem:[%s10501_s30 + $0x38] sm:$0xff]  ;;  %v8256_v8 = vcombine.high %v970_v63, %v982_v0  ;;  %v617_v10 = vmax.bf16 %v10309_v50, %v233_v4  ;;  %v9786_v0 = vld [vmem:[#allocation5 + $0x244] ss:$8 sps:$4 sm:$0xff]  }
  0xf7   : > { %6514 = vmatprep.mubr.bf16.mxu0 %v8136_v9  ;;  %v605_v9 = vmax.bf16 %v10309_v50, %v221_v1  ;;  %v611_v11 = vmax.bf16 %v10309_v50, %v227_v5  ;;  %v9781_v63 = vld [vmem:[#allocation5 + $0x830] ss:$8 sps:$4 sm:$0xff]   ;;  %v9789_v1 = vld [vmem:[#allocation5 + $0x844] ss:$8 sps:$4 sm:$0xff]  }
  0xf8   : > { %v329_v5 = vld [vmem:[%s10501_s30 + $0x368] sm:$0xff] }
  0xf9   : > { %v7886_v15 = vcombine.high %v605_v9, %v617_v10  ;;  %v7885_v28 = vcombine.low %v605_v9, %v617_v10  ;;  %v9787_v9 = vld [vmem:[#allocation5 + $0x840] ss:$8 sps:$4 sm:$0xff]  }
  0xfd   : > { %5357 = vmatmul.mubr.bf16.gmra.mrb[40].mxu1 %v8123_v16  ;;  %v7898_v16 = vcombine.high %v611_v11, %v623_v12 }
  0xfe   : > { %6515 = vmatmul.mubr.bf16.gmra.mrb[40].mxu0 %v8135_v17  ;;  %5366 = vmatprep.mubr.bf16.mxu1 %v8148_v20  ;;  %v245_v17 = vld [vmem:[%s10501_s30 + $0xc8] sm:$0xff]  ;;  %v263_v20 = vld [vmem:[%s10501_s30 + $0x158] sm:$0xff] }
  0xff   : > { %6524 = vmatprep.mubr.bf16.mxu0 %v8160_v21  ;;  %v629_v21 = vmax.bf16 %v10309_v50, %v245_v17  ;;  %v647_v24 = vmax.bf16 %v10309_v50, %v263_v20  ;;  %v9798_v20 = vld [vmem:[#allocation5 + $0x264] ss:$8 sps:$4 sm:$0xff]  }
 0x101   : > { %v7922_v36 = vcombine.high %v635_v23, %v647_v24 }
 0x105   : > { %5367 = vmatmul.mubr.bf16.gmra.mrb[44].mxu1 %v8147_v29  ;;  %v7897_v29 = vcombine.low %v611_v11, %v623_v12  ;;  %v9792_v12 = vld [vmem:[#allocation5 + $0x254] ss:$8 sps:$4 sm:$0xff]  }
 0x106   : > { %6525 = vmatmul.mubr.bf16.gmra.mrb[44].mxu0 %v8159_v30  ;;  %5376 = vmatprep.mubr.bf16.mxu1 %v8172_v34  ;;  %v281_v30 = vld [vmem:[%s10501_s30 + $0x1e8] sm:$0xff]  ;;  %v9771_v34 = vld [vmem:[#allocation5 + $0x814] ss:$8 sps:$4 sm:$0xff]  }
 0x107   : > { %6534 = vmatprep.mubr.bf16.mxu0 %v8184_v35  ;;  %v7910_v35 = vcombine.high %v629_v21, %v641_v22  ;;  %v665_v40 = vmax.bf16 %v10309_v50, %v281_v30 }
 0x10d   : > { %5377 = vmatmul.mubr.bf16.gmra.mrb[48].mxu1 %v8171_v41  ;;  %v659_v41 = vmax.bf16 %v10309_v50, %v275_v31 }
 0x10e   : > { %6535 = vmatmul.mubr.bf16.gmra.mrb[48].mxu0 %v8183_v42  ;;  %5386 = vmatprep.mubr.bf16.mxu1 %v8196_v46  ;;  %v671_v42 = vmax.bf16 %v10309_v50, %v287_v32  ;;  %v7909_v46 = vcombine.low %v629_v21, %v641_v22  ;;  %v9801_v21 = vld [vmem:[#allocation5 + $0x864] ss:$8 sps:$4 sm:$0xff]   ;;  %v9804_v32 = vld [vmem:[#allocation5 + $0x274] ss:$8 sps:$4 sm:$0xff]  }
 0x10f   : > { %6544 = vmatprep.mubr.bf16.mxu0 %v8208_v47  ;;  %v7921_v47 = vcombine.low %v635_v23, %v647_v24  ;;  %v341_v22 = vld [vmem:[%s10501_s30 + $0x3c8] sm:$0xff] }
 0x110   : > { %v7945_v4 = vcombine.low %v659_v41, %v671_v42 }
 0x115   : > { %5387 = vmatmul.mubr.bf16.gmra.mrb[52].mxu1 %v8195_v54  ;;  %v7934_v54 = vcombine.high %v653_v37, %v665_v40 }
 0x116   : > { %6545 = vmatmul.mubr.bf16.gmra.mrb[52].mxu0 %v8207_v55  ;;  %5396 = vmatprep.mubr.bf16.mxu1 %v8220_v59  ;;  %v7946_v55 = vcombine.high %v659_v41, %v671_v42  ;;  %v689_v59 = vmax.bf16 %v10309_v50, %v305_v51  ;;  %v9813_v41 = vld [vmem:[#allocation5 + $0x884] ss:$8 sps:$4 sm:$0xff]  }
 0x117   : > { %6554 = vmatprep.mubr.bf16.mxu0 %v8232_v60  ;;  %v683_v60 = vmax.bf16 %v10309_v50, %v299_v52  ;;  %v365_v42 = vld [vmem:[%s10501_s30 + $0x488] sm:$0xff] }
 0x118   : > { %v7958_v10 = vcombine.high %v677_v58, %v689_v59  ;;  %v7957_v23 = vcombine.low %v677_v58, %v689_v59  ;;  %v9814_v59 = vld [vmem:[#allocation5 + $0x290] ss:$8 sps:$4 sm:$0xff]  }
 0x119   : > { %v7970_v11 = vcombine.high %v683_v60, %v695_v61  ;;  %v7969_v24 = vcombine.low %v683_v60, %v695_v61  ;;  %v9817_v60 = vld [vmem:[#allocation5 + $0x890] ss:$8 sps:$4 sm:$0xff]   ;;  %v9822_v61 = vld [vmem:[#allocation5 + $0x2a4] ss:$8 sps:$4 sm:$0xff]  }
 0x11d   : > { %5397 = vmatmul.mubr.bf16.gmra.mrb[56].mxu1 %v8219_v2  ;;  %v317_v2 = vld [vmem:[%s10501_s30 + $0x308] sm:$0xff] }
 0x11e   : > { %6555 = vmatmul.mubr.bf16.gmra.mrb[56].mxu0 %v8231_v3  ;;  %5406 = vmatprep.mubr.bf16.mxu1 %v8244_v7  ;;  %v7933_v3 = vcombine.low %v653_v37, %v665_v40  ;;  %v335_v7 = vld [vmem:[%s10501_s30 + $0x398] sm:$0xff]  ;;  %v743_v37 = vmax.bf16 %v10309_v50, %v359_v27  ;;  %v9810_v40 = vld [vmem:[#allocation5 + $0x284] ss:$8 sps:$4 sm:$0xff]  }
 0x11f   : > { %6564 = vmatprep.mubr.bf16.mxu0 %v8256_v8  ;;  %v9784_v8 = vld [vmem:[#allocation5 + $0x240] ss:$8 sps:$4 sm:$0xff]   ;;  %v719_v17 = vmax.bf16 %v10309_v50, %v335_v7 }
 0x125   : > { %5407 = vmatmul.mubr.bf16.gmra.mrb[60].mxu1 %v8243_v13  ;;  %v9795_v13 = vld [vmem:[#allocation5 + $0x854] ss:$8 sps:$4 sm:$0xff]  }
 0x126   : > { %6565 = vmatmul.mubr.bf16.gmra.mrb[60].mxu0 %v8255_v14  ;;  %5449 = vmatprep.mubr.bf16.mxu1 %v7886_v15  ;;  %v701_v14 = vmax.bf16 %v10309_v50, %v317_v2  ;;  %v713_v15 = vmax.bf16 %v10309_v50, %v329_v5  ;;  %v401_v2 = vld [vmem:[%s10501_s30 + $0x5a8] sm:$0xff] }
 0x127   : > { %6607 = vmatprep.mubr.bf16.mxu0 %v7898_v16  ;;  %v707_v16 = vmax.bf16 %v10309_v50, %v323_v6  ;;  %v9820_v5 = vld [vmem:[#allocation5 + $0x2a0] ss:$8 sps:$4 sm:$0xff]  }
 0x128   : > { %v7982_v30 = vcombine.high %v701_v14, %v713_v15  ;;  %v9823_v6 = vld [vmem:[#allocation5 + $0x8a0] ss:$8 sps:$4 sm:$0xff]  }
 0x129   : > { %v7994_v31 = vcombine.high %v707_v16, %v719_v17 }
 0x12d   : > { %5450 = vmatmul.mubr.bf16.vlgmr.msra.gmra.mrb[0].mxu1 %v7885_v28  ;;  %v9796_v28 = vld [vmem:[#allocation5 + $0x260] ss:$8 sps:$4 sm:$0xff]  }
 0x12e   : > { %6608 = vmatmul.mubr.bf16.vlgmr.msra.gmra.mrb[0].mxu0 %v7897_v29  ;;  %5611 = vmatpush1.bf16.msra.mxu1 %v9760_v25  ;;  %v353_v25 = vld [vmem:[%s10501_s30 + $0x428] sm:$0xff] }
 0x12f   : > { %6769 = vmatpush1.bf16.msra.mxu0 %v9763_v26  ;;  %5459 = vmatprep.mubr.bf16.mxu1 %v7910_v35  ;;  %v347_v26 = vld [vmem:[%s10501_s30 + $0x3f8] sm:$0xff]  ;;  %v9799_v29 = vld [vmem:[#allocation5 + $0x860] ss:$8 sps:$4 sm:$0xff]   ;;  %v737_v35 = vmax.bf16 %v10309_v50, %v353_v25 }
 0x130   : > { %6617 = vmatprep.mubr.bf16.mxu0 %v7922_v36  ;;  %5612 = vmatprep.subr.bf16.mxu1 %v9768_v33  ;;  %v9807_v33 = vld [vmem:[#allocation5 + $0x874] ss:$8 sps:$4 sm:$0xff]   ;;  %v731_v36 = vmax.bf16 %v10309_v50, %v347_v26  ;;  %v9832_v25 = vld [vmem:[#allocation5 + $0x2c0] ss:$8 sps:$4 sm:$0xff]  }
 0x131   : > { %6770 = vmatprep.subr.bf16.mxu0 %v9771_v34  ;;  %v725_v34 = vmax.bf16 %v10309_v50, %v341_v22  ;;  %v425_v22 = vld [vmem:[%s10501_s30 + $0x668] sm:$0xff] }
 0x132   : > { %5613 = vmatpush1.bf16.msra.mxu1 %v9766_v38  ;;  %v9802_v38 = vld [vmem:[#allocation5 + $0x270] ss:$8 sps:$4 sm:$0xff]   ;;  %v8018_v52 = vcombine.high %v731_v36, %v743_v37  ;;  %v9835_v26 = vld [vmem:[#allocation5 + $0x8c0] ss:$8 sps:$4 sm:$0xff]  }
 0x133   : > { %6771 = vmatpush1.bf16.msra.mxu0 %v9769_v39  ;;  %5614 = vmatprep.subr.bf16.mxu1 %v9774_v43  ;;  %v9805_v39 = vld [vmem:[#allocation5 + $0x870] ss:$8 sps:$4 sm:$0xff]   ;;  %v7981_v43 = vcombine.low %v701_v14, %v713_v15  ;;  %v8006_v51 = vcombine.high %v725_v34, %v737_v35 }
 0x134   : > { %6772 = vmatprep.subr.bf16.mxu0 %v9777_v44  ;;  %v7993_v44 = vcombine.low %v707_v16, %v719_v17  ;;  %v9826_v15 = vld [vmem:[#allocation5 + $0x2b0] ss:$8 sps:$4 sm:$0xff]   ;;  %v9834_v17 = vld [vmem:[#allocation5 + $0x2c4] ss:$8 sps:$4 sm:$0xff]  }
 0x135   : > { %5460 = vmatmul.mubr.bf16.gmra.mrb[4].mxu1 %v7909_v46  ;;  %v371_v46 = vld [vmem:[%s10501_s30 + $0x4b8] sm:$0xff] }
 0x136   : > { %6618 = vmatmul.mubr.bf16.gmra.mrb[4].mxu0 %v7921_v47  ;;  %5469 = vmatprep.mubr.bf16.mxu1 %v7934_v54  ;;  %v383_v47 = vld [vmem:[%s10501_s30 + $0x518] sm:$0xff] }
 0x137   : > { %6627 = vmatprep.mubr.bf16.mxu0 %v7946_v55  ;;  %5615 = vmatpush1.bf16.msra.mxu1 %v9772_v48  ;;  %v9808_v48 = vld [vmem:[#allocation5 + $0x280] ss:$8 sps:$4 sm:$0xff]   ;;  %v9819_v54 = vld [vmem:[#allocation5 + $0x894] ss:$8 sps:$4 sm:$0xff]   ;;  %v749_v55 = vmax.bf16 %v10309_v50, %v365_v42  ;;  %v767_v58 = vmax.bf16 %v10309_v50, %v383_v47  ;;  %v9829_v16 = vld [vmem:[#allocation5 + $0x8b0] ss:$8 sps:$4 sm:$0xff]  }
 0x138   : > { %6773 = vmatpush1.bf16.msra.mxu0 %v9775_v49  ;;  %5616 = vmatprep.subr.bf16.mxu1 %v9780_v56  ;;  %v9811_v49 = vld [vmem:[#allocation5 + $0x880] ss:$8 sps:$4 sm:$0xff]   ;;  %v761_v56 = vmax.bf16 %v10309_v50, %v377_v45 }
 0x139   : > { %6774 = vmatprep.subr.bf16.mxu0 %v9783_v57  ;;  %v755_v57 = vmax.bf16 %v10309_v50, %v371_v46  ;;  %v449_v42 = vld [vmem:[%s10501_s30 + $0x728] sm:$0xff] }
 0x13a   : > { %v8030_v7 = vcombine.high %v749_v55, %v761_v56  ;;  %v9844_v45 = vld [vmem:[#allocation5 + $0x2e0] ss:$8 sps:$4 sm:$0xff]  }
 0x13b   : > { %5617 = vmatpush1.bf16.msra.mxu1 %v9778_v62  ;;  %v9825_v62 = vld [vmem:[#allocation5 + $0x8a4] ss:$8 sps:$4 sm:$0xff]   ;;  %v9847_v46 = vld [vmem:[#allocation5 + $0x8e0] ss:$8 sps:$4 sm:$0xff]  }
 0x13c   : > { %6775 = vmatpush1.bf16.msra.mxu0 %v9781_v63  ;;  %5618 = vmatprep.subr.bf16.mxu1 %v9786_v0  ;;  %v389_v63 = vld [vmem:[%s10501_s30 + $0x548] sm:$0xff]  ;;  %v8005_v0 = vcombine.low %v725_v34, %v737_v35  ;;  %v9838_v35 = vld [vmem:[#allocation5 + $0x2d0] ss:$8 sps:$4 sm:$0xff]  }
 0x13d   : > { %6776 = vmatprep.subr.bf16.mxu0 %v9789_v1  ;;  %5470 = vmatmul.mubr.bf16.gmra.mrb[8].mxu1 %v7933_v3  ;;  %v8017_v1 = vcombine.low %v731_v36, %v743_v37  ;;  %v395_v3 = vld [vmem:[%s10501_s30 + $0x578] sm:$0xff]  ;;  %v9846_v37 = vld [vmem:[#allocation5 + $0x2e4] ss:$8 sps:$4 sm:$0xff]  }
 0x13e   : > { %6628 = vmatmul.mubr.bf16.gmra.mrb[8].mxu0 %v7945_v4  ;;  %5479 = vmatprep.mubr.bf16.mxu1 %v7958_v10  ;;  %v407_v4 = vld [vmem:[%s10501_s30 + $0x5d8] sm:$0xff] }
 0x13f   : > { %6637 = vmatprep.mubr.bf16.mxu0 %v7970_v11  ;;  %5619 = vmatpush1.bf16.msra.mxu1 %v9784_v8  ;;  %v8042_v8 = vcombine.high %v755_v57, %v767_v58  ;;  %v9831_v10 = vld [vmem:[#allocation5 + $0x8b4] ss:$8 sps:$4 sm:$0xff]   ;;  %v773_v11 = vmax.bf16 %v10309_v50, %v389_v63  ;;  %v791_v14 = vmax.bf16 %v10309_v50, %v407_v4  ;;  %v9841_v36 = vld [vmem:[#allocation5 + $0x8d0] ss:$8 sps:$4 sm:$0xff]   ;;  %v473_v63 = vld [vmem:[%s10501_s30 + $0x7e8] sm:$0xff] }
 0x140   : > { %6777 = vmatpush1.bf16.msra.mxu0 %v9787_v9  ;;  %5620 = vmatprep.subr.bf16.mxu1 %v9792_v12  ;;  %v9828_v9 = vld [vmem:[#allocation5 + $0x2b4] ss:$8 sps:$4 sm:$0xff]   ;;  %v785_v12 = vmax.bf16 %v10309_v50, %v401_v2 }
 0x141   : > { %6778 = vmatprep.subr.bf16.mxu0 %v9795_v13  ;;  %v779_v13 = vmax.bf16 %v10309_v50, %v395_v3  ;;  %v467_v2 = vld [vmem:[%s10501_s30 + $0x7b8] sm:$0xff] }
 0x142   : > { %v8054_v27 = vcombine.high %v773_v11, %v785_v12  ;;  %v479_v3 = vld [vmem:[%s10501_s30 + $0x818] sm:$0xff] }
 0x143   : > { %5621 = vmatpush1.bf16.msra.mxu1 %v9790_v18  ;;  %v9837_v18 = vld [vmem:[#allocation5 + $0x8c4] ss:$8 sps:$4 sm:$0xff]  }
 0x144   : > { %6779 = vmatpush1.bf16.msra.mxu0 %v9793_v19  ;;  %5622 = vmatprep.subr.bf16.mxu1 %v9798_v20  ;;  %v413_v19 = vld [vmem:[%s10501_s30 + $0x608] sm:$0xff]  ;;  %v8029_v20 = vcombine.low %v749_v55, %v761_v56  ;;  %v9850_v56 = vld [vmem:[#allocation5 + $0x2f0] ss:$8 sps:$4 sm:$0xff]  }
 0x145   : > { %6780 = vmatprep.subr.bf16.mxu0 %v9801_v21  ;;  %5480 = vmatmul.mubr.bf16.gmra.mrb[12].mxu1 %v7957_v23  ;;  %v8041_v21 = vcombine.low %v755_v57, %v767_v58  ;;  %v419_v23 = vld [vmem:[%s10501_s30 + $0x638] sm:$0xff]  ;;  %v9858_v58 = vld [vmem:[#allocation5 + $0x304] ss:$8 sps:$4 sm:$0xff]  }
 0x146   : > { %6638 = vmatmul.mubr.bf16.gmra.mrb[12].mxu0 %v7969_v24  ;;  %5489 = vmatprep.mubr.bf16.mxu1 %v7982_v30  ;;  %v431_v24 = vld [vmem:[%s10501_s30 + $0x698] sm:$0xff] }
 0x147   : > { %6647 = vmatprep.mubr.bf16.mxu0 %v7994_v31  ;;  %5623 = vmatpush1.bf16.msra.mxu1 %v9796_v28  ;;  %v8066_v28 = vcombine.high %v779_v13, %v791_v14  ;;  %v9843_v30 = vld [vmem:[#allocation5 + $0x8d4] ss:$8 sps:$4 sm:$0xff]   ;;  %v797_v31 = vmax.bf16 %v10309_v50, %v413_v19  ;;  %v815_v34 = vmax.bf16 %v10309_v50, %v431_v24  ;;  %v9853_v57 = vld [vmem:[#allocation5 + $0x8f0] ss:$8 sps:$4 sm:$0xff]   ;;  %v509_v24 = vld [vmem:[%s10501_s30 + $0x908] sm:$0xff] }
 0x148   : > { %6781 = vmatpush1.bf16.msra.mxu0 %v9799_v29  ;;  %5624 = vmatprep.subr.bf16.mxu1 %v9804_v32  ;;  %v9840_v29 = vld [vmem:[#allocation5 + $0x2d4] ss:$8 sps:$4 sm:$0xff]   ;;  %v809_v32 = vmax.bf16 %v10309_v50, %v425_v22 }
 0x149   : > { %6782 = vmatprep.subr.bf16.mxu0 %v9807_v33  ;;  %v803_v33 = vmax.bf16 %v10309_v50, %v419_v23 }
 0x14a   : > { %v8078_v47 = vcombine.high %v797_v31, %v809_v32 }
 0x14b   : > { %5625 = vmatpush1.bf16.msra.mxu1 %v9802_v38  ;;  %v9849_v38 = vld [vmem:[#allocation5 + $0x8e4] ss:$8 sps:$4 sm:$0xff]  }
 0x14c   : > { %6783 = vmatpush1.bf16.msra.mxu0 %v9805_v39  ;;  %5626 = vmatprep.subr.bf16.mxu1 %v9810_v40  ;;  %v437_v39 = vld [vmem:[%s10501_s30 + $0x6c8] sm:$0xff]  ;;  %v8053_v40 = vcombine.low %v773_v11, %v785_v12 }
 0x14d   : > { %6784 = vmatprep.subr.bf16.mxu0 %v9813_v41  ;;  %5490 = vmatmul.mubr.bf16.gmra.mrb[16].mxu1 %v7981_v43  ;;  %v8065_v41 = vcombine.low %v779_v13, %v791_v14  ;;  %v443_v43 = vld [vmem:[%s10501_s30 + $0x6f8] sm:$0xff]  ;;  %v485_v12 = vld [vmem:[%s10501_s30 + $0x848] sm:$0xff] }
 0x14e   : > { %6648 = vmatmul.mubr.bf16.gmra.mrb[16].mxu0 %v7993_v44  ;;  %5499 = vmatprep.mubr.bf16.mxu1 %v8006_v51  ;;  %v455_v44 = vld [vmem:[%s10501_s30 + $0x758] sm:$0xff]  ;;  %v497_v13 = vld [vmem:[%s10501_s30 + $0x8a8] sm:$0xff] }
 0x14f   : > { %6657 = vmatprep.mubr.bf16.mxu0 %v8018_v52  ;;  %5627 = vmatpush1.bf16.msra.mxu1 %v9808_v48  ;;  %v8090_v48 = vcombine.high %v803_v33, %v815_v34  ;;  %v9855_v51 = vld [vmem:[#allocation5 + $0x8f4] ss:$8 sps:$4 sm:$0xff]   ;;  %v821_v52 = vmax.bf16 %v10309_v50, %v437_v39  ;;  %v839_v55 = vmax.bf16 %v10309_v50, %v455_v44 }
 0x150   : > { %6785 = vmatpush1.bf16.msra.mxu0 %v9811_v49  ;;  %5628 = vmatprep.subr.bf16.mxu1 %v9816_v53  ;;  %v9852_v49 = vld [vmem:[#allocation5 + $0x2f4] ss:$8 sps:$4 sm:$0xff]   ;;  %v833_v53 = vmax.bf16 %v10309_v50, %v449_v42 }
 0x151   : > { %6786 = vmatprep.subr.bf16.mxu0 %v9819_v54  ;;  %v827_v54 = vmax.bf16 %v10309_v50, %v443_v43  ;;  %v491_v14 = vld [vmem:[%s10501_s30 + $0x878] sm:$0xff] }
 0x152   : > { %v551_v39 = vld [vmem:[%s10501_s30 + $0xa58] sm:$0xff] }
 0x153   : > { %5629 = vmatpush1.bf16.msra.mxu1 %v9814_v59  ;;  %v9861_v59 = vld [vmem:[#allocation5 + $0x904] ss:$8 sps:$4 sm:$0xff]   ;;  %v935_v43 = vmax.bf16 %v10309_v50, %v551_v39  ;;  %v9864_v39 = vld [vmem:[#allocation5 + $0x314] ss:$8 sps:$4 sm:$0xff]  }
 0x154   : > { %6787 = vmatpush1.bf16.msra.mxu0 %v9817_v60  ;;  %5630 = vmatprep.subr.bf16.mxu1 %v9822_v61  ;;  %v461_v60 = vld [vmem:[%s10501_s30 + $0x788] sm:$0xff]  ;;  %v8077_v61 = vcombine.low %v797_v31, %v809_v32 }
 0x155   : > { %6788 = vmatprep.subr.bf16.mxu0 %v9825_v62  ;;  %5500 = vmatmul.mubr.bf16.gmra.mrb[20].mxu1 %v8005_v0  ;;  %v8089_v62 = vcombine.low %v803_v33, %v815_v34  ;;  %v8102_v0 = vcombine.high %v821_v52, %v833_v53  ;;  %v845_v4 = vmax.bf16 %v10309_v50, %v461_v60 }
 0x156   : > { %6658 = vmatmul.mubr.bf16.gmra.mrb[20].mxu0 %v8017_v1  ;;  %5509 = vmatprep.mubr.bf16.mxu1 %v8030_v7  ;;  %v8114_v1 = vcombine.high %v827_v54, %v839_v55  ;;  %v863_v7 = vmax.bf16 %v10309_v50, %v479_v3 }
 0x157   : > { %6667 = vmatprep.mubr.bf16.mxu0 %v8042_v8  ;;  %5631 = vmatpush1.bf16.msra.mxu1 %v9820_v5  ;;  %v857_v5 = vmax.bf16 %v10309_v50, %v473_v63  ;;  %v8101_v8 = vcombine.low %v821_v52, %v833_v53  ;;  %v575_v52 = vld [vmem:[%s10501_s30 + $0xb18] sm:$0xff] }
 0x158   : > { %6789 = vmatpush1.bf16.msra.mxu0 %v9823_v6  ;;  %5632 = vmatprep.subr.bf16.mxu1 %v9828_v9  ;;  %v851_v6 = vmax.bf16 %v10309_v50, %v467_v2  ;;  %v8113_v9 = vcombine.low %v827_v54, %v839_v55  ;;  %v587_v63 = vld [vmem:[%s10501_s30 + $0xb78] sm:$0xff] }
 0x159   : > { %6790 = vmatprep.subr.bf16.mxu0 %v9831_v10  ;;  %v8126_v10 = vcombine.high %v845_v4, %v857_v5  ;;  %v971_v3 = vmax.bf16 %v10309_v50, %v587_v63 }
 0x15a   : > { %v8138_v11 = vcombine.high %v851_v6, %v863_v7 }
 0x15b   : > { %5633 = vmatpush1.bf16.msra.mxu1 %v9826_v15  ;;  %v503_v15 = vld [vmem:[%s10501_s30 + $0x8d8] sm:$0xff] }
 0x15c   : > { %6791 = vmatpush1.bf16.msra.mxu0 %v9829_v16  ;;  %5634 = vmatprep.subr.bf16.mxu1 %v9834_v17  ;;  %v869_v16 = vmax.bf16 %v10309_v50, %v485_v12  ;;  %v881_v17 = vmax.bf16 %v10309_v50, %v497_v13  ;;  %v887_v19 = vmax.bf16 %v10309_v50, %v503_v15  ;;  %v240_v12 = vld [vmem:[%s10501_s30 + $0xa0] sm:$0xff] }
 0x15d   : > { %6792 = vmatprep.subr.bf16.mxu0 %v9837_v18  ;;  %5510 = vmatmul.mubr.bf16.gmra.mrb[24].mxu1 %v8029_v20  ;;  %v875_v18 = vmax.bf16 %v10309_v50, %v491_v14  ;;  %v8125_v20 = vcombine.low %v845_v4, %v857_v5 }
 0x15e   : > { %6668 = vmatmul.mubr.bf16.gmra.mrb[24].mxu0 %v8041_v21  ;;  %5519 = vmatprep.mubr.bf16.mxu1 %v8054_v27  ;;  %v8137_v21 = vcombine.low %v851_v6, %v863_v7  ;;  %v8150_v22 = vcombine.high %v869_v16, %v881_v17  ;;  %v527_v27 = vld [vmem:[%s10501_s30 + $0x998] sm:$0xff]  ;;  %v8149_v32 = vcombine.low %v869_v16, %v881_v17 }
 0x15f   : > { %6677 = vmatprep.mubr.bf16.mxu0 %v8066_v28  ;;  %5635 = vmatpush1.bf16.msra.mxu1 %v9832_v25  ;;  %v8162_v23 = vcombine.high %v875_v18, %v887_v19  ;;  %v521_v25 = vld [vmem:[%s10501_s30 + $0x968] sm:$0xff]  ;;  %v893_v28 = vmax.bf16 %v10309_v50, %v509_v24  ;;  %v911_v31 = vmax.bf16 %v10309_v50, %v527_v27  ;;  %v264_v24 = vld [vmem:[%s10501_s30 + $0x160] sm:$0xff] }
 0x160   : > { %6793 = vmatpush1.bf16.msra.mxu0 %v9835_v26  ;;  %5636 = vmatprep.subr.bf16.mxu1 %v9840_v29  ;;  %v515_v26 = vld [vmem:[%s10501_s30 + $0x938] sm:$0xff]  ;;  %v905_v29 = vmax.bf16 %v10309_v50, %v521_v25  ;;  %v8161_v33 = vcombine.low %v875_v18, %v887_v19  ;;  %v624_v16 = vmax.bf16 %v10309_v50, %v240_v12  ;;  %v324_v12 = vld [vmem:[%s10501_s30 + $0x340] sm:$0xff] }
 0x161   : > { %6794 = vmatprep.subr.bf16.mxu0 %v9843_v30  ;;  %v899_v30 = vmax.bf16 %v10309_v50, %v515_v26 }
 0x162   : > { %v8174_v34 = vcombine.high %v893_v28, %v905_v29  ;;  %v8173_v44 = vcombine.low %v893_v28, %v905_v29  ;;  %v648_v28 = vmax.bf16 %v10309_v50, %v264_v24  ;;  %v9894_v24 = vld [vmem:[#allocation5 + $0x364] ss:$8 sps:$4 sm:$0xff]  }
 0x163   : > { %5637 = vmatpush1.bf16.msra.mxu1 %v9838_v35  ;;  %v8186_v35 = vcombine.high %v899_v30, %v911_v31 }
 0x164   : > { %6795 = vmatpush1.bf16.msra.mxu0 %v9841_v36  ;;  %5638 = vmatprep.subr.bf16.mxu1 %v9846_v37  ;;  %v533_v36 = vld [vmem:[%s10501_s30 + $0x9c8] sm:$0xff] }
 0x165   : > { %6796 = vmatprep.subr.bf16.mxu0 %v9849_v38  ;;  %5520 = vmatmul.mubr.bf16.gmra.mrb[28].mxu1 %v8053_v40  ;;  %v545_v37 = vld [vmem:[%s10501_s30 + $0xa28] sm:$0xff]  ;;  %v539_v38 = vld [vmem:[%s10501_s30 + $0x9f8] sm:$0xff]  ;;  %v917_v40 = vmax.bf16 %v10309_v50, %v533_v36  ;;  %v282_v36 = vld [vmem:[%s10501_s30 + $0x1f0] sm:$0xff] }
 0x166   : > { %6678 = vmatmul.mubr.bf16.gmra.mrb[28].mxu0 %v8065_v41  ;;  %5529 = vmatprep.mubr.bf16.mxu1 %v8078_v47  ;;  %v929_v41 = vmax.bf16 %v10309_v50, %v545_v37  ;;  %v923_v42 = vmax.bf16 %v10309_v50, %v539_v38  ;;  %v276_v37 = vld [vmem:[%s10501_s30 + $0x1c0] sm:$0xff] }
 0x167   : > { %6687 = vmatprep.mubr.bf16.mxu0 %v8090_v48  ;;  %5639 = vmatpush1.bf16.msra.mxu1 %v9844_v45  ;;  %v8185_v45 = vcombine.low %v899_v30, %v911_v31  ;;  %v557_v48 = vld [vmem:[%s10501_s30 + $0xa88] sm:$0xff]  ;;  %v288_v38 = vld [vmem:[%s10501_s30 + $0x220] sm:$0xff] }
 0x168   : > { %6797 = vmatpush1.bf16.msra.mxu0 %v9847_v46  ;;  %5640 = vmatprep.subr.bf16.mxu1 %v9852_v49  ;;  %v8198_v46 = vcombine.high %v917_v40, %v929_v41  ;;  %v8210_v47 = vcombine.high %v923_v42, %v935_v43  ;;  %v569_v49 = vld [vmem:[%s10501_s30 + $0xae8] sm:$0xff]  ;;  %v941_v53 = vmax.bf16 %v10309_v50, %v557_v48 }
 0x169   : > { %6798 = vmatprep.subr.bf16.mxu0 %v9855_v51  ;;  %v563_v51 = vld [vmem:[%s10501_s30 + $0xab8] sm:$0xff]  ;;  %v953_v54 = vmax.bf16 %v10309_v50, %v569_v49  ;;  %v9856_v31 = vld [vmem:[#allocation5 + $0x300] ss:$8 sps:$4 sm:$0xff]   ;;  %v9873_v48 = vld [vmem:[#allocation5 + $0x924] ss:$8 sps:$4 sm:$0xff]  }
 0x16a   : > { %v947_v55 = vmax.bf16 %v10309_v50, %v563_v51 }
 0x16b   : > { %5641 = vmatpush1.bf16.msra.mxu1 %v9850_v56  ;;  %v959_v56 = vmax.bf16 %v10309_v50, %v575_v52  ;;  %v8221_v5 = vcombine.low %v941_v53, %v953_v54 }
 0x16c   : > { %6799 = vmatpush1.bf16.msra.mxu0 %v9853_v57  ;;  %5803 = vmatprep.subr.bf16.mxu1 %v9858_v58  ;;  %v8197_v57 = vcombine.low %v917_v40, %v929_v41  ;;  %v8209_v58 = vcombine.low %v923_v42, %v935_v43  ;;  %v9867_v40 = vld [vmem:[#allocation5 + $0x914] ss:$8 sps:$4 sm:$0xff]   ;;  %v9862_v42 = vld [vmem:[#allocation5 + $0x310] ss:$8 sps:$4 sm:$0xff]  }
 0x16d   : > { %6961 = vmatprep.subr.bf16.mxu0 %v9861_v59  ;;  %5530 = vmatmul.mubr.bf16.gmra.mrb[32].mxu1 %v8077_v61  ;;  %v8222_v59 = vcombine.high %v941_v53, %v953_v54  ;;  %v8234_v60 = vcombine.high %v947_v55, %v959_v56  ;;  %v581_v61 = vld [vmem:[%s10501_s30 + $0xb48] sm:$0xff]  ;;  %v8233_v6 = vcombine.low %v947_v55, %v959_v56  ;;  %v9865_v43 = vld [vmem:[#allocation5 + $0x910] ss:$8 sps:$4 sm:$0xff]  }
 0x16e   : > { %6688 = vmatmul.mubr.bf16.gmra.mrb[32].mxu0 %v8089_v62  ;;  %5539 = vmatprep.mubr.bf16.mxu1 %v8102_v0  ;;  %v593_v62 = vld [vmem:[%s10501_s30 + $0xba8] sm:$0xff]  ;;  %v599_v0 = vld [vmem:[%s10501_s30 + $0xbd8] sm:$0xff]  ;;  %v294_v56 = vld [vmem:[%s10501_s30 + $0x250] sm:$0xff] }
 0x16f   : > { %6697 = vmatprep.mubr.bf16.mxu0 %v8114_v1  ;;  %v965_v1 = vmax.bf16 %v10309_v50, %v581_v61  ;;  %v977_v2 = vmax.bf16 %v10309_v50, %v593_v62  ;;  %v983_v4 = vmax.bf16 %v10309_v50, %v599_v0  ;;  %v9868_v54 = vld [vmem:[#allocation5 + $0x320] ss:$8 sps:$4 sm:$0xff]   ;;  %v9879_v61 = vld [vmem:[#allocation5 + $0x934] ss:$8 sps:$4 sm:$0xff]   ;;  %v678_v62 = vmax.bf16 %v10309_v50, %v294_v56 }
 0x170   : > { %v9871_v55 = vld [vmem:[#allocation5 + $0x920] ss:$8 sps:$4 sm:$0xff]  }
 0x171   : > { %v8246_v7 = vcombine.high %v965_v1, %v977_v2  ;;  %v8245_v17 = vcombine.low %v965_v1, %v977_v2  ;;  %v8257_v18 = vcombine.low %v971_v3, %v983_v4  ;;  %v9874_v2 = vld [vmem:[#allocation5 + $0x330] ss:$8 sps:$4 sm:$0xff]   ;;  %v9907_v56 = vld [vmem:[#allocation5 + $0x980] ss:$8 sps:$4 sm:$0xff]  }
 0x175   : > { %5540 = vmatmul.mubr.bf16.gmra.mrb[36].mxu1 %v8101_v8  ;;  %v8258_v8 = vcombine.high %v971_v3, %v983_v4  ;;  %v9877_v3 = vld [vmem:[#allocation5 + $0x930] ss:$8 sps:$4 sm:$0xff]   ;;  %v9882_v4 = vld [vmem:[#allocation5 + $0x344] ss:$8 sps:$4 sm:$0xff]  }
 0x176   : > { %6698 = vmatmul.mubr.bf16.gmra.mrb[36].mxu0 %v8113_v9  ;;  %5549 = vmatprep.mubr.bf16.mxu1 %v8126_v10  ;;  %v222_v9 = vld [vmem:[%s10501_s30 + $0x10] sm:$0xff] }
 0x177   : > { %6707 = vmatprep.mubr.bf16.mxu0 %v8138_v11  ;;  %v234_v10 = vld [vmem:[%s10501_s30 + $0x70] sm:$0xff]  ;;  %v228_v11 = vld [vmem:[%s10501_s30 + $0x40] sm:$0xff]  ;;  %v606_v13 = vmax.bf16 %v10309_v50, %v222_v9 }
 0x178   : > { %v618_v14 = vmax.bf16 %v10309_v50, %v234_v10  ;;  %v612_v15 = vmax.bf16 %v10309_v50, %v228_v11  ;;  %v318_v10 = vld [vmem:[%s10501_s30 + $0x310] sm:$0xff] }
 0x179   : > { %v330_v11 = vld [vmem:[%s10501_s30 + $0x370] sm:$0xff] }
 0x17a   : > { %v7888_v19 = vcombine.high %v606_v13, %v618_v14  ;;  %v7887_v29 = vcombine.low %v606_v13, %v618_v14  ;;  %v7899_v30 = vcombine.low %v612_v15, %v624_v16  ;;  %v336_v13 = vld [vmem:[%s10501_s30 + $0x3a0] sm:$0xff] }
 0x17b   : > { %v9880_v14 = vld [vmem:[#allocation5 + $0x340] ss:$8 sps:$4 sm:$0xff]  }
 0x17d   : > { %5550 = vmatmul.mubr.bf16.gmra.mrb[40].mxu1 %v8125_v20  ;;  %v7900_v20 = vcombine.high %v612_v15, %v624_v16  ;;  %v9883_v15 = vld [vmem:[#allocation5 + $0x940] ss:$8 sps:$4 sm:$0xff]   ;;  %v9888_v16 = vld [vmem:[#allocation5 + $0x354] ss:$8 sps:$4 sm:$0xff]  }
 0x17e   : > { %6708 = vmatmul.mubr.bf16.gmra.mrb[40].mxu0 %v8137_v21  ;;  %5559 = vmatprep.mubr.bf16.mxu1 %v8150_v22  ;;  %v246_v21 = vld [vmem:[%s10501_s30 + $0xd0] sm:$0xff] }
 0x17f   : > { %6717 = vmatprep.mubr.bf16.mxu0 %v8162_v23  ;;  %v258_v22 = vld [vmem:[%s10501_s30 + $0x130] sm:$0xff]  ;;  %v252_v23 = vld [vmem:[%s10501_s30 + $0x100] sm:$0xff]  ;;  %v630_v25 = vmax.bf16 %v10309_v50, %v246_v21  ;;  %v720_v21 = vmax.bf16 %v10309_v50, %v336_v13 }
 0x180   : > { %v642_v26 = vmax.bf16 %v10309_v50, %v258_v22  ;;  %v636_v27 = vmax.bf16 %v10309_v50, %v252_v23  ;;  %v9886_v22 = vld [vmem:[#allocation5 + $0x350] ss:$8 sps:$4 sm:$0xff]   ;;  %v9924_v13 = vld [vmem:[#allocation5 + $0x3b4] ss:$8 sps:$4 sm:$0xff]  }
 0x181   : > { %v9889_v23 = vld [vmem:[#allocation5 + $0x950] ss:$8 sps:$4 sm:$0xff]  }
 0x182   : > { %v7911_v49 = vcombine.low %v630_v25, %v642_v26  ;;  %v7923_v51 = vcombine.low %v636_v27, %v648_v28 }
 0x185   : > { %5560 = vmatmul.mubr.bf16.gmra.mrb[44].mxu1 %v8149_v32  ;;  %v9859_v32 = vld [vmem:[#allocation5 + $0x900] ss:$8 sps:$4 sm:$0xff]  }
 0x186   : > { %6718 = vmatmul.mubr.bf16.gmra.mrb[44].mxu0 %v8161_v33  ;;  %5569 = vmatprep.mubr.bf16.mxu1 %v8174_v34  ;;  %v270_v33 = vld [vmem:[%s10501_s30 + $0x190] sm:$0xff]  ;;  %v7912_v34 = vcombine.high %v630_v25, %v642_v26  ;;  %v9897_v25 = vld [vmem:[#allocation5 + $0x964] ss:$8 sps:$4 sm:$0xff]  }
 0x187   : > { %6727 = vmatprep.mubr.bf16.mxu0 %v8186_v35  ;;  %v7924_v35 = vcombine.high %v636_v27, %v648_v28  ;;  %v654_v41 = vmax.bf16 %v10309_v50, %v270_v33  ;;  %v360_v33 = vld [vmem:[%s10501_s30 + $0x460] sm:$0xff] }
 0x18d   : > { %5570 = vmatmul.mubr.bf16.gmra.mrb[48].mxu1 %v8173_v44  ;;  %v666_v44 = vmax.bf16 %v10309_v50, %v282_v36  ;;  %v9900_v36 = vld [vmem:[#allocation5 + $0x374] ss:$8 sps:$4 sm:$0xff]  }
 0x18e   : > { %6728 = vmatmul.mubr.bf16.gmra.mrb[48].mxu0 %v8185_v45  ;;  %5579 = vmatprep.mubr.bf16.mxu1 %v8198_v46  ;;  %v660_v45 = vmax.bf16 %v10309_v50, %v276_v37  ;;  %v672_v46 = vmax.bf16 %v10309_v50, %v288_v38  ;;  %v9903_v37 = vld [vmem:[#allocation5 + $0x974] ss:$8 sps:$4 sm:$0xff]  }
 0x18f   : > { %6737 = vmatprep.mubr.bf16.mxu0 %v8210_v47  ;;  %v9870_v47 = vld [vmem:[#allocation5 + $0x324] ss:$8 sps:$4 sm:$0xff]   ;;  %v7936_v52 = vcombine.high %v654_v41, %v666_v44 }
 0x190   : > { %v7948_v53 = vcombine.high %v660_v45, %v672_v46 }
 0x195   : > { %5580 = vmatmul.mubr.bf16.gmra.mrb[52].mxu1 %v8197_v57  ;;  %v306_v57 = vld [vmem:[%s10501_s30 + $0x2b0] sm:$0xff] }
 0x196   : > { %6738 = vmatmul.mubr.bf16.gmra.mrb[52].mxu0 %v8209_v58  ;;  %5589 = vmatprep.mubr.bf16.mxu1 %v8222_v59  ;;  %v300_v58 = vld [vmem:[%s10501_s30 + $0x280] sm:$0xff]  ;;  %v690_v63 = vmax.bf16 %v10309_v50, %v306_v57  ;;  %v9912_v57 = vld [vmem:[#allocation5 + $0x394] ss:$8 sps:$4 sm:$0xff]  }
 0x197   : > { %6747 = vmatprep.mubr.bf16.mxu0 %v8234_v60  ;;  %v312_v59 = vld [vmem:[%s10501_s30 + $0x2e0] sm:$0xff]  ;;  %v9876_v60 = vld [vmem:[#allocation5 + $0x334] ss:$8 sps:$4 sm:$0xff]   ;;  %v684_v0 = vmax.bf16 %v10309_v50, %v300_v58 }
 0x198   : > { %v696_v1 = vmax.bf16 %v10309_v50, %v312_v59  ;;  %v7959_v26 = vcombine.low %v678_v62, %v690_v63  ;;  %v9915_v58 = vld [vmem:[#allocation5 + $0x994] ss:$8 sps:$4 sm:$0xff]  }
 0x19a   : > { %v7972_v9 = vcombine.high %v684_v0, %v696_v1  ;;  %v7971_v27 = vcombine.low %v684_v0, %v696_v1  ;;  %v9913_v0 = vld [vmem:[#allocation5 + $0x990] ss:$8 sps:$4 sm:$0xff]   ;;  %v9918_v1 = vld [vmem:[#allocation5 + $0x3a4] ss:$8 sps:$4 sm:$0xff]  }
 0x19d   : > { %5590 = vmatmul.mubr.bf16.gmra.mrb[56].mxu1 %v8221_v5  ;;  %v9885_v5 = vld [vmem:[#allocation5 + $0x944] ss:$8 sps:$4 sm:$0xff]  }
 0x19e   : > { %6748 = vmatmul.mubr.bf16.gmra.mrb[56].mxu0 %v8233_v6  ;;  %5599 = vmatprep.mubr.bf16.mxu1 %v8246_v7  ;;  %v7935_v6 = vcombine.low %v654_v41, %v666_v44  ;;  %v7947_v7 = vcombine.low %v660_v45, %v672_v46  ;;  %v744_v41 = vmax.bf16 %v10309_v50, %v360_v33  ;;  %v9906_v44 = vld [vmem:[#allocation5 + $0x384] ss:$8 sps:$4 sm:$0xff]   ;;  %v9936_v33 = vld [vmem:[#allocation5 + $0x3d4] ss:$8 sps:$4 sm:$0xff]  }
 0x19f   : > { %6757 = vmatprep.mubr.bf16.mxu0 %v8258_v8  ;;  %v7960_v8 = vcombine.high %v678_v62, %v690_v63  ;;  %v9909_v45 = vld [vmem:[#allocation5 + $0x984] ss:$8 sps:$4 sm:$0xff]   ;;  %v9910_v63 = vld [vmem:[#allocation5 + $0x390] ss:$8 sps:$4 sm:$0xff]  }
 0x1a5   : > { %5600 = vmatmul.mubr.bf16.gmra.mrb[60].mxu1 %v8245_v17  ;;  %v9891_v17 = vld [vmem:[#allocation5 + $0x954] ss:$8 sps:$4 sm:$0xff]  }
 0x1a6   : > { %6758 = vmatmul.mubr.bf16.gmra.mrb[60].mxu0 %v8257_v18  ;;  %5642 = vmatprep.mubr.bf16.mxu1 %v7888_v19  ;;  %v702_v18 = vmax.bf16 %v10309_v50, %v318_v10  ;;  %v714_v19 = vmax.bf16 %v10309_v50, %v330_v11  ;;  %v408_v10 = vld [vmem:[%s10501_s30 + $0x5e0] sm:$0xff] }
 0x1a7   : > { %6800 = vmatprep.mubr.bf16.mxu0 %v7900_v20  ;;  %v708_v20 = vmax.bf16 %v10309_v50, %v324_v12  ;;  %v9916_v11 = vld [vmem:[#allocation5 + $0x3a0] ss:$8 sps:$4 sm:$0xff]  }
 0x1a8   : > { %v7984_v28 = vcombine.high %v702_v18, %v714_v19  ;;  %v7983_v46 = vcombine.low %v702_v18, %v714_v19  ;;  %v9919_v12 = vld [vmem:[#allocation5 + $0x9a0] ss:$8 sps:$4 sm:$0xff]   ;;  %v792_v18 = vmax.bf16 %v10309_v50, %v408_v10  ;;  %v9922_v19 = vld [vmem:[#allocation5 + $0x3b0] ss:$8 sps:$4 sm:$0xff]  }
 0x1ad   : > { %5643 = vmatmul.mubr.bf16.vlgmr.msra.gmra.mrb[0].mxu1 %v7887_v29  ;;  %v7996_v29 = vcombine.high %v708_v20, %v720_v21 }
 0x1ae   : > { %6801 = vmatmul.mubr.bf16.vlgmr.msra.gmra.mrb[0].mxu0 %v7899_v30  ;;  %5804 = vmatpush1.bf16.msra.mxu1 %v9856_v31  ;;  %v342_v30 = vld [vmem:[%s10501_s30 + $0x3d0] sm:$0xff] }
 0x1af   : > { %6962 = vmatpush1.bf16.msra.mxu0 %v9859_v32  ;;  %5652 = vmatprep.mubr.bf16.mxu1 %v7912_v34  ;;  %v354_v31 = vld [vmem:[%s10501_s30 + $0x430] sm:$0xff]  ;;  %v348_v32 = vld [vmem:[%s10501_s30 + $0x400] sm:$0xff]  ;;  %v726_v38 = vmax.bf16 %v10309_v50, %v342_v30 }
 0x1b0   : > { %6810 = vmatprep.mubr.bf16.mxu0 %v7924_v35  ;;  %5805 = vmatprep.subr.bf16.mxu1 %v9864_v39  ;;  %v9892_v34 = vld [vmem:[#allocation5 + $0x360] ss:$8 sps:$4 sm:$0xff]   ;;  %v738_v39 = vmax.bf16 %v10309_v50, %v354_v31 }
 0x1b1   : > { %6963 = vmatprep.subr.bf16.mxu0 %v9867_v40  ;;  %v9895_v35 = vld [vmem:[#allocation5 + $0x960] ss:$8 sps:$4 sm:$0xff]   ;;  %v732_v40 = vmax.bf16 %v10309_v50, %v348_v32 }
 0x1b2   : > { %5806 = vmatpush1.bf16.msra.mxu1 %v9862_v42  ;;  %v9898_v42 = vld [vmem:[#allocation5 + $0x370] ss:$8 sps:$4 sm:$0xff]   ;;  %v432_v30 = vld [vmem:[%s10501_s30 + $0x6a0] sm:$0xff] }
 0x1b3   : > { %6964 = vmatpush1.bf16.msra.mxu0 %v9865_v43  ;;  %5807 = vmatprep.subr.bf16.mxu1 %v9870_v47  ;;  %v9901_v43 = vld [vmem:[#allocation5 + $0x970] ss:$8 sps:$4 sm:$0xff]   ;;  %v7995_v47 = vcombine.low %v708_v20, %v720_v21  ;;  %v9930_v21 = vld [vmem:[#allocation5 + $0x3c4] ss:$8 sps:$4 sm:$0xff]   ;;  %v9928_v31 = vld [vmem:[#allocation5 + $0x3c0] ss:$8 sps:$4 sm:$0xff]  }
 0x1b4   : > { %6965 = vmatprep.subr.bf16.mxu0 %v9873_v48  ;;  %v8008_v48 = vcombine.high %v726_v38, %v738_v39  ;;  %v9925_v20 = vld [vmem:[#allocation5 + $0x9b0] ss:$8 sps:$4 sm:$0xff]   ;;  %v9931_v32 = vld [vmem:[#allocation5 + $0x9c0] ss:$8 sps:$4 sm:$0xff]  }
 0x1b5   : > { %5653 = vmatmul.mubr.bf16.gmra.mrb[4].mxu1 %v7911_v49  ;;  %v8020_v49 = vcombine.high %v732_v40, %v744_v41 }
 0x1b6   : > { %6811 = vmatmul.mubr.bf16.gmra.mrb[4].mxu0 %v7923_v51  ;;  %5662 = vmatprep.mubr.bf16.mxu1 %v7936_v52  ;;  %v366_v51 = vld [vmem:[%s10501_s30 + $0x490] sm:$0xff] }
 0x1b7   : > { %6820 = vmatprep.mubr.bf16.mxu0 %v7948_v53  ;;  %5808 = vmatpush1.bf16.msra.mxu1 %v9868_v54  ;;  %v378_v52 = vld [vmem:[%s10501_s30 + $0x4f0] sm:$0xff]  ;;  %v372_v53 = vld [vmem:[%s10501_s30 + $0x4c0] sm:$0xff]  ;;  %v750_v59 = vmax.bf16 %v10309_v50, %v366_v51 }
 0x1b8   : > { %6966 = vmatpush1.bf16.msra.mxu0 %v9871_v55  ;;  %5809 = vmatprep.subr.bf16.mxu1 %v9876_v60  ;;  %v384_v54 = vld [vmem:[%s10501_s30 + $0x520] sm:$0xff]  ;;  %v762_v60 = vmax.bf16 %v10309_v50, %v378_v52 }
 0x1b9   : > { %6967 = vmatprep.subr.bf16.mxu0 %v9879_v61  ;;  %v9904_v55 = vld [vmem:[#allocation5 + $0x380] ss:$8 sps:$4 sm:$0xff]   ;;  %v756_v61 = vmax.bf16 %v10309_v50, %v372_v53  ;;  %v768_v62 = vmax.bf16 %v10309_v50, %v384_v54  ;;  %v9948_v54 = vld [vmem:[#allocation5 + $0x3f4] ss:$8 sps:$4 sm:$0xff]  }
 0x1ba   : > { %v456_v51 = vld [vmem:[%s10501_s30 + $0x760] sm:$0xff] }
 0x1bb   : > { %5810 = vmatpush1.bf16.msra.mxu1 %v9874_v2  ;;  %v9921_v2 = vld [vmem:[#allocation5 + $0x9a4] ss:$8 sps:$4 sm:$0xff]   ;;  %v9940_v52 = vld [vmem:[#allocation5 + $0x3e0] ss:$8 sps:$4 sm:$0xff]  }
 0x1bc   : > { %6968 = vmatpush1.bf16.msra.mxu0 %v9877_v3  ;;  %5811 = vmatprep.subr.bf16.mxu1 %v9882_v4  ;;  %v8007_v3 = vcombine.low %v726_v38, %v738_v39  ;;  %v8019_v4 = vcombine.low %v732_v40, %v744_v41  ;;  %v816_v38 = vmax.bf16 %v10309_v50, %v432_v30  ;;  %v9934_v39 = vld [vmem:[#allocation5 + $0x3d0] ss:$8 sps:$4 sm:$0xff]   ;;  %v9942_v41 = vld [vmem:[#allocation5 + $0x3e4] ss:$8 sps:$4 sm:$0xff]   ;;  %v9943_v53 = vld [vmem:[#allocation5 + $0x9e0] ss:$8 sps:$4 sm:$0xff]  }
 0x1bd   : > { %6969 = vmatprep.subr.bf16.mxu0 %v9885_v5  ;;  %5663 = vmatmul.mubr.bf16.gmra.mrb[8].mxu1 %v7935_v6  ;;  %v8032_v5 = vcombine.high %v750_v59, %v762_v60  ;;  %v8044_v6 = vcombine.high %v756_v61, %v768_v62  ;;  %v9937_v40 = vld [vmem:[#allocation5 + $0x9d0] ss:$8 sps:$4 sm:$0xff]   ;;  %v516_v30 = vld [vmem:[%s10501_s30 + $0x940] sm:$0xff] }
 0x1be   : > { %6821 = vmatmul.mubr.bf16.gmra.mrb[8].mxu0 %v7947_v7  ;;  %5672 = vmatprep.mubr.bf16.mxu1 %v7960_v8  ;;  %v390_v7 = vld [vmem:[%s10501_s30 + $0x550] sm:$0xff] }
 0x1bf   : > { %6830 = vmatprep.mubr.bf16.mxu0 %v7972_v9  ;;  %5812 = vmatpush1.bf16.msra.mxu1 %v9880_v14  ;;  %v402_v8 = vld [vmem:[%s10501_s30 + $0x5b0] sm:$0xff]  ;;  %v396_v9 = vld [vmem:[%s10501_s30 + $0x580] sm:$0xff] }
 0x1c0   : > { %6970 = vmatpush1.bf16.msra.mxu0 %v9883_v15  ;;  %5813 = vmatprep.subr.bf16.mxu1 %v9888_v16  ;;  %v9927_v14 = vld [vmem:[#allocation5 + $0x9b4] ss:$8 sps:$4 sm:$0xff]   ;;  %v774_v15 = vmax.bf16 %v10309_v50, %v390_v7  ;;  %v786_v16 = vmax.bf16 %v10309_v50, %v402_v8  ;;  %v480_v7 = vld [vmem:[%s10501_s30 + $0x820] sm:$0xff] }
 0x1c1   : > { %6971 = vmatprep.subr.bf16.mxu0 %v9891_v17  ;;  %v780_v17 = vmax.bf16 %v10309_v50, %v396_v9 }
 0x1c3   : > { %5814 = vmatpush1.bf16.msra.mxu1 %v9886_v22  ;;  %v9933_v22 = vld [vmem:[#allocation5 + $0x9c4] ss:$8 sps:$4 sm:$0xff]  }
 0x1c4   : > { %6972 = vmatpush1.bf16.msra.mxu0 %v9889_v23  ;;  %5815 = vmatprep.subr.bf16.mxu1 %v9894_v24  ;;  %v8031_v23 = vcombine.low %v750_v59, %v762_v60  ;;  %v8043_v24 = vcombine.low %v756_v61, %v768_v62  ;;  %v840_v59 = vmax.bf16 %v10309_v50, %v456_v51  ;;  %v9946_v60 = vld [vmem:[#allocation5 + $0x3f0] ss:$8 sps:$4 sm:$0xff]   ;;  %v9954_v62 = vld [vmem:[#allocation5 + $0x404] ss:$8 sps:$4 sm:$0xff]  }
 0x1c5   : > { %6973 = vmatprep.subr.bf16.mxu0 %v9897_v25  ;;  %5673 = vmatmul.mubr.bf16.gmra.mrb[12].mxu1 %v7959_v26  ;;  %v8056_v25 = vcombine.high %v774_v15, %v786_v16  ;;  %v8068_v26 = vcombine.high %v780_v17, %v792_v18  ;;  %v9949_v61 = vld [vmem:[#allocation5 + $0x9f0] ss:$8 sps:$4 sm:$0xff]  }
 0x1c6   : > { %6831 = vmatmul.mubr.bf16.gmra.mrb[12].mxu0 %v7971_v27  ;;  %5682 = vmatprep.mubr.bf16.mxu1 %v7984_v28  ;;  %v414_v27 = vld [vmem:[%s10501_s30 + $0x610] sm:$0xff] }
 0x1c7   : > { %6840 = vmatprep.mubr.bf16.mxu0 %v7996_v29  ;;  %5816 = vmatpush1.bf16.msra.mxu1 %v9892_v34  ;;  %v426_v28 = vld [vmem:[%s10501_s30 + $0x670] sm:$0xff]  ;;  %v420_v29 = vld [vmem:[%s10501_s30 + $0x640] sm:$0xff] }
 0x1c8   : > { %6974 = vmatpush1.bf16.msra.mxu0 %v9895_v35  ;;  %5817 = vmatprep.subr.bf16.mxu1 %v9900_v36  ;;  %v9939_v34 = vld [vmem:[#allocation5 + $0x9d4] ss:$8 sps:$4 sm:$0xff]   ;;  %v798_v35 = vmax.bf16 %v10309_v50, %v414_v27  ;;  %v810_v36 = vmax.bf16 %v10309_v50, %v426_v28 }
 0x1c9   : > { %6975 = vmatprep.subr.bf16.mxu0 %v9903_v37  ;;  %v804_v37 = vmax.bf16 %v10309_v50, %v420_v29  ;;  %v510_v28 = vld [vmem:[%s10501_s30 + $0x910] sm:$0xff] }
 0x1ca   : > { %v522_v29 = vld [vmem:[%s10501_s30 + $0x970] sm:$0xff] }
 0x1cb   : > { %5818 = vmatpush1.bf16.msra.mxu1 %v9898_v42  ;;  %v9945_v42 = vld [vmem:[#allocation5 + $0x9e4] ss:$8 sps:$4 sm:$0xff]  }
 0x1cc   : > { %6976 = vmatpush1.bf16.msra.mxu0 %v9901_v43  ;;  %5819 = vmatprep.subr.bf16.mxu1 %v9906_v44  ;;  %v8055_v43 = vcombine.low %v774_v15, %v786_v16  ;;  %v8067_v44 = vcombine.low %v780_v17, %v792_v18  ;;  %v486_v16 = vld [vmem:[%s10501_s30 + $0x850] sm:$0xff]  ;;  %v492_v18 = vld [vmem:[%s10501_s30 + $0x880] sm:$0xff] }
 0x1cd   : > { %6977 = vmatprep.subr.bf16.mxu0 %v9909_v45  ;;  %5683 = vmatmul.mubr.bf16.gmra.mrb[16].mxu1 %v7983_v46  ;;  %v8080_v45 = vcombine.high %v798_v35, %v810_v36  ;;  %v8092_v46 = vcombine.high %v804_v37, %v816_v38  ;;  %v498_v17 = vld [vmem:[%s10501_s30 + $0x8b0] sm:$0xff] }
 0x1ce   : > { %6841 = vmatmul.mubr.bf16.gmra.mrb[16].mxu0 %v7995_v47  ;;  %5692 = vmatprep.mubr.bf16.mxu1 %v8008_v48  ;;  %v438_v47 = vld [vmem:[%s10501_s30 + $0x6d0] sm:$0xff] }
 0x1cf   : > { %6850 = vmatprep.mubr.bf16.mxu0 %v8020_v49  ;;  %5820 = vmatpush1.bf16.msra.mxu1 %v9904_v55  ;;  %v450_v48 = vld [vmem:[%s10501_s30 + $0x730] sm:$0xff]  ;;  %v444_v49 = vld [vmem:[%s10501_s30 + $0x700] sm:$0xff] }
 0x1d0   : > { %6978 = vmatpush1.bf16.msra.mxu0 %v9907_v56  ;;  %5821 = vmatprep.subr.bf16.mxu1 %v9912_v57  ;;  %v9951_v55 = vld [vmem:[#allocation5 + $0x9f4] ss:$8 sps:$4 sm:$0xff]   ;;  %v822_v56 = vmax.bf16 %v10309_v50, %v438_v47  ;;  %v834_v57 = vmax.bf16 %v10309_v50, %v450_v48 }
 0x1d1   : > { %6979 = vmatprep.subr.bf16.mxu0 %v9915_v58  ;;  %v828_v58 = vmax.bf16 %v10309_v50, %v444_v49 }
 0x1d3   : > { %5822 = vmatpush1.bf16.msra.mxu1 %v9910_v63  ;;  %v9957_v63 = vld [vmem:[#allocation5 + $0xa04] ss:$8 sps:$4 sm:$0xff]  }
 0x1d4   : > { %6980 = vmatpush1.bf16.msra.mxu0 %v9913_v0  ;;  %5823 = vmatprep.subr.bf16.mxu1 %v9918_v1  ;;  %v8079_v0 = vcombine.low %v798_v35, %v810_v36  ;;  %v8091_v1 = vcombine.low %v804_v37, %v816_v38 }
 0x1d5   : > { %6981 = vmatprep.subr.bf16.mxu0 %v9921_v2  ;;  %5693 = vmatmul.mubr.bf16.gmra.mrb[20].mxu1 %v8007_v3  ;;  %v8104_v2 = vcombine.high %v822_v56, %v834_v57  ;;  %v8116_v3 = vcombine.high %v828_v58, %v840_v59 }
 0x1d6   : > { %6851 = vmatmul.mubr.bf16.gmra.mrb[20].mxu0 %v8019_v4  ;;  %5702 = vmatprep.mubr.bf16.mxu1 %v8032_v5  ;;  %v462_v4 = vld [vmem:[%s10501_s30 + $0x790] sm:$0xff] }
 0x1d7   : > { %6860 = vmatprep.mubr.bf16.mxu0 %v8044_v6  ;;  %5824 = vmatpush1.bf16.msra.mxu1 %v9916_v11  ;;  %v474_v5 = vld [vmem:[%s10501_s30 + $0x7f0] sm:$0xff]  ;;  %v468_v6 = vld [vmem:[%s10501_s30 + $0x7c0] sm:$0xff]  ;;  %v846_v8 = vmax.bf16 %v10309_v50, %v462_v4  ;;  %v864_v11 = vmax.bf16 %v10309_v50, %v480_v7 }
 0x1d8   : > { %6982 = vmatpush1.bf16.msra.mxu0 %v9919_v12  ;;  %5825 = vmatprep.subr.bf16.mxu1 %v9924_v13  ;;  %v858_v9 = vmax.bf16 %v10309_v50, %v474_v5  ;;  %v852_v10 = vmax.bf16 %v10309_v50, %v468_v6  ;;  %v8103_v12 = vcombine.low %v822_v56, %v834_v57  ;;  %v576_v56 = vld [vmem:[%s10501_s30 + $0xb20] sm:$0xff] }
 0x1d9   : > { %6983 = vmatprep.subr.bf16.mxu0 %v9927_v14  ;;  %v8115_v13 = vcombine.low %v828_v58, %v840_v59  ;;  %v600_v4 = vld [vmem:[%s10501_s30 + $0xbe0] sm:$0xff] }
 0x1da   : > { %v8128_v14 = vcombine.high %v846_v8, %v858_v9  ;;  %v8140_v15 = vcombine.high %v852_v10, %v864_v11 }
 0x1db   : > { %5826 = vmatpush1.bf16.msra.mxu1 %v9922_v19  ;;  %v504_v19 = vld [vmem:[%s10501_s30 + $0x8e0] sm:$0xff] }
 0x1dc   : > { %6984 = vmatpush1.bf16.msra.mxu0 %v9925_v20  ;;  %5827 = vmatprep.subr.bf16.mxu1 %v9930_v21  ;;  %v870_v20 = vmax.bf16 %v10309_v50, %v486_v16  ;;  %v882_v21 = vmax.bf16 %v10309_v50, %v498_v17  ;;  %v241_v16 = vld [vmem:[%s10501_s30 + $0xa8] sm:$0xff] }
 0x1dd   : > { %6985 = vmatprep.subr.bf16.mxu0 %v9933_v22  ;;  %5703 = vmatmul.mubr.bf16.gmra.mrb[24].mxu1 %v8031_v23  ;;  %v876_v22 = vmax.bf16 %v10309_v50, %v492_v18  ;;  %v888_v23 = vmax.bf16 %v10309_v50, %v504_v19 }
 0x1de   : > { %6861 = vmatmul.mubr.bf16.gmra.mrb[24].mxu0 %v8043_v24  ;;  %5712 = vmatprep.mubr.bf16.mxu1 %v8056_v25  ;;  %v8127_v24 = vcombine.low %v846_v8, %v858_v9  ;;  %v8139_v25 = vcombine.low %v852_v10, %v864_v11  ;;  %v8151_v36 = vcombine.low %v870_v20, %v882_v21 }
 0x1df   : > { %6870 = vmatprep.mubr.bf16.mxu0 %v8068_v26  ;;  %5828 = vmatpush1.bf16.msra.mxu1 %v9928_v31  ;;  %v8152_v26 = vcombine.high %v870_v20, %v882_v21  ;;  %v8164_v27 = vcombine.high %v876_v22, %v888_v23  ;;  %v528_v31 = vld [vmem:[%s10501_s30 + $0x9a0] sm:$0xff]  ;;  %v8163_v37 = vcombine.low %v876_v22, %v888_v23 }
 0x1e0   : > { %6986 = vmatpush1.bf16.msra.mxu0 %v9931_v32  ;;  %5829 = vmatprep.subr.bf16.mxu1 %v9936_v33  ;;  %v894_v32 = vmax.bf16 %v10309_v50, %v510_v28  ;;  %v906_v33 = vmax.bf16 %v10309_v50, %v522_v29  ;;  %v912_v35 = vmax.bf16 %v10309_v50, %v528_v31  ;;  %v265_v28 = vld [vmem:[%s10501_s30 + $0x168] sm:$0xff] }
 0x1e1   : > { %6987 = vmatprep.subr.bf16.mxu0 %v9939_v34  ;;  %v900_v34 = vmax.bf16 %v10309_v50, %v516_v30  ;;  %v984_v8 = vmax.bf16 %v10309_v50, %v600_v4  ;;  %v625_v20 = vmax.bf16 %v10309_v50, %v241_v16  ;;  %v325_v16 = vld [vmem:[%s10501_s30 + $0x348] sm:$0xff] }
 0x1e2   : > { %v8176_v38 = vcombine.high %v894_v32, %v906_v33  ;;  %v8175_v48 = vcombine.low %v894_v32, %v906_v33  ;;  %v649_v32 = vmax.bf16 %v10309_v50, %v265_v28  ;;  %v9990_v28 = vld [vmem:[#allocation5 + $0x464] ss:$8 sps:$4 sm:$0xff]  }
 0x1e3   : > { %5830 = vmatpush1.bf16.msra.mxu1 %v9934_v39  ;;  %v8188_v39 = vcombine.high %v900_v34, %v912_v35  ;;  %v8187_v49 = vcombine.low %v900_v34, %v912_v35  ;;  %v9952_v35 = vld [vmem:[#allocation5 + $0x400] ss:$8 sps:$4 sm:$0xff]  }
 0x1e4   : > { %6988 = vmatpush1.bf16.msra.mxu0 %v9937_v40  ;;  %5831 = vmatprep.subr.bf16.mxu1 %v9942_v41  ;;  %v534_v40 = vld [vmem:[%s10501_s30 + $0x9d0] sm:$0xff] }
 0x1e5   : > { %6989 = vmatprep.subr.bf16.mxu0 %v9945_v42  ;;  %5713 = vmatmul.mubr.bf16.gmra.mrb[28].mxu1 %v8055_v43  ;;  %v546_v41 = vld [vmem:[%s10501_s30 + $0xa30] sm:$0xff]  ;;  %v540_v42 = vld [vmem:[%s10501_s30 + $0xa00] sm:$0xff] }
 0x1e6   : > { %6871 = vmatmul.mubr.bf16.gmra.mrb[28].mxu0 %v8067_v44  ;;  %5722 = vmatprep.mubr.bf16.mxu1 %v8080_v45  ;;  %v552_v43 = vld [vmem:[%s10501_s30 + $0xa60] sm:$0xff]  ;;  %v918_v44 = vmax.bf16 %v10309_v50, %v534_v40  ;;  %v930_v45 = vmax.bf16 %v10309_v50, %v546_v41  ;;  %v283_v40 = vld [vmem:[%s10501_s30 + $0x1f8] sm:$0xff]  ;;  %v277_v41 = vld [vmem:[%s10501_s30 + $0x1c8] sm:$0xff] }
 0x1e7   : > { %6880 = vmatprep.mubr.bf16.mxu0 %v8092_v46  ;;  %5832 = vmatpush1.bf16.msra.mxu1 %v9940_v52  ;;  %v924_v46 = vmax.bf16 %v10309_v50, %v540_v42  ;;  %v936_v47 = vmax.bf16 %v10309_v50, %v552_v43  ;;  %v289_v42 = vld [vmem:[%s10501_s30 + $0x228] sm:$0xff]  ;;  %v9960_v43 = vld [vmem:[#allocation5 + $0x414] ss:$8 sps:$4 sm:$0xff]  }
 0x1e8   : > { %6990 = vmatpush1.bf16.msra.mxu0 %v9943_v53  ;;  %5833 = vmatprep.subr.bf16.mxu1 %v9948_v54  ;;  %v8200_v51 = vcombine.high %v918_v44, %v930_v45  ;;  %v558_v53 = vld [vmem:[%s10501_s30 + $0xa90] sm:$0xff] }
 0x1e9   : > { %6991 = vmatprep.subr.bf16.mxu0 %v9951_v55  ;;  %v8212_v52 = vcombine.high %v924_v46, %v936_v47  ;;  %v570_v54 = vld [vmem:[%s10501_s30 + $0xaf0] sm:$0xff]  ;;  %v564_v55 = vld [vmem:[%s10501_s30 + $0xac0] sm:$0xff]  ;;  %v942_v57 = vmax.bf16 %v10309_v50, %v558_v53 }
 0x1ea   : > { %v954_v58 = vmax.bf16 %v10309_v50, %v570_v54  ;;  %v948_v59 = vmax.bf16 %v10309_v50, %v564_v55  ;;  %v9969_v53 = vld [vmem:[#allocation5 + $0xa24] ss:$8 sps:$4 sm:$0xff]  }
 0x1eb   : > { %5834 = vmatpush1.bf16.msra.mxu1 %v9946_v60  ;;  %v960_v60 = vmax.bf16 %v10309_v50, %v576_v56 }
 0x1ec   : > { %6992 = vmatpush1.bf16.msra.mxu0 %v9949_v61  ;;  %5996 = vmatprep.subr.bf16.mxu1 %v9954_v62  ;;  %v8199_v61 = vcombine.low %v918_v44, %v930_v45  ;;  %v8211_v62 = vcombine.low %v924_v46, %v936_v47  ;;  %v8223_v9 = vcombine.low %v942_v57, %v954_v58  ;;  %v9963_v44 = vld [vmem:[#allocation5 + $0xa14] ss:$8 sps:$4 sm:$0xff]   ;;  %v9958_v46 = vld [vmem:[#allocation5 + $0x410] ss:$8 sps:$4 sm:$0xff]  }
 0x1ed   : > { %7154 = vmatprep.subr.bf16.mxu0 %v9957_v63  ;;  %5723 = vmatmul.mubr.bf16.gmra.mrb[32].mxu1 %v8079_v0  ;;  %v8224_v63 = vcombine.high %v942_v57, %v954_v58  ;;  %v8236_v0 = vcombine.high %v948_v59, %v960_v60  ;;  %v8235_v10 = vcombine.low %v948_v59, %v960_v60  ;;  %v9961_v47 = vld [vmem:[#allocation5 + $0xa10] ss:$8 sps:$4 sm:$0xff]   ;;  %v9964_v58 = vld [vmem:[#allocation5 + $0x420] ss:$8 sps:$4 sm:$0xff]  }
 0x1ee   : > { %6881 = vmatmul.mubr.bf16.gmra.mrb[32].mxu0 %v8091_v1  ;;  %5732 = vmatprep.mubr.bf16.mxu1 %v8104_v2  ;;  %v582_v1 = vld [vmem:[%s10501_s30 + $0xb50] sm:$0xff]  ;;  %v9967_v59 = vld [vmem:[#allocation5 + $0xa20] ss:$8 sps:$4 sm:$0xff]   ;;  %v295_v60 = vld [vmem:[%s10501_s30 + $0x258] sm:$0xff] }
 0x1ef   : > { %6890 = vmatprep.mubr.bf16.mxu0 %v8116_v3  ;;  %v594_v2 = vld [vmem:[%s10501_s30 + $0xbb0] sm:$0xff]  ;;  %v588_v3 = vld [vmem:[%s10501_s30 + $0xb80] sm:$0xff]  ;;  %v966_v5 = vmax.bf16 %v10309_v50, %v582_v1 }
 0x1f0   : > { %v978_v6 = vmax.bf16 %v10309_v50, %v594_v2  ;;  %v972_v7 = vmax.bf16 %v10309_v50, %v588_v3  ;;  %v9975_v1 = vld [vmem:[#allocation5 + $0xa34] ss:$8 sps:$4 sm:$0xff]   ;;  %v679_v2 = vmax.bf16 %v10309_v50, %v295_v60  ;;  %v10003_v60 = vld [vmem:[#allocation5 + $0xa80] ss:$8 sps:$4 sm:$0xff]  }
 0x1f2   : > { %v8248_v11 = vcombine.high %v966_v5, %v978_v6  ;;  %v8247_v21 = vcombine.low %v966_v5, %v978_v6  ;;  %v8259_v22 = vcombine.low %v972_v7, %v984_v8  ;;  %v9970_v6 = vld [vmem:[#allocation5 + $0x430] ss:$8 sps:$4 sm:$0xff]  }
 0x1f5   : > { %5733 = vmatmul.mubr.bf16.gmra.mrb[36].mxu1 %v8103_v12  ;;  %v8260_v12 = vcombine.high %v972_v7, %v984_v8  ;;  %v9973_v7 = vld [vmem:[#allocation5 + $0xa30] ss:$8 sps:$4 sm:$0xff]   ;;  %v9978_v8 = vld [vmem:[#allocation5 + $0x444] ss:$8 sps:$4 sm:$0xff]  }
 0x1f6   : > { %6891 = vmatmul.mubr.bf16.gmra.mrb[36].mxu0 %v8115_v13  ;;  %5742 = vmatprep.mubr.bf16.mxu1 %v8128_v14  ;;  %v223_v13 = vld [vmem:[%s10501_s30 + $0x18] sm:$0xff] }
 0x1f7   : > { %6900 = vmatprep.mubr.bf16.mxu0 %v8140_v15  ;;  %v235_v14 = vld [vmem:[%s10501_s30 + $0x78] sm:$0xff]  ;;  %v229_v15 = vld [vmem:[%s10501_s30 + $0x48] sm:$0xff]  ;;  %v607_v17 = vmax.bf16 %v10309_v50, %v223_v13 }
 0x1f8   : > { %v619_v18 = vmax.bf16 %v10309_v50, %v235_v14  ;;  %v613_v19 = vmax.bf16 %v10309_v50, %v229_v15  ;;  %v319_v14 = vld [vmem:[%s10501_s30 + $0x318] sm:$0xff] }
 0x1f9   : > { %v331_v15 = vld [vmem:[%s10501_s30 + $0x378] sm:$0xff] }
 0x1fa   : > { %v7890_v23 = vcombine.high %v607_v17, %v619_v18  ;;  %v7889_v33 = vcombine.low %v607_v17, %v619_v18  ;;  %v7901_v34 = vcombine.low %v613_v19, %v625_v20  ;;  %v337_v17 = vld [vmem:[%s10501_s30 + $0x3a8] sm:$0xff] }
 0x1fb   : > { %v9976_v18 = vld [vmem:[#allocation5 + $0x440] ss:$8 sps:$4 sm:$0xff]  }
 0x1fd   : > { %5743 = vmatmul.mubr.bf16.gmra.mrb[40].mxu1 %v8127_v24  ;;  %v7902_v24 = vcombine.high %v613_v19, %v625_v20  ;;  %v9979_v19 = vld [vmem:[#allocation5 + $0xa40] ss:$8 sps:$4 sm:$0xff]   ;;  %v9984_v20 = vld [vmem:[#allocation5 + $0x454] ss:$8 sps:$4 sm:$0xff]  }
 0x1fe   : > { %6901 = vmatmul.mubr.bf16.gmra.mrb[40].mxu0 %v8139_v25  ;;  %5752 = vmatprep.mubr.bf16.mxu1 %v8152_v26  ;;  %v247_v25 = vld [vmem:[%s10501_s30 + $0xd8] sm:$0xff] }
 0x1ff   : > { %6910 = vmatprep.mubr.bf16.mxu0 %v8164_v27  ;;  %v259_v26 = vld [vmem:[%s10501_s30 + $0x138] sm:$0xff]  ;;  %v253_v27 = vld [vmem:[%s10501_s30 + $0x108] sm:$0xff]  ;;  %v631_v29 = vmax.bf16 %v10309_v50, %v247_v25  ;;  %v721_v25 = vmax.bf16 %v10309_v50, %v337_v17 }
 0x200   : > { %v643_v30 = vmax.bf16 %v10309_v50, %v259_v26  ;;  %v637_v31 = vmax.bf16 %v10309_v50, %v253_v27  ;;  %v9982_v26 = vld [vmem:[#allocation5 + $0x450] ss:$8 sps:$4 sm:$0xff]   ;;  %v10020_v17 = vld [vmem:[#allocation5 + $0x4b4] ss:$8 sps:$4 sm:$0xff]  }
 0x201   : > { %v9985_v27 = vld [vmem:[#allocation5 + $0xa50] ss:$8 sps:$4 sm:$0xff]  }
 0x202   : > { %v7913_v54 = vcombine.low %v631_v29, %v643_v30  ;;  %v7925_v55 = vcombine.low %v637_v31, %v649_v32 }
 0x205   : > { %5753 = vmatmul.mubr.bf16.gmra.mrb[44].mxu1 %v8151_v36  ;;  %v9955_v36 = vld [vmem:[#allocation5 + $0xa00] ss:$8 sps:$4 sm:$0xff]  }
 0x206   : > { %6911 = vmatmul.mubr.bf16.gmra.mrb[44].mxu0 %v8163_v37  ;;  %5762 = vmatprep.mubr.bf16.mxu1 %v8176_v38  ;;  %v271_v37 = vld [vmem:[%s10501_s30 + $0x198] sm:$0xff]  ;;  %v7914_v38 = vcombine.high %v631_v29, %v643_v30  ;;  %v9993_v29 = vld [vmem:[#allocation5 + $0xa64] ss:$8 sps:$4 sm:$0xff]  }
 0x207   : > { %6920 = vmatprep.mubr.bf16.mxu0 %v8188_v39  ;;  %v7926_v39 = vcombine.high %v637_v31, %v649_v32  ;;  %v655_v45 = vmax.bf16 %v10309_v50, %v271_v37  ;;  %v361_v37 = vld [vmem:[%s10501_s30 + $0x468] sm:$0xff] }
 0x20d   : > { %5763 = vmatmul.mubr.bf16.gmra.mrb[48].mxu1 %v8175_v48  ;;  %v667_v48 = vmax.bf16 %v10309_v50, %v283_v40  ;;  %v9996_v40 = vld [vmem:[#allocation5 + $0x474] ss:$8 sps:$4 sm:$0xff]  }
 0x20e   : > { %6921 = vmatmul.mubr.bf16.gmra.mrb[48].mxu0 %v8187_v49  ;;  %5772 = vmatprep.mubr.bf16.mxu1 %v8200_v51  ;;  %v661_v49 = vmax.bf16 %v10309_v50, %v277_v41  ;;  %v673_v51 = vmax.bf16 %v10309_v50, %v289_v42  ;;  %v9999_v41 = vld [vmem:[#allocation5 + $0xa74] ss:$8 sps:$4 sm:$0xff]  }
 0x20f   : > { %6930 = vmatprep.mubr.bf16.mxu0 %v8212_v52  ;;  %v9966_v52 = vld [vmem:[#allocation5 + $0x424] ss:$8 sps:$4 sm:$0xff]   ;;  %v7938_v56 = vcombine.high %v655_v45, %v667_v48 }
 0x210   : > { %v7950_v57 = vcombine.high %v661_v49, %v673_v51 }
 0x215   : > { %5773 = vmatmul.mubr.bf16.gmra.mrb[52].mxu1 %v8199_v61  ;;  %v307_v61 = vld [vmem:[%s10501_s30 + $0x2b8] sm:$0xff] }
 0x216   : > { %6931 = vmatmul.mubr.bf16.gmra.mrb[52].mxu0 %v8211_v62  ;;  %5782 = vmatprep.mubr.bf16.mxu1 %v8224_v63  ;;  %v301_v62 = vld [vmem:[%s10501_s30 + $0x288] sm:$0xff]  ;;  %v691_v3 = vmax.bf16 %v10309_v50, %v307_v61  ;;  %v10008_v61 = vld [vmem:[#allocation5 + $0x494] ss:$8 sps:$4 sm:$0xff]  }
 0x217   : > { %6940 = vmatprep.mubr.bf16.mxu0 %v8236_v0  ;;  %v313_v63 = vld [vmem:[%s10501_s30 + $0x2e8] sm:$0xff]  ;;  %v9972_v0 = vld [vmem:[#allocation5 + $0x434] ss:$8 sps:$4 sm:$0xff]   ;;  %v685_v4 = vmax.bf16 %v10309_v50, %v301_v62 }
 0x218   : > { %v697_v5 = vmax.bf16 %v10309_v50, %v313_v63  ;;  %v7961_v30 = vcombine.low %v679_v2, %v691_v3  ;;  %v10011_v62 = vld [vmem:[#allocation5 + $0xa94] ss:$8 sps:$4 sm:$0xff]  }
 0x21a   : > { %v7974_v13 = vcombine.high %v685_v4, %v697_v5  ;;  %v7973_v31 = vcombine.low %v685_v4, %v697_v5  ;;  %v10009_v4 = vld [vmem:[#allocation5 + $0xa90] ss:$8 sps:$4 sm:$0xff]   ;;  %v10014_v5 = vld [vmem:[#allocation5 + $0x4a4] ss:$8 sps:$4 sm:$0xff]  }
 0x21d   : > { %5783 = vmatmul.mubr.bf16.gmra.mrb[56].mxu1 %v8223_v9  ;;  %v9981_v9 = vld [vmem:[#allocation5 + $0xa44] ss:$8 sps:$4 sm:$0xff]  }
 0x21e   : > { %6941 = vmatmul.mubr.bf16.gmra.mrb[56].mxu0 %v8235_v10  ;;  %5792 = vmatprep.mubr.bf16.mxu1 %v8248_v11  ;;  %v7937_v10 = vcombine.low %v655_v45, %v667_v48  ;;  %v7949_v11 = vcombine.low %v661_v49, %v673_v51  ;;  %v745_v45 = vmax.bf16 %v10309_v50, %v361_v37  ;;  %v10002_v48 = vld [vmem:[#allocation5 + $0x484] ss:$8 sps:$4 sm:$0xff]   ;;  %v10032_v37 = vld [vmem:[#allocation5 + $0x4d4] ss:$8 sps:$4 sm:$0xff]  }
 0x21f   : > { %6950 = vmatprep.mubr.bf16.mxu0 %v8260_v12  ;;  %v7962_v12 = vcombine.high %v679_v2, %v691_v3  ;;  %v10005_v49 = vld [vmem:[#allocation5 + $0xa84] ss:$8 sps:$4 sm:$0xff]   ;;  %v10006_v3 = vld [vmem:[#allocation5 + $0x490] ss:$8 sps:$4 sm:$0xff]  }
 0x225   : > { %5793 = vmatmul.mubr.bf16.gmra.mrb[60].mxu1 %v8247_v21  ;;  %v9987_v21 = vld [vmem:[#allocation5 + $0xa54] ss:$8 sps:$4 sm:$0xff]  }
 0x226   : > { %6951 = vmatmul.mubr.bf16.gmra.mrb[60].mxu0 %v8259_v22  ;;  %5835 = vmatprep.mubr.bf16.mxu1 %v7890_v23  ;;  %v703_v22 = vmax.bf16 %v10309_v50, %v319_v14  ;;  %v715_v23 = vmax.bf16 %v10309_v50, %v331_v15  ;;  %v409_v14 = vld [vmem:[%s10501_s30 + $0x5e8] sm:$0xff] }
 0x227   : > { %6993 = vmatprep.mubr.bf16.mxu0 %v7902_v24  ;;  %v709_v24 = vmax.bf16 %v10309_v50, %v325_v16  ;;  %v10012_v15 = vld [vmem:[#allocation5 + $0x4a0] ss:$8 sps:$4 sm:$0xff]  }
 0x228   : > { %v7986_v32 = vcombine.high %v703_v22, %v715_v23  ;;  %v7985_v51 = vcombine.low %v703_v22, %v715_v23  ;;  %v10015_v16 = vld [vmem:[#allocation5 + $0xaa0] ss:$8 sps:$4 sm:$0xff]   ;;  %v793_v22 = vmax.bf16 %v10309_v50, %v409_v14  ;;  %v10018_v23 = vld [vmem:[#allocation5 + $0x4b0] ss:$8 sps:$4 sm:$0xff]  }
 0x22d   : > { %5836 = vmatmul.mubr.bf16.vlgmr.msra.gmra.mrb[0].mxu1 %v7889_v33  ;;  %v7998_v33 = vcombine.high %v709_v24, %v721_v25 }
 0x22e   : > { %6994 = vmatmul.mubr.bf16.vlgmr.msra.gmra.mrb[0].mxu0 %v7901_v34  ;;  %5997 = vmatpush1.bf16.msra.mxu1 %v9952_v35  ;;  %v343_v34 = vld [vmem:[%s10501_s30 + $0x3d8] sm:$0xff] }
 0x22f   : > { %7155 = vmatpush1.bf16.msra.mxu0 %v9955_v36  ;;  %5845 = vmatprep.mubr.bf16.mxu1 %v7914_v38  ;;  %v355_v35 = vld [vmem:[%s10501_s30 + $0x438] sm:$0xff]  ;;  %v349_v36 = vld [vmem:[%s10501_s30 + $0x408] sm:$0xff]  ;;  %v727_v42 = vmax.bf16 %v10309_v50, %v343_v34 }
 0x230   : > { %7003 = vmatprep.mubr.bf16.mxu0 %v7926_v39  ;;  %5998 = vmatprep.subr.bf16.mxu1 %v9960_v43  ;;  %v9988_v38 = vld [vmem:[#allocation5 + $0x460] ss:$8 sps:$4 sm:$0xff]   ;;  %v739_v43 = vmax.bf16 %v10309_v50, %v355_v35 }
 0x231   : > { %7156 = vmatprep.subr.bf16.mxu0 %v9963_v44  ;;  %v9991_v39 = vld [vmem:[#allocation5 + $0xa60] ss:$8 sps:$4 sm:$0xff]   ;;  %v733_v44 = vmax.bf16 %v10309_v50, %v349_v36 }
 0x232   : > { %5999 = vmatpush1.bf16.msra.mxu1 %v9958_v46  ;;  %v9994_v46 = vld [vmem:[#allocation5 + $0x470] ss:$8 sps:$4 sm:$0xff]   ;;  %v433_v34 = vld [vmem:[%s10501_s30 + $0x6a8] sm:$0xff] }
 0x233   : > { %7157 = vmatpush1.bf16.msra.mxu0 %v9961_v47  ;;  %6000 = vmatprep.subr.bf16.mxu1 %v9966_v52  ;;  %v9997_v47 = vld [vmem:[#allocation5 + $0xa70] ss:$8 sps:$4 sm:$0xff]   ;;  %v7997_v52 = vcombine.low %v709_v24, %v721_v25  ;;  %v10026_v25 = vld [vmem:[#allocation5 + $0x4c4] ss:$8 sps:$4 sm:$0xff]   ;;  %v10024_v35 = vld [vmem:[#allocation5 + $0x4c0] ss:$8 sps:$4 sm:$0xff]  }
 0x234   : > { %7158 = vmatprep.subr.bf16.mxu0 %v9969_v53  ;;  %v8010_v53 = vcombine.high %v727_v42, %v739_v43  ;;  %v10021_v24 = vld [vmem:[#allocation5 + $0xab0] ss:$8 sps:$4 sm:$0xff]   ;;  %v10027_v36 = vld [vmem:[#allocation5 + $0xac0] ss:$8 sps:$4 sm:$0xff]  }
 0x235   : > { %5846 = vmatmul.mubr.bf16.gmra.mrb[4].mxu1 %v7913_v54  ;;  %v8022_v54 = vcombine.high %v733_v44, %v745_v45 }
 0x236   : > { %7004 = vmatmul.mubr.bf16.gmra.mrb[4].mxu0 %v7925_v55  ;;  %5855 = vmatprep.mubr.bf16.mxu1 %v7938_v56  ;;  %v367_v55 = vld [vmem:[%s10501_s30 + $0x498] sm:$0xff] }
 0x237   : > { %7013 = vmatprep.mubr.bf16.mxu0 %v7950_v57  ;;  %6001 = vmatpush1.bf16.msra.mxu1 %v9964_v58  ;;  %v379_v56 = vld [vmem:[%s10501_s30 + $0x4f8] sm:$0xff]  ;;  %v373_v57 = vld [vmem:[%s10501_s30 + $0x4c8] sm:$0xff]  ;;  %v751_v63 = vmax.bf16 %v10309_v50, %v367_v55 }
 0x238   : > { %7159 = vmatpush1.bf16.msra.mxu0 %v9967_v59  ;;  %6002 = vmatprep.subr.bf16.mxu1 %v9972_v0  ;;  %v385_v58 = vld [vmem:[%s10501_s30 + $0x528] sm:$0xff]  ;;  %v763_v0 = vmax.bf16 %v10309_v50, %v379_v56 }
 0x239   : > { %7160 = vmatprep.subr.bf16.mxu0 %v9975_v1  ;;  %v10000_v59 = vld [vmem:[#allocation5 + $0x480] ss:$8 sps:$4 sm:$0xff]   ;;  %v757_v1 = vmax.bf16 %v10309_v50, %v373_v57  ;;  %v769_v2 = vmax.bf16 %v10309_v50, %v385_v58  ;;  %v10044_v58 = vld [vmem:[#allocation5 + $0x4f4] ss:$8 sps:$4 sm:$0xff]  }
 0x23a   : > { %v457_v55 = vld [vmem:[%s10501_s30 + $0x768] sm:$0xff] }
 0x23b   : > { %6003 = vmatpush1.bf16.msra.mxu1 %v9970_v6  ;;  %v10017_v6 = vld [vmem:[#allocation5 + $0xaa4] ss:$8 sps:$4 sm:$0xff]   ;;  %v10036_v56 = vld [vmem:[#allocation5 + $0x4e0] ss:$8 sps:$4 sm:$0xff]  }
 0x23c   : > { %7161 = vmatpush1.bf16.msra.mxu0 %v9973_v7  ;;  %6004 = vmatprep.subr.bf16.mxu1 %v9978_v8  ;;  %v8009_v7 = vcombine.low %v727_v42, %v739_v43  ;;  %v8021_v8 = vcombine.low %v733_v44, %v745_v45  ;;  %v817_v42 = vmax.bf16 %v10309_v50, %v433_v34  ;;  %v10030_v43 = vld [vmem:[#allocation5 + $0x4d0] ss:$8 sps:$4 sm:$0xff]   ;;  %v10038_v45 = vld [vmem:[#allocation5 + $0x4e4] ss:$8 sps:$4 sm:$0xff]   ;;  %v10039_v57 = vld [vmem:[#allocation5 + $0xae0] ss:$8 sps:$4 sm:$0xff]  }
 0x23d   : > { %7162 = vmatprep.subr.bf16.mxu0 %v9981_v9  ;;  %5856 = vmatmul.mubr.bf16.gmra.mrb[8].mxu1 %v7937_v10  ;;  %v8034_v9 = vcombine.high %v751_v63, %v763_v0  ;;  %v8046_v10 = vcombine.high %v757_v1, %v769_v2  ;;  %v10033_v44 = vld [vmem:[#allocation5 + $0xad0] ss:$8 sps:$4 sm:$0xff]   ;;  %v517_v34 = vld [vmem:[%s10501_s30 + $0x948] sm:$0xff] }
 0x23e   : > { %7014 = vmatmul.mubr.bf16.gmra.mrb[8].mxu0 %v7949_v11  ;;  %5865 = vmatprep.mubr.bf16.mxu1 %v7962_v12  ;;  %v391_v11 = vld [vmem:[%s10501_s30 + $0x558] sm:$0xff] }
 0x23f   : > { %7023 = vmatprep.mubr.bf16.mxu0 %v7974_v13  ;;  %6005 = vmatpush1.bf16.msra.mxu1 %v9976_v18  ;;  %v403_v12 = vld [vmem:[%s10501_s30 + $0x5b8] sm:$0xff]  ;;  %v397_v13 = vld [vmem:[%s10501_s30 + $0x588] sm:$0xff] }
 0x240   : > { %7163 = vmatpush1.bf16.msra.mxu0 %v9979_v19  ;;  %6006 = vmatprep.subr.bf16.mxu1 %v9984_v20  ;;  %v10023_v18 = vld [vmem:[#allocation5 + $0xab4] ss:$8 sps:$4 sm:$0xff]   ;;  %v775_v19 = vmax.bf16 %v10309_v50, %v391_v11  ;;  %v787_v20 = vmax.bf16 %v10309_v50, %v403_v12  ;;  %v481_v11 = vld [vmem:[%s10501_s30 + $0x828] sm:$0xff] }
 0x241   : > { %7164 = vmatprep.subr.bf16.mxu0 %v9987_v21  ;;  %v781_v21 = vmax.bf16 %v10309_v50, %v397_v13 }
 0x243   : > { %6007 = vmatpush1.bf16.msra.mxu1 %v9982_v26  ;;  %v10029_v26 = vld [vmem:[#allocation5 + $0xac4] ss:$8 sps:$4 sm:$0xff]  }
 0x244   : > { %7165 = vmatpush1.bf16.msra.mxu0 %v9985_v27  ;;  %6008 = vmatprep.subr.bf16.mxu1 %v9990_v28  ;;  %v8033_v27 = vcombine.low %v751_v63, %v763_v0  ;;  %v8045_v28 = vcombine.low %v757_v1, %v769_v2  ;;  %v841_v63 = vmax.bf16 %v10309_v50, %v457_v55  ;;  %v10042_v0 = vld [vmem:[#allocation5 + $0x4f0] ss:$8 sps:$4 sm:$0xff]   ;;  %v10050_v2 = vld [vmem:[#allocation5 + $0x504] ss:$8 sps:$4 sm:$0xff]  }
 0x245   : > { %7166 = vmatprep.subr.bf16.mxu0 %v9993_v29  ;;  %5866 = vmatmul.mubr.bf16.gmra.mrb[12].mxu1 %v7961_v30  ;;  %v8058_v29 = vcombine.high %v775_v19, %v787_v20  ;;  %v8070_v30 = vcombine.high %v781_v21, %v793_v22  ;;  %v10045_v1 = vld [vmem:[#allocation5 + $0xaf0] ss:$8 sps:$4 sm:$0xff]  }
 0x246   : > { %7024 = vmatmul.mubr.bf16.gmra.mrb[12].mxu0 %v7973_v31  ;;  %5875 = vmatprep.mubr.bf16.mxu1 %v7986_v32  ;;  %v415_v31 = vld [vmem:[%s10501_s30 + $0x618] sm:$0xff] }
 0x247   : > { %7033 = vmatprep.mubr.bf16.mxu0 %v7998_v33  ;;  %6009 = vmatpush1.bf16.msra.mxu1 %v9988_v38  ;;  %v427_v32 = vld [vmem:[%s10501_s30 + $0x678] sm:$0xff]  ;;  %v421_v33 = vld [vmem:[%s10501_s30 + $0x648] sm:$0xff] }
 0x248   : > { %7167 = vmatpush1.bf16.msra.mxu0 %v9991_v39  ;;  %6010 = vmatprep.subr.bf16.mxu1 %v9996_v40  ;;  %v10035_v38 = vld [vmem:[#allocation5 + $0xad4] ss:$8 sps:$4 sm:$0xff]   ;;  %v799_v39 = vmax.bf16 %v10309_v50, %v415_v31  ;;  %v811_v40 = vmax.bf16 %v10309_v50, %v427_v32 }
 0x249   : > { %7168 = vmatprep.subr.bf16.mxu0 %v9999_v41  ;;  %v805_v41 = vmax.bf16 %v10309_v50, %v421_v33  ;;  %v511_v32 = vld [vmem:[%s10501_s30 + $0x918] sm:$0xff] }
 0x24a   : > { %v523_v33 = vld [vmem:[%s10501_s30 + $0x978] sm:$0xff] }
 0x24b   : > { %6011 = vmatpush1.bf16.msra.mxu1 %v9994_v46  ;;  %v10041_v46 = vld [vmem:[#allocation5 + $0xae4] ss:$8 sps:$4 sm:$0xff]  }
 0x24c   : > { %7169 = vmatpush1.bf16.msra.mxu0 %v9997_v47  ;;  %6012 = vmatprep.subr.bf16.mxu1 %v10002_v48  ;;  %v8057_v47 = vcombine.low %v775_v19, %v787_v20  ;;  %v8069_v48 = vcombine.low %v781_v21, %v793_v22  ;;  %v487_v20 = vld [vmem:[%s10501_s30 + $0x858] sm:$0xff]  ;;  %v493_v22 = vld [vmem:[%s10501_s30 + $0x888] sm:$0xff] }
 0x24d   : > { %7170 = vmatprep.subr.bf16.mxu0 %v10005_v49  ;;  %5876 = vmatmul.mubr.bf16.gmra.mrb[16].mxu1 %v7985_v51  ;;  %v8082_v49 = vcombine.high %v799_v39, %v811_v40  ;;  %v8094_v51 = vcombine.high %v805_v41, %v817_v42  ;;  %v499_v21 = vld [vmem:[%s10501_s30 + $0x8b8] sm:$0xff] }
 0x24e   : > { %7034 = vmatmul.mubr.bf16.gmra.mrb[16].mxu0 %v7997_v52  ;;  %5885 = vmatprep.mubr.bf16.mxu1 %v8010_v53  ;;  %v439_v52 = vld [vmem:[%s10501_s30 + $0x6d8] sm:$0xff] }
 0x24f   : > { %7043 = vmatprep.mubr.bf16.mxu0 %v8022_v54  ;;  %6013 = vmatpush1.bf16.msra.mxu1 %v10000_v59  ;;  %v451_v53 = vld [vmem:[%s10501_s30 + $0x738] sm:$0xff]  ;;  %v445_v54 = vld [vmem:[%s10501_s30 + $0x708] sm:$0xff] }
 0x250   : > { %7171 = vmatpush1.bf16.msra.mxu0 %v10003_v60  ;;  %6014 = vmatprep.subr.bf16.mxu1 %v10008_v61  ;;  %v10047_v59 = vld [vmem:[#allocation5 + $0xaf4] ss:$8 sps:$4 sm:$0xff]   ;;  %v823_v60 = vmax.bf16 %v10309_v50, %v439_v52  ;;  %v835_v61 = vmax.bf16 %v10309_v50, %v451_v53 }
 0x251   : > { %7172 = vmatprep.subr.bf16.mxu0 %v10011_v62  ;;  %v829_v62 = vmax.bf16 %v10309_v50, %v445_v54 }
 0x253   : > { %6015 = vmatpush1.bf16.msra.mxu1 %v10006_v3  ;;  %v10053_v3 = vld [vmem:[#allocation5 + $0xb04] ss:$8 sps:$4 sm:$0xff]  }
 0x254   : > { %7173 = vmatpush1.bf16.msra.mxu0 %v10009_v4  ;;  %6016 = vmatprep.subr.bf16.mxu1 %v10014_v5  ;;  %v8081_v4 = vcombine.low %v799_v39, %v811_v40  ;;  %v8093_v5 = vcombine.low %v805_v41, %v817_v42 }
 0x255   : > { %7174 = vmatprep.subr.bf16.mxu0 %v10017_v6  ;;  %5886 = vmatmul.mubr.bf16.gmra.mrb[20].mxu1 %v8009_v7  ;;  %v8106_v6 = vcombine.high %v823_v60, %v835_v61  ;;  %v8118_v7 = vcombine.high %v829_v62, %v841_v63 }
 0x256   : > { %7044 = vmatmul.mubr.bf16.gmra.mrb[20].mxu0 %v8021_v8  ;;  %5895 = vmatprep.mubr.bf16.mxu1 %v8034_v9  ;;  %v463_v8 = vld [vmem:[%s10501_s30 + $0x798] sm:$0xff] }
 0x257   : > { %7053 = vmatprep.mubr.bf16.mxu0 %v8046_v10  ;;  %6017 = vmatpush1.bf16.msra.mxu1 %v10012_v15  ;;  %v475_v9 = vld [vmem:[%s10501_s30 + $0x7f8] sm:$0xff]  ;;  %v469_v10 = vld [vmem:[%s10501_s30 + $0x7c8] sm:$0xff]  ;;  %v847_v12 = vmax.bf16 %v10309_v50, %v463_v8  ;;  %v865_v15 = vmax.bf16 %v10309_v50, %v481_v11 }
 0x258   : > { %7175 = vmatpush1.bf16.msra.mxu0 %v10015_v16  ;;  %6018 = vmatprep.subr.bf16.mxu1 %v10020_v17  ;;  %v859_v13 = vmax.bf16 %v10309_v50, %v475_v9  ;;  %v853_v14 = vmax.bf16 %v10309_v50, %v469_v10  ;;  %v8105_v16 = vcombine.low %v823_v60, %v835_v61  ;;  %v577_v60 = vld [vmem:[%s10501_s30 + $0xb28] sm:$0xff] }
 0x259   : > { %7176 = vmatprep.subr.bf16.mxu0 %v10023_v18  ;;  %v8117_v17 = vcombine.low %v829_v62, %v841_v63  ;;  %v601_v8 = vld [vmem:[%s10501_s30 + $0xbe8] sm:$0xff] }
 0x25a   : > { %v8130_v18 = vcombine.high %v847_v12, %v859_v13  ;;  %v8142_v19 = vcombine.high %v853_v14, %v865_v15 }
 0x25b   : > { %6019 = vmatpush1.bf16.msra.mxu1 %v10018_v23  ;;  %v505_v23 = vld [vmem:[%s10501_s30 + $0x8e8] sm:$0xff] }
 0x25c   : > { %7177 = vmatpush1.bf16.msra.mxu0 %v10021_v24  ;;  %6020 = vmatprep.subr.bf16.mxu1 %v10026_v25  ;;  %v871_v24 = vmax.bf16 %v10309_v50, %v487_v20  ;;  %v883_v25 = vmax.bf16 %v10309_v50, %v499_v21  ;;  %v242_v20 = vld [vmem:[%s10501_s30 + $0xb0] sm:$0xff] }
 0x25d   : > { %7178 = vmatprep.subr.bf16.mxu0 %v10029_v26  ;;  %5896 = vmatmul.mubr.bf16.gmra.mrb[24].mxu1 %v8033_v27  ;;  %v877_v26 = vmax.bf16 %v10309_v50, %v493_v22  ;;  %v889_v27 = vmax.bf16 %v10309_v50, %v505_v23 }
 0x25e   : > { %7054 = vmatmul.mubr.bf16.gmra.mrb[24].mxu0 %v8045_v28  ;;  %5905 = vmatprep.mubr.bf16.mxu1 %v8058_v29  ;;  %v8129_v28 = vcombine.low %v847_v12, %v859_v13  ;;  %v8141_v29 = vcombine.low %v853_v14, %v865_v15  ;;  %v8153_v40 = vcombine.low %v871_v24, %v883_v25 }
 0x25f   : > { %7063 = vmatprep.mubr.bf16.mxu0 %v8070_v30  ;;  %6021 = vmatpush1.bf16.msra.mxu1 %v10024_v35  ;;  %v8154_v30 = vcombine.high %v871_v24, %v883_v25  ;;  %v8166_v31 = vcombine.high %v877_v26, %v889_v27  ;;  %v529_v35 = vld [vmem:[%s10501_s30 + $0x9a8] sm:$0xff]  ;;  %v8165_v41 = vcombine.low %v877_v26, %v889_v27 }
 0x260   : > { %7179 = vmatpush1.bf16.msra.mxu0 %v10027_v36  ;;  %6022 = vmatprep.subr.bf16.mxu1 %v10032_v37  ;;  %v895_v36 = vmax.bf16 %v10309_v50, %v511_v32  ;;  %v907_v37 = vmax.bf16 %v10309_v50, %v523_v33  ;;  %v913_v39 = vmax.bf16 %v10309_v50, %v529_v35  ;;  %v266_v32 = vld [vmem:[%s10501_s30 + $0x170] sm:$0xff] }
 0x261   : > { %7180 = vmatprep.subr.bf16.mxu0 %v10035_v38  ;;  %v901_v38 = vmax.bf16 %v10309_v50, %v517_v34  ;;  %v985_v12 = vmax.bf16 %v10309_v50, %v601_v8  ;;  %v626_v24 = vmax.bf16 %v10309_v50, %v242_v20  ;;  %v326_v20 = vld [vmem:[%s10501_s30 + $0x350] sm:$0xff] }
 0x262   : > { %v8178_v42 = vcombine.high %v895_v36, %v907_v37  ;;  %v8177_v53 = vcombine.low %v895_v36, %v907_v37  ;;  %v650_v36 = vmax.bf16 %v10309_v50, %v266_v32  ;;  %v10086_v32 = vld [vmem:[#allocation5 + $0x564] ss:$8 sps:$4 sm:$0xff]  }
 0x263   : > { %6023 = vmatpush1.bf16.msra.mxu1 %v10030_v43  ;;  %v8190_v43 = vcombine.high %v901_v38, %v913_v39  ;;  %v8189_v54 = vcombine.low %v901_v38, %v913_v39  ;;  %v10048_v39 = vld [vmem:[#allocation5 + $0x500] ss:$8 sps:$4 sm:$0xff]  }
 0x264   : > { %7181 = vmatpush1.bf16.msra.mxu0 %v10033_v44  ;;  %6024 = vmatprep.subr.bf16.mxu1 %v10038_v45  ;;  %v535_v44 = vld [vmem:[%s10501_s30 + $0x9d8] sm:$0xff] }
 0x265   : > { %7182 = vmatprep.subr.bf16.mxu0 %v10041_v46  ;;  %5906 = vmatmul.mubr.bf16.gmra.mrb[28].mxu1 %v8057_v47  ;;  %v547_v45 = vld [vmem:[%s10501_s30 + $0xa38] sm:$0xff]  ;;  %v541_v46 = vld [vmem:[%s10501_s30 + $0xa08] sm:$0xff] }
 0x266   : > { %7064 = vmatmul.mubr.bf16.gmra.mrb[28].mxu0 %v8069_v48  ;;  %5915 = vmatprep.mubr.bf16.mxu1 %v8082_v49  ;;  %v553_v47 = vld [vmem:[%s10501_s30 + $0xa68] sm:$0xff]  ;;  %v919_v48 = vmax.bf16 %v10309_v50, %v535_v44  ;;  %v931_v49 = vmax.bf16 %v10309_v50, %v547_v45  ;;  %v284_v44 = vld [vmem:[%s10501_s30 + $0x200] sm:$0xff]  ;;  %v278_v45 = vld [vmem:[%s10501_s30 + $0x1d0] sm:$0xff] }
 0x267   : > { %7073 = vmatprep.mubr.bf16.mxu0 %v8094_v51  ;;  %6025 = vmatpush1.bf16.msra.mxu1 %v10036_v56  ;;  %v925_v51 = vmax.bf16 %v10309_v50, %v541_v46  ;;  %v937_v52 = vmax.bf16 %v10309_v50, %v553_v47  ;;  %v290_v46 = vld [vmem:[%s10501_s30 + $0x230] sm:$0xff] }
 0x268   : > { %7183 = vmatpush1.bf16.msra.mxu0 %v10039_v57  ;;  %6026 = vmatprep.subr.bf16.mxu1 %v10044_v58  ;;  %v8202_v55 = vcombine.high %v919_v48, %v931_v49  ;;  %v559_v57 = vld [vmem:[%s10501_s30 + $0xa98] sm:$0xff] }
 0x269   : > { %7184 = vmatprep.subr.bf16.mxu0 %v10047_v59  ;;  %v8214_v56 = vcombine.high %v925_v51, %v937_v52  ;;  %v571_v58 = vld [vmem:[%s10501_s30 + $0xaf8] sm:$0xff]  ;;  %v565_v59 = vld [vmem:[%s10501_s30 + $0xac8] sm:$0xff]  ;;  %v943_v61 = vmax.bf16 %v10309_v50, %v559_v57 }
 0x26a   : > { %v955_v62 = vmax.bf16 %v10309_v50, %v571_v58  ;;  %v949_v63 = vmax.bf16 %v10309_v50, %v565_v59  ;;  %v10056_v47 = vld [vmem:[#allocation5 + $0x514] ss:$8 sps:$4 sm:$0xff]   ;;  %v10065_v57 = vld [vmem:[#allocation5 + $0xb24] ss:$8 sps:$4 sm:$0xff]  }
 0x26b   : > { %6027 = vmatpush1.bf16.msra.mxu1 %v10042_v0  ;;  %v961_v0 = vmax.bf16 %v10309_v50, %v577_v60 }
 0x26c   : > { %7185 = vmatpush1.bf16.msra.mxu0 %v10045_v1  ;;  %6189 = vmatprep.subr.bf16.mxu1 %v10050_v2  ;;  %v8201_v1 = vcombine.low %v919_v48, %v931_v49  ;;  %v8213_v2 = vcombine.low %v925_v51, %v937_v52  ;;  %v8225_v13 = vcombine.low %v943_v61, %v955_v62  ;;  %v10059_v48 = vld [vmem:[#allocation5 + $0xb14] ss:$8 sps:$4 sm:$0xff]   ;;  %v10054_v51 = vld [vmem:[#allocation5 + $0x510] ss:$8 sps:$4 sm:$0xff]  }
 0x26d   : > { %7347 = vmatprep.subr.bf16.mxu0 %v10053_v3  ;;  %5916 = vmatmul.mubr.bf16.gmra.mrb[32].mxu1 %v8081_v4  ;;  %v8226_v3 = vcombine.high %v943_v61, %v955_v62  ;;  %v8238_v4 = vcombine.high %v949_v63, %v961_v0  ;;  %v8237_v14 = vcombine.low %v949_v63, %v961_v0  ;;  %v10057_v52 = vld [vmem:[#allocation5 + $0xb10] ss:$8 sps:$4 sm:$0xff]   ;;  %v10060_v62 = vld [vmem:[#allocation5 + $0x520] ss:$8 sps:$4 sm:$0xff]  }
 0x26e   : > { %7074 = vmatmul.mubr.bf16.gmra.mrb[32].mxu0 %v8093_v5  ;;  %5925 = vmatprep.mubr.bf16.mxu1 %v8106_v6  ;;  %v583_v5 = vld [vmem:[%s10501_s30 + $0xb58] sm:$0xff]  ;;  %v10063_v63 = vld [vmem:[#allocation5 + $0xb20] ss:$8 sps:$4 sm:$0xff]  }
 0x26f   : > { %7083 = vmatprep.mubr.bf16.mxu0 %v8118_v7  ;;  %v595_v6 = vld [vmem:[%s10501_s30 + $0xbb8] sm:$0xff]  ;;  %v589_v7 = vld [vmem:[%s10501_s30 + $0xb88] sm:$0xff]  ;;  %v967_v9 = vmax.bf16 %v10309_v50, %v583_v5  ;;  %v296_v0 = vld [vmem:[%s10501_s30 + $0x260] sm:$0xff] }
 0x270   : > { %v979_v10 = vmax.bf16 %v10309_v50, %v595_v6  ;;  %v973_v11 = vmax.bf16 %v10309_v50, %v589_v7  ;;  %v10071_v5 = vld [vmem:[#allocation5 + $0xb34] ss:$8 sps:$4 sm:$0xff]   ;;  %v680_v6 = vmax.bf16 %v10309_v50, %v296_v0  ;;  %v10099_v0 = vld [vmem:[#allocation5 + $0xb80] ss:$8 sps:$4 sm:$0xff]  }
 0x272   : > { %v8250_v15 = vcombine.high %v967_v9, %v979_v10  ;;  %v8249_v25 = vcombine.low %v967_v9, %v979_v10  ;;  %v8261_v26 = vcombine.low %v973_v11, %v985_v12  ;;  %v10066_v10 = vld [vmem:[#allocation5 + $0x530] ss:$8 sps:$4 sm:$0xff]  }
 0x275   : > { %5926 = vmatmul.mubr.bf16.gmra.mrb[36].mxu1 %v8105_v16  ;;  %v8262_v16 = vcombine.high %v973_v11, %v985_v12  ;;  %v10069_v11 = vld [vmem:[#allocation5 + $0xb30] ss:$8 sps:$4 sm:$0xff]   ;;  %v10074_v12 = vld [vmem:[#allocation5 + $0x544] ss:$8 sps:$4 sm:$0xff]  }
 0x276   : > { %7084 = vmatmul.mubr.bf16.gmra.mrb[36].mxu0 %v8117_v17  ;;  %5935 = vmatprep.mubr.bf16.mxu1 %v8130_v18  ;;  %v224_v17 = vld [vmem:[%s10501_s30 + $0x20] sm:$0xff] }
 0x277   : > { %7093 = vmatprep.mubr.bf16.mxu0 %v8142_v19  ;;  %v236_v18 = vld [vmem:[%s10501_s30 + $0x80] sm:$0xff]  ;;  %v230_v19 = vld [vmem:[%s10501_s30 + $0x50] sm:$0xff]  ;;  %v608_v21 = vmax.bf16 %v10309_v50, %v224_v17 }
 0x278   : > { %v620_v22 = vmax.bf16 %v10309_v50, %v236_v18  ;;  %v614_v23 = vmax.bf16 %v10309_v50, %v230_v19  ;;  %v320_v18 = vld [vmem:[%s10501_s30 + $0x320] sm:$0xff] }
 0x279   : > { %v332_v19 = vld [vmem:[%s10501_s30 + $0x380] sm:$0xff] }
 0x27a   : > { %v7892_v27 = vcombine.high %v608_v21, %v620_v22  ;;  %v7891_v37 = vcombine.low %v608_v21, %v620_v22  ;;  %v7903_v38 = vcombine.low %v614_v23, %v626_v24  ;;  %v338_v21 = vld [vmem:[%s10501_s30 + $0x3b0] sm:$0xff]  ;;  %v10072_v22 = vld [vmem:[#allocation5 + $0x540] ss:$8 sps:$4 sm:$0xff]  }
 0x27d   : > { %5936 = vmatmul.mubr.bf16.gmra.mrb[40].mxu1 %v8129_v28  ;;  %v7904_v28 = vcombine.high %v614_v23, %v626_v24  ;;  %v10075_v23 = vld [vmem:[#allocation5 + $0xb40] ss:$8 sps:$4 sm:$0xff]   ;;  %v10080_v24 = vld [vmem:[#allocation5 + $0x554] ss:$8 sps:$4 sm:$0xff]  }
 0x27e   : > { %7094 = vmatmul.mubr.bf16.gmra.mrb[40].mxu0 %v8141_v29  ;;  %5945 = vmatprep.mubr.bf16.mxu1 %v8154_v30  ;;  %v248_v29 = vld [vmem:[%s10501_s30 + $0xe0] sm:$0xff] }
 0x27f   : > { %7103 = vmatprep.mubr.bf16.mxu0 %v8166_v31  ;;  %v260_v30 = vld [vmem:[%s10501_s30 + $0x140] sm:$0xff]  ;;  %v254_v31 = vld [vmem:[%s10501_s30 + $0x110] sm:$0xff]  ;;  %v632_v33 = vmax.bf16 %v10309_v50, %v248_v29  ;;  %v722_v29 = vmax.bf16 %v10309_v50, %v338_v21 }
 0x280   : > { %v644_v34 = vmax.bf16 %v10309_v50, %v260_v30  ;;  %v638_v35 = vmax.bf16 %v10309_v50, %v254_v31  ;;  %v10078_v30 = vld [vmem:[#allocation5 + $0x550] ss:$8 sps:$4 sm:$0xff]   ;;  %v10116_v21 = vld [vmem:[#allocation5 + $0x5b4] ss:$8 sps:$4 sm:$0xff]  }
 0x281   : > { %v10081_v31 = vld [vmem:[#allocation5 + $0xb50] ss:$8 sps:$4 sm:$0xff]  }
 0x282   : > { %v7915_v58 = vcombine.low %v632_v33, %v644_v34  ;;  %v7927_v59 = vcombine.low %v638_v35, %v650_v36 }
 0x285   : > { %5946 = vmatmul.mubr.bf16.gmra.mrb[44].mxu1 %v8153_v40  ;;  %v10051_v40 = vld [vmem:[#allocation5 + $0xb00] ss:$8 sps:$4 sm:$0xff]  }
 0x286   : > { %7104 = vmatmul.mubr.bf16.gmra.mrb[44].mxu0 %v8165_v41  ;;  %5955 = vmatprep.mubr.bf16.mxu1 %v8178_v42  ;;  %v272_v41 = vld [vmem:[%s10501_s30 + $0x1a0] sm:$0xff]  ;;  %v7916_v42 = vcombine.high %v632_v33, %v644_v34 }
 0x287   : > { %7113 = vmatprep.mubr.bf16.mxu0 %v8190_v43  ;;  %v7928_v43 = vcombine.high %v638_v35, %v650_v36  ;;  %v656_v49 = vmax.bf16 %v10309_v50, %v272_v41  ;;  %v10089_v33 = vld [vmem:[#allocation5 + $0xb64] ss:$8 sps:$4 sm:$0xff]   ;;  %v362_v41 = vld [vmem:[%s10501_s30 + $0x470] sm:$0xff] }
 0x28d   : > { %5956 = vmatmul.mubr.bf16.gmra.mrb[48].mxu1 %v8177_v53  ;;  %v668_v53 = vmax.bf16 %v10309_v50, %v284_v44  ;;  %v10092_v44 = vld [vmem:[#allocation5 + $0x574] ss:$8 sps:$4 sm:$0xff]  }
 0x28e   : > { %7114 = vmatmul.mubr.bf16.gmra.mrb[48].mxu0 %v8189_v54  ;;  %5965 = vmatprep.mubr.bf16.mxu1 %v8202_v55  ;;  %v662_v54 = vmax.bf16 %v10309_v50, %v278_v45  ;;  %v674_v55 = vmax.bf16 %v10309_v50, %v290_v46  ;;  %v10095_v45 = vld [vmem:[#allocation5 + $0xb74] ss:$8 sps:$4 sm:$0xff]  }
 0x28f   : > { %7123 = vmatprep.mubr.bf16.mxu0 %v8214_v56  ;;  %v10062_v56 = vld [vmem:[#allocation5 + $0x524] ss:$8 sps:$4 sm:$0xff]   ;;  %v7940_v60 = vcombine.high %v656_v49, %v668_v53 }
 0x290   : > { %v7952_v61 = vcombine.high %v662_v54, %v674_v55 }
 0x295   : > { %5966 = vmatmul.mubr.bf16.gmra.mrb[52].mxu1 %v8201_v1  ;;  %v308_v1 = vld [vmem:[%s10501_s30 + $0x2c0] sm:$0xff] }
 0x296   : > { %7124 = vmatmul.mubr.bf16.gmra.mrb[52].mxu0 %v8213_v2  ;;  %5975 = vmatprep.mubr.bf16.mxu1 %v8226_v3  ;;  %v302_v2 = vld [vmem:[%s10501_s30 + $0x290] sm:$0xff]  ;;  %v692_v7 = vmax.bf16 %v10309_v50, %v308_v1 }
 0x297   : > { %7133 = vmatprep.mubr.bf16.mxu0 %v8238_v4  ;;  %v314_v3 = vld [vmem:[%s10501_s30 + $0x2f0] sm:$0xff]  ;;  %v686_v8 = vmax.bf16 %v10309_v50, %v302_v2 }
 0x298   : > { %v10068_v4 = vld [vmem:[#allocation5 + $0x534] ss:$8 sps:$4 sm:$0xff]   ;;  %v698_v9 = vmax.bf16 %v10309_v50, %v314_v3  ;;  %v7963_v34 = vcombine.low %v680_v6, %v692_v7 }
 0x299   : > { %v10104_v1 = vld [vmem:[#allocation5 + $0x594] ss:$8 sps:$4 sm:$0xff]  }
 0x29a   : > { %v7976_v17 = vcombine.high %v686_v8, %v698_v9  ;;  %v7975_v35 = vcombine.low %v686_v8, %v698_v9  ;;  %v10107_v2 = vld [vmem:[#allocation5 + $0xb94] ss:$8 sps:$4 sm:$0xff]   ;;  %v10105_v8 = vld [vmem:[#allocation5 + $0xb90] ss:$8 sps:$4 sm:$0xff]   ;;  %v10110_v9 = vld [vmem:[#allocation5 + $0x5a4] ss:$8 sps:$4 sm:$0xff]  }
 0x29d   : > { %5976 = vmatmul.mubr.bf16.gmra.mrb[56].mxu1 %v8225_v13  ;;  %v10077_v13 = vld [vmem:[#allocation5 + $0xb44] ss:$8 sps:$4 sm:$0xff]  }
 0x29e   : > { %7134 = vmatmul.mubr.bf16.gmra.mrb[56].mxu0 %v8237_v14  ;;  %5985 = vmatprep.mubr.bf16.mxu1 %v8250_v15  ;;  %v7939_v14 = vcombine.low %v656_v49, %v668_v53  ;;  %v7951_v15 = vcombine.low %v662_v54, %v674_v55  ;;  %v746_v49 = vmax.bf16 %v10309_v50, %v362_v41  ;;  %v10098_v53 = vld [vmem:[#allocation5 + $0x584] ss:$8 sps:$4 sm:$0xff]   ;;  %v10128_v41 = vld [vmem:[#allocation5 + $0x5d4] ss:$8 sps:$4 sm:$0xff]  }
 0x29f   : > { %7143 = vmatprep.mubr.bf16.mxu0 %v8262_v16  ;;  %v7964_v16 = vcombine.high %v680_v6, %v692_v7  ;;  %v10101_v54 = vld [vmem:[#allocation5 + $0xb84] ss:$8 sps:$4 sm:$0xff]   ;;  %v10102_v7 = vld [vmem:[#allocation5 + $0x590] ss:$8 sps:$4 sm:$0xff]  }
 0x2a5   : > { %5986 = vmatmul.mubr.bf16.gmra.mrb[60].mxu1 %v8249_v25  ;;  %v10083_v25 = vld [vmem:[#allocation5 + $0xb54] ss:$8 sps:$4 sm:$0xff]  }
 0x2a6   : > { %7144 = vmatmul.mubr.bf16.gmra.mrb[60].mxu0 %v8261_v26  ;;  %6028 = vmatprep.mubr.bf16.mxu1 %v7892_v27  ;;  %v704_v26 = vmax.bf16 %v10309_v50, %v320_v18  ;;  %v716_v27 = vmax.bf16 %v10309_v50, %v332_v19  ;;  %v410_v18 = vld [vmem:[%s10501_s30 + $0x5f0] sm:$0xff]  ;;  %v10108_v19 = vld [vmem:[#allocation5 + $0x5a0] ss:$8 sps:$4 sm:$0xff]  }
 0x2a7   : > { %7186 = vmatprep.mubr.bf16.mxu0 %v7904_v28  ;;  %v710_v28 = vmax.bf16 %v10309_v50, %v326_v20  ;;  %v10111_v20 = vld [vmem:[#allocation5 + $0xba0] ss:$8 sps:$4 sm:$0xff]  }
 0x2a8   : > { %v7988_v36 = vcombine.high %v704_v26, %v716_v27  ;;  %v7987_v55 = vcombine.low %v704_v26, %v716_v27  ;;  %v794_v26 = vmax.bf16 %v10309_v50, %v410_v18  ;;  %v10114_v27 = vld [vmem:[#allocation5 + $0x5b0] ss:$8 sps:$4 sm:$0xff]  }
 0x2ad   : > { %6029 = vmatmul.mubr.bf16.vlgmr.msra.gmra.mrb[0].mxu1 %v7891_v37  ;;  %v8000_v37 = vcombine.high %v710_v28, %v722_v29 }
 0x2ae   : > { %7187 = vmatmul.mubr.bf16.vlgmr.msra.gmra.mrb[0].mxu0 %v7903_v38  ;;  %6190 = vmatpush1.bf16.msra.mxu1 %v10048_v39  ;;  %v344_v38 = vld [vmem:[%s10501_s30 + $0x3e0] sm:$0xff] }
 0x2af   : > { %7348 = vmatpush1.bf16.msra.mxu0 %v10051_v40  ;;  %6038 = vmatprep.mubr.bf16.mxu1 %v7916_v42  ;;  %v356_v39 = vld [vmem:[%s10501_s30 + $0x440] sm:$0xff]  ;;  %v350_v40 = vld [vmem:[%s10501_s30 + $0x410] sm:$0xff]  ;;  %v728_v46 = vmax.bf16 %v10309_v50, %v344_v38 }
 0x2b0   : > { %7196 = vmatprep.mubr.bf16.mxu0 %v7928_v43  ;;  %6191 = vmatprep.subr.bf16.mxu1 %v10056_v47  ;;  %v10084_v42 = vld [vmem:[#allocation5 + $0x560] ss:$8 sps:$4 sm:$0xff]   ;;  %v740_v47 = vmax.bf16 %v10309_v50, %v356_v39  ;;  %v434_v38 = vld [vmem:[%s10501_s30 + $0x6b0] sm:$0xff] }
 0x2b1   : > { %7349 = vmatprep.subr.bf16.mxu0 %v10059_v48  ;;  %v10087_v43 = vld [vmem:[#allocation5 + $0xb60] ss:$8 sps:$4 sm:$0xff]   ;;  %v734_v48 = vmax.bf16 %v10309_v50, %v350_v40 }
 0x2b2   : > { %6192 = vmatpush1.bf16.msra.mxu1 %v10054_v51  ;;  %v10090_v51 = vld [vmem:[#allocation5 + $0x570] ss:$8 sps:$4 sm:$0xff]   ;;  %v10120_v39 = vld [vmem:[#allocation5 + $0x5c0] ss:$8 sps:$4 sm:$0xff]  }
 0x2b3   : > { %7350 = vmatpush1.bf16.msra.mxu0 %v10057_v52  ;;  %6193 = vmatprep.subr.bf16.mxu1 %v10062_v56  ;;  %v10093_v52 = vld [vmem:[#allocation5 + $0xb70] ss:$8 sps:$4 sm:$0xff]   ;;  %v7999_v56 = vcombine.low %v710_v28, %v722_v29  ;;  %v10122_v29 = vld [vmem:[#allocation5 + $0x5c4] ss:$8 sps:$4 sm:$0xff]   ;;  %v10123_v40 = vld [vmem:[#allocation5 + $0xbc0] ss:$8 sps:$4 sm:$0xff]  }
 0x2b4   : > { %7351 = vmatprep.subr.bf16.mxu0 %v10065_v57  ;;  %v8012_v57 = vcombine.high %v728_v46, %v740_v47  ;;  %v10117_v28 = vld [vmem:[#allocation5 + $0xbb0] ss:$8 sps:$4 sm:$0xff]  }
 0x2b5   : > { %6039 = vmatmul.mubr.bf16.gmra.mrb[4].mxu1 %v7915_v58  ;;  %v8024_v58 = vcombine.high %v734_v48, %v746_v49 }
 0x2b6   : > { %7197 = vmatmul.mubr.bf16.gmra.mrb[4].mxu0 %v7927_v59  ;;  %6048 = vmatprep.mubr.bf16.mxu1 %v7940_v60  ;;  %v368_v59 = vld [vmem:[%s10501_s30 + $0x4a0] sm:$0xff] }
 0x2b7   : > { %7206 = vmatprep.mubr.bf16.mxu0 %v7952_v61  ;;  %6194 = vmatpush1.bf16.msra.mxu1 %v10060_v62  ;;  %v380_v60 = vld [vmem:[%s10501_s30 + $0x500] sm:$0xff]  ;;  %v374_v61 = vld [vmem:[%s10501_s30 + $0x4d0] sm:$0xff]  ;;  %v752_v3 = vmax.bf16 %v10309_v50, %v368_v59 }
 0x2b8   : > { %7352 = vmatpush1.bf16.msra.mxu0 %v10063_v63  ;;  %6195 = vmatprep.subr.bf16.mxu1 %v10068_v4  ;;  %v386_v62 = vld [vmem:[%s10501_s30 + $0x530] sm:$0xff]  ;;  %v10096_v63 = vld [vmem:[#allocation5 + $0x580] ss:$8 sps:$4 sm:$0xff]   ;;  %v764_v4 = vmax.bf16 %v10309_v50, %v380_v60 }
 0x2b9   : > { %7353 = vmatprep.subr.bf16.mxu0 %v10071_v5  ;;  %v758_v5 = vmax.bf16 %v10309_v50, %v374_v61  ;;  %v770_v6 = vmax.bf16 %v10309_v50, %v386_v62  ;;  %v458_v59 = vld [vmem:[%s10501_s30 + $0x770] sm:$0xff]  ;;  %v10132_v60 = vld [vmem:[#allocation5 + $0x5e0] ss:$8 sps:$4 sm:$0xff]  }
 0x2ba   : > { %v10135_v61 = vld [vmem:[#allocation5 + $0xbe0] ss:$8 sps:$4 sm:$0xff]   ;;  %v10140_v62 = vld [vmem:[#allocation5 + $0x5f4] ss:$8 sps:$4 sm:$0xff]  }
 0x2bb   : > { %6196 = vmatpush1.bf16.msra.mxu1 %v10066_v10  ;;  %v10113_v10 = vld [vmem:[#allocation5 + $0xba4] ss:$8 sps:$4 sm:$0xff]  }
 0x2bc   : > { %7354 = vmatpush1.bf16.msra.mxu0 %v10069_v11  ;;  %6197 = vmatprep.subr.bf16.mxu1 %v10074_v12  ;;  %v8011_v11 = vcombine.low %v728_v46, %v740_v47  ;;  %v8023_v12 = vcombine.low %v734_v48, %v746_v49  ;;  %v818_v46 = vmax.bf16 %v10309_v50, %v434_v38  ;;  %v10126_v47 = vld [vmem:[#allocation5 + $0x5d0] ss:$8 sps:$4 sm:$0xff]   ;;  %v10134_v49 = vld [vmem:[#allocation5 + $0x5e4] ss:$8 sps:$4 sm:$0xff]  }
 0x2bd   : > { %7355 = vmatprep.subr.bf16.mxu0 %v10077_v13  ;;  %6049 = vmatmul.mubr.bf16.gmra.mrb[8].mxu1 %v7939_v14  ;;  %v8036_v13 = vcombine.high %v752_v3, %v764_v4  ;;  %v8048_v14 = vcombine.high %v758_v5, %v770_v6  ;;  %v10129_v48 = vld [vmem:[#allocation5 + $0xbd0] ss:$8 sps:$4 sm:$0xff]  }
 0x2be   : > { %7207 = vmatmul.mubr.bf16.gmra.mrb[8].mxu0 %v7951_v15  ;;  %6058 = vmatprep.mubr.bf16.mxu1 %v7964_v16  ;;  %v392_v15 = vld [vmem:[%s10501_s30 + $0x560] sm:$0xff] }
 0x2bf   : > { %7216 = vmatprep.mubr.bf16.mxu0 %v7976_v17  ;;  %6198 = vmatpush1.bf16.msra.mxu1 %v10072_v22  ;;  %v404_v16 = vld [vmem:[%s10501_s30 + $0x5c0] sm:$0xff]  ;;  %v398_v17 = vld [vmem:[%s10501_s30 + $0x590] sm:$0xff] }
 0x2c0   : > { %7356 = vmatpush1.bf16.msra.mxu0 %v10075_v23  ;;  %6199 = vmatprep.subr.bf16.mxu1 %v10080_v24  ;;  %v10119_v22 = vld [vmem:[#allocation5 + $0xbb4] ss:$8 sps:$4 sm:$0xff]   ;;  %v776_v23 = vmax.bf16 %v10309_v50, %v392_v15  ;;  %v788_v24 = vmax.bf16 %v10309_v50, %v404_v16 }
 0x2c1   : > { %7357 = vmatprep.subr.bf16.mxu0 %v10083_v25  ;;  %v782_v25 = vmax.bf16 %v10309_v50, %v398_v17 }
 0x2c3   : > { %6200 = vmatpush1.bf16.msra.mxu1 %v10078_v30  ;;  %v10125_v30 = vld [vmem:[#allocation5 + $0xbc4] ss:$8 sps:$4 sm:$0xff]  }
 0x2c4   : > { %7358 = vmatpush1.bf16.msra.mxu0 %v10081_v31  ;;  %6201 = vmatprep.subr.bf16.mxu1 %v10086_v32  ;;  %v8035_v31 = vcombine.low %v752_v3, %v764_v4  ;;  %v8047_v32 = vcombine.low %v758_v5, %v770_v6  ;;  %v842_v3 = vmax.bf16 %v10309_v50, %v458_v59  ;;  %v10138_v4 = vld [vmem:[#allocation5 + $0x5f0] ss:$8 sps:$4 sm:$0xff]   ;;  %v560_v59 = vld [vmem:[%s10501_s30 + $0xaa0] sm:$0xff] }
 0x2c5   : > { %7359 = vmatprep.subr.bf16.mxu0 %v10089_v33  ;;  %6059 = vmatmul.mubr.bf16.gmra.mrb[12].mxu1 %v7963_v34  ;;  %v8060_v33 = vcombine.high %v776_v23, %v788_v24  ;;  %v8072_v34 = vcombine.high %v782_v25, %v794_v26  ;;  %v10141_v5 = vld [vmem:[#allocation5 + $0xbf0] ss:$8 sps:$4 sm:$0xff]  }
 0x2c6   : > { %7217 = vmatmul.mubr.bf16.gmra.mrb[12].mxu0 %v7975_v35  ;;  %6068 = vmatprep.mubr.bf16.mxu1 %v7988_v36  ;;  %v416_v35 = vld [vmem:[%s10501_s30 + $0x620] sm:$0xff] }
 0x2c7   : > { %7226 = vmatprep.mubr.bf16.mxu0 %v8000_v37  ;;  %6202 = vmatpush1.bf16.msra.mxu1 %v10084_v42  ;;  %v428_v36 = vld [vmem:[%s10501_s30 + $0x680] sm:$0xff]  ;;  %v422_v37 = vld [vmem:[%s10501_s30 + $0x650] sm:$0xff] }
 0x2c8   : > { %7360 = vmatpush1.bf16.msra.mxu0 %v10087_v43  ;;  %6203 = vmatprep.subr.bf16.mxu1 %v10092_v44  ;;  %v10131_v42 = vld [vmem:[#allocation5 + $0xbd4] ss:$8 sps:$4 sm:$0xff]   ;;  %v800_v43 = vmax.bf16 %v10309_v50, %v416_v35  ;;  %v812_v44 = vmax.bf16 %v10309_v50, %v428_v36  ;;  %v524_v35 = vld [vmem:[%s10501_s30 + $0x980] sm:$0xff] }
 0x2c9   : > { %7361 = vmatprep.subr.bf16.mxu0 %v10095_v45  ;;  %v806_v45 = vmax.bf16 %v10309_v50, %v422_v37  ;;  %v518_v36 = vld [vmem:[%s10501_s30 + $0x950] sm:$0xff] }
 0x2ca   : > { %v8083_v6 = vcombine.low %v800_v43, %v812_v44  ;;  %v530_v37 = vld [vmem:[%s10501_s30 + $0x9b0] sm:$0xff] }
 0x2cb   : > { %6204 = vmatpush1.bf16.msra.mxu1 %v10090_v51  ;;  %v10137_v51 = vld [vmem:[#allocation5 + $0xbe4] ss:$8 sps:$4 sm:$0xff]  }
 0x2cc   : > { %7362 = vmatpush1.bf16.msra.mxu0 %v10093_v52  ;;  %6205 = vmatprep.subr.bf16.mxu1 %v10098_v53  ;;  %v8059_v52 = vcombine.low %v776_v23, %v788_v24  ;;  %v8071_v53 = vcombine.low %v782_v25, %v794_v26  ;;  %v500_v23 = vld [vmem:[%s10501_s30 + $0x8c0] sm:$0xff]  ;;  %v494_v24 = vld [vmem:[%s10501_s30 + $0x890] sm:$0xff] }
 0x2cd   : > { %7363 = vmatprep.subr.bf16.mxu0 %v10101_v54  ;;  %6069 = vmatmul.mubr.bf16.gmra.mrb[16].mxu1 %v7987_v55  ;;  %v8084_v54 = vcombine.high %v800_v43, %v812_v44  ;;  %v8096_v55 = vcombine.high %v806_v45, %v818_v46  ;;  %v506_v25 = vld [vmem:[%s10501_s30 + $0x8f0] sm:$0xff] }
 0x2ce   : > { %7227 = vmatmul.mubr.bf16.gmra.mrb[16].mxu0 %v7999_v56  ;;  %6078 = vmatprep.mubr.bf16.mxu1 %v8012_v57  ;;  %v440_v56 = vld [vmem:[%s10501_s30 + $0x6e0] sm:$0xff] }
 0x2cf   : > { %7236 = vmatprep.mubr.bf16.mxu0 %v8024_v58  ;;  %6206 = vmatpush1.bf16.msra.mxu1 %v10096_v63  ;;  %v452_v57 = vld [vmem:[%s10501_s30 + $0x740] sm:$0xff]  ;;  %v446_v58 = vld [vmem:[%s10501_s30 + $0x710] sm:$0xff] }
 0x2d0   : > { %7364 = vmatpush1.bf16.msra.mxu0 %v10099_v0  ;;  %6207 = vmatprep.subr.bf16.mxu1 %v10104_v1  ;;  %v10143_v63 = vld [vmem:[#allocation5 + $0xbf4] ss:$8 sps:$4 sm:$0xff]   ;;  %v824_v0 = vmax.bf16 %v10309_v50, %v440_v56  ;;  %v836_v1 = vmax.bf16 %v10309_v50, %v452_v57 }
 0x2d1   : > { %7365 = vmatprep.subr.bf16.mxu0 %v10107_v2  ;;  %v830_v2 = vmax.bf16 %v10309_v50, %v446_v58 }
 0x2d2   : > { %v8107_v18 = vcombine.low %v824_v0, %v836_v1 }
 0x2d3   : > { %6208 = vmatpush1.bf16.msra.mxu1 %v10102_v7  ;;  %v8095_v7 = vcombine.low %v806_v45, %v818_v46  ;;  %v536_v46 = vld [vmem:[%s10501_s30 + $0x9e0] sm:$0xff] }
 0x2d4   : > { %7366 = vmatpush1.bf16.msra.mxu0 %v10105_v8  ;;  %6209 = vmatprep.subr.bf16.mxu1 %v10110_v9  ;;  %v8108_v8 = vcombine.high %v824_v0, %v836_v1  ;;  %v8120_v9 = vcombine.high %v830_v2, %v842_v3 }
 0x2d5   : > { %7367 = vmatprep.subr.bf16.mxu0 %v10113_v10  ;;  %6079 = vmatmul.mubr.bf16.gmra.mrb[20].mxu1 %v8011_v11  ;;  %v464_v10 = vld [vmem:[%s10501_s30 + $0x7a0] sm:$0xff] }
 0x2d6   : > { %7237 = vmatmul.mubr.bf16.gmra.mrb[20].mxu0 %v8023_v12  ;;  %6088 = vmatprep.mubr.bf16.mxu1 %v8036_v13  ;;  %v476_v11 = vld [vmem:[%s10501_s30 + $0x800] sm:$0xff]  ;;  %v470_v12 = vld [vmem:[%s10501_s30 + $0x7d0] sm:$0xff] }
 0x2d7   : > { %7246 = vmatprep.mubr.bf16.mxu0 %v8048_v14  ;;  %6210 = vmatpush1.bf16.msra.mxu1 %v10108_v19  ;;  %v482_v13 = vld [vmem:[%s10501_s30 + $0x830] sm:$0xff]  ;;  %v848_v14 = vmax.bf16 %v10309_v50, %v464_v10  ;;  %v860_v15 = vmax.bf16 %v10309_v50, %v476_v11  ;;  %v854_v16 = vmax.bf16 %v10309_v50, %v470_v12 }
 0x2d8   : > { %7368 = vmatpush1.bf16.msra.mxu0 %v10111_v20  ;;  %6211 = vmatprep.subr.bf16.mxu1 %v10116_v21  ;;  %v866_v17 = vmax.bf16 %v10309_v50, %v482_v13  ;;  %v8119_v19 = vcombine.low %v830_v2, %v842_v3  ;;  %v602_v10 = vld [vmem:[%s10501_s30 + $0xbf0] sm:$0xff] }
 0x2d9   : > { %7369 = vmatprep.subr.bf16.mxu0 %v10119_v22  ;;  %v8132_v20 = vcombine.high %v848_v14, %v860_v15  ;;  %v488_v22 = vld [vmem:[%s10501_s30 + $0x860] sm:$0xff] }
 0x2da   : > { %v8144_v21 = vcombine.high %v854_v16, %v866_v17  ;;  %v872_v26 = vmax.bf16 %v10309_v50, %v488_v22  ;;  %v243_v22 = vld [vmem:[%s10501_s30 + $0xb8] sm:$0xff] }
 0x2db   : > { %6212 = vmatpush1.bf16.msra.mxu1 %v10114_v27  ;;  %v884_v27 = vmax.bf16 %v10309_v50, %v500_v23 }
 0x2dc   : > { %7370 = vmatpush1.bf16.msra.mxu0 %v10117_v28  ;;  %6213 = vmatprep.subr.bf16.mxu1 %v10122_v29  ;;  %v878_v28 = vmax.bf16 %v10309_v50, %v494_v24  ;;  %v890_v29 = vmax.bf16 %v10309_v50, %v506_v25 }
 0x2dd   : > { %7371 = vmatprep.subr.bf16.mxu0 %v10125_v30  ;;  %6089 = vmatmul.mubr.bf16.gmra.mrb[24].mxu1 %v8035_v31  ;;  %v8131_v30 = vcombine.low %v848_v14, %v860_v15  ;;  %v8143_v31 = vcombine.low %v854_v16, %v866_v17  ;;  %v986_v14 = vmax.bf16 %v10309_v50, %v602_v10 }
 0x2de   : > { %7247 = vmatmul.mubr.bf16.gmra.mrb[24].mxu0 %v8047_v32  ;;  %6098 = vmatprep.mubr.bf16.mxu1 %v8060_v33  ;;  %v8156_v32 = vcombine.high %v872_v26, %v884_v27  ;;  %v8168_v33 = vcombine.high %v878_v28, %v890_v29  ;;  %v8167_v43 = vcombine.low %v878_v28, %v890_v29 }
 0x2df   : > { %7256 = vmatprep.mubr.bf16.mxu0 %v8072_v34  ;;  %6214 = vmatpush1.bf16.msra.mxu1 %v10120_v39  ;;  %v512_v34 = vld [vmem:[%s10501_s30 + $0x920] sm:$0xff]  ;;  %v908_v39 = vmax.bf16 %v10309_v50, %v524_v35 }
 0x2e0   : > { %7372 = vmatpush1.bf16.msra.mxu0 %v10123_v40  ;;  %6215 = vmatprep.subr.bf16.mxu1 %v10128_v41  ;;  %v896_v38 = vmax.bf16 %v10309_v50, %v512_v34  ;;  %v902_v40 = vmax.bf16 %v10309_v50, %v518_v36  ;;  %v914_v41 = vmax.bf16 %v10309_v50, %v530_v37  ;;  %v267_v34 = vld [vmem:[%s10501_s30 + $0x178] sm:$0xff] }
 0x2e1   : > { %7373 = vmatprep.subr.bf16.mxu0 %v10131_v42  ;;  %v8155_v42 = vcombine.low %v872_v26, %v884_v27  ;;  %v627_v26 = vmax.bf16 %v10309_v50, %v243_v22 }
 0x2e2   : > { %v8180_v44 = vcombine.high %v896_v38, %v908_v39  ;;  %v8192_v45 = vcombine.high %v902_v40, %v914_v41  ;;  %v8191_v56 = vcombine.low %v902_v40, %v914_v41 }
 0x2e3   : > { %6216 = vmatpush1.bf16.msra.mxu1 %v10126_v47  ;;  %v548_v47 = vld [vmem:[%s10501_s30 + $0xa40] sm:$0xff] }
 0x2e4   : > { %7374 = vmatpush1.bf16.msra.mxu0 %v10129_v48  ;;  %6217 = vmatprep.subr.bf16.mxu1 %v10134_v49  ;;  %v542_v48 = vld [vmem:[%s10501_s30 + $0xa10] sm:$0xff] }
 0x2e5   : > { %7375 = vmatprep.subr.bf16.mxu0 %v10137_v51  ;;  %6099 = vmatmul.mubr.bf16.gmra.mrb[28].mxu1 %v8059_v52  ;;  %v554_v49 = vld [vmem:[%s10501_s30 + $0xa70] sm:$0xff]  ;;  %v920_v51 = vmax.bf16 %v10309_v50, %v536_v46  ;;  %v932_v52 = vmax.bf16 %v10309_v50, %v548_v47  ;;  %v291_v46 = vld [vmem:[%s10501_s30 + $0x238] sm:$0xff] }
 0x2e6   : > { %7257 = vmatmul.mubr.bf16.gmra.mrb[28].mxu0 %v8071_v53  ;;  %6108 = vmatprep.mubr.bf16.mxu1 %v8084_v54  ;;  %v926_v53 = vmax.bf16 %v10309_v50, %v542_v48  ;;  %v938_v54 = vmax.bf16 %v10309_v50, %v554_v49 }
 0x2e7   : > { %7266 = vmatprep.mubr.bf16.mxu0 %v8096_v55  ;;  %6218 = vmatpush1.bf16.msra.mxu1 %v10132_v60  ;;  %v8179_v55 = vcombine.low %v896_v38, %v908_v39  ;;  %v8204_v57 = vcombine.high %v920_v51, %v932_v52  ;;  %v572_v60 = vld [vmem:[%s10501_s30 + $0xb00] sm:$0xff]  ;;  %v8203_v3 = vcombine.low %v920_v51, %v932_v52 }
 0x2e8   : > { %7376 = vmatpush1.bf16.msra.mxu0 %v10135_v61  ;;  %6219 = vmatprep.subr.bf16.mxu1 %v10140_v62  ;;  %v8216_v58 = vcombine.high %v926_v53, %v938_v54  ;;  %v566_v61 = vld [vmem:[%s10501_s30 + $0xad0] sm:$0xff]  ;;  %v956_v0 = vmax.bf16 %v10309_v50, %v572_v60  ;;  %v651_v38 = vmax.bf16 %v10309_v50, %v267_v34 }
 0x2e9   : > { %7377 = vmatprep.subr.bf16.mxu0 %v10143_v63  ;;  %v578_v62 = vld [vmem:[%s10501_s30 + $0xb30] sm:$0xff]  ;;  %v944_v63 = vmax.bf16 %v10309_v50, %v560_v59  ;;  %v950_v1 = vmax.bf16 %v10309_v50, %v566_v61  ;;  %v675_v51 = vmax.bf16 %v10309_v50, %v291_v46  ;;  %v315_v59 = vld [vmem:[%s10501_s30 + $0x2f8] sm:$0xff] }
 0x2ea   : > { %v962_v2 = vmax.bf16 %v10309_v50, %v578_v62 }
 0x2eb   : > { %6220 = vmatpush1.bf16.msra.mxu1 %v10138_v4  ;;  %v8215_v4 = vcombine.low %v926_v53, %v938_v54  ;;  %v8227_v15 = vcombine.low %v944_v63, %v956_v0 }
 0x2ec   : > { %7378 = vmatpush1.bf16.msra.mxu0 %v10141_v5  ;;  %v8228_v5 = vcombine.high %v944_v63, %v956_v0  ;;  %v8239_v16 = vcombine.low %v950_v1, %v962_v2  ;;  %v699_v63 = vmax.bf16 %v10309_v50, %v315_v59 }
 0x2ed   : > { %6109 = vmatmul.mubr.bf16.gmra.mrb[32].mxu1 %v8083_v6  ;;  %v8240_v6 = vcombine.high %v950_v1, %v962_v2 }
 0x2ee   : > { %7267 = vmatmul.mubr.bf16.gmra.mrb[32].mxu0 %v8095_v7  ;;  %6118 = vmatprep.mubr.bf16.mxu1 %v8108_v8  ;;  %v584_v7 = vld [vmem:[%s10501_s30 + $0xb60] sm:$0xff] }
 0x2ef   : > { %7276 = vmatprep.mubr.bf16.mxu0 %v8120_v9  ;;  %v596_v8 = vld [vmem:[%s10501_s30 + $0xbc0] sm:$0xff]  ;;  %v590_v9 = vld [vmem:[%s10501_s30 + $0xb90] sm:$0xff]  ;;  %v968_v11 = vmax.bf16 %v10309_v50, %v584_v7  ;;  %v339_v7 = vld [vmem:[%s10501_s30 + $0x3b8] sm:$0xff] }
 0x2f0   : > { %v980_v12 = vmax.bf16 %v10309_v50, %v596_v8  ;;  %v974_v13 = vmax.bf16 %v10309_v50, %v590_v9 }
 0x2f2   : > { %v8252_v17 = vcombine.high %v968_v11, %v980_v12  ;;  %v8251_v27 = vcombine.low %v968_v11, %v980_v12  ;;  %v8263_v28 = vcombine.low %v974_v13, %v986_v14  ;;  %v723_v11 = vmax.bf16 %v10309_v50, %v339_v7 }
 0x2f5   : > { %6119 = vmatmul.mubr.bf16.gmra.mrb[36].mxu1 %v8107_v18  ;;  %v8264_v18 = vcombine.high %v974_v13, %v986_v14 }
 0x2f6   : > { %7277 = vmatmul.mubr.bf16.gmra.mrb[36].mxu0 %v8119_v19  ;;  %6128 = vmatprep.mubr.bf16.mxu1 %v8132_v20  ;;  %v225_v19 = vld [vmem:[%s10501_s30 + $0x28] sm:$0xff] }
 0x2f7   : > { %7286 = vmatprep.mubr.bf16.mxu0 %v8144_v21  ;;  %v237_v20 = vld [vmem:[%s10501_s30 + $0x88] sm:$0xff]  ;;  %v231_v21 = vld [vmem:[%s10501_s30 + $0x58] sm:$0xff]  ;;  %v609_v23 = vmax.bf16 %v10309_v50, %v225_v19 }
 0x2f8   : > { %v621_v24 = vmax.bf16 %v10309_v50, %v237_v20  ;;  %v615_v25 = vmax.bf16 %v10309_v50, %v231_v21  ;;  %v363_v19 = vld [vmem:[%s10501_s30 + $0x478] sm:$0xff] }
 0x2fa   : > { %v7894_v29 = vcombine.high %v609_v23, %v621_v24  ;;  %v7893_v39 = vcombine.low %v609_v23, %v621_v24  ;;  %v7905_v40 = vcombine.low %v615_v25, %v627_v26  ;;  %v747_v23 = vmax.bf16 %v10309_v50, %v363_v19 }
 0x2fd   : > { %6129 = vmatmul.mubr.bf16.gmra.mrb[40].mxu1 %v8131_v30  ;;  %v7906_v30 = vcombine.high %v615_v25, %v627_v26 }
 0x2fe   : > { %7287 = vmatmul.mubr.bf16.gmra.mrb[40].mxu0 %v8143_v31  ;;  %6138 = vmatprep.mubr.bf16.mxu1 %v8156_v32  ;;  %v249_v31 = vld [vmem:[%s10501_s30 + $0xe8] sm:$0xff] }
 0x2ff   : > { %7296 = vmatprep.mubr.bf16.mxu0 %v8168_v33  ;;  %v261_v32 = vld [vmem:[%s10501_s30 + $0x148] sm:$0xff]  ;;  %v255_v33 = vld [vmem:[%s10501_s30 + $0x118] sm:$0xff]  ;;  %v633_v35 = vmax.bf16 %v10309_v50, %v249_v31 }
 0x300   : > { %v645_v36 = vmax.bf16 %v10309_v50, %v261_v32  ;;  %v639_v37 = vmax.bf16 %v10309_v50, %v255_v33  ;;  %v387_v31 = vld [vmem:[%s10501_s30 + $0x538] sm:$0xff] }
 0x302   : > { %v7918_v41 = vcombine.high %v633_v35, %v645_v36  ;;  %v7917_v52 = vcombine.low %v633_v35, %v645_v36  ;;  %v7929_v53 = vcombine.low %v639_v37, %v651_v38  ;;  %v771_v35 = vmax.bf16 %v10309_v50, %v387_v31 }
 0x305   : > { %6139 = vmatmul.mubr.bf16.gmra.mrb[44].mxu1 %v8155_v42  ;;  %v7930_v42 = vcombine.high %v639_v37, %v651_v38 }
 0x306   : > { %7297 = vmatmul.mubr.bf16.gmra.mrb[44].mxu0 %v8167_v43  ;;  %6148 = vmatprep.mubr.bf16.mxu1 %v8180_v44  ;;  %v273_v43 = vld [vmem:[%s10501_s30 + $0x1a8] sm:$0xff] }
 0x307   : > { %7306 = vmatprep.mubr.bf16.mxu0 %v8192_v45  ;;  %v285_v44 = vld [vmem:[%s10501_s30 + $0x208] sm:$0xff]  ;;  %v279_v45 = vld [vmem:[%s10501_s30 + $0x1d8] sm:$0xff]  ;;  %v657_v47 = vmax.bf16 %v10309_v50, %v273_v43 }
 0x308   : > { %v669_v48 = vmax.bf16 %v10309_v50, %v285_v44  ;;  %v663_v49 = vmax.bf16 %v10309_v50, %v279_v45  ;;  %v411_v43 = vld [vmem:[%s10501_s30 + $0x5f8] sm:$0xff] }
 0x30a   : > { %v7942_v54 = vcombine.high %v657_v47, %v669_v48  ;;  %v7941_v0 = vcombine.low %v657_v47, %v669_v48  ;;  %v7953_v1 = vcombine.low %v663_v49, %v675_v51  ;;  %v795_v47 = vmax.bf16 %v10309_v50, %v411_v43 }
 0x30d   : > { %6149 = vmatmul.mubr.bf16.gmra.mrb[48].mxu1 %v8179_v55  ;;  %v7954_v55 = vcombine.high %v663_v49, %v675_v51 }
 0x30e   : > { %7307 = vmatmul.mubr.bf16.gmra.mrb[48].mxu0 %v8191_v56  ;;  %6158 = vmatprep.mubr.bf16.mxu1 %v8204_v57  ;;  %v297_v56 = vld [vmem:[%s10501_s30 + $0x268] sm:$0xff] }
 0x30f   : > { %7316 = vmatprep.mubr.bf16.mxu0 %v8216_v58  ;;  %v309_v57 = vld [vmem:[%s10501_s30 + $0x2c8] sm:$0xff]  ;;  %v303_v58 = vld [vmem:[%s10501_s30 + $0x298] sm:$0xff]  ;;  %v681_v60 = vmax.bf16 %v10309_v50, %v297_v56 }
 0x310   : > { %v693_v61 = vmax.bf16 %v10309_v50, %v309_v57  ;;  %v687_v62 = vmax.bf16 %v10309_v50, %v303_v58  ;;  %v435_v56 = vld [vmem:[%s10501_s30 + $0x6b8] sm:$0xff] }
 0x312   : > { %v7966_v2 = vcombine.high %v681_v60, %v693_v61  ;;  %v7965_v12 = vcombine.low %v681_v60, %v693_v61  ;;  %v7977_v13 = vcombine.low %v687_v62, %v699_v63  ;;  %v819_v60 = vmax.bf16 %v10309_v50, %v435_v56 }
 0x315   : > { %6159 = vmatmul.mubr.bf16.gmra.mrb[52].mxu1 %v8203_v3  ;;  %v7978_v3 = vcombine.high %v687_v62, %v699_v63 }
 0x316   : > { %7317 = vmatmul.mubr.bf16.gmra.mrb[52].mxu0 %v8215_v4  ;;  %6168 = vmatprep.mubr.bf16.mxu1 %v8228_v5  ;;  %v321_v4 = vld [vmem:[%s10501_s30 + $0x328] sm:$0xff] }
 0x317   : > { %7326 = vmatprep.mubr.bf16.mxu0 %v8240_v6  ;;  %v333_v5 = vld [vmem:[%s10501_s30 + $0x388] sm:$0xff]  ;;  %v327_v6 = vld [vmem:[%s10501_s30 + $0x358] sm:$0xff]  ;;  %v705_v8 = vmax.bf16 %v10309_v50, %v321_v4 }
 0x318   : > { %v717_v9 = vmax.bf16 %v10309_v50, %v333_v5  ;;  %v711_v10 = vmax.bf16 %v10309_v50, %v327_v6  ;;  %v459_v4 = vld [vmem:[%s10501_s30 + $0x778] sm:$0xff] }
 0x31a   : > { %v7990_v14 = vcombine.high %v705_v8, %v717_v9  ;;  %v7989_v24 = vcombine.low %v705_v8, %v717_v9  ;;  %v8001_v25 = vcombine.low %v711_v10, %v723_v11  ;;  %v843_v8 = vmax.bf16 %v10309_v50, %v459_v4 }
 0x31d   : > { %6169 = vmatmul.mubr.bf16.gmra.mrb[56].mxu1 %v8227_v15  ;;  %v8002_v15 = vcombine.high %v711_v10, %v723_v11 }
 0x31e   : > { %7327 = vmatmul.mubr.bf16.gmra.mrb[56].mxu0 %v8239_v16  ;;  %6178 = vmatprep.mubr.bf16.mxu1 %v8252_v17  ;;  %v345_v16 = vld [vmem:[%s10501_s30 + $0x3e8] sm:$0xff] }
 0x31f   : > { %7336 = vmatprep.mubr.bf16.mxu0 %v8264_v18  ;;  %v357_v17 = vld [vmem:[%s10501_s30 + $0x448] sm:$0xff]  ;;  %v351_v18 = vld [vmem:[%s10501_s30 + $0x418] sm:$0xff]  ;;  %v729_v20 = vmax.bf16 %v10309_v50, %v345_v16 }
 0x320   : > { %v741_v21 = vmax.bf16 %v10309_v50, %v357_v17  ;;  %v735_v22 = vmax.bf16 %v10309_v50, %v351_v18  ;;  %v483_v16 = vld [vmem:[%s10501_s30 + $0x838] sm:$0xff] }
 0x322   : > { %v8014_v26 = vcombine.high %v729_v20, %v741_v21  ;;  %v8013_v36 = vcombine.low %v729_v20, %v741_v21  ;;  %v8025_v37 = vcombine.low %v735_v22, %v747_v23  ;;  %v867_v20 = vmax.bf16 %v10309_v50, %v483_v16 }
 0x325   : > { %6179 = vmatmul.mubr.bf16.gmra.mrb[60].mxu1 %v8251_v27  ;;  %v8026_v27 = vcombine.high %v735_v22, %v747_v23 }
 0x326   : > { %7337 = vmatmul.mubr.bf16.gmra.mrb[60].mxu0 %v8263_v28  ;;  %6221 = vmatprep.mubr.bf16.mxu1 %v7894_v29  ;;  %v369_v28 = vld [vmem:[%s10501_s30 + $0x4a8] sm:$0xff] }
 0x327   : > { %7379 = vmatprep.mubr.bf16.mxu0 %v7906_v30  ;;  %v381_v29 = vld [vmem:[%s10501_s30 + $0x508] sm:$0xff]  ;;  %v375_v30 = vld [vmem:[%s10501_s30 + $0x4d8] sm:$0xff]  ;;  %v753_v32 = vmax.bf16 %v10309_v50, %v369_v28 }
 0x328   : > { %v765_v33 = vmax.bf16 %v10309_v50, %v381_v29  ;;  %v759_v34 = vmax.bf16 %v10309_v50, %v375_v30  ;;  %v507_v28 = vld [vmem:[%s10501_s30 + $0x8f8] sm:$0xff] }
 0x32a   : > { %v8038_v38 = vcombine.high %v753_v32, %v765_v33  ;;  %v8037_v48 = vcombine.low %v753_v32, %v765_v33  ;;  %v8049_v49 = vcombine.low %v759_v34, %v771_v35  ;;  %v891_v32 = vmax.bf16 %v10309_v50, %v507_v28 }
 0x32d   : > { %6222 = vmatmul.mubr.bf16.vlgmr.msra.gmra.mrb[0].mxu1 %v7893_v39  ;;  %v8050_v39 = vcombine.high %v759_v34, %v771_v35 }
 0x32e   : > { %7380 = vmatmul.mubr.bf16.vlgmr.msra.gmra.mrb[0].mxu0 %v7905_v40  ;;  %6231 = vmatprep.mubr.bf16.mxu1 %v7918_v41  ;;  %v393_v40 = vld [vmem:[%s10501_s30 + $0x568] sm:$0xff] }
 0x32f   : > { %7389 = vmatprep.mubr.bf16.mxu0 %v7930_v42  ;;  %v405_v41 = vld [vmem:[%s10501_s30 + $0x5c8] sm:$0xff]  ;;  %v399_v42 = vld [vmem:[%s10501_s30 + $0x598] sm:$0xff]  ;;  %v777_v44 = vmax.bf16 %v10309_v50, %v393_v40 }
 0x330   : > { %v789_v45 = vmax.bf16 %v10309_v50, %v405_v41  ;;  %v783_v46 = vmax.bf16 %v10309_v50, %v399_v42  ;;  %v531_v40 = vld [vmem:[%s10501_s30 + $0x9b8] sm:$0xff] }
 0x332   : > { %v8062_v51 = vcombine.high %v777_v44, %v789_v45  ;;  %v8061_v61 = vcombine.low %v777_v44, %v789_v45  ;;  %v8073_v62 = vcombine.low %v783_v46, %v795_v47  ;;  %v915_v44 = vmax.bf16 %v10309_v50, %v531_v40 }
 0x335   : > { %6232 = vmatmul.mubr.bf16.gmra.mrb[4].mxu1 %v7917_v52  ;;  %v8074_v52 = vcombine.high %v783_v46, %v795_v47 }
 0x336   : > { %7390 = vmatmul.mubr.bf16.gmra.mrb[4].mxu0 %v7929_v53  ;;  %6241 = vmatprep.mubr.bf16.mxu1 %v7942_v54  ;;  %v417_v53 = vld [vmem:[%s10501_s30 + $0x628] sm:$0xff] }
 0x337   : > { %7399 = vmatprep.mubr.bf16.mxu0 %v7954_v55  ;;  %v429_v54 = vld [vmem:[%s10501_s30 + $0x688] sm:$0xff]  ;;  %v423_v55 = vld [vmem:[%s10501_s30 + $0x658] sm:$0xff]  ;;  %v801_v57 = vmax.bf16 %v10309_v50, %v417_v53 }
 0x338   : > { %v813_v58 = vmax.bf16 %v10309_v50, %v429_v54  ;;  %v807_v59 = vmax.bf16 %v10309_v50, %v423_v55  ;;  %v555_v53 = vld [vmem:[%s10501_s30 + $0xa78] sm:$0xff] }
 0x33a   : > { %v8086_v63 = vcombine.high %v801_v57, %v813_v58  ;;  %v8085_v9 = vcombine.low %v801_v57, %v813_v58  ;;  %v8097_v10 = vcombine.low %v807_v59, %v819_v60  ;;  %v939_v57 = vmax.bf16 %v10309_v50, %v555_v53 }
 0x33d   : > { %6242 = vmatmul.mubr.bf16.gmra.mrb[8].mxu1 %v7941_v0  ;;  %v8098_v0 = vcombine.high %v807_v59, %v819_v60 }
 0x33e   : > { %7400 = vmatmul.mubr.bf16.gmra.mrb[8].mxu0 %v7953_v1  ;;  %6251 = vmatprep.mubr.bf16.mxu1 %v7966_v2  ;;  %v441_v1 = vld [vmem:[%s10501_s30 + $0x6e8] sm:$0xff] }
 0x33f   : > { %7409 = vmatprep.mubr.bf16.mxu0 %v7978_v3  ;;  %v453_v2 = vld [vmem:[%s10501_s30 + $0x748] sm:$0xff]  ;;  %v447_v3 = vld [vmem:[%s10501_s30 + $0x718] sm:$0xff]  ;;  %v825_v5 = vmax.bf16 %v10309_v50, %v441_v1 }
 0x340   : > { %v837_v6 = vmax.bf16 %v10309_v50, %v453_v2  ;;  %v831_v7 = vmax.bf16 %v10309_v50, %v447_v3  ;;  %v579_v1 = vld [vmem:[%s10501_s30 + $0xb38] sm:$0xff] }
 0x342   : > { %v8110_v11 = vcombine.high %v825_v5, %v837_v6  ;;  %v8109_v21 = vcombine.low %v825_v5, %v837_v6  ;;  %v8121_v22 = vcombine.low %v831_v7, %v843_v8  ;;  %v963_v5 = vmax.bf16 %v10309_v50, %v579_v1 }
 0x345   : > { %6252 = vmatmul.mubr.bf16.gmra.mrb[12].mxu1 %v7965_v12  ;;  %v8122_v12 = vcombine.high %v831_v7, %v843_v8 }
 0x346   : > { %7410 = vmatmul.mubr.bf16.gmra.mrb[12].mxu0 %v7977_v13  ;;  %6261 = vmatprep.mubr.bf16.mxu1 %v7990_v14  ;;  %v465_v13 = vld [vmem:[%s10501_s30 + $0x7a8] sm:$0xff] }
 0x347   : > { %7419 = vmatprep.mubr.bf16.mxu0 %v8002_v15  ;;  %v477_v14 = vld [vmem:[%s10501_s30 + $0x808] sm:$0xff]  ;;  %v471_v15 = vld [vmem:[%s10501_s30 + $0x7d8] sm:$0xff]  ;;  %v849_v17 = vmax.bf16 %v10309_v50, %v465_v13 }
 0x348   : > { %v861_v18 = vmax.bf16 %v10309_v50, %v477_v14  ;;  %v855_v19 = vmax.bf16 %v10309_v50, %v471_v15  ;;  %v603_v13 = vld [vmem:[%s10501_s30 + $0xbf8] sm:$0xff] }
 0x34a   : > { %v8134_v23 = vcombine.high %v849_v17, %v861_v18  ;;  %v8133_v33 = vcombine.low %v849_v17, %v861_v18  ;;  %v8145_v34 = vcombine.low %v855_v19, %v867_v20  ;;  %v987_v17 = vmax.bf16 %v10309_v50, %v603_v13 }
 0x34d   : > { %6262 = vmatmul.mubr.bf16.gmra.mrb[16].mxu1 %v7989_v24  ;;  %v8146_v24 = vcombine.high %v855_v19, %v867_v20 }
 0x34e   : > { %7420 = vmatmul.mubr.bf16.gmra.mrb[16].mxu0 %v8001_v25  ;;  %6271 = vmatprep.mubr.bf16.mxu1 %v8014_v26  ;;  %v489_v25 = vld [vmem:[%s10501_s30 + $0x868] sm:$0xff] }
 0x34f   : > { %7429 = vmatprep.mubr.bf16.mxu0 %v8026_v27  ;;  %v501_v26 = vld [vmem:[%s10501_s30 + $0x8c8] sm:$0xff]  ;;  %v495_v27 = vld [vmem:[%s10501_s30 + $0x898] sm:$0xff]  ;;  %v873_v29 = vmax.bf16 %v10309_v50, %v489_v25 }
 0x350   : > { %v885_v30 = vmax.bf16 %v10309_v50, %v501_v26  ;;  %v879_v31 = vmax.bf16 %v10309_v50, %v495_v27  ;;  %v1372_v27 = vld [vmem:[#allocation7] sm:$0x3] }
 0x352   : > { %v8158_v35 = vcombine.high %v873_v29, %v885_v30  ;;  %v8157_v45 = vcombine.low %v873_v29, %v885_v30  ;;  %v8169_v46 = vcombine.low %v879_v31, %v891_v32 }
 0x355   : > { %6272 = vmatmul.mubr.bf16.gmra.mrb[20].mxu1 %v8013_v36  ;;  %v8170_v36 = vcombine.high %v879_v31, %v891_v32 }
 0x356   : > { %7430 = vmatmul.mubr.bf16.gmra.mrb[20].mxu0 %v8025_v37  ;;  %6281 = vmatprep.mubr.bf16.mxu1 %v8038_v38  ;;  %v513_v37 = vld [vmem:[%s10501_s30 + $0x928] sm:$0xff] }
 0x357   : > { %7439 = vmatprep.mubr.bf16.mxu0 %v8050_v39  ;;  %v525_v38 = vld [vmem:[%s10501_s30 + $0x988] sm:$0xff]  ;;  %v519_v39 = vld [vmem:[%s10501_s30 + $0x958] sm:$0xff]  ;;  %v897_v41 = vmax.bf16 %v10309_v50, %v513_v37 }
 0x358   : > { %v909_v42 = vmax.bf16 %v10309_v50, %v525_v38  ;;  %v903_v43 = vmax.bf16 %v10309_v50, %v519_v39 }
 0x35a   : > { %v8182_v47 = vcombine.high %v897_v41, %v909_v42  ;;  %v8181_v58 = vcombine.low %v897_v41, %v909_v42  ;;  %v8193_v59 = vcombine.low %v903_v43, %v915_v44 }
 0x35d   : > { %6282 = vmatmul.mubr.bf16.gmra.mrb[24].mxu1 %v8037_v48  ;;  %v8194_v48 = vcombine.high %v903_v43, %v915_v44 }
 0x35e   : > { %7440 = vmatmul.mubr.bf16.gmra.mrb[24].mxu0 %v8049_v49  ;;  %6291 = vmatprep.mubr.bf16.mxu1 %v8062_v51  ;;  %v537_v49 = vld [vmem:[%s10501_s30 + $0x9e8] sm:$0xff] }
 0x35f   : > { %7449 = vmatprep.mubr.bf16.mxu0 %v8074_v52  ;;  %v549_v51 = vld [vmem:[%s10501_s30 + $0xa48] sm:$0xff]  ;;  %v543_v52 = vld [vmem:[%s10501_s30 + $0xa18] sm:$0xff]  ;;  %v921_v54 = vmax.bf16 %v10309_v50, %v537_v49 }
 0x360   : > { %v933_v55 = vmax.bf16 %v10309_v50, %v549_v51  ;;  %v927_v56 = vmax.bf16 %v10309_v50, %v543_v52 }
 0x362   : > { %v8206_v60 = vcombine.high %v921_v54, %v933_v55  ;;  %v8205_v6 = vcombine.low %v921_v54, %v933_v55  ;;  %v8217_v7 = vcombine.low %v927_v56, %v939_v57 }
 0x365   : > { %6292 = vmatmul.mubr.bf16.gmra.mrb[28].mxu1 %v8061_v61  ;;  %v8218_v61 = vcombine.high %v927_v56, %v939_v57 }
 0x366   : > { %7450 = vmatmul.mubr.bf16.gmra.mrb[28].mxu0 %v8073_v62  ;;  %6301 = vmatprep.mubr.bf16.mxu1 %v8086_v63  ;;  %v561_v62 = vld [vmem:[%s10501_s30 + $0xaa8] sm:$0xff] }
 0x367   : > { %7459 = vmatprep.mubr.bf16.mxu0 %v8098_v0  ;;  %v573_v63 = vld [vmem:[%s10501_s30 + $0xb08] sm:$0xff]  ;;  %v567_v0 = vld [vmem:[%s10501_s30 + $0xad8] sm:$0xff]  ;;  %v945_v2 = vmax.bf16 %v10309_v50, %v561_v62 }
 0x368   : > { %v957_v3 = vmax.bf16 %v10309_v50, %v573_v63  ;;  %v951_v4 = vmax.bf16 %v10309_v50, %v567_v0 }
 0x36a   : > { %v8230_v8 = vcombine.high %v945_v2, %v957_v3  ;;  %v8229_v18 = vcombine.low %v945_v2, %v957_v3  ;;  %v8241_v19 = vcombine.low %v951_v4, %v963_v5 }
 0x36d   : > { %6302 = vmatmul.mubr.bf16.gmra.mrb[32].mxu1 %v8085_v9  ;;  %v8242_v9 = vcombine.high %v951_v4, %v963_v5 }
 0x36e   : > { %7460 = vmatmul.mubr.bf16.gmra.mrb[32].mxu0 %v8097_v10  ;;  %6311 = vmatprep.mubr.bf16.mxu1 %v8110_v11  ;;  %v585_v10 = vld [vmem:[%s10501_s30 + $0xb68] sm:$0xff] }
 0x36f   : > { %7469 = vmatprep.mubr.bf16.mxu0 %v8122_v12  ;;  %v597_v11 = vld [vmem:[%s10501_s30 + $0xbc8] sm:$0xff]  ;;  %v591_v12 = vld [vmem:[%s10501_s30 + $0xb98] sm:$0xff]  ;;  %v969_v14 = vmax.bf16 %v10309_v50, %v585_v10 }
 0x370   : > { %v981_v15 = vmax.bf16 %v10309_v50, %v597_v11  ;;  %v975_v16 = vmax.bf16 %v10309_v50, %v591_v12 }
 0x372   : > { %v8254_v20 = vcombine.high %v969_v14, %v981_v15 }
 0x375   : > { %6312 = vmatmul.mubr.bf16.gmra.mrb[36].mxu1 %v8109_v21  ;;  %v8266_v21 = vcombine.high %v975_v16, %v987_v17 }
 0x376   : > { %7470 = vmatmul.mubr.bf16.gmra.mrb[36].mxu0 %v8121_v22  ;;  %6321 = vmatprep.mubr.bf16.mxu1 %v8134_v23  ;;  %v8253_v22 = vcombine.low %v969_v14, %v981_v15  ;;  %v8265_v23 = vcombine.low %v975_v16, %v987_v17 }
 0x377   : > { %7479 = vmatprep.mubr.bf16.mxu0 %v8146_v24  ;;  %v1374_v24 = vlaneseq }
 0x379   : > { %v1375_v25 = vshrl.u32 %v1374_v24, 7 }
 0x37b   : > { %v1376_v26 = vsub.s32 0, %v1375_v25  ;;  %v1380_v28 = vsub.s32 1, %v1375_v25 }
 0x37d   : > { %6322 = vmatmul.mubr.bf16.gmra.mrb[40].mxu1 %v8133_v33  ;;  %v11295_v29 = vrot.slane %v1372_v27, %v1376_v26  ;;  %v11297_v50 = vrot.slane %v1372_v27, %v1380_v28 }
 0x37e   : > { %7480 = vmatmul.mubr.bf16.gmra.mrb[40].mxu0 %v8145_v34  ;;  %6331 = vmatprep.mubr.bf16.mxu1 %v8158_v35 }
 0x37f   : > { %7489 = vmatprep.mubr.bf16.mxu0 %v8170_v36 }
 0x385   : > { %6332 = vmatmul.mubr.bf16.gmra.mrb[44].mxu1 %v8157_v45 }
 0x386   : > { %7490 = vmatmul.mubr.bf16.gmra.mrb[44].mxu0 %v8169_v46  ;;  %6341 = vmatprep.mubr.bf16.mxu1 %v8182_v47 }
 0x387   : > { %7499 = vmatprep.mubr.bf16.mxu0 %v8194_v48 }
 0x38d   : > { %6342 = vmatmul.mubr.bf16.gmra.mrb[48].mxu1 %v8181_v58 }
 0x38e   : > { %7500 = vmatmul.mubr.bf16.gmra.mrb[48].mxu0 %v8193_v59  ;;  %6351 = vmatprep.mubr.bf16.mxu1 %v8206_v60 }
 0x38f   : > { %7509 = vmatprep.mubr.bf16.mxu0 %v8218_v61 }
 0x395   : > { %6352 = vmatmul.mubr.bf16.gmra.mrb[52].mxu1 %v8205_v6 }
 0x396   : > { %7510 = vmatmul.mubr.bf16.gmra.mrb[52].mxu0 %v8217_v7  ;;  %6361 = vmatprep.mubr.bf16.mxu1 %v8230_v8 }
 0x397   : > { %7519 = vmatprep.mubr.bf16.mxu0 %v8242_v9 }
 0x39d   : > { %6362 = vmatmul.mubr.bf16.gmra.mrb[56].mxu1 %v8229_v18 }
 0x39e   : > { %7520 = vmatmul.mubr.bf16.gmra.mrb[56].mxu0 %v8241_v19  ;;  %6371 = vmatprep.mubr.bf16.mxu1 %v8254_v20 }
 0x39f   : > { %7529 = vmatprep.mubr.bf16.mxu0 %v8266_v21 }
 0x3a5   : > { %6372 = vmatmul.mubr.bf16.gmra.mrb[60].mxu1 %v8253_v22 }
 0x3a6   : > { %7530 = vmatmul.mubr.bf16.gmra.mrb[60].mxu0 %v8265_v23 }
 0x400   : > { %v6223_v30 = vpop.f32.mrb[0].mxu1 }
 0x401   : > { %v7381_v31 = vpop.f32.mrb[0].mxu0  ;;  %v8723_v32 = vadd.f32 %v6223_v30, %v11295_v29  ;;  %v6225_v33 = vpop.f32.mrb[1].mxu1 }
 0x402   : > { %v7383_v34 = vpop.f32.mrb[1].mxu0  ;;  %v8725_v35 = vadd.f32 %v6225_v33, %v11297_v50  ;;  %v6227_v36 = vpop.f32.mrb[2].mxu1 }
 0x403   : > { %v7385_v37 = vpop.f32.mrb[2].mxu0  ;;  %v8724_v38 = vadd.f32 %v8723_v32, %v7381_v31  ;;  %v8727_v39 = vadd.f32 %v6227_v36, %v11295_v29  ;;  %v6229_v40 = vpop.f32.mrb[3].mxu1 }
 0x404   : > { %v7387_v41 = vpop.f32.mrb[3].mxu0  ;;  %v8726_v42 = vadd.f32 %v8725_v35, %v7383_v34  ;;  %v8729_v43 = vadd.f32 %v6229_v40, %v11297_v50 }
 0x405   : > { %v8728_v44 = vadd.f32 %v8727_v39, %v7385_v37 }
 0x406   : > { %v8689_v45 = vpack.c.bf16 %v8726_v42, %v8724_v38  ;;  %v8730_v46 = vadd.f32 %v8729_v43, %v7387_v41 }
 0x408   : > { %7732 = vst [vmem:[%s11304_s20] sm:$0xff] %v8689_v45  ;;  %v8690_v47 = vpack.c.bf16 %v8730_v46, %v8728_v44  ;;  %v6233_v48 = vpop.f32.mrb[4].mxu1 }
 0x409   : > { %v7391_v49 = vpop.f32.mrb[4].mxu0  ;;  %v8731_v51 = vadd.f32 %v6233_v48, %v11295_v29  ;;  %v6235_v52 = vpop.f32.mrb[5].mxu1 }
 0x40a   : > { %v7393_v53 = vpop.f32.mrb[5].mxu0  ;;  %7733 = vst [vmem:[%s11304_s20 + $0x8] sm:$0xff] %v8690_v47  ;;  %v8733_v54 = vadd.f32 %v6235_v52, %v11297_v50  ;;  %v6237_v55 = vpop.f32.mrb[6].mxu1 }
 0x40b   : > { %v7395_v56 = vpop.f32.mrb[6].mxu0  ;;  %v8732_v57 = vadd.f32 %v8731_v51, %v7391_v49  ;;  %v8735_v58 = vadd.f32 %v6237_v55, %v11295_v29  ;;  %v6239_v59 = vpop.f32.mrb[7].mxu1 }
 0x40c   : > { %v7397_v60 = vpop.f32.mrb[7].mxu0  ;;  %v8734_v61 = vadd.f32 %v8733_v54, %v7393_v53  ;;  %v8737_v62 = vadd.f32 %v6239_v59, %v11297_v50 }
 0x40d   : > { %v8736_v63 = vadd.f32 %v8735_v58, %v7395_v56 }
 0x40e   : > { %v8691_v0 = vpack.c.bf16 %v8734_v61, %v8732_v57  ;;  %v8738_v1 = vadd.f32 %v8737_v62, %v7397_v60 }
 0x410   : > { %7734 = vst [vmem:[%s11304_s20 + $0x10] sm:$0xff] %v8691_v0  ;;  %v8692_v2 = vpack.c.bf16 %v8738_v1, %v8736_v63  ;;  %v6243_v3 = vpop.f32.mrb[8].mxu1 }
 0x411   : > { %v7401_v4 = vpop.f32.mrb[8].mxu0  ;;  %v8739_v5 = vadd.f32 %v6243_v3, %v11295_v29  ;;  %v6245_v6 = vpop.f32.mrb[9].mxu1 }
 0x412   : > { %v7403_v7 = vpop.f32.mrb[9].mxu0  ;;  %7735 = vst [vmem:[%s11304_s20 + $0x18] sm:$0xff] %v8692_v2  ;;  %v8741_v8 = vadd.f32 %v6245_v6, %v11297_v50  ;;  %v6247_v9 = vpop.f32.mrb[10].mxu1 }
 0x413   : > { %v7405_v10 = vpop.f32.mrb[10].mxu0  ;;  %v8740_v11 = vadd.f32 %v8739_v5, %v7401_v4  ;;  %v8743_v12 = vadd.f32 %v6247_v9, %v11295_v29  ;;  %v6249_v13 = vpop.f32.mrb[11].mxu1 }
 0x414   : > { %v7407_v14 = vpop.f32.mrb[11].mxu0  ;;  %v8742_v15 = vadd.f32 %v8741_v8, %v7403_v7  ;;  %v8745_v16 = vadd.f32 %v6249_v13, %v11297_v50 }
 0x415   : > { %v8744_v17 = vadd.f32 %v8743_v12, %v7405_v10 }
 0x416   : > { %v8693_v18 = vpack.c.bf16 %v8742_v15, %v8740_v11  ;;  %v8746_v19 = vadd.f32 %v8745_v16, %v7407_v14 }
 0x418   : > { %7736 = vst [vmem:[%s11304_s20 + $0x20] sm:$0xff] %v8693_v18  ;;  %v8694_v20 = vpack.c.bf16 %v8746_v19, %v8744_v17  ;;  %v6253_v21 = vpop.f32.mrb[12].mxu1 }
 0x419   : > { %v7411_v22 = vpop.f32.mrb[12].mxu0  ;;  %v8747_v23 = vadd.f32 %v6253_v21, %v11295_v29  ;;  %v6255_v24 = vpop.f32.mrb[13].mxu1 }
 0x41a   : > { %v7413_v25 = vpop.f32.mrb[13].mxu0  ;;  %7737 = vst [vmem:[%s11304_s20 + $0x28] sm:$0xff] %v8694_v20  ;;  %v8749_v26 = vadd.f32 %v6255_v24, %v11297_v50  ;;  %v6257_v27 = vpop.f32.mrb[14].mxu1 }
 0x41b   : > { %v7415_v28 = vpop.f32.mrb[14].mxu0  ;;  %v8748_v30 = vadd.f32 %v8747_v23, %v7411_v22  ;;  %v8751_v31 = vadd.f32 %v6257_v27, %v11295_v29  ;;  %v6259_v32 = vpop.f32.mrb[15].mxu1 }
 0x41c   : > { %v7417_v33 = vpop.f32.mrb[15].mxu0  ;;  %v8750_v34 = vadd.f32 %v8749_v26, %v7413_v25  ;;  %v8753_v35 = vadd.f32 %v6259_v32, %v11297_v50 }
 0x41d   : > { %v8752_v36 = vadd.f32 %v8751_v31, %v7415_v28 }
 0x41e   : > { %v8695_v37 = vpack.c.bf16 %v8750_v34, %v8748_v30  ;;  %v8754_v38 = vadd.f32 %v8753_v35, %v7417_v33 }
 0x420   : > { %7738 = vst [vmem:[%s11304_s20 + $0x30] sm:$0xff] %v8695_v37  ;;  %v8696_v39 = vpack.c.bf16 %v8754_v38, %v8752_v36  ;;  %v6263_v40 = vpop.f32.mrb[16].mxu1 }
 0x421   : > { %v7421_v41 = vpop.f32.mrb[16].mxu0  ;;  %v8755_v42 = vadd.f32 %v6263_v40, %v11295_v29  ;;  %v6265_v43 = vpop.f32.mrb[17].mxu1 }
 0x422   : > { %v7423_v44 = vpop.f32.mrb[17].mxu0  ;;  %7739 = vst [vmem:[%s11304_s20 + $0x38] sm:$0xff] %v8696_v39  ;;  %v8757_v45 = vadd.f32 %v6265_v43, %v11297_v50  ;;  %v6267_v46 = vpop.f32.mrb[18].mxu1 }
 0x423   : > { %v7425_v47 = vpop.f32.mrb[18].mxu0  ;;  %v8756_v48 = vadd.f32 %v8755_v42, %v7421_v41  ;;  %v8759_v49 = vadd.f32 %v6267_v46, %v11295_v29  ;;  %v6269_v51 = vpop.f32.mrb[19].mxu1 }
 0x424   : > { %v7427_v52 = vpop.f32.mrb[19].mxu0  ;;  %v8758_v53 = vadd.f32 %v8757_v45, %v7423_v44  ;;  %v8761_v54 = vadd.f32 %v6269_v51, %v11297_v50 }
 0x425   : > { %v8760_v55 = vadd.f32 %v8759_v49, %v7425_v47 }
 0x426   : > { %v8697_v56 = vpack.c.bf16 %v8758_v53, %v8756_v48  ;;  %v8762_v57 = vadd.f32 %v8761_v54, %v7427_v52 }
 0x428   : > { %7740 = vst [vmem:[%s11304_s20 + $0x40] sm:$0xff] %v8697_v56  ;;  %v8698_v58 = vpack.c.bf16 %v8762_v57, %v8760_v55  ;;  %v6273_v59 = vpop.f32.mrb[20].mxu1 }
 0x429   : > { %v7431_v60 = vpop.f32.mrb[20].mxu0  ;;  %v8763_v61 = vadd.f32 %v6273_v59, %v11295_v29  ;;  %v6275_v62 = vpop.f32.mrb[21].mxu1 }
 0x42a   : > { %v7433_v63 = vpop.f32.mrb[21].mxu0  ;;  %7741 = vst [vmem:[%s11304_s20 + $0x48] sm:$0xff] %v8698_v58  ;;  %v8765_v0 = vadd.f32 %v6275_v62, %v11297_v50  ;;  %v6277_v1 = vpop.f32.mrb[22].mxu1 }
 0x42b   : > { %v7435_v2 = vpop.f32.mrb[22].mxu0  ;;  %v8764_v3 = vadd.f32 %v8763_v61, %v7431_v60  ;;  %v8767_v4 = vadd.f32 %v6277_v1, %v11295_v29  ;;  %v6279_v5 = vpop.f32.mrb[23].mxu1 }
 0x42c   : > { %v7437_v6 = vpop.f32.mrb[23].mxu0  ;;  %v8766_v7 = vadd.f32 %v8765_v0, %v7433_v63  ;;  %v8769_v8 = vadd.f32 %v6279_v5, %v11297_v50 }
 0x42d   : > { %v8768_v9 = vadd.f32 %v8767_v4, %v7435_v2 }
 0x42e   : > { %v8699_v10 = vpack.c.bf16 %v8766_v7, %v8764_v3  ;;  %v8770_v11 = vadd.f32 %v8769_v8, %v7437_v6 }
 0x430   : > { %7742 = vst [vmem:[%s11304_s20 + $0x50] sm:$0xff] %v8699_v10  ;;  %v8700_v12 = vpack.c.bf16 %v8770_v11, %v8768_v9  ;;  %v6283_v13 = vpop.f32.mrb[24].mxu1 }
 0x431   : > { %v7441_v14 = vpop.f32.mrb[24].mxu0  ;;  %v8771_v15 = vadd.f32 %v6283_v13, %v11295_v29  ;;  %v6285_v16 = vpop.f32.mrb[25].mxu1 }
 0x432   : > { %v7443_v17 = vpop.f32.mrb[25].mxu0  ;;  %7743 = vst [vmem:[%s11304_s20 + $0x58] sm:$0xff] %v8700_v12  ;;  %v8773_v18 = vadd.f32 %v6285_v16, %v11297_v50  ;;  %v6287_v19 = vpop.f32.mrb[26].mxu1 }
 0x433   : > { %v7445_v20 = vpop.f32.mrb[26].mxu0  ;;  %v8772_v21 = vadd.f32 %v8771_v15, %v7441_v14  ;;  %v8775_v22 = vadd.f32 %v6287_v19, %v11295_v29  ;;  %v6289_v23 = vpop.f32.mrb[27].mxu1 }
 0x434   : > { %v7447_v24 = vpop.f32.mrb[27].mxu0  ;;  %v8774_v25 = vadd.f32 %v8773_v18, %v7443_v17  ;;  %v8777_v26 = vadd.f32 %v6289_v23, %v11297_v50 }
 0x435   : > { %v8776_v27 = vadd.f32 %v8775_v22, %v7445_v20 }
 0x436   : > { %v8701_v28 = vpack.c.bf16 %v8774_v25, %v8772_v21  ;;  %v8778_v30 = vadd.f32 %v8777_v26, %v7447_v24 }
 0x438   : > { %7744 = vst [vmem:[%s11304_s20 + $0x60] sm:$0xff] %v8701_v28  ;;  %v8702_v31 = vpack.c.bf16 %v8778_v30, %v8776_v27  ;;  %v6293_v32 = vpop.f32.mrb[28].mxu1 }
 0x439   : > { %v7451_v33 = vpop.f32.mrb[28].mxu0  ;;  %v8779_v34 = vadd.f32 %v6293_v32, %v11295_v29  ;;  %v6295_v35 = vpop.f32.mrb[29].mxu1 }
 0x43a   : > { %v7453_v36 = vpop.f32.mrb[29].mxu0  ;;  %7745 = vst [vmem:[%s11304_s20 + $0x68] sm:$0xff] %v8702_v31  ;;  %v8781_v37 = vadd.f32 %v6295_v35, %v11297_v50  ;;  %v6297_v38 = vpop.f32.mrb[30].mxu1 }
 0x43b   : > { %v7455_v39 = vpop.f32.mrb[30].mxu0  ;;  %v8780_v40 = vadd.f32 %v8779_v34, %v7451_v33  ;;  %v8783_v41 = vadd.f32 %v6297_v38, %v11295_v29  ;;  %v6299_v42 = vpop.f32.mrb[31].mxu1 }
 0x43c   : > { %v7457_v43 = vpop.f32.mrb[31].mxu0  ;;  %v8782_v44 = vadd.f32 %v8781_v37, %v7453_v36  ;;  %v8785_v45 = vadd.f32 %v6299_v42, %v11297_v50 }
 0x43d   : > { %v8784_v46 = vadd.f32 %v8783_v41, %v7455_v39 }
 0x43e   : > { %v8703_v47 = vpack.c.bf16 %v8782_v44, %v8780_v40  ;;  %v8786_v48 = vadd.f32 %v8785_v45, %v7457_v43 }
 0x440   : > { %7746 = vst [vmem:[%s11304_s20 + $0x70] sm:$0xff] %v8703_v47  ;;  %v8704_v49 = vpack.c.bf16 %v8786_v48, %v8784_v46  ;;  %v6303_v51 = vpop.f32.mrb[32].mxu1 }
 0x441   : > { %v7461_v52 = vpop.f32.mrb[32].mxu0  ;;  %v8787_v53 = vadd.f32 %v6303_v51, %v11295_v29  ;;  %v6305_v54 = vpop.f32.mrb[33].mxu1 }
 0x442   : > { %v7463_v55 = vpop.f32.mrb[33].mxu0  ;;  %7747 = vst [vmem:[%s11304_s20 + $0x78] sm:$0xff] %v8704_v49  ;;  %v8789_v56 = vadd.f32 %v6305_v54, %v11297_v50  ;;  %v6307_v57 = vpop.f32.mrb[34].mxu1 }
 0x443   : > { %v7465_v58 = vpop.f32.mrb[34].mxu0  ;;  %v8788_v59 = vadd.f32 %v8787_v53, %v7461_v52  ;;  %v8791_v60 = vadd.f32 %v6307_v57, %v11295_v29  ;;  %v6309_v61 = vpop.f32.mrb[35].mxu1 }
 0x444   : > { %v7467_v62 = vpop.f32.mrb[35].mxu0  ;;  %v8790_v63 = vadd.f32 %v8789_v56, %v7463_v55  ;;  %v8793_v0 = vadd.f32 %v6309_v61, %v11297_v50 }
 0x445   : > { %v8792_v1 = vadd.f32 %v8791_v60, %v7465_v58 }
 0x446   : > { %v8705_v2 = vpack.c.bf16 %v8790_v63, %v8788_v59  ;;  %v8794_v3 = vadd.f32 %v8793_v0, %v7467_v62 }
 0x448   : > { %7748 = vst [vmem:[%s11304_s20 + $0x80] sm:$0xff] %v8705_v2  ;;  %v8706_v4 = vpack.c.bf16 %v8794_v3, %v8792_v1  ;;  %v6313_v5 = vpop.f32.mrb[36].mxu1 }
 0x449   : > { %v7471_v6 = vpop.f32.mrb[36].mxu0  ;;  %v8795_v7 = vadd.f32 %v6313_v5, %v11295_v29  ;;  %v6315_v8 = vpop.f32.mrb[37].mxu1 }
 0x44a   : > { %v7473_v9 = vpop.f32.mrb[37].mxu0  ;;  %7749 = vst [vmem:[%s11304_s20 + $0x88] sm:$0xff] %v8706_v4  ;;  %v8797_v10 = vadd.f32 %v6315_v8, %v11297_v50  ;;  %v6317_v11 = vpop.f32.mrb[38].mxu1 }
 0x44b   : > { %v7475_v12 = vpop.f32.mrb[38].mxu0  ;;  %v8796_v13 = vadd.f32 %v8795_v7, %v7471_v6  ;;  %v8799_v14 = vadd.f32 %v6317_v11, %v11295_v29  ;;  %v6319_v15 = vpop.f32.mrb[39].mxu1 }
 0x44c   : > { %v7477_v16 = vpop.f32.mrb[39].mxu0  ;;  %v8798_v17 = vadd.f32 %v8797_v10, %v7473_v9  ;;  %v8801_v18 = vadd.f32 %v6319_v15, %v11297_v50 }
 0x44d   : > { %v8800_v19 = vadd.f32 %v8799_v14, %v7475_v12 }
 0x44e   : > { %v8707_v20 = vpack.c.bf16 %v8798_v17, %v8796_v13  ;;  %v8802_v21 = vadd.f32 %v8801_v18, %v7477_v16 }
 0x450   : > { %7750 = vst [vmem:[%s11304_s20 + $0x90] sm:$0xff] %v8707_v20  ;;  %v8708_v22 = vpack.c.bf16 %v8802_v21, %v8800_v19  ;;  %v6323_v23 = vpop.f32.mrb[40].mxu1 }
 0x451   : > { %v7481_v24 = vpop.f32.mrb[40].mxu0  ;;  %v8803_v25 = vadd.f32 %v6323_v23, %v11295_v29  ;;  %v6325_v26 = vpop.f32.mrb[41].mxu1 }
 0x452   : > { %v7483_v27 = vpop.f32.mrb[41].mxu0  ;;  %7751 = vst [vmem:[%s11304_s20 + $0x98] sm:$0xff] %v8708_v22  ;;  %v8805_v28 = vadd.f32 %v6325_v26, %v11297_v50  ;;  %v6327_v30 = vpop.f32.mrb[42].mxu1 }
 0x453   : > { %v7485_v31 = vpop.f32.mrb[42].mxu0  ;;  %v8804_v32 = vadd.f32 %v8803_v25, %v7481_v24  ;;  %v8807_v33 = vadd.f32 %v6327_v30, %v11295_v29  ;;  %v6329_v34 = vpop.f32.mrb[43].mxu1 }
 0x454   : > { %v7487_v35 = vpop.f32.mrb[43].mxu0  ;;  %v8806_v36 = vadd.f32 %v8805_v28, %v7483_v27  ;;  %v8809_v37 = vadd.f32 %v6329_v34, %v11297_v50 }
 0x455   : > { %v8808_v38 = vadd.f32 %v8807_v33, %v7485_v31 }
 0x456   : > { %v8709_v39 = vpack.c.bf16 %v8806_v36, %v8804_v32  ;;  %v8810_v40 = vadd.f32 %v8809_v37, %v7487_v35 }
 0x458   : > { %7752 = vst [vmem:[%s11304_s20 + $0xa0] sm:$0xff] %v8709_v39  ;;  %v8710_v41 = vpack.c.bf16 %v8810_v40, %v8808_v38  ;;  %v6333_v42 = vpop.f32.mrb[44].mxu1 }
 0x459   : > { %v7491_v43 = vpop.f32.mrb[44].mxu0  ;;  %v8811_v44 = vadd.f32 %v6333_v42, %v11295_v29  ;;  %v6335_v45 = vpop.f32.mrb[45].mxu1 }
 0x45a   : > { %v7493_v46 = vpop.f32.mrb[45].mxu0  ;;  %7753 = vst [vmem:[%s11304_s20 + $0xa8] sm:$0xff] %v8710_v41  ;;  %v8813_v47 = vadd.f32 %v6335_v45, %v11297_v50  ;;  %v6337_v48 = vpop.f32.mrb[46].mxu1 }
 0x45b   : > { %v7495_v49 = vpop.f32.mrb[46].mxu0  ;;  %v8812_v51 = vadd.f32 %v8811_v44, %v7491_v43  ;;  %v8815_v52 = vadd.f32 %v6337_v48, %v11295_v29  ;;  %v6339_v53 = vpop.f32.mrb[47].mxu1 }
 0x45c   : > { %v7497_v54 = vpop.f32.mrb[47].mxu0  ;;  %v8814_v55 = vadd.f32 %v8813_v47, %v7493_v46  ;;  %v8817_v56 = vadd.f32 %v6339_v53, %v11297_v50 }
 0x45d   : > { %v8816_v57 = vadd.f32 %v8815_v52, %v7495_v49 }
 0x45e   : > { %v8711_v58 = vpack.c.bf16 %v8814_v55, %v8812_v51  ;;  %v8818_v59 = vadd.f32 %v8817_v56, %v7497_v54 }
 0x460   : > { %7754 = vst [vmem:[%s11304_s20 + $0xb0] sm:$0xff] %v8711_v58  ;;  %v8712_v60 = vpack.c.bf16 %v8818_v59, %v8816_v57  ;;  %v6343_v61 = vpop.f32.mrb[48].mxu1 }
 0x461   : > { %v7501_v62 = vpop.f32.mrb[48].mxu0  ;;  %v8819_v63 = vadd.f32 %v6343_v61, %v11295_v29  ;;  %v6345_v0 = vpop.f32.mrb[49].mxu1 }
 0x462   : > { %v7503_v1 = vpop.f32.mrb[49].mxu0  ;;  %7755 = vst [vmem:[%s11304_s20 + $0xb8] sm:$0xff] %v8712_v60  ;;  %v8821_v2 = vadd.f32 %v6345_v0, %v11297_v50  ;;  %v6347_v3 = vpop.f32.mrb[50].mxu1 }
 0x463   : > { %v7505_v4 = vpop.f32.mrb[50].mxu0  ;;  %v8820_v5 = vadd.f32 %v8819_v63, %v7501_v62  ;;  %v8823_v6 = vadd.f32 %v6347_v3, %v11295_v29  ;;  %v6349_v7 = vpop.f32.mrb[51].mxu1 }
 0x464   : > { %v7507_v8 = vpop.f32.mrb[51].mxu0  ;;  %v8822_v9 = vadd.f32 %v8821_v2, %v7503_v1  ;;  %v8825_v10 = vadd.f32 %v6349_v7, %v11297_v50 }
 0x465   : > { %v8824_v11 = vadd.f32 %v8823_v6, %v7505_v4 }
 0x466   : > { %v8713_v12 = vpack.c.bf16 %v8822_v9, %v8820_v5  ;;  %v8826_v13 = vadd.f32 %v8825_v10, %v7507_v8 }
 0x468   : > { %7756 = vst [vmem:[%s11304_s20 + $0xc0] sm:$0xff] %v8713_v12  ;;  %v8714_v14 = vpack.c.bf16 %v8826_v13, %v8824_v11  ;;  %v6353_v15 = vpop.f32.mrb[52].mxu1 }
 0x469   : > { %v7511_v16 = vpop.f32.mrb[52].mxu0  ;;  %v8827_v17 = vadd.f32 %v6353_v15, %v11295_v29  ;;  %v6355_v18 = vpop.f32.mrb[53].mxu1 }
 0x46a   : > { %v7513_v19 = vpop.f32.mrb[53].mxu0  ;;  %7757 = vst [vmem:[%s11304_s20 + $0xc8] sm:$0xff] %v8714_v14  ;;  %v8829_v20 = vadd.f32 %v6355_v18, %v11297_v50  ;;  %v6357_v21 = vpop.f32.mrb[54].mxu1 }
 0x46b   : > { %v7515_v22 = vpop.f32.mrb[54].mxu0  ;;  %v8828_v23 = vadd.f32 %v8827_v17, %v7511_v16  ;;  %v8831_v24 = vadd.f32 %v6357_v21, %v11295_v29  ;;  %v6359_v25 = vpop.f32.mrb[55].mxu1 }
 0x46c   : > { %v7517_v26 = vpop.f32.mrb[55].mxu0  ;;  %v8830_v27 = vadd.f32 %v8829_v20, %v7513_v19  ;;  %v8833_v28 = vadd.f32 %v6359_v25, %v11297_v50 }
 0x46d   : > { %v8832_v30 = vadd.f32 %v8831_v24, %v7515_v22 }
 0x46e   : > { %v8715_v31 = vpack.c.bf16 %v8830_v27, %v8828_v23  ;;  %v8834_v32 = vadd.f32 %v8833_v28, %v7517_v26 }
 0x470   : > { %7758 = vst [vmem:[%s11304_s20 + $0xd0] sm:$0xff] %v8715_v31  ;;  %v8716_v33 = vpack.c.bf16 %v8834_v32, %v8832_v30  ;;  %v6363_v34 = vpop.f32.mrb[56].mxu1 }
 0x471   : > { %v7521_v35 = vpop.f32.mrb[56].mxu0  ;;  %v8835_v36 = vadd.f32 %v6363_v34, %v11295_v29  ;;  %v6365_v37 = vpop.f32.mrb[57].mxu1 }
 0x472   : > { %v7523_v38 = vpop.f32.mrb[57].mxu0  ;;  %7759 = vst [vmem:[%s11304_s20 + $0xd8] sm:$0xff] %v8716_v33  ;;  %v8837_v39 = vadd.f32 %v6365_v37, %v11297_v50  ;;  %v6367_v40 = vpop.f32.mrb[58].mxu1 }
 0x473   : > { %v7525_v41 = vpop.f32.mrb[58].mxu0  ;;  %v8836_v42 = vadd.f32 %v8835_v36, %v7521_v35  ;;  %v8839_v43 = vadd.f32 %v6367_v40, %v11295_v29  ;;  %v6369_v44 = vpop.f32.mrb[59].mxu1 }
 0x474   : > { %v7527_v45 = vpop.f32.mrb[59].mxu0  ;;  %v8838_v46 = vadd.f32 %v8837_v39, %v7523_v38  ;;  %v8841_v47 = vadd.f32 %v6369_v44, %v11297_v50 }
 0x475   : > { %v8840_v48 = vadd.f32 %v8839_v43, %v7525_v41 }
 0x476   : > { %v8717_v49 = vpack.c.bf16 %v8838_v46, %v8836_v42  ;;  %v8842_v51 = vadd.f32 %v8841_v47, %v7527_v45 }
 0x478   : > { %7760 = vst [vmem:[%s11304_s20 + $0xe0] sm:$0xff] %v8717_v49  ;;  %v8718_v52 = vpack.c.bf16 %v8842_v51, %v8840_v48  ;;  %v6373_v53 = vpop.f32.mrb[60].mxu1 }
 0x479   : > { %v7531_v54 = vpop.f32.mrb[60].mxu0  ;;  %v8843_v55 = vadd.f32 %v6373_v53, %v11295_v29  ;;  %v6375_v56 = vpop.f32.mrb[61].mxu1 }
 0x47a   : > { %v7533_v57 = vpop.f32.mrb[61].mxu0  ;;  %7761 = vst [vmem:[%s11304_s20 + $0xe8] sm:$0xff] %v8718_v52  ;;  %v8845_v58 = vadd.f32 %v6375_v56, %v11297_v50  ;;  %v6377_v59 = vpop.f32.mrb[62].mxu1 }
 0x47b   : > { %v7535_v60 = vpop.f32.mrb[62].mxu0  ;;  %v8844_v61 = vadd.f32 %v8843_v55, %v7531_v54  ;;  %v8847_v62 = vadd.f32 %v6377_v59, %v11295_v29  ;;  %v6379_v63 = vpop.f32.mrb[63].mxu1 }
 0x47c   : > { %v7537_v0 = vpop.f32.mrb[63].mxu0  ;;  %v8846_v1 = vadd.f32 %v8845_v58, %v7533_v57  ;;  %v8849_v2 = vadd.f32 %v6379_v63, %v11297_v50 }
 0x47d   : > { %v8848_v3 = vadd.f32 %v8847_v62, %v7535_v60 }
 0x47e   : > { %v8719_v4 = vpack.c.bf16 %v8846_v1, %v8844_v61  ;;  %v8850_v5 = vadd.f32 %v8849_v2, %v7537_v0 }
 0x480   : > { %7762 = vst [vmem:[%s11304_s20 + $0xf0] sm:$0xff] %v8719_v4  ;;  %v8720_v29 = vpack.c.bf16 %v8850_v5, %v8848_v3 }
 0x482   : > { %7763 = vst [vmem:[%s11304_s20 + $0xf8] sm:$0xff] %v8720_v29 }
 0x483   : > { %10243 = shalt.err (!%p10240_p7)
}
 0x484   : > { %s10244_s11 = scalar_lea.hbm %s11401_s23, 4096  ;;  %s10248_s22 = scalar_lea.hbm %s11451_s3, 32768 }
 0x485   : > { %p10245_p9 = scmp.ne.s32.totalorder %s11401_s23, %s10244_s11  ;;  %p10249_p5 = scmp.lt.u32.totalorder %s11401_s23, %s11451_s3 }
 0x486   : > { %p10250_p10 = scmp.lt.u32.totalorder %s10248_s22, %s10244_s11  ;;  %p10252_p1 = scmp.lt.u32.totalorder %s10244_s11, %s11401_s23 }
 0x487   : > { %p10246_p12 = pnand %p10245_p9, %p10445_p4 }
 0x488   : > { %p10251_p11 = por %p10250_p10, %p10249_p5 }
 0x489   : > { %p10247_p0 = pneg %p10246_p12 }
 0x48a   : > { %p10253_p2 = por %p10252_p1, %p10251_p11 }
 0x48c   : > { %p10254_p6 = pnand %p10253_p2, %p10247_p0 }
 0x48e   : > { %10257 = shalt.err (!%p10254_p6)
}
 0x48f   : > { %s10311_s18 = smov 128   ;;  %s10312_s20 = smov 8  }
 0x490   : > { %9504 = dma.vmem_to_hbm [thread:$0]  (%p10445_p4), %s11403_s21, 4096, %s11401_s23, %s7765_s5, %s10311_s18, %s10311_s18, %s10312_s20  }
 0x491 PF: > { %p9526_p8 = scmp.ge.s32.totalorder %s10300_s15, 2  ;;  %s7794_s10 = sand.u32 1, %s10288_s12  }
 0x492   : > { %p11466_p13 = scmp.ne.s32.totalorder %s11456_s19, 0  ;;  %s7795_s26 = scalar_lea.sflag [#allocation4], %s7794_s10 }
 0x494   : > { %p9518_p3 = pnand %p9526_p8, %p11466_p13 }
 0x496   : > { %10283 = dma.done.wait (!%p9518_p3), %s7795_s26, 4096  }
 0x497   : > { %10285 = vsyncadd (!%p9518_p3), %s7795_s26, 4294963200  ;;  %p17_p7 = scmp.ge.s32.totalorder %s10435_s4, 10   ;;  %s11467_s12 = smov %s10292_s13 }
 0x498   : > { %s11468_s13 = smov %s10296_s14  ;;  %s11469_s14 = smov %s10451_s7 }
 0x499   : > { %s11470_s15 = smov %s10435_s4  ;;  %19 = sbr.rel (!%p17_p7) target bundleno = 6 (0x6), region = 85 }
 0x4a0   :  { %7800 = vsyncpa [#allocation3], 1 }
 0x4a1   :  { %7802 = vsyncpa [#allocation3 + $0x1], 1 }
 0x4a2   :  { %7803 = vsyncpa [#allocation6], 1 }
 0x4a3   :  { %7804 = vsyncpa [#allocation4], 1 }
 0x4a4   :  { %7806 = vsyncpa [#allocation4 + $0x1], 1 }

</bundles_post_ra>
